<compile_context>
chip_gen: v6e
topology: v6e:2x2x1
jax: 0.10.0
libtpu: 0.0.40
codegen_flags: <defaults>
</compile_context>

<pallas_src>
import functools

import jax
import jax.numpy as jnp
from jax.experimental import pallas as pl
from jax.experimental.pallas import tpu as pltpu


# -----------------------------------------------------------------------------
# Fused kernel
# -----------------------------------------------------------------------------
def _layer_norm(x, gamma, beta, eps=1e-5):
    mu = jnp.mean(x, axis=-1, keepdims=True)
    var = jnp.mean(jnp.square(x - mu), axis=-1, keepdims=True)
    return (x - mu) * jax.lax.rsqrt(var + eps) * gamma + beta


def _netwrapper_kernel(
    feat_ref, pos_ref,                       # [V, Gt, d_latent], [V, Gt, d_in] (f32)
    w_lat_ref, w_pos_ref, b_in_ref,          # [d_latent,H] bf16, [d_in,H] bf16, [1,H] f32
    ln1_g_ref, ln1_b_ref,                    # [1,H] f32
    wq_ref, wk_ref, wv_ref, wo_ref,          # [H,H] bf16 (wq pre-scaled by 1/sqrt(H))
    ln2_g_ref, ln2_b_ref,                    # [1,H] f32
    wf1_ref, bf1_ref, wf2_ref, bf2_ref,      # [H,Hf] bf16, [1,Hf] f32, [Hf,H] bf16, [1,H] f32
    fc_w1_ref, fc_b1_ref,                    # [H,Hm] bf16, [1,Hm] f32
    fc_w2_ref, fc_b2_ref,                    # [Hm,OUTP] bf16 (zero-padded), [1,OUTP] f32
    feat_out_ref,                            # [Gt, HP]   f32 (lane-dense, padded)
    out_ref,                                 # [Gt, OUTP] f32 (lane-dense, padded)
    *, n_views,
):
    V = n_views
    Gt = feat_ref.shape[1]
    H = w_lat_ref.shape[1]
    HP = feat_out_ref.shape[1]
    bf16 = jnp.bfloat16
    f32 = jnp.float32

    # ---- input projection: h = feat @ w_lat + pos @ w_pos + b_in ------------
    feat2 = feat_ref[...].reshape(V * Gt, feat_ref.shape[2])     # view-major rows
    pos2 = pos_ref[...].reshape(V * Gt, pos_ref.shape[2])
    h = (jnp.dot(feat2.astype(bf16), w_lat_ref[...], preferred_element_type=f32)
         + jnp.dot(pos2.astype(bf16), w_pos_ref[...], preferred_element_type=f32)
         + b_in_ref[...])                                        # [V*Gt, H] f32

    # ---- pre-norm single-head self-attention over the view axis -------------
    xn = _layer_norm(h, ln1_g_ref[...], ln1_b_ref[...])
    xnb = xn.astype(bf16)
    q = jnp.dot(xnb, wq_ref[...], preferred_element_type=f32)   # scale folded into wq
    k = jnp.dot(xnb, wk_ref[...], preferred_element_type=f32)
    v = jnp.dot(xnb, wv_ref[...], preferred_element_type=f32)

    # rows are view-major: view i occupies rows [i*Gt, (i+1)*Gt)  (static slices)
    q_v = [q[i * Gt:(i + 1) * Gt, :] for i in range(V)]
    k_v = [k[i * Gt:(i + 1) * Gt, :] for i in range(V)]
    v_v = [v[i * Gt:(i + 1) * Gt, :] for i in range(V)]

    a_parts = []
    for i in range(V):
        # scores of query-view i against every key-view (V tiny -> unrolled VPU path)
        s = [jnp.sum(q_v[i] * k_v[j], axis=-1, keepdims=True) for j in range(V)]  # [Gt,1]
        m = s[0]
        for j in range(1, V):
            m = jnp.maximum(m, s[j])
        e = [jnp.exp(sj - m) for sj in s]
        denom = e[0]
        for j in range(1, V):
            denom = denom + e[j]
        inv = pl.reciprocal(denom, approx=True)                   # EUP, ~free
        acc = (e[0] * inv) * v_v[0]
        for j in range(1, V):
            acc = acc + (e[j] * inv) * v_v[j]
        a_parts.append(acc)                                       # [Gt, H]
    a = jnp.concatenate(a_parts, axis=0)                          # [V*Gt, H]

    x = h + jnp.dot(a.astype(bf16), wo_ref[...], preferred_element_type=f32)

    # ---- pre-norm feed-forward ----------------------------------------------
    xn2 = _layer_norm(x, ln2_g_ref[...], ln2_b_ref[...])
    f = jnp.dot(xn2.astype(bf16), wf1_ref[...], preferred_element_type=f32)
    f = jnp.maximum(f + bf1_ref[...], 0.0)
    x = x + jnp.dot(f.astype(bf16), wf2_ref[...], preferred_element_type=f32) + bf2_ref[...]

    # ---- mean pool over views -> out_feat ------------------------------------
    pooled = x[0:Gt, :]
    for i in range(1, V):
        pooled = pooled + x[i * Gt:(i + 1) * Gt, :]
    pooled = pooled * (1.0 / V)                                    # [Gt, H]

    # lane-dense full-width store (zero-pad last dim to HP if H < HP)
    if HP > H:
        pooled_pad = jnp.concatenate(
            [pooled, jnp.zeros((Gt, HP - H), dtype=pooled.dtype)], axis=-1)
    else:
        pooled_pad = pooled
    feat_out_ref[...] = pooled_pad.astype(feat_out_ref.dtype)

    # ---- rgb_fc head: Linear -> ReLU -> Linear (lane-dense padded output) ----
    hm = jnp.dot(pooled.astype(bf16), fc_w1_ref[...], preferred_element_type=f32)
    hm = jnp.maximum(hm + fc_b1_ref[...], 0.0)
    out = jnp.dot(hm.astype(bf16), fc_w2_ref[...], preferred_element_type=f32) + fc_b2_ref[...]
    out_ref[...] = out.astype(out_ref.dtype)


# -----------------------------------------------------------------------------
# Wrapper
# -----------------------------------------------------------------------------
def _const_spec(shape):
    n = len(shape)
    return pl.BlockSpec(shape, lambda i, _n=n: (0,) * _n)         # VMEM-resident


def _pick_block_g(G, max_g):
    for gt in (max_g, 1024, 512, 256, 128, 64, 32, 16, 8):
        if gt <= max_g and gt <= G and G % gt == 0:
            return gt
    return G


def _pad_lanes(w):
    return max(128, ((w + 127) // 128) * 128)


def netwrapper_forward(params, rgb_feat, position, mask_index=None, *, block_g=256):
    """rgb_feat: [R,S,V,d_latent], position: [R,S,V,d_in] (f32).
    Returns (outputs [R,S,d_out], out_feat [R,S,hidden])."""
    if mask_index is not None:
        # TODO(synk): MRVM mask_index masking path not implemented (inference only).
        raise NotImplementedError("mask_index masking is not implemented")

    R, S, V, d_latent = rgb_feat.shape
    d_in = position.shape[-1]
    H = params["w_lat"].shape[1]
    Hf = params["wf1"].shape[1]
    Hm = params["fc_w1"].shape[1]
    d_out = params["fc_w2"].shape[1]
    G = R * S

    # lane-dense padded widths for the output slabs (avoid masked partial stores)
    OUTP = _pad_lanes(d_out)
    HP = _pad_lanes(H)

    # layout plumbing (wrapper-side): view-major [V, G, d] so the kernel is pure 2D.
    feat = jnp.transpose(rgb_feat.reshape(G, V, d_latent), (1, 0, 2))
    pos = jnp.transpose(position.reshape(G, V, d_in), (1, 0, 2))

    # NOTE: at large scale size Gt against v7x's 64 MiB VMEM (2x double-buffered
    # activation tiles + resident weights); 256 rows at H<=256 fp32 is safe.
    Gt = _pick_block_g(G, block_g)
    grid = (G // Gt,)

    bf16 = jnp.bfloat16
    fc_w2p = jnp.pad(params["fc_w2"], ((0, 0), (0, OUTP - d_out)))
    fc_b2p = jnp.pad(params["fc_b2"], ((0, 0), (0, OUTP - d_out)))
    wq_scaled = params["wq"] * (float(H) ** -0.5)   # fold attention scale into wq

    # MXU weights pre-cast to bf16 once (halved DMA / resident bytes); LN params,
    # biases stay f32 (VPU elementwise kept f32, important for v5e).
    w_args = (
        params["w_lat"].astype(bf16), params["w_pos"].astype(bf16), params["b_in"],
        params["ln1_g"], params["ln1_b"],
        wq_scaled.astype(bf16), params["wk"].astype(bf16),
        params["wv"].astype(bf16), params["wo"].astype(bf16),
        params["ln2_g"], params["ln2_b"],
        params["wf1"].astype(bf16), params["bf1"],
        params["wf2"].astype(bf16), params["bf2"],
        params["fc_w1"].astype(bf16), params["fc_b1"],
        fc_w2p.astype(bf16), fc_b2p,
    )

    in_specs = [
        pl.BlockSpec((V, Gt, d_latent), lambda i: (0, i, 0)),
        pl.BlockSpec((V, Gt, d_in), lambda i: (0, i, 0)),
    ] + [_const_spec(a.shape) for a in w_args]

    out_specs = (
        pl.BlockSpec((Gt, HP), lambda i: (i, 0)),
        pl.BlockSpec((Gt, OUTP), lambda i: (i, 0)),
    )
    out_shape = (
        jax.ShapeDtypeStruct((G, HP), jnp.float32),
        jax.ShapeDtypeStruct((G, OUTP), jnp.float32),
    )

    flops = (2 * G * V * (d_latent * H + d_in * H + 4 * H * H + 2 * H * Hf)
             + 4 * G * V * V * H                      # attention scores + weighted sum
             + 2 * G * (H * Hm + Hm * OUTP))          # rgb_fc head
    transcendentals = G * V * V + 4 * G * V           # exp + rsqrt/reciprocal
    bytes_accessed = (4 * (feat.size + pos.size + G * HP + G * OUTP)
                      + sum(int(a.size) * a.dtype.itemsize for a in w_args))

    out_feat_p, out_p = pl.pallas_call(
        functools.partial(_netwrapper_kernel, n_views=V),
        out_shape=out_shape,
        grid=grid,
        in_specs=in_specs,
        out_specs=out_specs,
        compiler_params=pltpu.CompilerParams(dimension_semantics=("parallel",)),
        cost_estimate=pl.CostEstimate(flops=flops,
                                      transcendentals=transcendentals,
                                      bytes_accessed=bytes_accessed),
    )(feat, pos, *w_args)

    outputs = out_p[:, :d_out].reshape(R, S, d_out)
    out_feat = (out_feat_p[:, :H] if HP != H else out_feat_p).reshape(R, S, H)
    return outputs, out_feat


# -----------------------------------------------------------------------------
# Parameter construction (deterministic, synthetic)
# -----------------------------------------------------------------------------
def init_params(key, d_latent, d_in, hidden, d_out):
    ks = jax.random.split(key, 12)
    s = 0.05
    Hf = 2 * hidden
    Hm = hidden // 2
    return {
        # NerFormer input projection (split instead of concat)
        "w_lat": jax.random.normal(ks[0], (d_latent, hidden), jnp.float32) * s,
        "w_pos": jax.random.normal(ks[1], (d_in, hidden), jnp.float32) * s,
        "b_in": jnp.zeros((1, hidden), jnp.float32),
        # transformer block
        "ln1_g": jnp.ones((1, hidden), jnp.float32),
        "ln1_b": jnp.zeros((1, hidden), jnp.float32),
        "wq": jax.random.normal(ks[2], (hidden, hidden), jnp.float32) * s,
        "wk": jax.random.normal(ks[3], (hidden, hidden), jnp.float32) * s,
        "wv": jax.random.normal(ks[4], (hidden, hidden), jnp.float32) * s,
        "wo": jax.random.normal(ks[5], (hidden, hidden), jnp.float32) * s,
        "ln2_g": jnp.ones((1, hidden), jnp.float32),
        "ln2_b": jnp.zeros((1, hidden), jnp.float32),
        "wf1": jax.random.normal(ks[6], (hidden, Hf), jnp.float32) * s,
        "bf1": jnp.zeros((1, Hf), jnp.float32),
        "wf2": jax.random.normal(ks[7], (Hf, hidden), jnp.float32) * s,
        "bf2": jnp.zeros((1, hidden), jnp.float32),
        # rgb_fc head: Linear(H, H//2) -> ReLU -> Linear(H//2, d_out)
        "fc_w1": jax.random.normal(ks[8], (hidden, Hm), jnp.float32) * s,
        "fc_b1": jnp.zeros((1, Hm), jnp.float32),
        "fc_w2": jax.random.normal(ks[9], (Hm, d_out), jnp.float32) * s,
        "fc_b2": jnp.zeros((1, d_out), jnp.float32),
    }


if __name__ == "__main__":
    # Small shapes consistent with the module's forward semantics.
    R, S, V = 2, 64, 4         # rays, samples per ray, source views  (G = 128)
    d_latent, d_in = 16, 12    # image-feature dim, positional-encoding dim
    hidden, d_out = 32, 4

    key = jax.random.PRNGKey(0)
    k_feat, k_pos, k_param = jax.random.split(key, 3)
    rgb_feat = jax.random.normal(k_feat, (R, S, V, d_latent), jnp.float32)
    position = jax.random.normal(k_pos, (R, S, V, d_in), jnp.float32)
    params = init_params(k_param, d_latent, d_in, hidden, d_out)

    # block_g=64 -> grid=(2,) so the tiled/pipelined path is actually exercised.
    fwd = jax.jit(functools.partial(netwrapper_forward, block_g=64))
    outputs, out_feat = fwd(params, rgb_feat, position)
    jax.block_until_ready((outputs, out_feat))

    assert outputs.shape == (R, S, d_out), outputs.shape
    assert out_feat.shape == (R, S, hidden), out_feat.shape
    assert bool(jnp.all(jnp.isfinite(outputs))) and bool(jnp.all(jnp.isfinite(out_feat)))
    print("KERNEL_OK")
</pallas_src>

<mosaic_0001>
module attributes {stable_mosaic.version = 11 : i64} {
  func.func @_netwrapper_kernel(%arg0: i32, %arg1: memref<4x64x16xf32, #tpu.memory_space<vmem>>, %arg2: memref<4x64x12xf32, #tpu.memory_space<vmem>>, %arg3: memref<16x32xbf16, #tpu.memory_space<vmem>>, %arg4: memref<12x32xbf16, #tpu.memory_space<vmem>>, %arg5: memref<1x32xf32, #tpu.memory_space<vmem>>, %arg6: memref<1x32xf32, #tpu.memory_space<vmem>>, %arg7: memref<1x32xf32, #tpu.memory_space<vmem>>, %arg8: memref<32x32xbf16, #tpu.memory_space<vmem>>, %arg9: memref<32x32xbf16, #tpu.memory_space<vmem>>, %arg10: memref<32x32xbf16, #tpu.memory_space<vmem>>, %arg11: memref<32x32xbf16, #tpu.memory_space<vmem>>, %arg12: memref<1x32xf32, #tpu.memory_space<vmem>>, %arg13: memref<1x32xf32, #tpu.memory_space<vmem>>, %arg14: memref<32x64xbf16, #tpu.memory_space<vmem>>, %arg15: memref<1x64xf32, #tpu.memory_space<vmem>>, %arg16: memref<64x32xbf16, #tpu.memory_space<vmem>>, %arg17: memref<1x32xf32, #tpu.memory_space<vmem>>, %arg18: memref<32x16xbf16, #tpu.memory_space<vmem>>, %arg19: memref<1x16xf32, #tpu.memory_space<vmem>>, %arg20: memref<16x128xbf16, #tpu.memory_space<vmem>>, %arg21: memref<1x128xf32, #tpu.memory_space<vmem>>, %arg22: memref<64x128xf32, #tpu.memory_space<vmem>>, %arg23: memref<64x128xf32, #tpu.memory_space<vmem>>) attributes {dimension_semantics = [#tpu.dimension_semantics<parallel>], iteration_bounds = array<i64: 2>, scalar_prefetch = 0 : i64, scratch_operands = 0 : i64, tpu.core_type = #tpu.core_type<tc>, window_params = [{transform_indices = @transform_0, window_bounds = array<i64: 4, 64, 16>}, {transform_indices = @transform_1, window_bounds = array<i64: 4, 64, 12>}, {pipeline_mode = #tpu.pipeline_mode<synchronous>, transform_indices = @transform_2, window_bounds = array<i64: 16, 32>}, {pipeline_mode = #tpu.pipeline_mode<synchronous>, transform_indices = @transform_3, window_bounds = array<i64: 12, 32>}, {pipeline_mode = #tpu.pipeline_mode<synchronous>, transform_indices = @transform_4, window_bounds = array<i64: 1, 32>}, {pipeline_mode = #tpu.pipeline_mode<synchronous>, transform_indices = @transform_5, window_bounds = array<i64: 1, 32>}, {pipeline_mode = #tpu.pipeline_mode<synchronous>, transform_indices = @transform_6, window_bounds = array<i64: 1, 32>}, {pipeline_mode = #tpu.pipeline_mode<synchronous>, transform_indices = @transform_7, window_bounds = array<i64: 32, 32>}, {pipeline_mode = #tpu.pipeline_mode<synchronous>, transform_indices = @transform_8, window_bounds = array<i64: 32, 32>}, {pipeline_mode = #tpu.pipeline_mode<synchronous>, transform_indices = @transform_9, window_bounds = array<i64: 32, 32>}, {pipeline_mode = #tpu.pipeline_mode<synchronous>, transform_indices = @transform_10, window_bounds = array<i64: 32, 32>}, {pipeline_mode = #tpu.pipeline_mode<synchronous>, transform_indices = @transform_11, window_bounds = array<i64: 1, 32>}, {pipeline_mode = #tpu.pipeline_mode<synchronous>, transform_indices = @transform_12, window_bounds = array<i64: 1, 32>}, {pipeline_mode = #tpu.pipeline_mode<synchronous>, transform_indices = @transform_13, window_bounds = array<i64: 32, 64>}, {pipeline_mode = #tpu.pipeline_mode<synchronous>, transform_indices = @transform_14, window_bounds = array<i64: 1, 64>}, {pipeline_mode = #tpu.pipeline_mode<synchronous>, transform_indices = @transform_15, window_bounds = array<i64: 64, 32>}, {pipeline_mode = #tpu.pipeline_mode<synchronous>, transform_indices = @transform_16, window_bounds = array<i64: 1, 32>}, {pipeline_mode = #tpu.pipeline_mode<synchronous>, transform_indices = @transform_17, window_bounds = array<i64: 32, 16>}, {pipeline_mode = #tpu.pipeline_mode<synchronous>, transform_indices = @transform_18, window_bounds = array<i64: 1, 16>}, {pipeline_mode = #tpu.pipeline_mode<synchronous>, transform_indices = @transform_19, window_bounds = array<i64: 16, 128>}, {pipeline_mode = #tpu.pipeline_mode<synchronous>, transform_indices = @transform_20, window_bounds = array<i64: 1, 128>}, {transform_indices = @transform_21, window_bounds = array<i64: 64, 128>}, {transform_indices = @transform_22, window_bounds = array<i64: 64, 128>}]} {
    %c0 = arith.constant 0 : index
    %c0_0 = arith.constant 0 : index
    %c0_1 = arith.constant 0 : index
    %0 = vector.load %arg1[%c0, %c0_0, %c0_1] : memref<4x64x16xf32, #tpu.memory_space<vmem>>, vector<4x64x16xf32>
    %1 = vector.shape_cast %0 : vector<4x64x16xf32> to vector<256x16xf32>
    %c0_2 = arith.constant 0 : index
    %c0_3 = arith.constant 0 : index
    %c0_4 = arith.constant 0 : index
    %2 = vector.load %arg2[%c0_2, %c0_3, %c0_4] : memref<4x64x12xf32, #tpu.memory_space<vmem>>, vector<4x64x12xf32>
    %3 = vector.shape_cast %2 : vector<4x64x12xf32> to vector<256x12xf32>
    %4 = arith.truncf %1 : vector<256x16xf32> to vector<256x16xbf16>
    %c0_5 = arith.constant 0 : index
    %c0_6 = arith.constant 0 : index
    %5 = vector.load %arg3[%c0_5, %c0_6] : memref<16x32xbf16, #tpu.memory_space<vmem>>, vector<16x32xbf16>
    %cst = arith.constant dense<0.000000e+00> : vector<256x32xf32>
    %6 = tpu.matmul %4, %5, %cst {dimension_numbers = #tpu.dot_dimension_numbers<[1], [0], [0], [1], [0, 0, 1, 1], [], []>} : vector<256x16xbf16>, vector<16x32xbf16>, vector<256x32xf32> -> vector<256x32xf32>
    %7 = arith.truncf %3 : vector<256x12xf32> to vector<256x12xbf16>
    %c0_7 = arith.constant 0 : index
    %c0_8 = arith.constant 0 : index
    %8 = vector.load %arg4[%c0_7, %c0_8] : memref<12x32xbf16, #tpu.memory_space<vmem>>, vector<12x32xbf16>
    %cst_9 = arith.constant dense<0.000000e+00> : vector<256x32xf32>
    %9 = tpu.matmul %7, %8, %cst_9 {dimension_numbers = #tpu.dot_dimension_numbers<[1], [0], [0], [1], [0, 0, 1, 1], [], []>} : vector<256x12xbf16>, vector<12x32xbf16>, vector<256x32xf32> -> vector<256x32xf32>
    %10 = arith.addf %6, %9 : vector<256x32xf32>
    %c0_10 = arith.constant 0 : index
    %c0_11 = arith.constant 0 : index
    %11 = vector.load %arg5[%c0_10, %c0_11] : memref<1x32xf32, #tpu.memory_space<vmem>>, vector<1x32xf32>
    %12 = vector.broadcast %11 : vector<1x32xf32> to vector<256x32xf32>
    %13 = arith.addf %10, %12 : vector<256x32xf32>
    %c0_12 = arith.constant 0 : index
    %c0_13 = arith.constant 0 : index
    %14 = vector.load %arg6[%c0_12, %c0_13] : memref<1x32xf32, #tpu.memory_space<vmem>>, vector<1x32xf32>
    %c0_14 = arith.constant 0 : index
    %c0_15 = arith.constant 0 : index
    %15 = vector.load %arg7[%c0_14, %c0_15] : memref<1x32xf32, #tpu.memory_space<vmem>>, vector<1x32xf32>
    %cst_16 = arith.constant dense<0.000000e+00> : vector<256xf32>
    %16 = vector.multi_reduction <add>, %13, %cst_16 [1] : vector<256x32xf32> to vector<256xf32>
    %17 = vector.shape_cast %16 : vector<256xf32> to vector<256x1xf32>
    %cst_17 = arith.constant 3.200000e+01 : f32
    %18 = vector.broadcast %cst_17 : f32 to vector<256x1xf32>
    %19 = arith.divf %17, %18 : vector<256x1xf32>
    %20 = vector.broadcast %19 : vector<256x1xf32> to vector<256x32xf32>
    %21 = arith.subf %13, %20 : vector<256x32xf32>
    %22 = arith.mulf %21, %21 : vector<256x32xf32>
    %cst_18 = arith.constant dense<0.000000e+00> : vector<256xf32>
    %23 = vector.multi_reduction <add>, %22, %cst_18 [1] : vector<256x32xf32> to vector<256xf32>
    %24 = vector.shape_cast %23 : vector<256xf32> to vector<256x1xf32>
    %cst_19 = arith.constant 3.200000e+01 : f32
    %25 = vector.broadcast %cst_19 : f32 to vector<256x1xf32>
    %26 = arith.divf %24, %25 : vector<256x1xf32>
    %27 = vector.broadcast %19 : vector<256x1xf32> to vector<256x32xf32>
    %28 = arith.subf %13, %27 : vector<256x32xf32>
    %cst_20 = arith.constant 9.99999974E-6 : f32
    %29 = vector.broadcast %cst_20 : f32 to vector<256x1xf32>
    %30 = arith.addf %26, %29 : vector<256x1xf32>
    %31 = math.rsqrt %30 : vector<256x1xf32>
    %32 = vector.broadcast %31 : vector<256x1xf32> to vector<256x32xf32>
    %33 = arith.mulf %28, %32 : vector<256x32xf32>
    %34 = vector.broadcast %14 : vector<1x32xf32> to vector<256x32xf32>
    %35 = arith.mulf %33, %34 : vector<256x32xf32>
    %36 = vector.broadcast %15 : vector<1x32xf32> to vector<256x32xf32>
    %37 = arith.addf %35, %36 : vector<256x32xf32>
    %38 = arith.truncf %37 : vector<256x32xf32> to vector<256x32xbf16>
    %c0_21 = arith.constant 0 : index
    %c0_22 = arith.constant 0 : index
    %39 = vector.load %arg8[%c0_21, %c0_22] : memref<32x32xbf16, #tpu.memory_space<vmem>>, vector<32x32xbf16>
    %cst_23 = arith.constant dense<0.000000e+00> : vector<256x32xf32>
    %40 = tpu.matmul %38, %39, %cst_23 {dimension_numbers = #tpu.dot_dimension_numbers<[1], [0], [0], [1], [0, 0, 1, 1], [], []>} : vector<256x32xbf16>, vector<32x32xbf16>, vector<256x32xf32> -> vector<256x32xf32>
    %c0_24 = arith.constant 0 : index
    %c0_25 = arith.constant 0 : index
    %41 = vector.load %arg9[%c0_24, %c0_25] : memref<32x32xbf16, #tpu.memory_space<vmem>>, vector<32x32xbf16>
    %cst_26 = arith.constant dense<0.000000e+00> : vector<256x32xf32>
    %42 = tpu.matmul %38, %41, %cst_26 {dimension_numbers = #tpu.dot_dimension_numbers<[1], [0], [0], [1], [0, 0, 1, 1], [], []>} : vector<256x32xbf16>, vector<32x32xbf16>, vector<256x32xf32> -> vector<256x32xf32>
    %c0_27 = arith.constant 0 : index
    %c0_28 = arith.constant 0 : index
    %43 = vector.load %arg10[%c0_27, %c0_28] : memref<32x32xbf16, #tpu.memory_space<vmem>>, vector<32x32xbf16>
    %cst_29 = arith.constant dense<0.000000e+00> : vector<256x32xf32>
    %44 = tpu.matmul %38, %43, %cst_29 {dimension_numbers = #tpu.dot_dimension_numbers<[1], [0], [0], [1], [0, 0, 1, 1], [], []>} : vector<256x32xbf16>, vector<32x32xbf16>, vector<256x32xf32> -> vector<256x32xf32>
    %45 = vector.extract_strided_slice %40 {offsets = [0, 0], sizes = [64, 32], strides = [1, 1]} : vector<256x32xf32> to vector<64x32xf32>
    %46 = vector.extract_strided_slice %40 {offsets = [64, 0], sizes = [64, 32], strides = [1, 1]} : vector<256x32xf32> to vector<64x32xf32>
    %47 = vector.extract_strided_slice %40 {offsets = [128, 0], sizes = [64, 32], strides = [1, 1]} : vector<256x32xf32> to vector<64x32xf32>
    %48 = vector.extract_strided_slice %40 {offsets = [192, 0], sizes = [64, 32], strides = [1, 1]} : vector<256x32xf32> to vector<64x32xf32>
    %49 = vector.extract_strided_slice %42 {offsets = [0, 0], sizes = [64, 32], strides = [1, 1]} : vector<256x32xf32> to vector<64x32xf32>
    %50 = vector.extract_strided_slice %42 {offsets = [64, 0], sizes = [64, 32], strides = [1, 1]} : vector<256x32xf32> to vector<64x32xf32>
    %51 = vector.extract_strided_slice %42 {offsets = [128, 0], sizes = [64, 32], strides = [1, 1]} : vector<256x32xf32> to vector<64x32xf32>
    %52 = vector.extract_strided_slice %42 {offsets = [192, 0], sizes = [64, 32], strides = [1, 1]} : vector<256x32xf32> to vector<64x32xf32>
    %53 = vector.extract_strided_slice %44 {offsets = [0, 0], sizes = [64, 32], strides = [1, 1]} : vector<256x32xf32> to vector<64x32xf32>
    %54 = vector.extract_strided_slice %44 {offsets = [64, 0], sizes = [64, 32], strides = [1, 1]} : vector<256x32xf32> to vector<64x32xf32>
    %55 = vector.extract_strided_slice %44 {offsets = [128, 0], sizes = [64, 32], strides = [1, 1]} : vector<256x32xf32> to vector<64x32xf32>
    %56 = vector.extract_strided_slice %44 {offsets = [192, 0], sizes = [64, 32], strides = [1, 1]} : vector<256x32xf32> to vector<64x32xf32>
    %57 = arith.mulf %45, %49 : vector<64x32xf32>
    %cst_30 = arith.constant dense<0.000000e+00> : vector<64xf32>
    %58 = vector.multi_reduction <add>, %57, %cst_30 [1] : vector<64x32xf32> to vector<64xf32>
    %59 = vector.shape_cast %58 : vector<64xf32> to vector<64x1xf32>
    %60 = arith.mulf %45, %50 : vector<64x32xf32>
    %cst_31 = arith.constant dense<0.000000e+00> : vector<64xf32>
    %61 = vector.multi_reduction <add>, %60, %cst_31 [1] : vector<64x32xf32> to vector<64xf32>
    %62 = vector.shape_cast %61 : vector<64xf32> to vector<64x1xf32>
    %63 = arith.mulf %45, %51 : vector<64x32xf32>
    %cst_32 = arith.constant dense<0.000000e+00> : vector<64xf32>
    %64 = vector.multi_reduction <add>, %63, %cst_32 [1] : vector<64x32xf32> to vector<64xf32>
    %65 = vector.shape_cast %64 : vector<64xf32> to vector<64x1xf32>
    %66 = arith.mulf %45, %52 : vector<64x32xf32>
    %cst_33 = arith.constant dense<0.000000e+00> : vector<64xf32>
    %67 = vector.multi_reduction <add>, %66, %cst_33 [1] : vector<64x32xf32> to vector<64xf32>
    %68 = vector.shape_cast %67 : vector<64xf32> to vector<64x1xf32>
    %69 = arith.maximumf %59, %62 : vector<64x1xf32>
    %70 = arith.maximumf %69, %65 : vector<64x1xf32>
    %71 = arith.maximumf %70, %68 : vector<64x1xf32>
    %72 = arith.subf %59, %71 : vector<64x1xf32>
    %73 = math.exp %72 : vector<64x1xf32>
    %74 = arith.subf %62, %71 : vector<64x1xf32>
    %75 = math.exp %74 : vector<64x1xf32>
    %76 = arith.subf %65, %71 : vector<64x1xf32>
    %77 = math.exp %76 : vector<64x1xf32>
    %78 = arith.subf %68, %71 : vector<64x1xf32>
    %79 = math.exp %78 : vector<64x1xf32>
    %80 = arith.addf %73, %75 : vector<64x1xf32>
    %81 = arith.addf %80, %77 : vector<64x1xf32>
    %82 = arith.addf %81, %79 : vector<64x1xf32>
    %83 = tpu.reciprocal %82 {approx = true} : vector<64x1xf32> -> vector<64x1xf32>
    %84 = arith.mulf %73, %83 : vector<64x1xf32>
    %85 = vector.broadcast %84 : vector<64x1xf32> to vector<64x32xf32>
    %86 = arith.mulf %85, %53 : vector<64x32xf32>
    %87 = arith.mulf %75, %83 : vector<64x1xf32>
    %88 = vector.broadcast %87 : vector<64x1xf32> to vector<64x32xf32>
    %89 = arith.mulf %88, %54 : vector<64x32xf32>
    %90 = arith.addf %86, %89 : vector<64x32xf32>
    %91 = arith.mulf %77, %83 : vector<64x1xf32>
    %92 = vector.broadcast %91 : vector<64x1xf32> to vector<64x32xf32>
    %93 = arith.mulf %92, %55 : vector<64x32xf32>
    %94 = arith.addf %90, %93 : vector<64x32xf32>
    %95 = arith.mulf %79, %83 : vector<64x1xf32>
    %96 = vector.broadcast %95 : vector<64x1xf32> to vector<64x32xf32>
    %97 = arith.mulf %96, %56 : vector<64x32xf32>
    %98 = arith.addf %94, %97 : vector<64x32xf32>
    %99 = arith.mulf %46, %49 : vector<64x32xf32>
    %cst_34 = arith.constant dense<0.000000e+00> : vector<64xf32>
    %100 = vector.multi_reduction <add>, %99, %cst_34 [1] : vector<64x32xf32> to vector<64xf32>
    %101 = vector.shape_cast %100 : vector<64xf32> to vector<64x1xf32>
    %102 = arith.mulf %46, %50 : vector<64x32xf32>
    %cst_35 = arith.constant dense<0.000000e+00> : vector<64xf32>
    %103 = vector.multi_reduction <add>, %102, %cst_35 [1] : vector<64x32xf32> to vector<64xf32>
    %104 = vector.shape_cast %103 : vector<64xf32> to vector<64x1xf32>
    %105 = arith.mulf %46, %51 : vector<64x32xf32>
    %cst_36 = arith.constant dense<0.000000e+00> : vector<64xf32>
    %106 = vector.multi_reduction <add>, %105, %cst_36 [1] : vector<64x32xf32> to vector<64xf32>
    %107 = vector.shape_cast %106 : vector<64xf32> to vector<64x1xf32>
    %108 = arith.mulf %46, %52 : vector<64x32xf32>
    %cst_37 = arith.constant dense<0.000000e+00> : vector<64xf32>
    %109 = vector.multi_reduction <add>, %108, %cst_37 [1] : vector<64x32xf32> to vector<64xf32>
    %110 = vector.shape_cast %109 : vector<64xf32> to vector<64x1xf32>
    %111 = arith.maximumf %101, %104 : vector<64x1xf32>
    %112 = arith.maximumf %111, %107 : vector<64x1xf32>
    %113 = arith.maximumf %112, %110 : vector<64x1xf32>
    %114 = arith.subf %101, %113 : vector<64x1xf32>
    %115 = math.exp %114 : vector<64x1xf32>
    %116 = arith.subf %104, %113 : vector<64x1xf32>
    %117 = math.exp %116 : vector<64x1xf32>
    %118 = arith.subf %107, %113 : vector<64x1xf32>
    %119 = math.exp %118 : vector<64x1xf32>
    %120 = arith.subf %110, %113 : vector<64x1xf32>
    %121 = math.exp %120 : vector<64x1xf32>
    %122 = arith.addf %115, %117 : vector<64x1xf32>
    %123 = arith.addf %122, %119 : vector<64x1xf32>
    %124 = arith.addf %123, %121 : vector<64x1xf32>
    %125 = tpu.reciprocal %124 {approx = true} : vector<64x1xf32> -> vector<64x1xf32>
    %126 = arith.mulf %115, %125 : vector<64x1xf32>
    %127 = vector.broadcast %126 : vector<64x1xf32> to vector<64x32xf32>
    %128 = arith.mulf %127, %53 : vector<64x32xf32>
    %129 = arith.mulf %117, %125 : vector<64x1xf32>
    %130 = vector.broadcast %129 : vector<64x1xf32> to vector<64x32xf32>
    %131 = arith.mulf %130, %54 : vector<64x32xf32>
    %132 = arith.addf %128, %131 : vector<64x32xf32>
    %133 = arith.mulf %119, %125 : vector<64x1xf32>
    %134 = vector.broadcast %133 : vector<64x1xf32> to vector<64x32xf32>
    %135 = arith.mulf %134, %55 : vector<64x32xf32>
    %136 = arith.addf %132, %135 : vector<64x32xf32>
    %137 = arith.mulf %121, %125 : vector<64x1xf32>
    %138 = vector.broadcast %137 : vector<64x1xf32> to vector<64x32xf32>
    %139 = arith.mulf %138, %56 : vector<64x32xf32>
    %140 = arith.addf %136, %139 : vector<64x32xf32>
    %141 = arith.mulf %47, %49 : vector<64x32xf32>
    %cst_38 = arith.constant dense<0.000000e+00> : vector<64xf32>
    %142 = vector.multi_reduction <add>, %141, %cst_38 [1] : vector<64x32xf32> to vector<64xf32>
    %143 = vector.shape_cast %142 : vector<64xf32> to vector<64x1xf32>
    %144 = arith.mulf %47, %50 : vector<64x32xf32>
    %cst_39 = arith.constant dense<0.000000e+00> : vector<64xf32>
    %145 = vector.multi_reduction <add>, %144, %cst_39 [1] : vector<64x32xf32> to vector<64xf32>
    %146 = vector.shape_cast %145 : vector<64xf32> to vector<64x1xf32>
    %147 = arith.mulf %47, %51 : vector<64x32xf32>
    %cst_40 = arith.constant dense<0.000000e+00> : vector<64xf32>
    %148 = vector.multi_reduction <add>, %147, %cst_40 [1] : vector<64x32xf32> to vector<64xf32>
    %149 = vector.shape_cast %148 : vector<64xf32> to vector<64x1xf32>
    %150 = arith.mulf %47, %52 : vector<64x32xf32>
    %cst_41 = arith.constant dense<0.000000e+00> : vector<64xf32>
    %151 = vector.multi_reduction <add>, %150, %cst_41 [1] : vector<64x32xf32> to vector<64xf32>
    %152 = vector.shape_cast %151 : vector<64xf32> to vector<64x1xf32>
    %153 = arith.maximumf %143, %146 : vector<64x1xf32>
    %154 = arith.maximumf %153, %149 : vector<64x1xf32>
    %155 = arith.maximumf %154, %152 : vector<64x1xf32>
    %156 = arith.subf %143, %155 : vector<64x1xf32>
    %157 = math.exp %156 : vector<64x1xf32>
    %158 = arith.subf %146, %155 : vector<64x1xf32>
    %159 = math.exp %158 : vector<64x1xf32>
    %160 = arith.subf %149, %155 : vector<64x1xf32>
    %161 = math.exp %160 : vector<64x1xf32>
    %162 = arith.subf %152, %155 : vector<64x1xf32>
    %163 = math.exp %162 : vector<64x1xf32>
    %164 = arith.addf %157, %159 : vector<64x1xf32>
    %165 = arith.addf %164, %161 : vector<64x1xf32>
    %166 = arith.addf %165, %163 : vector<64x1xf32>
    %167 = tpu.reciprocal %166 {approx = true} : vector<64x1xf32> -> vector<64x1xf32>
    %168 = arith.mulf %157, %167 : vector<64x1xf32>
    %169 = vector.broadcast %168 : vector<64x1xf32> to vector<64x32xf32>
    %170 = arith.mulf %169, %53 : vector<64x32xf32>
    %171 = arith.mulf %159, %167 : vector<64x1xf32>
    %172 = vector.broadcast %171 : vector<64x1xf32> to vector<64x32xf32>
    %173 = arith.mulf %172, %54 : vector<64x32xf32>
    %174 = arith.addf %170, %173 : vector<64x32xf32>
    %175 = arith.mulf %161, %167 : vector<64x1xf32>
    %176 = vector.broadcast %175 : vector<64x1xf32> to vector<64x32xf32>
    %177 = arith.mulf %176, %55 : vector<64x32xf32>
    %178 = arith.addf %174, %177 : vector<64x32xf32>
    %179 = arith.mulf %163, %167 : vector<64x1xf32>
    %180 = vector.broadcast %179 : vector<64x1xf32> to vector<64x32xf32>
    %181 = arith.mulf %180, %56 : vector<64x32xf32>
    %182 = arith.addf %178, %181 : vector<64x32xf32>
    %183 = arith.mulf %48, %49 : vector<64x32xf32>
    %cst_42 = arith.constant dense<0.000000e+00> : vector<64xf32>
    %184 = vector.multi_reduction <add>, %183, %cst_42 [1] : vector<64x32xf32> to vector<64xf32>
    %185 = vector.shape_cast %184 : vector<64xf32> to vector<64x1xf32>
    %186 = arith.mulf %48, %50 : vector<64x32xf32>
    %cst_43 = arith.constant dense<0.000000e+00> : vector<64xf32>
    %187 = vector.multi_reduction <add>, %186, %cst_43 [1] : vector<64x32xf32> to vector<64xf32>
    %188 = vector.shape_cast %187 : vector<64xf32> to vector<64x1xf32>
    %189 = arith.mulf %48, %51 : vector<64x32xf32>
    %cst_44 = arith.constant dense<0.000000e+00> : vector<64xf32>
    %190 = vector.multi_reduction <add>, %189, %cst_44 [1] : vector<64x32xf32> to vector<64xf32>
    %191 = vector.shape_cast %190 : vector<64xf32> to vector<64x1xf32>
    %192 = arith.mulf %48, %52 : vector<64x32xf32>
    %cst_45 = arith.constant dense<0.000000e+00> : vector<64xf32>
    %193 = vector.multi_reduction <add>, %192, %cst_45 [1] : vector<64x32xf32> to vector<64xf32>
    %194 = vector.shape_cast %193 : vector<64xf32> to vector<64x1xf32>
    %195 = arith.maximumf %185, %188 : vector<64x1xf32>
    %196 = arith.maximumf %195, %191 : vector<64x1xf32>
    %197 = arith.maximumf %196, %194 : vector<64x1xf32>
    %198 = arith.subf %185, %197 : vector<64x1xf32>
    %199 = math.exp %198 : vector<64x1xf32>
    %200 = arith.subf %188, %197 : vector<64x1xf32>
    %201 = math.exp %200 : vector<64x1xf32>
    %202 = arith.subf %191, %197 : vector<64x1xf32>
    %203 = math.exp %202 : vector<64x1xf32>
    %204 = arith.subf %194, %197 : vector<64x1xf32>
    %205 = math.exp %204 : vector<64x1xf32>
    %206 = arith.addf %199, %201 : vector<64x1xf32>
    %207 = arith.addf %206, %203 : vector<64x1xf32>
    %208 = arith.addf %207, %205 : vector<64x1xf32>
    %209 = tpu.reciprocal %208 {approx = true} : vector<64x1xf32> -> vector<64x1xf32>
    %210 = arith.mulf %199, %209 : vector<64x1xf32>
    %211 = vector.broadcast %210 : vector<64x1xf32> to vector<64x32xf32>
    %212 = arith.mulf %211, %53 : vector<64x32xf32>
    %213 = arith.mulf %201, %209 : vector<64x1xf32>
    %214 = vector.broadcast %213 : vector<64x1xf32> to vector<64x32xf32>
    %215 = arith.mulf %214, %54 : vector<64x32xf32>
    %216 = arith.addf %212, %215 : vector<64x32xf32>
    %217 = arith.mulf %203, %209 : vector<64x1xf32>
    %218 = vector.broadcast %217 : vector<64x1xf32> to vector<64x32xf32>
    %219 = arith.mulf %218, %55 : vector<64x32xf32>
    %220 = arith.addf %216, %219 : vector<64x32xf32>
    %221 = arith.mulf %205, %209 : vector<64x1xf32>
    %222 = vector.broadcast %221 : vector<64x1xf32> to vector<64x32xf32>
    %223 = arith.mulf %222, %56 : vector<64x32xf32>
    %224 = arith.addf %220, %223 : vector<64x32xf32>
    %225 = tpu.concatenate %98, %140, %182, %224 in 0 : vector<64x32xf32>, vector<64x32xf32>, vector<64x32xf32>, vector<64x32xf32> -> vector<256x32xf32>
    %226 = arith.truncf %225 : vector<256x32xf32> to vector<256x32xbf16>
    %c0_46 = arith.constant 0 : index
    %c0_47 = arith.constant 0 : index
    %227 = vector.load %arg11[%c0_46, %c0_47] : memref<32x32xbf16, #tpu.memory_space<vmem>>, vector<32x32xbf16>
    %cst_48 = arith.constant dense<0.000000e+00> : vector<256x32xf32>
    %228 = tpu.matmul %226, %227, %cst_48 {dimension_numbers = #tpu.dot_dimension_numbers<[1], [0], [0], [1], [0, 0, 1, 1], [], []>} : vector<256x32xbf16>, vector<32x32xbf16>, vector<256x32xf32> -> vector<256x32xf32>
    %229 = arith.addf %13, %228 : vector<256x32xf32>
    %c0_49 = arith.constant 0 : index
    %c0_50 = arith.constant 0 : index
    %230 = vector.load %arg12[%c0_49, %c0_50] : memref<1x32xf32, #tpu.memory_space<vmem>>, vector<1x32xf32>
    %c0_51 = arith.constant 0 : index
    %c0_52 = arith.constant 0 : index
    %231 = vector.load %arg13[%c0_51, %c0_52] : memref<1x32xf32, #tpu.memory_space<vmem>>, vector<1x32xf32>
    %cst_53 = arith.constant dense<0.000000e+00> : vector<256xf32>
    %232 = vector.multi_reduction <add>, %229, %cst_53 [1] : vector<256x32xf32> to vector<256xf32>
    %233 = vector.shape_cast %232 : vector<256xf32> to vector<256x1xf32>
    %cst_54 = arith.constant 3.200000e+01 : f32
    %234 = vector.broadcast %cst_54 : f32 to vector<256x1xf32>
    %235 = arith.divf %233, %234 : vector<256x1xf32>
    %236 = vector.broadcast %235 : vector<256x1xf32> to vector<256x32xf32>
    %237 = arith.subf %229, %236 : vector<256x32xf32>
    %238 = arith.mulf %237, %237 : vector<256x32xf32>
    %cst_55 = arith.constant dense<0.000000e+00> : vector<256xf32>
    %239 = vector.multi_reduction <add>, %238, %cst_55 [1] : vector<256x32xf32> to vector<256xf32>
    %240 = vector.shape_cast %239 : vector<256xf32> to vector<256x1xf32>
    %cst_56 = arith.constant 3.200000e+01 : f32
    %241 = vector.broadcast %cst_56 : f32 to vector<256x1xf32>
    %242 = arith.divf %240, %241 : vector<256x1xf32>
    %243 = vector.broadcast %235 : vector<256x1xf32> to vector<256x32xf32>
    %244 = arith.subf %229, %243 : vector<256x32xf32>
    %cst_57 = arith.constant 9.99999974E-6 : f32
    %245 = vector.broadcast %cst_57 : f32 to vector<256x1xf32>
    %246 = arith.addf %242, %245 : vector<256x1xf32>
    %247 = math.rsqrt %246 : vector<256x1xf32>
    %248 = vector.broadcast %247 : vector<256x1xf32> to vector<256x32xf32>
    %249 = arith.mulf %244, %248 : vector<256x32xf32>
    %250 = vector.broadcast %230 : vector<1x32xf32> to vector<256x32xf32>
    %251 = arith.mulf %249, %250 : vector<256x32xf32>
    %252 = vector.broadcast %231 : vector<1x32xf32> to vector<256x32xf32>
    %253 = arith.addf %251, %252 : vector<256x32xf32>
    %254 = arith.truncf %253 : vector<256x32xf32> to vector<256x32xbf16>
    %c0_58 = arith.constant 0 : index
    %c0_59 = arith.constant 0 : index
    %255 = vector.load %arg14[%c0_58, %c0_59] : memref<32x64xbf16, #tpu.memory_space<vmem>>, vector<32x64xbf16>
    %cst_60 = arith.constant dense<0.000000e+00> : vector<256x64xf32>
    %256 = tpu.matmul %254, %255, %cst_60 {dimension_numbers = #tpu.dot_dimension_numbers<[1], [0], [0], [1], [0, 0, 1, 1], [], []>} : vector<256x32xbf16>, vector<32x64xbf16>, vector<256x64xf32> -> vector<256x64xf32>
    %c0_61 = arith.constant 0 : index
    %c0_62 = arith.constant 0 : index
    %257 = vector.load %arg15[%c0_61, %c0_62] : memref<1x64xf32, #tpu.memory_space<vmem>>, vector<1x64xf32>
    %258 = vector.broadcast %257 : vector<1x64xf32> to vector<256x64xf32>
    %259 = arith.addf %256, %258 : vector<256x64xf32>
    %cst_63 = arith.constant 0.000000e+00 : f32
    %260 = vector.broadcast %cst_63 : f32 to vector<256x64xf32>
    %261 = arith.maximumf %259, %260 : vector<256x64xf32>
    %262 = arith.truncf %261 : vector<256x64xf32> to vector<256x64xbf16>
    %c0_64 = arith.constant 0 : index
    %c0_65 = arith.constant 0 : index
    %263 = vector.load %arg16[%c0_64, %c0_65] : memref<64x32xbf16, #tpu.memory_space<vmem>>, vector<64x32xbf16>
    %cst_66 = arith.constant dense<0.000000e+00> : vector<256x32xf32>
    %264 = tpu.matmul %262, %263, %cst_66 {dimension_numbers = #tpu.dot_dimension_numbers<[1], [0], [0], [1], [0, 0, 1, 1], [], []>} : vector<256x64xbf16>, vector<64x32xbf16>, vector<256x32xf32> -> vector<256x32xf32>
    %265 = arith.addf %229, %264 : vector<256x32xf32>
    %c0_67 = arith.constant 0 : index
    %c0_68 = arith.constant 0 : index
    %266 = vector.load %arg17[%c0_67, %c0_68] : memref<1x32xf32, #tpu.memory_space<vmem>>, vector<1x32xf32>
    %267 = vector.broadcast %266 : vector<1x32xf32> to vector<256x32xf32>
    %268 = arith.addf %265, %267 : vector<256x32xf32>
    %269 = vector.extract_strided_slice %268 {offsets = [0, 0], sizes = [64, 32], strides = [1, 1]} : vector<256x32xf32> to vector<64x32xf32>
    %270 = vector.extract_strided_slice %268 {offsets = [64, 0], sizes = [64, 32], strides = [1, 1]} : vector<256x32xf32> to vector<64x32xf32>
    %271 = arith.addf %269, %270 : vector<64x32xf32>
    %272 = vector.extract_strided_slice %268 {offsets = [128, 0], sizes = [64, 32], strides = [1, 1]} : vector<256x32xf32> to vector<64x32xf32>
    %273 = arith.addf %271, %272 : vector<64x32xf32>
    %274 = vector.extract_strided_slice %268 {offsets = [192, 0], sizes = [64, 32], strides = [1, 1]} : vector<256x32xf32> to vector<64x32xf32>
    %275 = arith.addf %273, %274 : vector<64x32xf32>
    %cst_69 = arith.constant 2.500000e-01 : f32
    %276 = vector.broadcast %cst_69 : f32 to vector<64x32xf32>
    %277 = arith.mulf %275, %276 : vector<64x32xf32>
    %cst_70 = arith.constant 0.000000e+00 : f32
    %278 = vector.broadcast %cst_70 : f32 to vector<64x96xf32>
    %279 = tpu.concatenate %277, %278 in 1 : vector<64x32xf32>, vector<64x96xf32> -> vector<64x128xf32>
    %c0_71 = arith.constant 0 : index
    %c0_72 = arith.constant 0 : index
    %280 = vector.load %arg22[%c0_71, %c0_72] : memref<64x128xf32, #tpu.memory_space<vmem>>, vector<64x128xf32>
    tpu.vector_store %arg22[%c0_71, %c0_72], %279 {strides = array<i32>} : memref<64x128xf32, #tpu.memory_space<vmem>>, vector<64x128xf32>,
    %281 = arith.truncf %277 : vector<64x32xf32> to vector<64x32xbf16>
    %c0_73 = arith.constant 0 : index
    %c0_74 = arith.constant 0 : index
    %282 = vector.load %arg18[%c0_73, %c0_74] : memref<32x16xbf16, #tpu.memory_space<vmem>>, vector<32x16xbf16>
    %cst_75 = arith.constant dense<0.000000e+00> : vector<64x16xf32>
    %283 = tpu.matmul %281, %282, %cst_75 {dimension_numbers = #tpu.dot_dimension_numbers<[1], [0], [0], [1], [0, 0, 1, 1], [], []>} : vector<64x32xbf16>, vector<32x16xbf16>, vector<64x16xf32> -> vector<64x16xf32>
    %c0_76 = arith.constant 0 : index
    %c0_77 = arith.constant 0 : index
    %284 = vector.load %arg19[%c0_76, %c0_77] : memref<1x16xf32, #tpu.memory_space<vmem>>, vector<1x16xf32>
    %285 = vector.broadcast %284 : vector<1x16xf32> to vector<64x16xf32>
    %286 = arith.addf %283, %285 : vector<64x16xf32>
    %cst_78 = arith.constant 0.000000e+00 : f32
    %287 = vector.broadcast %cst_78 : f32 to vector<64x16xf32>
    %288 = arith.maximumf %286, %287 : vector<64x16xf32>
    %289 = arith.truncf %288 : vector<64x16xf32> to vector<64x16xbf16>
    %c0_79 = arith.constant 0 : index
    %c0_80 = arith.constant 0 : index
    %290 = vector.load %arg20[%c0_79, %c0_80] : memref<16x128xbf16, #tpu.memory_space<vmem>>, vector<16x128xbf16>
    %cst_81 = arith.constant dense<0.000000e+00> : vector<64x128xf32>
    %291 = tpu.matmul %289, %290, %cst_81 {dimension_numbers = #tpu.dot_dimension_numbers<[1], [0], [0], [1], [0, 0, 1, 1], [], []>} : vector<64x16xbf16>, vector<16x128xbf16>, vector<64x128xf32> -> vector<64x128xf32>
    %c0_82 = arith.constant 0 : index
    %c0_83 = arith.constant 0 : index
    %292 = vector.load %arg21[%c0_82, %c0_83] : memref<1x128xf32, #tpu.memory_space<vmem>>, vector<1x128xf32>
    %293 = vector.broadcast %292 : vector<1x128xf32> to vector<64x128xf32>
    %294 = arith.addf %291, %293 : vector<64x128xf32>
    %c0_84 = arith.constant 0 : index
    %c0_85 = arith.constant 0 : index
    %295 = vector.load %arg23[%c0_84, %c0_85] : memref<64x128xf32, #tpu.memory_space<vmem>>, vector<64x128xf32>
    tpu.vector_store %arg23[%c0_84, %c0_85], %294 {strides = array<i32>} : memref<64x128xf32, #tpu.memory_space<vmem>>, vector<64x128xf32>,
    return
  }
  func.func @transform_0(%arg0: i32) -> (i32, i32, i32) {
    %c0_i32 = arith.constant 0 : i32
    %c0_i32_0 = arith.constant 0 : i32
    %c0_i32_1 = arith.constant 0 : i32
    return %c0_i32, %arg0, %c0_i32_0 : i32, i32, i32
  }
  func.func @transform_1(%arg0: i32) -> (i32, i32, i32) {
    %c0_i32 = arith.constant 0 : i32
    %c0_i32_0 = arith.constant 0 : i32
    %c0_i32_1 = arith.constant 0 : i32
    return %c0_i32, %arg0, %c0_i32_0 : i32, i32, i32
  }
  func.func @transform_2(%arg0: i32) -> (i32, i32) {
    %c0_i32 = arith.constant 0 : i32
    %c0_i32_0 = arith.constant 0 : i32
    %c0_i32_1 = arith.constant 0 : i32
    return %c0_i32, %c0_i32_0 : i32, i32
  }
  func.func @transform_3(%arg0: i32) -> (i32, i32) {
    %c0_i32 = arith.constant 0 : i32
    %c0_i32_0 = arith.constant 0 : i32
    %c0_i32_1 = arith.constant 0 : i32
    return %c0_i32, %c0_i32_0 : i32, i32
  }
  func.func @transform_4(%arg0: i32) -> (i32, i32) {
    %c0_i32 = arith.constant 0 : i32
    %c0_i32_0 = arith.constant 0 : i32
    %c0_i32_1 = arith.constant 0 : i32
    return %c0_i32, %c0_i32_0 : i32, i32
  }
  func.func @transform_5(%arg0: i32) -> (i32, i32) {
    %c0_i32 = arith.constant 0 : i32
    %c0_i32_0 = arith.constant 0 : i32
    %c0_i32_1 = arith.constant 0 : i32
    return %c0_i32, %c0_i32_0 : i32, i32
  }
  func.func @transform_6(%arg0: i32) -> (i32, i32) {
    %c0_i32 = arith.constant 0 : i32
    %c0_i32_0 = arith.constant 0 : i32
    %c0_i32_1 = arith.constant 0 : i32
    return %c0_i32, %c0_i32_0 : i32, i32
  }
  func.func @transform_7(%arg0: i32) -> (i32, i32) {
    %c0_i32 = arith.constant 0 : i32
    %c0_i32_0 = arith.constant 0 : i32
    %c0_i32_1 = arith.constant 0 : i32
    return %c0_i32, %c0_i32_0 : i32, i32
  }
  func.func @transform_8(%arg0: i32) -> (i32, i32) {
    %c0_i32 = arith.constant 0 : i32
    %c0_i32_0 = arith.constant 0 : i32
    %c0_i32_1 = arith.constant 0 : i32
    return %c0_i32, %c0_i32_0 : i32, i32
  }
  func.func @transform_9(%arg0: i32) -> (i32, i32) {
    %c0_i32 = arith.constant 0 : i32
    %c0_i32_0 = arith.constant 0 : i32
    %c0_i32_1 = arith.constant 0 : i32
    return %c0_i32, %c0_i32_0 : i32, i32
  }
  func.func @transform_10(%arg0: i32) -> (i32, i32) {
    %c0_i32 = arith.constant 0 : i32
    %c0_i32_0 = arith.constant 0 : i32
    %c0_i32_1 = arith.constant 0 : i32
    return %c0_i32, %c0_i32_0 : i32, i32
  }
  func.func @transform_11(%arg0: i32) -> (i32, i32) {
    %c0_i32 = arith.constant 0 : i32
    %c0_i32_0 = arith.constant 0 : i32
    %c0_i32_1 = arith.constant 0 : i32
    return %c0_i32, %c0_i32_0 : i32, i32
  }
  func.func @transform_12(%arg0: i32) -> (i32, i32) {
    %c0_i32 = arith.constant 0 : i32
    %c0_i32_0 = arith.constant 0 : i32
    %c0_i32_1 = arith.constant 0 : i32
    return %c0_i32, %c0_i32_0 : i32, i32
  }
  func.func @transform_13(%arg0: i32) -> (i32, i32) {
    %c0_i32 = arith.constant 0 : i32
    %c0_i32_0 = arith.constant 0 : i32
    %c0_i32_1 = arith.constant 0 : i32
    return %c0_i32, %c0_i32_0 : i32, i32
  }
  func.func @transform_14(%arg0: i32) -> (i32, i32) {
    %c0_i32 = arith.constant 0 : i32
    %c0_i32_0 = arith.constant 0 : i32
    %c0_i32_1 = arith.constant 0 : i32
    return %c0_i32, %c0_i32_0 : i32, i32
  }
  func.func @transform_15(%arg0: i32) -> (i32, i32) {
    %c0_i32 = arith.constant 0 : i32
    %c0_i32_0 = arith.constant 0 : i32
    %c0_i32_1 = arith.constant 0 : i32
    return %c0_i32, %c0_i32_0 : i32, i32
  }
  func.func @transform_16(%arg0: i32) -> (i32, i32) {
    %c0_i32 = arith.constant 0 : i32
    %c0_i32_0 = arith.constant 0 : i32
    %c0_i32_1 = arith.constant 0 : i32
    return %c0_i32, %c0_i32_0 : i32, i32
  }
  func.func @transform_17(%arg0: i32) -> (i32, i32) {
    %c0_i32 = arith.constant 0 : i32
    %c0_i32_0 = arith.constant 0 : i32
    %c0_i32_1 = arith.constant 0 : i32
    return %c0_i32, %c0_i32_0 : i32, i32
  }
  func.func @transform_18(%arg0: i32) -> (i32, i32) {
    %c0_i32 = arith.constant 0 : i32
    %c0_i32_0 = arith.constant 0 : i32
    %c0_i32_1 = arith.constant 0 : i32
    return %c0_i32, %c0_i32_0 : i32, i32
  }
  func.func @transform_19(%arg0: i32) -> (i32, i32) {
    %c0_i32 = arith.constant 0 : i32
    %c0_i32_0 = arith.constant 0 : i32
    %c0_i32_1 = arith.constant 0 : i32
    return %c0_i32, %c0_i32_0 : i32, i32
  }
  func.func @transform_20(%arg0: i32) -> (i32, i32) {
    %c0_i32 = arith.constant 0 : i32
    %c0_i32_0 = arith.constant 0 : i32
    %c0_i32_1 = arith.constant 0 : i32
    return %c0_i32, %c0_i32_0 : i32, i32
  }
  func.func @transform_21(%arg0: i32) -> (i32, i32) {
    %c0_i32 = arith.constant 0 : i32
    %c0_i32_0 = arith.constant 0 : i32
    return %arg0, %c0_i32 : i32, i32
  }
  func.func @transform_22(%arg0: i32) -> (i32, i32) {
    %c0_i32 = arith.constant 0 : i32
    %c0_i32_0 = arith.constant 0 : i32
    return %arg0, %c0_i32 : i32, i32
  }
}

</mosaic_0001>

<bundles_post_ra>
// kernel: netwrapper_forward.1
= control target key start
LH: loop header
LB: loop body
LE: loop exit
PB: predicated region body
PF: predicated region fallthrough
CT: control target
= control target key end

     0   :  { %s11047_s0 = inlined_call_operand.vmem [shape: f32[4,128,16], index: 0, kind: input, shape index: {}]   ;;  %s11048_s1 = inlined_call_operand.vmem [shape: f32[4,128,12], index: 1, kind: input, shape index: {}]   ;;  %s11049_s2 = inlined_call_operand.vmem [shape: bf16[16,32], index: 2, kind: input, shape index: {}]   ;;  %s11050_s3 = inlined_call_operand.vmem [shape: bf16[12,32], index: 3, kind: input, shape index: {}]   ;;  %s11051_s4 = inlined_call_operand.vmem [shape: f32[1,32], index: 4, kind: input, shape index: {}]   ;;  %s11052_s5 = inlined_call_operand.vmem [shape: f32[1,32], index: 5, kind: input, shape index: {}]   ;;  %s11053_s6 = inlined_call_operand.vmem [shape: f32[1,32], index: 6, kind: input, shape index: {}]   ;;  %s11054_s7 = inlined_call_operand.vmem [shape: bf16[32,32], index: 7, kind: input, shape index: {}]   ;;  %s11055_s8 = inlined_call_operand.vmem [shape: bf16[32,32], index: 8, kind: input, shape index: {}]   ;;  %s11056_s9 = inlined_call_operand.vmem [shape: bf16[32,32], index: 9, kind: input, shape index: {}]   ;;  %s11057_s10 = inlined_call_operand.vmem [shape: bf16[32,32], index: 10, kind: input, shape index: {}]   ;;  %s11058_s11 = inlined_call_operand.vmem [shape: f32[1,32], index: 11, kind: input, shape index: {}]   ;;  %s11059_s12 = inlined_call_operand.vmem [shape: f32[1,32], index: 12, kind: input, shape index: {}]   ;;  %s11060_s13 = inlined_call_operand.vmem [shape: bf16[32,64], index: 13, kind: input, shape index: {}]   ;;  %s11061_s14 = inlined_call_operand.vmem [shape: f32[1,64], index: 14, kind: input, shape index: {}]   ;;  %s11062_s15 = inlined_call_operand.vmem [shape: bf16[64,32], index: 15, kind: input, shape index: {}]   ;;  %s11063_s16 = inlined_call_operand.vmem [shape: f32[1,32], index: 16, kind: input, shape index: {}]   ;;  %s11064_s17 = inlined_call_operand.vmem [shape: bf16[32,16], index: 17, kind: input, shape index: {}]   ;;  %s11065_s18 = inlined_call_operand.vmem [shape: f32[1,16], index: 18, kind: input, shape index: {}]   ;;  %s11066_s19 = inlined_call_operand.vmem [shape: bf16[16,128], index: 19, kind: input, shape index: {}]   ;;  %s11067_s20 = inlined_call_operand.vmem [shape: f32[1,128], index: 20, kind: input, shape index: {}]   ;;  %s11068_s21 = inlined_call_operand.vmem [shape: f32[128,128], index: 21, kind: output, shape index: {0}]   ;;  %s11069_s22 = inlined_call_operand.vmem [shape: f32[128,128], index: 22, kind: output, shape index: {1}]  }
   0x1   :  { %11326 = sst [smem:[#allocation149_spill]] %s11047_s0 }
   0x2   :  { %11327 = sst [smem:[#allocation150_spill]] %s11048_s1 }
   0x3   :  { %11328 = sst [smem:[#allocation151_spill]] %s11049_s2 }
   0x4   :  { %11329 = sst [smem:[#allocation152_spill]] %s11050_s3 }
   0x5   :  { %11330 = sst [smem:[#allocation153_spill]] %s11051_s4 }
   0x6   :  { %11331 = sst [smem:[#allocation154_spill]] %s11052_s5 }
   0x7   :  { %11332 = sst [smem:[#allocation155_spill]] %s11053_s6 }
   0x8   :  { %s7214_s3 = smov 0   ;;  %s7216_s28 = smov 0  }
   0x9   :  { %s7218_s29 = smov 0  }
   0xa LB: > { %s7231_s4 = sadd.s32 1, %s7097_s29   ;;  %s40_s23 = sadd.s32 1, %s7093_s28  ;;  %s7097_s29 = sphi %s7218_s29, %s11892_s29   ;;  %s7093_s28 = sphi %s7216_s28, %s11891_s28   ;;  %s7089_s3 = sphi %s7214_s3, %s11890_s3  }
   0xb   : > { %s37_s0 = ssub.s32 %s7097_s29, %s7231_s4  ;;  %p47_p1 = scmp.ne.s32.totalorder %s7093_s28, %s7089_s3 }
   0xc   : > { %p38_p0 = scmp.eq.s32.totalorder %s37_s0, 0  ;;  %p48_p2 = scmp.eq.s32.totalorder %s7097_s29, 0 }
   0xd   : > { %p5936_p4 = scmp.ge.s32.totalorder %s7097_s29, 2 }
   0xe   : > { %s7240_s1 = scalar_select %p38_p0, %s7093_s28, %s40_s23  }
   0xf   : > { %p7242_p3 = por %p48_p2, %p47_p1  ;;  %607 = sbr.rel (%p5936_p4) target bundleno = 72 (0x48), region = 92 }
  0x14   : > { %610 = sbr.rel (!%p7242_p3) target bundleno = 46 (0x2e), region = 96  ;;  %s612_s24 = sand.u32 (%p7242_p3), 1, %s7093_s28  }
  0x15   : > { %s6116_s6 = sshll.u32 (%p7242_p3), %s7097_s29, 6  ;;  %s5937_s25 = sshll.u32 (%p7242_p3), %s612_s24, 8 }
  0x16   : > { %s11334_s27 = sld [smem:[#allocation149_spill]] (%p7242_p3)  ;;  %s7259_s23 = scalar_lea.vmem (%p7242_p3), [#allocation2], %s5937_s25 }
  0x1c   : > { %s7254_s0 = scalar_lea.vmem %s11334_s27, %s6116_s6 }
  0x1d   : > { %v708_v0 = vld [vmem:[%s7254_s0] sm:$0xff]  ;;  %v710_v1 = vld [vmem:[%s7254_s0 + $0x8] sm:$0xff]  ;;  %v712_v2 = vld [vmem:[%s7254_s0 + $0x10] sm:$0xff] }
  0x1e   : > { %709 = vst [vmem:[%s7259_s23] sm:$0xff] %v708_v0  ;;  %711 = vst [vmem:[%s7259_s23 + $0x8] sm:$0xff] %v710_v1  ;;  %v714_v3 = vld [vmem:[%s7254_s0 + $0x18] sm:$0xff]  ;;  %v716_v4 = vld [vmem:[%s7254_s0 + $0x20] sm:$0xff] }
  0x1f   : > { %713 = vst [vmem:[%s7259_s23 + $0x10] sm:$0xff] %v712_v2  ;;  %v718_v5 = vld [vmem:[%s7254_s0 + $0x28] sm:$0xff]  ;;  %715 = vst [vmem:[%s7259_s23 + $0x18] sm:$0xff] %v714_v3  ;;  %v720_v6 = vld [vmem:[%s7254_s0 + $0x30] sm:$0xff] }
  0x20   : > { %717 = vst [vmem:[%s7259_s23 + $0x20] sm:$0xff] %v716_v4  ;;  %719 = vst [vmem:[%s7259_s23 + $0x28] sm:$0xff] %v718_v5  ;;  %v722_v7 = vld [vmem:[%s7254_s0 + $0x38] sm:$0xff]  ;;  %v724_v8 = vld [vmem:[%s7254_s0 + $0x80] sm:$0xff] }
  0x21   : > { %721 = vst [vmem:[%s7259_s23 + $0x30] sm:$0xff] %v720_v6  ;;  %723 = vst [vmem:[%s7259_s23 + $0x38] sm:$0xff] %v722_v7  ;;  %v726_v9 = vld [vmem:[%s7254_s0 + $0x88] sm:$0xff]  ;;  %v728_v10 = vld [vmem:[%s7254_s0 + $0x90] sm:$0xff] }
  0x22   : > { %725 = vst [vmem:[%s7259_s23 + $0x40] sm:$0xff] %v724_v8  ;;  %v730_v11 = vld [vmem:[%s7254_s0 + $0x98] sm:$0xff]  ;;  %727 = vst [vmem:[%s7259_s23 + $0x48] sm:$0xff] %v726_v9  ;;  %v732_v12 = vld [vmem:[%s7254_s0 + $0xa0] sm:$0xff] }
  0x23   : > { %729 = vst [vmem:[%s7259_s23 + $0x50] sm:$0xff] %v728_v10  ;;  %731 = vst [vmem:[%s7259_s23 + $0x58] sm:$0xff] %v730_v11  ;;  %v734_v13 = vld [vmem:[%s7254_s0 + $0xa8] sm:$0xff]  ;;  %v736_v14 = vld [vmem:[%s7254_s0 + $0xb0] sm:$0xff] }
  0x24   : > { %733 = vst [vmem:[%s7259_s23 + $0x60] sm:$0xff] %v732_v12  ;;  %735 = vst [vmem:[%s7259_s23 + $0x68] sm:$0xff] %v734_v13  ;;  %v738_v15 = vld [vmem:[%s7254_s0 + $0xb8] sm:$0xff]  ;;  %v740_v16 = vld [vmem:[%s7254_s0 + $0x100] sm:$0xff] }
  0x25   : > { %737 = vst [vmem:[%s7259_s23 + $0x70] sm:$0xff] %v736_v14  ;;  %v742_v17 = vld [vmem:[%s7254_s0 + $0x108] sm:$0xff]  ;;  %739 = vst [vmem:[%s7259_s23 + $0x78] sm:$0xff] %v738_v15  ;;  %v744_v18 = vld [vmem:[%s7254_s0 + $0x110] sm:$0xff] }
  0x26   : > { %741 = vst [vmem:[%s7259_s23 + $0x80] sm:$0xff] %v740_v16  ;;  %743 = vst [vmem:[%s7259_s23 + $0x88] sm:$0xff] %v742_v17  ;;  %v746_v19 = vld [vmem:[%s7254_s0 + $0x118] sm:$0xff]  ;;  %v748_v20 = vld [vmem:[%s7254_s0 + $0x120] sm:$0xff] }
  0x27   : > { %745 = vst [vmem:[%s7259_s23 + $0x90] sm:$0xff] %v744_v18  ;;  %747 = vst [vmem:[%s7259_s23 + $0x98] sm:$0xff] %v746_v19  ;;  %v750_v21 = vld [vmem:[%s7254_s0 + $0x128] sm:$0xff]  ;;  %v752_v22 = vld [vmem:[%s7254_s0 + $0x130] sm:$0xff] }
  0x28   : > { %749 = vst [vmem:[%s7259_s23 + $0xa0] sm:$0xff] %v748_v20  ;;  %v754_v23 = vld [vmem:[%s7254_s0 + $0x138] sm:$0xff]  ;;  %751 = vst [vmem:[%s7259_s23 + $0xa8] sm:$0xff] %v750_v21  ;;  %v756_v24 = vld [vmem:[%s7254_s0 + $0x180] sm:$0xff] }
  0x29   : > { %753 = vst [vmem:[%s7259_s23 + $0xb0] sm:$0xff] %v752_v22  ;;  %755 = vst [vmem:[%s7259_s23 + $0xb8] sm:$0xff] %v754_v23  ;;  %v758_v25 = vld [vmem:[%s7254_s0 + $0x188] sm:$0xff]  ;;  %v760_v26 = vld [vmem:[%s7254_s0 + $0x190] sm:$0xff] }
  0x2a   : > { %757 = vst [vmem:[%s7259_s23 + $0xc0] sm:$0xff] %v756_v24  ;;  %759 = vst [vmem:[%s7259_s23 + $0xc8] sm:$0xff] %v758_v25  ;;  %v762_v27 = vld [vmem:[%s7254_s0 + $0x198] sm:$0xff]  ;;  %v764_v28 = vld [vmem:[%s7254_s0 + $0x1a0] sm:$0xff] }
  0x2b   : > { %761 = vst [vmem:[%s7259_s23 + $0xd0] sm:$0xff] %v760_v26  ;;  %v766_v29 = vld [vmem:[%s7254_s0 + $0x1a8] sm:$0xff]  ;;  %763 = vst [vmem:[%s7259_s23 + $0xd8] sm:$0xff] %v762_v27  ;;  %v768_v30 = vld [vmem:[%s7254_s0 + $0x1b0] sm:$0xff] }
  0x2c   : > { %765 = vst [vmem:[%s7259_s23 + $0xe0] sm:$0xff] %v764_v28  ;;  %767 = vst [vmem:[%s7259_s23 + $0xe8] sm:$0xff] %v766_v29  ;;  %v770_v31 = vld [vmem:[%s7254_s0 + $0x1b8] sm:$0xff] }
  0x2d   : > { %769 = vst [vmem:[%s7259_s23 + $0xf0] sm:$0xff] %v768_v30  ;;  %771 = vst [vmem:[%s7259_s23 + $0xf8] sm:$0xff] %v770_v31 }
  0x2e PF: > { %777 = sbr.rel (!%p7242_p3) target bundleno = 72 (0x48), region = 134  ;;  %s779_s24 = sand.u32 (%p7242_p3), 1, %s7093_s28  }
  0x2f   : > { %s6117_s6 = sshll.u32 (%p7242_p3), %s7097_s29, 6  ;;  %s5940_s25 = sshll.u32 (%p7242_p3), %s779_s24, 8 }
  0x30   : > { %s11335_s27 = sld [smem:[#allocation150_spill]] (%p7242_p3)  ;;  %s7334_s5 = scalar_lea.vmem (%p7242_p3), [#allocation3], %s5940_s25 }
  0x36   : > { %s7329_s30 = scalar_lea.vmem %s11335_s27, %s6117_s6 }
  0x37   : > { %v875_v32 = vld [vmem:[%s7329_s30] sm:$0xff]  ;;  %v877_v33 = vld [vmem:[%s7329_s30 + $0x8] sm:$0xff]  ;;  %v879_v34 = vld [vmem:[%s7329_s30 + $0x10] sm:$0xff] }
  0x38   : > { %876 = vst [vmem:[%s7334_s5] sm:$0xff] %v875_v32  ;;  %878 = vst [vmem:[%s7334_s5 + $0x8] sm:$0xff] %v877_v33  ;;  %v881_v35 = vld [vmem:[%s7329_s30 + $0x18] sm:$0xff]  ;;  %v883_v36 = vld [vmem:[%s7329_s30 + $0x20] sm:$0xff] }
  0x39   : > { %880 = vst [vmem:[%s7334_s5 + $0x10] sm:$0xff] %v879_v34  ;;  %v885_v37 = vld [vmem:[%s7329_s30 + $0x28] sm:$0xff]  ;;  %882 = vst [vmem:[%s7334_s5 + $0x18] sm:$0xff] %v881_v35  ;;  %v887_v38 = vld [vmem:[%s7329_s30 + $0x30] sm:$0xff] }
  0x3a   : > { %884 = vst [vmem:[%s7334_s5 + $0x20] sm:$0xff] %v883_v36  ;;  %886 = vst [vmem:[%s7334_s5 + $0x28] sm:$0xff] %v885_v37  ;;  %v889_v39 = vld [vmem:[%s7329_s30 + $0x38] sm:$0xff]  ;;  %v891_v40 = vld [vmem:[%s7329_s30 + $0x80] sm:$0xff] }
  0x3b   : > { %888 = vst [vmem:[%s7334_s5 + $0x30] sm:$0xff] %v887_v38  ;;  %890 = vst [vmem:[%s7334_s5 + $0x38] sm:$0xff] %v889_v39  ;;  %v893_v41 = vld [vmem:[%s7329_s30 + $0x88] sm:$0xff]  ;;  %v895_v42 = vld [vmem:[%s7329_s30 + $0x90] sm:$0xff] }
  0x3c   : > { %892 = vst [vmem:[%s7334_s5 + $0x40] sm:$0xff] %v891_v40  ;;  %v897_v43 = vld [vmem:[%s7329_s30 + $0x98] sm:$0xff]  ;;  %894 = vst [vmem:[%s7334_s5 + $0x48] sm:$0xff] %v893_v41  ;;  %v899_v44 = vld [vmem:[%s7329_s30 + $0xa0] sm:$0xff] }
  0x3d   : > { %896 = vst [vmem:[%s7334_s5 + $0x50] sm:$0xff] %v895_v42  ;;  %898 = vst [vmem:[%s7334_s5 + $0x58] sm:$0xff] %v897_v43  ;;  %v901_v45 = vld [vmem:[%s7329_s30 + $0xa8] sm:$0xff]  ;;  %v903_v46 = vld [vmem:[%s7329_s30 + $0xb0] sm:$0xff] }
  0x3e   : > { %900 = vst [vmem:[%s7334_s5 + $0x60] sm:$0xff] %v899_v44  ;;  %902 = vst [vmem:[%s7334_s5 + $0x68] sm:$0xff] %v901_v45  ;;  %v905_v47 = vld [vmem:[%s7329_s30 + $0xb8] sm:$0xff]  ;;  %v907_v48 = vld [vmem:[%s7329_s30 + $0x100] sm:$0xff] }
  0x3f   : > { %904 = vst [vmem:[%s7334_s5 + $0x70] sm:$0xff] %v903_v46  ;;  %v909_v49 = vld [vmem:[%s7329_s30 + $0x108] sm:$0xff]  ;;  %906 = vst [vmem:[%s7334_s5 + $0x78] sm:$0xff] %v905_v47  ;;  %v911_v50 = vld [vmem:[%s7329_s30 + $0x110] sm:$0xff] }
  0x40   : > { %908 = vst [vmem:[%s7334_s5 + $0x80] sm:$0xff] %v907_v48  ;;  %910 = vst [vmem:[%s7334_s5 + $0x88] sm:$0xff] %v909_v49  ;;  %v913_v51 = vld [vmem:[%s7329_s30 + $0x118] sm:$0xff]  ;;  %v915_v52 = vld [vmem:[%s7329_s30 + $0x120] sm:$0xff] }
  0x41   : > { %912 = vst [vmem:[%s7334_s5 + $0x90] sm:$0xff] %v911_v50  ;;  %914 = vst [vmem:[%s7334_s5 + $0x98] sm:$0xff] %v913_v51  ;;  %v917_v53 = vld [vmem:[%s7329_s30 + $0x128] sm:$0xff]  ;;  %v919_v54 = vld [vmem:[%s7329_s30 + $0x130] sm:$0xff] }
  0x42   : > { %916 = vst [vmem:[%s7334_s5 + $0xa0] sm:$0xff] %v915_v52  ;;  %v921_v55 = vld [vmem:[%s7329_s30 + $0x138] sm:$0xff]  ;;  %918 = vst [vmem:[%s7334_s5 + $0xa8] sm:$0xff] %v917_v53  ;;  %v923_v56 = vld [vmem:[%s7329_s30 + $0x180] sm:$0xff] }
  0x43   : > { %920 = vst [vmem:[%s7334_s5 + $0xb0] sm:$0xff] %v919_v54  ;;  %922 = vst [vmem:[%s7334_s5 + $0xb8] sm:$0xff] %v921_v55  ;;  %v925_v57 = vld [vmem:[%s7329_s30 + $0x188] sm:$0xff]  ;;  %v927_v58 = vld [vmem:[%s7329_s30 + $0x190] sm:$0xff] }
  0x44   : > { %924 = vst [vmem:[%s7334_s5 + $0xc0] sm:$0xff] %v923_v56  ;;  %926 = vst [vmem:[%s7334_s5 + $0xc8] sm:$0xff] %v925_v57  ;;  %v929_v59 = vld [vmem:[%s7329_s30 + $0x198] sm:$0xff]  ;;  %v931_v60 = vld [vmem:[%s7329_s30 + $0x1a0] sm:$0xff] }
  0x45   : > { %928 = vst [vmem:[%s7334_s5 + $0xd0] sm:$0xff] %v927_v58  ;;  %v933_v61 = vld [vmem:[%s7329_s30 + $0x1a8] sm:$0xff]  ;;  %930 = vst [vmem:[%s7334_s5 + $0xd8] sm:$0xff] %v929_v59  ;;  %v935_v62 = vld [vmem:[%s7329_s30 + $0x1b0] sm:$0xff] }
  0x46   : > { %932 = vst [vmem:[%s7334_s5 + $0xe0] sm:$0xff] %v931_v60  ;;  %934 = vst [vmem:[%s7334_s5 + $0xe8] sm:$0xff] %v933_v61  ;;  %v937_v63 = vld [vmem:[%s7329_s30 + $0x1b8] sm:$0xff] }
  0x47   : > { %936 = vst [vmem:[%s7334_s5 + $0xf0] sm:$0xff] %v935_v62  ;;  %938 = vst [vmem:[%s7334_s5 + $0xf8] sm:$0xff] %v937_v63 }
  0x48 PF: > { %p5943_p5 = scmp.ge.s32.totalorder %s7097_s29, 1  ;;  %p943_p6 = scmp.lt.s32.totalorder %s7097_s29, 3 }
  0x4a   : > { %p944_p7 = pnand %p5943_p5, %p943_p6 }
  0x4c   : > { %947 = sbr.rel (%p944_p7) target bundleno = 2671 (0xa6f), region = 172 }
  0x51   : > { %s11336_s24 = sld [smem:[#allocation152_spill]]  ;;  %vm1196_vm0 = vcmask 1045504   ;;  %s950_s30 = sand.u32 1, %s7089_s3   ;;  %vm1147_vm1 = vcmask 97280   ;;  %vm1367_vm2 = vcmask 130048   ;;  %vm1618_vm3 = vcmask 261120  }
  0x52   : > { %s11337_s26 = sld [smem:[#allocation151_spill]]  ;;  %s5944_s2 = sshll.u32 %s950_s30, 8  ;;  %vm5274_vm4 = vcmask 523264  }
  0x53   : > { %s7406_s27 = scalar_lea.vmem [#allocation3], %s5944_s2  ;;  %s7410_s5 = scalar_lea.vmem [#allocation2], %s5944_s2 }
  0x54   : > { %v1074_v3 = vld [vmem:[%s7406_s27] sm:$0xff]  ;;  %v1075_v4 = vld [vmem:[%s7406_s27 + $0x8] sm:$0xff]  ;;  %v1076_v8 = vld [vmem:[%s7406_s27 + $0x10] sm:$0xff]  ;;  %s11338_s23 = sld [smem:[#allocation153_spill]]  ;;  %s11873_s25 = sadd.s32 4294967295, %s7097_s29  }
  0x55   : > { %v1042_v5 = vld [vmem:[%s7410_s5] sm:$0xff]  ;;  %v1124_v6 = vpack.c.bf16 %v1075_v4, %v1074_v3  ;;  %v1043_v7 = vld [vmem:[%s7410_s5 + $0x8] sm:$0xff]  ;;  %v1077_v9 = vld [vmem:[%s7406_s27 + $0x18] sm:$0xff]  ;;  %s11371_s6 = sld [smem:[#allocation154_spill]] }
  0x56   : > { %v1106_v10 = vpack.c.bf16 %v1043_v7, %v1042_v5  ;;  %v1125_v11 = vpack.c.bf16 %v1077_v9, %v1076_v8  ;;  %v1044_v12 = vld [vmem:[%s7410_s5 + $0x10] sm:$0xff]  ;;  %v1045_v13 = vld [vmem:[%s7410_s5 + $0x18] sm:$0xff]  ;;  %v1078_v14 = vld [vmem:[%s7406_s27 + $0x20] sm:$0xff]  ;;  %s11372_s30 = sld [smem:[#allocation155_spill]] }
  0x57   : > { %v6608_v0 = vld [vmem:[%s11336_s24] sm:$0x3f]   ;;  %6275 = vmatprep.mubr.msk.bf16.mxu0 %vm1147_vm1, %v1124_v6  ;;  %v1107_v15 = vpack.c.bf16 %v1045_v13, %v1044_v12  ;;  %v1079_v16 = vld [vmem:[%s7406_s27 + $0x28] sm:$0xff]  ;;  %v1080_v21 = vld [vmem:[%s7406_s27 + $0x30] sm:$0xff] }
  0x58   : > { %v6609_v1 = vld [vmem:[%s11337_s26] sm:$0xff]   ;;  %6583 = vmatprep.subr.msk.bf16.mxu0 %vm1196_vm0, %v6608_v0  ;;  %v1198_v2 = vsel %vm1196_vm0, %v6608_v0, 0  ;;  %v1047_v18 = vld [vmem:[%s7410_s5 + $0x28] sm:$0xff]  ;;  %6309 = vmatprep.mubr.msk.bf16.mxu1 %vm1367_vm2, %v1106_v10  ;;  %v1126_v19 = vpack.c.bf16 %v1079_v16, %v1078_v14  ;;  %v1081_v22 = vld [vmem:[%s7406_s27 + $0x38] sm:$0xff]  ;;  %s5946_s26 = sshll.u32 %s11873_s25, 3 }
  0x59   : > { %6307 = vmatprep.subr.bf16.mxu1 %v6609_v1  ;;  %6274 = vmatpush3.bf16.msra.mxu0 %v1198_v2  ;;  %v1046_v17 = vld [vmem:[%s7410_s5 + $0x20] sm:$0xff]  ;;  %v1048_v23 = vld [vmem:[%s7410_s5 + $0x30] sm:$0xff]  ;;  %v1049_v24 = vld [vmem:[%s7410_s5 + $0x38] sm:$0xff]  ;;  %v1127_v29 = vpack.c.bf16 %v1081_v22, %v1080_v21  ;;  %p1030_p8 = scmp.lt.s32.totalorder %s5946_s26, 15 }
  0x5a   : > { %6308 = vmatpush3.bf16.msra.mxu1 %v6609_v1  ;;  %v1108_v20 = vpack.c.bf16 %v1047_v18, %v1046_v17  ;;  %v1082_v25 = vld [vmem:[%s7406_s27 + $0x40] sm:$0xff]  ;;  %v1083_v26 = vld [vmem:[%s7406_s27 + $0x48] sm:$0xff]  ;;  %v1109_v30 = vpack.c.bf16 %v1049_v24, %v1048_v23  ;;  %v1084_v33 = vld [vmem:[%s7406_s27 + $0x50] sm:$0xff] }
  0x5b   : > { %v1050_v27 = vld [vmem:[%s7410_s5 + $0x40] sm:$0xff]  ;;  %v1051_v28 = vld [vmem:[%s7410_s5 + $0x48] sm:$0xff]  ;;  %v1128_v31 = vpack.c.bf16 %v1083_v26, %v1082_v25  ;;  %v1085_v34 = vld [vmem:[%s7406_s27 + $0x58] sm:$0xff]  ;;  %s11894_s26 = smov (!%p1030_p8, %s5946_s26), 15 }
  0x5c   : > { %6276 = vmatmul.mubr.msk.bf16.vlgmr.msra.gmra.mxu0 %vm1147_vm1, %v1125_v11  ;;  %v1110_v32 = vpack.c.bf16 %v1051_v28, %v1050_v27  ;;  %v1052_v35 = vld [vmem:[%s7410_s5 + $0x50] sm:$0xff]  ;;  %v1053_v36 = vld [vmem:[%s7410_s5 + $0x58] sm:$0xff]  ;;  %v1086_v37 = vld [vmem:[%s7406_s27 + $0x60] sm:$0xff]  ;;  %v1129_v41 = vpack.c.bf16 %v1085_v34, %v1084_v33  ;;  %s5947_s29 = sshll.u32 %s11894_s26, 3 }
  0x5d   : > { %6310 = vmatmul.mubr.msk.bf16.vlgmr.msra.gmra.mxu1 %vm1367_vm2, %v1107_v15  ;;  %6279 = vmatprep.mubr.msk.bf16.mxu0 %vm1147_vm1, %v1126_v19  ;;  %v1087_v38 = vld [vmem:[%s7406_s27 + $0x68] sm:$0xff]  ;;  %v1054_v39 = vld [vmem:[%s7410_s5 + $0x60] sm:$0xff]  ;;  %v1111_v42 = vpack.c.bf16 %v1053_v36, %v1052_v35  ;;  %v1088_v45 = vld [vmem:[%s7406_s27 + $0x70] sm:$0xff]  ;;  %s10967_s3 = scalar_lea.vmem %s11068_s21, %s5947_s29  ;;  %s1039_s2 = scalar_lea.vmem %s11069_s22, %s5947_s29 }
  0x5e   : > { %6313 = vmatprep.mubr.msk.bf16.mxu1 %vm1367_vm2, %v1108_v20  ;;  %v1055_v40 = vld [vmem:[%s7410_s5 + $0x68] sm:$0xff]  ;;  %v1130_v43 = vpack.c.bf16 %v1087_v38, %v1086_v37  ;;  %v1089_v46 = vld [vmem:[%s7406_s27 + $0x78] sm:$0xff]  ;;  %v1056_v47 = vld [vmem:[%s7410_s5 + $0x70] sm:$0xff] }
  0x5f   : > { %v1112_v44 = vpack.c.bf16 %v1055_v40, %v1054_v39  ;;  %v1057_v48 = vld [vmem:[%s7410_s5 + $0x78] sm:$0xff]  ;;  %v1090_v49 = vld [vmem:[%s7406_s27 + $0x80] sm:$0xff]  ;;  %v1091_v50 = vld [vmem:[%s7406_s27 + $0x88] sm:$0xff]  ;;  %v1131_v53 = vpack.c.bf16 %v1089_v46, %v1088_v45 }
  0x60   : > { %v1058_v51 = vld [vmem:[%s7410_s5 + $0x80] sm:$0xff]  ;;  %v1059_v52 = vld [vmem:[%s7410_s5 + $0x88] sm:$0xff]  ;;  %v1113_v54 = vpack.c.bf16 %v1057_v48, %v1056_v47  ;;  %v1132_v55 = vpack.c.bf16 %v1091_v50, %v1090_v49  ;;  %v1092_v57 = vld [vmem:[%s7406_s27 + $0x90] sm:$0xff] }
  0x61   : > { %v1114_v56 = vpack.c.bf16 %v1059_v52, %v1058_v51  ;;  %v1093_v58 = vld [vmem:[%s7406_s27 + $0x98] sm:$0xff]  ;;  %v1060_v59 = vld [vmem:[%s7410_s5 + $0x90] sm:$0xff]  ;;  %v1094_v61 = vld [vmem:[%s7406_s27 + $0xa0] sm:$0xff] }
  0x62   : > { %v1061_v60 = vld [vmem:[%s7410_s5 + $0x98] sm:$0xff]  ;;  %v1095_v62 = vld [vmem:[%s7406_s27 + $0xa8] sm:$0xff]  ;;  %v1062_v63 = vld [vmem:[%s7410_s5 + $0xa0] sm:$0xff]  ;;  %v1133_v1 = vpack.c.bf16 %v1093_v58, %v1092_v57 }
  0x63   : > { %v1063_v0 = vld [vmem:[%s7410_s5 + $0xa8] sm:$0xff]  ;;  %v1115_v2 = vpack.c.bf16 %v1061_v60, %v1060_v59  ;;  %v1134_v3 = vpack.c.bf16 %v1095_v62, %v1094_v61  ;;  %v1096_v5 = vld [vmem:[%s7406_s27 + $0xb0] sm:$0xff]  ;;  %v1097_v6 = vld [vmem:[%s7406_s27 + $0xb8] sm:$0xff] }
  0x64   : > { %6280 = vmatmul.mubr.msk.bf16.gmra.mxu0 %vm1147_vm1, %v1127_v29  ;;  %v1116_v4 = vpack.c.bf16 %v1063_v0, %v1062_v63  ;;  %v1064_v7 = vld [vmem:[%s7410_s5 + $0xb0] sm:$0xff]  ;;  %v1065_v8 = vld [vmem:[%s7410_s5 + $0xb8] sm:$0xff]  ;;  %v1098_v9 = vld [vmem:[%s7406_s27 + $0xc0] sm:$0xff]  ;;  %v1135_v13 = vpack.c.bf16 %v1097_v6, %v1096_v5 }
  0x65   : > { %6314 = vmatmul.mubr.msk.bf16.gmra.mxu1 %vm1367_vm2, %v1109_v30  ;;  %6283 = vmatprep.mubr.msk.bf16.mxu0 %vm1147_vm1, %v1128_v31  ;;  %v1099_v10 = vld [vmem:[%s7406_s27 + $0xc8] sm:$0xff]  ;;  %v1066_v11 = vld [vmem:[%s7410_s5 + $0xc0] sm:$0xff]  ;;  %v1117_v14 = vpack.c.bf16 %v1065_v8, %v1064_v7  ;;  %v1100_v17 = vld [vmem:[%s7406_s27 + $0xd0] sm:$0xff] }
  0x66   : > { %6317 = vmatprep.mubr.msk.bf16.mxu1 %vm1367_vm2, %v1110_v32  ;;  %v1067_v12 = vld [vmem:[%s7410_s5 + $0xc8] sm:$0xff]  ;;  %v1136_v15 = vpack.c.bf16 %v1099_v10, %v1098_v9  ;;  %v1101_v18 = vld [vmem:[%s7406_s27 + $0xd8] sm:$0xff]  ;;  %v1068_v19 = vld [vmem:[%s7410_s5 + $0xd0] sm:$0xff] }
  0x67   : > { %v1118_v16 = vpack.c.bf16 %v1067_v12, %v1066_v11  ;;  %v1069_v20 = vld [vmem:[%s7410_s5 + $0xd8] sm:$0xff]  ;;  %v1102_v21 = vld [vmem:[%s7406_s27 + $0xe0] sm:$0xff]  ;;  %v1103_v22 = vld [vmem:[%s7406_s27 + $0xe8] sm:$0xff]  ;;  %v1137_v25 = vpack.c.bf16 %v1101_v18, %v1100_v17 }
  0x68   : > { %v1070_v23 = vld [vmem:[%s7410_s5 + $0xe0] sm:$0xff]  ;;  %v1071_v24 = vld [vmem:[%s7410_s5 + $0xe8] sm:$0xff]  ;;  %v1119_v26 = vpack.c.bf16 %v1069_v20, %v1068_v19  ;;  %v1138_v27 = vpack.c.bf16 %v1103_v22, %v1102_v21  ;;  %v1104_v29 = vld [vmem:[%s7406_s27 + $0xf0] sm:$0xff] }
  0x69   : > { %v1120_v28 = vpack.c.bf16 %v1071_v24, %v1070_v23  ;;  %v1105_v30 = vld [vmem:[%s7406_s27 + $0xf8] sm:$0xff]  ;;  %v1072_v31 = vld [vmem:[%s7410_s5 + $0xf0] sm:$0xff]  ;;  %v7509_v37 = vld [vmem:[%s11338_s23] ss:$0 sm:$0xff] }
  0x6a   : > { %v1073_v32 = vld [vmem:[%s7410_s5 + $0xf8] sm:$0xff]  ;;  %v1139_v33 = vpack.c.bf16 %v1105_v30, %v1104_v29 }
  0x6b   : > { %v1121_v34 = vpack.c.bf16 %v1073_v32, %v1072_v31 }
  0x6c   : > { %6284 = vmatmul.mubr.msk.bf16.gmra.mxu0 %vm1147_vm1, %v1129_v41 }
  0x6d   : > { %6318 = vmatmul.mubr.msk.bf16.gmra.mxu1 %vm1367_vm2, %v1111_v42  ;;  %6287 = vmatprep.mubr.msk.bf16.mxu0 %vm1147_vm1, %v1130_v43 }
  0x6e   : > { %6321 = vmatprep.mubr.msk.bf16.mxu1 %vm1367_vm2, %v1112_v44 }
  0x74   : > { %6288 = vmatmul.mubr.msk.bf16.gmra.mxu0 %vm1147_vm1, %v1131_v53 }
  0x75   : > { %6322 = vmatmul.mubr.msk.bf16.gmra.mxu1 %vm1367_vm2, %v1113_v54  ;;  %6291 = vmatprep.mubr.msk.bf16.mxu0 %vm1147_vm1, %v1132_v55 }
  0x76   : > { %6325 = vmatprep.mubr.msk.bf16.mxu1 %vm1367_vm2, %v1114_v56 }
  0x7c   : > { %6292 = vmatmul.mubr.msk.bf16.gmra.mxu0 %vm1147_vm1, %v1133_v1 }
  0x7d   : > { %6326 = vmatmul.mubr.msk.bf16.gmra.mxu1 %vm1367_vm2, %v1115_v2  ;;  %6295 = vmatprep.mubr.msk.bf16.mxu0 %vm1147_vm1, %v1134_v3 }
  0x7e   : > { %6329 = vmatprep.mubr.msk.bf16.mxu1 %vm1367_vm2, %v1116_v4 }
  0x84   : > { %6296 = vmatmul.mubr.msk.bf16.gmra.mxu0 %vm1147_vm1, %v1135_v13 }
  0x85   : > { %6330 = vmatmul.mubr.msk.bf16.gmra.mxu1 %vm1367_vm2, %v1117_v14  ;;  %6299 = vmatprep.mubr.msk.bf16.mxu0 %vm1147_vm1, %v1136_v15 }
  0x86   : > { %6333 = vmatprep.mubr.msk.bf16.mxu1 %vm1367_vm2, %v1118_v16 }
  0x8c   : > { %6300 = vmatmul.mubr.msk.bf16.gmra.mxu0 %vm1147_vm1, %v1137_v25 }
  0x8d   : > { %6334 = vmatmul.mubr.msk.bf16.gmra.mxu1 %vm1367_vm2, %v1119_v26  ;;  %6303 = vmatprep.mubr.msk.bf16.mxu0 %vm1147_vm1, %v1138_v27 }
  0x8e   : > { %6337 = vmatprep.mubr.msk.bf16.mxu1 %vm1367_vm2, %v1120_v28 }
  0x94   : > { %6304 = vmatmul.mubr.msk.bf16.gmra.mxu0 %vm1147_vm1, %v1139_v33 }
  0x95   : > { %6338 = vmatmul.mubr.msk.bf16.gmra.mxu1 %vm1367_vm2, %v1121_v34 }
 0x11c   : > { %v6277_v35 = vpop.f32.mrf.mxu0 }
 0x11d   : > { %v6311_v36 = vpop.f32.mrf.mxu1 }
 0x11e   : > { %v1459_v38 = vadd.f32 %v6311_v36, %v6277_v35  ;;  %v1234_v39 = vpop.f32.mrf.mxu0 }
 0x11f   : > { %v1450_v40 = vpop.f32.mrf.mxu1 }
 0x120   : > { %v7512_v41 = vadd.f32 %v7509_v37, %v1459_v38  ;;  %v1451_v42 = vadd.f32 %v1450_v40, %v1234_v39  ;;  %v6278_v43 = vpop.f32.mrf.mxu0 }
 0x121   : > { %v6312_v44 = vpop.f32.mrf.mxu1 }
 0x122   : > { %11339 = vst [vmem:[#allocation4_spill] sm:$0xff] %v7512_v41  ;;  %v7515_v45 = vadd.f32 %v7509_v37, %v1451_v42  ;;  %v1462_v46 = vadd.f32 %v6312_v44, %v6278_v43  ;;  %v1237_v47 = vpop.f32.mrf.mxu0  ;;  %v1625_v48 = vsel %vm1618_vm3, %v7512_v41, 0.0 }
 0x123   : > { %1626 = vadd.xlane.f32.xlu1 %v1625_v48  ;;  %v1453_v49 = vpop.f32.mrf.mxu1 }
 0x124   : > { %11340 = vst [vmem:[#allocation5_spill] sm:$0xff] %v7515_v45  ;;  %v7520_v50 = vadd.f32 %v7509_v37, %v1462_v46  ;;  %v1454_v51 = vadd.f32 %v1453_v49, %v1237_v47  ;;  %v6281_v52 = vpop.f32.mrf.mxu0  ;;  %v1619_v53 = vsel %vm1618_vm3, %v7515_v45, 0.0 }
 0x125   : > { %v6315_v54 = vpop.f32.mrf.mxu1  ;;  %1620 = vadd.xlane.f32.xlu0 %v1619_v53 }
 0x126   : > { %11341 = vst [vmem:[#allocation6_spill] sm:$0xff] %v7520_v50  ;;  %v7525_v55 = vadd.f32 %v7509_v37, %v1454_v51  ;;  %v1250_v56 = vpop.f32.mrf.mxu0  ;;  %v1628_v57 = vsel %vm1618_vm3, %v7520_v50, 0.0  ;;  %v1475_v59 = vadd.f32 %v6315_v54, %v6281_v52 }
 0x127   : > { %1629 = vadd.xlane.f32.xlu1 %v1628_v57  ;;  %v1466_v58 = vpop.f32.mrf.mxu1 }
 0x128   : > { %11342 = vst [vmem:[#allocation7_spill] sm:$0xff] %v7525_v55  ;;  %v1467_v60 = vadd.f32 %v1466_v58, %v1250_v56  ;;  %v6282_v61 = vpop.f32.mrf.mxu0  ;;  %v1622_v62 = vsel %vm1618_vm3, %v7525_v55, 0.0  ;;  %v7535_v4 = vadd.f32 %v7509_v37, %v1475_v59 }
 0x129   : > { %v6316_v63 = vpop.f32.mrf.mxu1  ;;  %1623 = vadd.xlane.f32.xlu0 %v1622_v62 }
 0x12a   : > { %v7532_v0 = vadd.f32 %v7509_v37, %v1467_v60  ;;  %v1253_v1 = vpop.f32.mrf.mxu0  ;;  %v1478_v2 = vadd.f32 %v6316_v63, %v6282_v61  ;;  %11344 = vst [vmem:[#allocation9_spill] sm:$0xff] %v7535_v4  ;;  %v1637_v17 = vsel %vm1618_vm3, %v7535_v4, 0.0 }
 0x12b   : > { %v1469_v3 = vpop.f32.mrf.mxu1 }
 0x12c   : > { %11343 = vst [vmem:[#allocation8_spill] sm:$0xff] %v7532_v0  ;;  %v1470_v5 = vadd.f32 %v1469_v3, %v1253_v1  ;;  %v6285_v6 = vpop.f32.mrf.mxu0  ;;  %v1631_v7 = vsel %vm1618_vm3, %v7532_v0, 0.0  ;;  %v7543_v11 = vadd.f32 %v7509_v37, %v1478_v2 }
 0x12d   : > { %v6319_v8 = vpop.f32.mrf.mxu1  ;;  %1632 = vadd.xlane.f32.xlu0 %v1631_v7 }
 0x12e   : > { %v7540_v9 = vadd.f32 %v7509_v37, %v1470_v5  ;;  %v1266_v10 = vpop.f32.mrf.mxu0  ;;  %11346 = vst [vmem:[#allocation11_spill] sm:$0xff] %v7543_v11  ;;  %v1491_v13 = vadd.f32 %v6319_v8, %v6285_v6  ;;  %v1640_v22 = vsel %vm1618_vm3, %v7543_v11, 0.0 }
 0x12f   : > { %v1482_v12 = vpop.f32.mrf.mxu1 }
 0x130   : > { %11345 = vst [vmem:[#allocation10_spill] sm:$0xff] %v7540_v9  ;;  %v1483_v14 = vadd.f32 %v1482_v12, %v1266_v10  ;;  %v6286_v15 = vpop.f32.mrf.mxu0  ;;  %v1634_v16 = vsel %vm1618_vm3, %v7540_v9, 0.0  ;;  %v7555_v23 = vadd.f32 %v7509_v37, %v1491_v13 }
 0x131   : > { %v6320_v18 = vpop.f32.mrf.mxu1  ;;  %1635 = vadd.xlane.f32.xlu1 %v1634_v16  ;;  %1638 = vadd.xlane.f32.xlu0 %v1637_v17 }
 0x132   : > { %v7550_v19 = vadd.f32 %v7509_v37, %v1483_v14  ;;  %v1269_v20 = vpop.f32.mrf.mxu0  ;;  %11348 = vst [vmem:[#allocation13_spill] sm:$0xff] %v7555_v23  ;;  %v1494_v24 = vadd.f32 %v6320_v18, %v6286_v15  ;;  %v1649_v38 = vsel %vm1618_vm3, %v7555_v23, 0.0 }
 0x133   : > { %v1485_v21 = vpop.f32.mrf.mxu1 }
 0x134   : > { %11347 = vst [vmem:[#allocation12_spill] sm:$0xff] %v7550_v19  ;;  %v1486_v25 = vadd.f32 %v1485_v21, %v1269_v20  ;;  %v6289_v26 = vpop.f32.mrf.mxu0  ;;  %v1643_v27 = vsel %vm1618_vm3, %v7550_v19, 0.0  ;;  %v7563_v33 = vadd.f32 %v7509_v37, %v1494_v24 }
 0x135   : > { %v6323_v28 = vpop.f32.mrf.mxu1  ;;  %1641 = vadd.xlane.f32.xlu1 %v1640_v22  ;;  %1644 = vadd.xlane.f32.xlu0 %v1643_v27 }
 0x136   : > { %v7560_v29 = vadd.f32 %v7509_v37, %v1486_v25  ;;  %v1507_v30 = vadd.f32 %v6323_v28, %v6289_v26  ;;  %v1282_v31 = vpop.f32.mrf.mxu0  ;;  %11350 = vst [vmem:[#allocation15_spill] sm:$0xff] %v7563_v33  ;;  %v1652_v49 = vsel %vm1618_vm3, %v7563_v33, 0.0 }
 0x137   : > { %v1498_v32 = vpop.f32.mrf.mxu1 }
 0x138   : > { %11349 = vst [vmem:[#allocation14_spill] sm:$0xff] %v7560_v29  ;;  %v1499_v34 = vadd.f32 %v1498_v32, %v1282_v31  ;;  %v6290_v35 = vpop.f32.mrf.mxu0  ;;  %v1646_v36 = vsel %vm1618_vm3, %v7560_v29, 0.0  ;;  %v7570_v40 = vadd.f32 %v7509_v37, %v1507_v30 }
 0x139   : > { %v6324_v39 = vpop.f32.mrf.mxu1  ;;  %1647 = vadd.xlane.f32.xlu1 %v1646_v36  ;;  %1650 = vadd.xlane.f32.xlu0 %v1649_v38 }
 0x13a   : > { %11351 = vst [vmem:[#allocation16_spill] sm:$0xff] %v7570_v40  ;;  %v7573_v42 = vadd.f32 %v7509_v37, %v1499_v34  ;;  %v1510_v43 = vadd.f32 %v6324_v39, %v6290_v35  ;;  %v1285_v44 = vpop.f32.mrf.mxu0  ;;  %v1661_v58 = vsel %vm1618_vm3, %v7570_v40, 0.0 }
 0x13b   : > { %v1501_v46 = vpop.f32.mrf.mxu1 }
 0x13c   : > { %11352 = vst [vmem:[#allocation17_spill] sm:$0xff] %v7573_v42  ;;  %v1502_v47 = vadd.f32 %v1501_v46, %v1285_v44  ;;  %v6293_v48 = vpop.f32.mrf.mxu0  ;;  %v1655_v51 = vsel %vm1618_vm3, %v7573_v42, 0.0  ;;  %v7580_v53 = vadd.f32 %v7509_v37, %v1510_v43 }
 0x13d   : > { %v6327_v52 = vpop.f32.mrf.mxu1  ;;  %1653 = vadd.xlane.f32.xlu1 %v1652_v49  ;;  %1656 = vadd.xlane.f32.xlu0 %v1655_v51 }
 0x13e   : > { %11353 = vst [vmem:[#allocation18_spill] sm:$0xff] %v7580_v53  ;;  %v7583_v54 = vadd.f32 %v7509_v37, %v1502_v47  ;;  %v1523_v56 = vadd.f32 %v6327_v52, %v6293_v48  ;;  %v1298_v57 = vpop.f32.mrf.mxu0  ;;  %v1664_v6 = vsel %vm1618_vm3, %v7580_v53, 0.0 }
 0x13f   : > { %v1514_v59 = vpop.f32.mrf.mxu1 }
 0x140   : > { %11354 = vst [vmem:[#allocation19_spill] sm:$0xff] %v7583_v54  ;;  %v1515_v60 = vadd.f32 %v1514_v59, %v1298_v57  ;;  %v6294_v61 = vpop.f32.mrf.mxu0  ;;  %v1658_v62 = vsel %vm1618_vm3, %v7583_v54, 0.0  ;;  %v7590_v1 = vadd.f32 %v7509_v37, %v1523_v56 }
 0x141   : > { %v6328_v63 = vpop.f32.mrf.mxu1  ;;  %1659 = vadd.xlane.f32.xlu1 %v1658_v62  ;;  %1662 = vadd.xlane.f32.xlu0 %v1661_v58 }
 0x142   : > { %11355 = vst [vmem:[#allocation20_spill] sm:$0xff] %v7590_v1  ;;  %v7593_v2 = vadd.f32 %v7509_v37, %v1515_v60  ;;  %v1526_v3 = vadd.f32 %v6328_v63, %v6294_v61  ;;  %v1301_v5 = vpop.f32.mrf.mxu0  ;;  %v1673_v18 = vsel %vm1618_vm3, %v7590_v1, 0.0 }
 0x143   : > { %v1517_v7 = vpop.f32.mrf.mxu1 }
 0x144   : > { %11356 = vst [vmem:[#allocation21_spill] sm:$0xff] %v7593_v2  ;;  %v1518_v8 = vadd.f32 %v1517_v7, %v1301_v5  ;;  %v6297_v10 = vpop.f32.mrf.mxu0  ;;  %v1667_v12 = vsel %vm1618_vm3, %v7593_v2, 0.0  ;;  %v7600_v14 = vadd.f32 %v7509_v37, %v1526_v3 }
 0x145   : > { %v6331_v13 = vpop.f32.mrf.mxu1  ;;  %1665 = vadd.xlane.f32.xlu1 %v1664_v6  ;;  %1668 = vadd.xlane.f32.xlu0 %v1667_v12 }
 0x146   : > { %11357 = vst [vmem:[#allocation22_spill] sm:$0xff] %v7600_v14  ;;  %v7603_v15 = vadd.f32 %v7509_v37, %v1518_v8  ;;  %v1539_v16 = vadd.f32 %v6331_v13, %v6297_v10  ;;  %v1314_v17 = vpop.f32.mrf.mxu0  ;;  %v1676_v31 = vsel %vm1618_vm3, %v7600_v14, 0.0 }
 0x147   : > { %v1530_v20 = vpop.f32.mrf.mxu1 }
 0x148   : > { %11358 = vst [vmem:[#allocation23_spill] sm:$0xff] %v7603_v15  ;;  %v1531_v21 = vadd.f32 %v1530_v20, %v1314_v17  ;;  %v6298_v22 = vpop.f32.mrf.mxu0  ;;  %v1670_v24 = vsel %vm1618_vm3, %v7603_v15, 0.0  ;;  %v7610_v26 = vadd.f32 %v7509_v37, %v1539_v16 }
 0x149   : > { %v6332_v25 = vpop.f32.mrf.mxu1  ;;  %1671 = vadd.xlane.f32.xlu1 %v1670_v24  ;;  %1674 = vadd.xlane.f32.xlu0 %v1673_v18 }
 0x14a   : > { %11359 = vst [vmem:[#allocation24_spill] sm:$0xff] %v7610_v26  ;;  %v7613_v27 = vadd.f32 %v7509_v37, %v1531_v21  ;;  %v1542_v28 = vadd.f32 %v6332_v25, %v6298_v22  ;;  %v1317_v30 = vpop.f32.mrf.mxu0  ;;  %v1685_v47 = vsel %vm1618_vm3, %v7610_v26, 0.0 }
 0x14b   : > { %v1533_v32 = vpop.f32.mrf.mxu1 }
 0x14c   : > { %11360 = vst [vmem:[#allocation25_spill] sm:$0xff] %v7613_v27  ;;  %v1534_v34 = vadd.f32 %v1533_v32, %v1317_v30  ;;  %v6301_v35 = vpop.f32.mrf.mxu0  ;;  %v1679_v36 = vsel %vm1618_vm3, %v7613_v27, 0.0  ;;  %v7620_v39 = vadd.f32 %v7509_v37, %v1542_v28 }
 0x14d   : > { %v6335_v38 = vpop.f32.mrf.mxu1  ;;  %1677 = vadd.xlane.f32.xlu1 %v1676_v31  ;;  %1680 = vadd.xlane.f32.xlu0 %v1679_v36 }
 0x14e   : > { %11361 = vst [vmem:[#allocation26_spill] sm:$0xff] %v7620_v39  ;;  %v7623_v43 = vadd.f32 %v7509_v37, %v1534_v34  ;;  %v1555_v44 = vadd.f32 %v6335_v38, %v6301_v35  ;;  %v1330_v46 = vpop.f32.mrf.mxu0  ;;  %v1688_v61 = vsel %vm1618_vm3, %v7620_v39, 0.0 }
 0x14f   : > { %v1546_v48 = vpop.f32.mrf.mxu1 }
 0x150   : > { %11362 = vst [vmem:[#allocation27_spill] sm:$0xff] %v7623_v43  ;;  %v1547_v49 = vadd.f32 %v1546_v48, %v1330_v46  ;;  %v6302_v51 = vpop.f32.mrf.mxu0  ;;  %v1682_v52 = vsel %vm1618_vm3, %v7623_v43, 0.0  ;;  %v7630_v57 = vadd.f32 %v7509_v37, %v1555_v44 }
 0x151   : > { %v6336_v56 = vpop.f32.mrf.mxu1  ;;  %1683 = vadd.xlane.f32.xlu1 %v1682_v52  ;;  %1686 = vadd.xlane.f32.xlu0 %v1685_v47  ;;  %v6610_v47 = vld [vmem:[%s11054_s7 + $0x8] sm:$0xff]  }
 0x152   : > { %11363 = vst [vmem:[#allocation28_spill] sm:$0xff] %v7630_v57  ;;  %v7633_v58 = vadd.f32 %v7509_v37, %v1547_v49  ;;  %v1558_v59 = vadd.f32 %v6336_v56, %v6302_v51  ;;  %v1333_v60 = vpop.f32.mrf.mxu0  ;;  %v1697_v13 = vsel %vm1618_vm3, %v7630_v57, 0.0  ;;  %6341 = vmatprep.subr.bf16.mxu0 %v6610_v47 }
 0x153   : > { %v1549_v62 = vpop.f32.mrf.mxu1  ;;  %6342 = vmatpush3.bf16.msra.mxu0 %v6610_v47 }
 0x154   : > { %11364 = vst [vmem:[#allocation29_spill] sm:$0xff] %v7633_v58  ;;  %v1550_v63 = vadd.f32 %v1549_v62, %v1333_v60  ;;  %v6305_v3 = vpop.f32.mrf.mxu0  ;;  %v1691_v5 = vsel %vm1618_vm3, %v7633_v58, 0.0  ;;  %v7640_v7 = vadd.f32 %v7509_v37, %v1558_v59 }
 0x155   : > { %v6339_v6 = vpop.f32.mrf.mxu1  ;;  %1689 = vadd.xlane.f32.xlu1 %v1688_v61  ;;  %1692 = vadd.xlane.f32.xlu0 %v1691_v5 }
 0x156   : > { %11365 = vst [vmem:[#allocation30_spill] sm:$0xff] %v7640_v7  ;;  %v7643_v8 = vadd.f32 %v7509_v37, %v1550_v63  ;;  %v1571_v10 = vadd.f32 %v6339_v6, %v6305_v3  ;;  %v1346_v12 = vpop.f32.mrf.mxu0  ;;  %v1700_v30 = vsel %vm1618_vm3, %v7640_v7, 0.0 }
 0x157   : > { %v1562_v16 = vpop.f32.mrf.mxu1 }
 0x158   : > { %11366 = vst [vmem:[#allocation31_spill] sm:$0xff] %v7643_v8  ;;  %v1563_v17 = vadd.f32 %v1562_v16, %v1346_v12  ;;  %v6306_v18 = vpop.f32.mrf.mxu0  ;;  %v1694_v20 = vsel %vm1618_vm3, %v7643_v8, 0.0  ;;  %v7650_v22 = vadd.f32 %v7509_v37, %v1571_v10 }
 0x159   : > { %v6340_v21 = vpop.f32.mrf.mxu1  ;;  %1695 = vadd.xlane.f32.xlu1 %v1694_v20  ;;  %1698 = vadd.xlane.f32.xlu0 %v1697_v13 }
 0x15a   : > { %11367 = vst [vmem:[#allocation32_spill] sm:$0xff] %v7650_v22  ;;  %v7653_v24 = vadd.f32 %v7509_v37, %v1563_v17  ;;  %v1574_v25 = vadd.f32 %v6340_v21, %v6306_v18  ;;  %v1349_v28 = vpop.f32.mrf.mxu0  ;;  %v1709_v38 = vsel %vm1618_vm3, %v7650_v22, 0.0 }
 0x15b   : > { %v1565_v31 = vpop.f32.mrf.mxu1 }
 0x15c   : > { %11368 = vst [vmem:[#allocation33_spill] sm:$0xff] %v7653_v24  ;;  %v1566_v32 = vadd.f32 %v1565_v31, %v1349_v28  ;;  %v1703_v34 = vsel %vm1618_vm3, %v7653_v24, 0.0  ;;  %v7660_v35 = vadd.f32 %v7509_v37, %v1574_v25 }
 0x15d   : > { %1701 = vadd.xlane.f32.xlu1 %v1700_v30  ;;  %1704 = vadd.xlane.f32.xlu0 %v1703_v34 }
 0x15e   : > { %11369 = vst [vmem:[#allocation34_spill] sm:$0xff] %v7660_v35  ;;  %v7663_v36 = vadd.f32 %v7509_v37, %v1566_v32  ;;  %v1712_v46 = vsel %vm1618_vm3, %v7660_v35, 0.0  ;;  %v6611_v37 = vld [vmem:[%s11055_s8 + $0x8] sm:$0xff]  }
 0x15f   : > { %6377 = vmatprep.subr.bf16.mxu1 %v6611_v37 }
 0x160   : > { %11370 = vst [vmem:[#allocation35_spill] sm:$0xff] %v7663_v36  ;;  %v1706_v44 = vsel %vm1618_vm3, %v7663_v36, 0.0  ;;  %6378 = vmatpush3.bf16.msra.mxu1 %v6611_v37 }
 0x161   : > { %1707 = vadd.xlane.f32.xlu1 %v1706_v44  ;;  %1710 = vadd.xlane.f32.xlu0 %v1709_v38 }
 0x165   : > { %1713 = vadd.xlane.f32.xlu1 %v1712_v46 }
 0x1ac   : > { %v1627_v48 = vpop.xlane.xlu1 %1626 }
 0x1ad   : > { %v1718_v49 = vmul.f32 0.03125, %v1627_v48 }
 0x1ae   : > { %v1621_v51 = vpop.xlane.xlu0 %1620 }
 0x1af   : > { %v1716_v52 = vmul.f32 0.03125, %v1621_v51  ;;  %v7678_v59 = vsub.f32 %v7512_v41, %v1718_v49 }
 0x1b0   : > { %v1630_v56 = vpop.xlane.xlu1 %1629 }
 0x1b1   : > { %v7681_v60 = vsub.f32 %v7515_v45, %v1716_v52  ;;  %v1719_v61 = vmul.f32 0.03125, %v1630_v56  ;;  %v1782_v12 = vmul.f32 %v7678_v59, %v7678_v59 }
 0x1b2   : > { %v1624_v62 = vpop.xlane.xlu0 %1623 }
 0x1b3   : > { %v1717_v63 = vmul.f32 0.03125, %v1624_v62  ;;  %v1780_v3 = vmul.f32 %v7681_v60, %v7681_v60  ;;  %v7686_v5 = vsub.f32 %v7520_v50, %v1719_v61  ;;  %v1818_v20 = vsel %vm1618_vm3, %v1782_v12, 0.0 }
 0x1b5   : > { %v7689_v6 = vsub.f32 %v7525_v55, %v1717_v63  ;;  %v1812_v10 = vsel %vm1618_vm3, %v1780_v3, 0.0  ;;  %v1783_v25 = vmul.f32 %v7686_v5, %v7686_v5 }
 0x1b6   : > { %1813 = vadd.xlane.f32.xlu0 %v1812_v10  ;;  %v1633_v13 = vpop.xlane.xlu0 %1632 }
 0x1b7   : > { %v1720_v16 = vmul.f32 0.03125, %v1633_v13  ;;  %v1781_v17 = vmul.f32 %v7689_v6, %v7689_v6  ;;  %v1821_v46 = vsel %vm1618_vm3, %v1783_v25, 0.0  ;;  %v6613_v25 = vld [vmem:[%s11055_s8] sm:$0xff]  }
 0x1b8   : > { %6379 = vmatprep.subr.bf16.mxu1 %v6613_v25 }
 0x1b9   : > { %v7697_v18 = vsub.f32 %v7532_v0, %v1720_v16  ;;  %v1815_v21 = vsel %vm1618_vm3, %v1781_v17, 0.0  ;;  %6380 = vmatpush3.bf16.msra.mxu1 %v6613_v25 }
 0x1ba   : > { %v1636_v28 = vpop.xlane.xlu1 %1635  ;;  %1819 = vadd.xlane.f32.xlu0 %v1818_v20  ;;  %1816 = vadd.xlane.f32.xlu1 %v1815_v21  ;;  %v1639_v30 = vpop.xlane.xlu0 %1638  ;;  %v6612_v21 = vld [vmem:[%s11054_s7] sm:$0xff]  }
 0x1bb   : > { %v1721_v31 = vmul.f32 0.03125, %v1636_v28  ;;  %v1722_v32 = vmul.f32 0.03125, %v1639_v30  ;;  %v1784_v34 = vmul.f32 %v7697_v18, %v7697_v18  ;;  %6343 = vmatprep.subr.bf16.mxu0 %v6612_v21 }
 0x1bc   : > { %6344 = vmatpush3.bf16.msra.mxu0 %v6612_v21 }
 0x1bd   : > { %v7706_v38 = vsub.f32 %v7540_v9, %v1721_v31  ;;  %v7709_v44 = vsub.f32 %v7535_v4, %v1722_v32  ;;  %v1824_v47 = vsel %vm1618_vm3, %v1784_v34, 0.0 }
 0x1be   : > { %v1642_v37 = vpop.xlane.xlu1 %1641  ;;  %1822 = vadd.xlane.f32.xlu1 %v1821_v46  ;;  %1825 = vadd.xlane.f32.xlu0 %v1824_v47  ;;  %v1645_v48 = vpop.xlane.xlu0 %1644 }
 0x1bf   : > { %v1723_v49 = vmul.f32 0.03125, %v1642_v37  ;;  %v1724_v51 = vmul.f32 0.03125, %v1645_v48  ;;  %v1785_v52 = vmul.f32 %v7706_v38, %v7706_v38  ;;  %v1786_v56 = vmul.f32 %v7709_v44, %v7709_v44 }
 0x1c1   : > { %v7718_v61 = vsub.f32 %v7543_v11, %v1723_v49  ;;  %v7721_v62 = vsub.f32 %v7550_v19, %v1724_v51  ;;  %v1827_v63 = vsel %vm1618_vm3, %v1785_v52, 0.0  ;;  %v1830_v3 = vsel %vm1618_vm3, %v1786_v56, 0.0 }
 0x1c2   : > { %v1648_v10 = vpop.xlane.xlu1 %1647  ;;  %1828 = vadd.xlane.f32.xlu1 %v1827_v63  ;;  %1831 = vadd.xlane.f32.xlu0 %v1830_v3  ;;  %v1651_v12 = vpop.xlane.xlu0 %1650 }
 0x1c3   : > { %v1725_v13 = vmul.f32 0.03125, %v1648_v10  ;;  %v1726_v16 = vmul.f32 0.03125, %v1651_v12  ;;  %v1787_v17 = vmul.f32 %v7718_v61, %v7718_v61  ;;  %v1788_v20 = vmul.f32 %v7721_v62, %v7721_v62 }
 0x1c5   : > { %v7736_v28 = vsub.f32 %v7560_v29, %v1725_v13  ;;  %v7739_v30 = vsub.f32 %v7555_v23, %v1726_v16  ;;  %v1833_v31 = vsel %vm1618_vm3, %v1787_v17, 0.0  ;;  %v1836_v32 = vsel %vm1618_vm3, %v1788_v20, 0.0 }
 0x1c6   : > { %v1654_v34 = vpop.xlane.xlu1 %1653  ;;  %1834 = vadd.xlane.f32.xlu1 %v1833_v31  ;;  %1837 = vadd.xlane.f32.xlu0 %v1836_v32  ;;  %v1657_v46 = vpop.xlane.xlu0 %1656 }
 0x1c7   : > { %v1727_v47 = vmul.f32 0.03125, %v1654_v34  ;;  %v1728_v37 = vmul.f32 0.03125, %v1657_v46  ;;  %v1789_v48 = vmul.f32 %v7736_v28, %v7736_v28  ;;  %v1790_v49 = vmul.f32 %v7739_v30, %v7739_v30 }
 0x1c9   : > { %v7748_v51 = vsub.f32 %v7563_v33, %v1727_v47  ;;  %v7751_v52 = vsub.f32 %v7573_v42, %v1728_v37  ;;  %v1839_v56 = vsel %vm1618_vm3, %v1789_v48, 0.0  ;;  %v1842_v63 = vsel %vm1618_vm3, %v1790_v49, 0.0 }
 0x1ca   : > { %v1660_v3 = vpop.xlane.xlu1 %1659  ;;  %1840 = vadd.xlane.f32.xlu1 %v1839_v56  ;;  %1843 = vadd.xlane.f32.xlu0 %v1842_v63  ;;  %v1663_v10 = vpop.xlane.xlu0 %1662 }
 0x1cb   : > { %v1729_v12 = vmul.f32 0.03125, %v1660_v3  ;;  %v1730_v13 = vmul.f32 0.03125, %v1663_v10  ;;  %v1791_v16 = vmul.f32 %v7748_v51, %v7748_v51  ;;  %v1792_v17 = vmul.f32 %v7751_v52, %v7751_v52 }
 0x1cd   : > { %v7760_v20 = vsub.f32 %v7583_v54, %v1729_v12  ;;  %v7763_v21 = vsub.f32 %v7570_v40, %v1730_v13  ;;  %v1845_v25 = vsel %vm1618_vm3, %v1791_v16, 0.0  ;;  %v1848_v31 = vsel %vm1618_vm3, %v1792_v17, 0.0 }
 0x1ce   : > { %v1666_v32 = vpop.xlane.xlu1 %1665  ;;  %1846 = vadd.xlane.f32.xlu1 %v1845_v25  ;;  %1849 = vadd.xlane.f32.xlu0 %v1848_v31  ;;  %v1669_v34 = vpop.xlane.xlu0 %1668 }
 0x1cf   : > { %v1731_v46 = vmul.f32 0.03125, %v1666_v32  ;;  %v1732_v47 = vmul.f32 0.03125, %v1669_v34  ;;  %v1793_v37 = vmul.f32 %v7760_v20, %v7760_v20  ;;  %v1794_v48 = vmul.f32 %v7763_v21, %v7763_v21 }
 0x1d1   : > { %v7772_v49 = vsub.f32 %v7580_v53, %v1731_v46  ;;  %v7775_v56 = vsub.f32 %v7593_v2, %v1732_v47  ;;  %v1851_v63 = vsel %vm1618_vm3, %v1793_v37, 0.0  ;;  %v1854_v3 = vsel %vm1618_vm3, %v1794_v48, 0.0 }
 0x1d2   : > { %v1672_v10 = vpop.xlane.xlu1 %1671  ;;  %1852 = vadd.xlane.f32.xlu1 %v1851_v63  ;;  %1855 = vadd.xlane.f32.xlu0 %v1854_v3  ;;  %v1675_v12 = vpop.xlane.xlu0 %1674 }
 0x1d3   : > { %v1733_v13 = vmul.f32 0.03125, %v1672_v10  ;;  %v1734_v16 = vmul.f32 0.03125, %v1675_v12  ;;  %v1795_v17 = vmul.f32 %v7772_v49, %v7772_v49  ;;  %v1796_v25 = vmul.f32 %v7775_v56, %v7775_v56 }
 0x1d5   : > { %v7784_v31 = vsub.f32 %v7603_v15, %v1733_v13  ;;  %v7787_v32 = vsub.f32 %v7590_v1, %v1734_v16  ;;  %v1857_v34 = vsel %vm1618_vm3, %v1795_v17, 0.0  ;;  %v1860_v46 = vsel %vm1618_vm3, %v1796_v25, 0.0 }
 0x1d6   : > { %v1678_v47 = vpop.xlane.xlu1 %1677  ;;  %1858 = vadd.xlane.f32.xlu1 %v1857_v34  ;;  %1861 = vadd.xlane.f32.xlu0 %v1860_v46  ;;  %v1681_v37 = vpop.xlane.xlu0 %1680 }
 0x1d7   : > { %v1735_v48 = vmul.f32 0.03125, %v1678_v47  ;;  %v1736_v63 = vmul.f32 0.03125, %v1681_v37  ;;  %v1797_v3 = vmul.f32 %v7784_v31, %v7784_v31  ;;  %v1798_v10 = vmul.f32 %v7787_v32, %v7787_v32 }
 0x1d9   : > { %v7796_v12 = vsub.f32 %v7600_v14, %v1735_v48  ;;  %v7799_v13 = vsub.f32 %v7613_v27, %v1736_v63  ;;  %v1863_v16 = vsel %vm1618_vm3, %v1797_v3, 0.0  ;;  %v1866_v17 = vsel %vm1618_vm3, %v1798_v10, 0.0 }
 0x1da   : > { %v1684_v25 = vpop.xlane.xlu1 %1683  ;;  %1864 = vadd.xlane.f32.xlu1 %v1863_v16  ;;  %1867 = vadd.xlane.f32.xlu0 %v1866_v17  ;;  %v1687_v34 = vpop.xlane.xlu0 %1686 }
 0x1db   : > { %v1737_v46 = vmul.f32 0.03125, %v1684_v25  ;;  %v1738_v47 = vmul.f32 0.03125, %v1687_v34  ;;  %v1799_v37 = vmul.f32 %v7796_v12, %v7796_v12  ;;  %v1800_v48 = vmul.f32 %v7799_v13, %v7799_v13 }
 0x1dd   : > { %v7808_v14 = vsub.f32 %v7623_v43, %v1737_v46  ;;  %v7811_v63 = vsub.f32 %v7610_v26, %v1738_v47  ;;  %v1869_v3 = vsel %vm1618_vm3, %v1799_v37, 0.0  ;;  %v1872_v10 = vsel %vm1618_vm3, %v1800_v48, 0.0 }
 0x1de   : > { %v1690_v16 = vpop.xlane.xlu1 %1689  ;;  %1870 = vadd.xlane.f32.xlu1 %v1869_v3  ;;  %1873 = vadd.xlane.f32.xlu0 %v1872_v10  ;;  %v1693_v17 = vpop.xlane.xlu0 %1692 }
 0x1df   : > { %v1739_v25 = vmul.f32 0.03125, %v1690_v16  ;;  %v1740_v34 = vmul.f32 0.03125, %v1693_v17  ;;  %v1801_v27 = vmul.f32 %v7808_v14, %v7808_v14  ;;  %v1802_v46 = vmul.f32 %v7811_v63, %v7811_v63 }
 0x1e1   : > { %v7820_v43 = vsub.f32 %v7620_v39, %v1739_v25  ;;  %v7823_v47 = vsub.f32 %v7633_v58, %v1740_v34  ;;  %v1875_v37 = vsel %vm1618_vm3, %v1801_v27, 0.0  ;;  %v1878_v48 = vsel %vm1618_vm3, %v1802_v46, 0.0 }
 0x1e2   : > { %v1696_v3 = vpop.xlane.xlu1 %1695  ;;  %1876 = vadd.xlane.f32.xlu1 %v1875_v37  ;;  %1879 = vadd.xlane.f32.xlu0 %v1878_v48  ;;  %v1699_v10 = vpop.xlane.xlu0 %1698 }
 0x1e3   : > { %v1741_v16 = vmul.f32 0.03125, %v1696_v3  ;;  %v1742_v17 = vmul.f32 0.03125, %v1699_v10  ;;  %v1803_v26 = vmul.f32 %v7820_v43, %v7820_v43  ;;  %v1804_v25 = vmul.f32 %v7823_v47, %v7823_v47 }
 0x1e5   : > { %v7832_v39 = vsub.f32 %v7643_v8, %v1741_v16  ;;  %v7835_v34 = vsub.f32 %v7630_v57, %v1742_v17  ;;  %v1881_v27 = vsel %vm1618_vm3, %v1803_v26, 0.0  ;;  %v1884_v46 = vsel %vm1618_vm3, %v1804_v25, 0.0 }
 0x1e6   : > { %v1702_v37 = vpop.xlane.xlu1 %1701  ;;  %1882 = vadd.xlane.f32.xlu1 %v1881_v27  ;;  %1885 = vadd.xlane.f32.xlu0 %v1884_v46  ;;  %v1705_v48 = vpop.xlane.xlu0 %1704 }
 0x1e7   : > { %v1743_v3 = vmul.f32 0.03125, %v1702_v37  ;;  %v1744_v10 = vmul.f32 0.03125, %v1705_v48  ;;  %v1805_v58 = vmul.f32 %v7832_v39, %v7832_v39  ;;  %v1806_v16 = vmul.f32 %v7835_v34, %v7835_v34 }
 0x1e9   : > { %v7844_v8 = vsub.f32 %v7640_v7, %v1743_v3  ;;  %v7847_v17 = vsub.f32 %v7653_v24, %v1744_v10  ;;  %v1887_v26 = vsel %vm1618_vm3, %v1805_v58, 0.0  ;;  %v1890_v25 = vsel %vm1618_vm3, %v1806_v16, 0.0 }
 0x1ea   : > { %v1708_v27 = vpop.xlane.xlu1 %1707  ;;  %1888 = vadd.xlane.f32.xlu1 %v1887_v26  ;;  %1891 = vadd.xlane.f32.xlu0 %v1890_v25  ;;  %v1711_v46 = vpop.xlane.xlu0 %1710 }
 0x1eb   : > { %v1745_v37 = vmul.f32 0.03125, %v1708_v27  ;;  %v1746_v48 = vmul.f32 0.03125, %v1711_v46  ;;  %v1807_v57 = vmul.f32 %v7844_v8, %v7844_v8  ;;  %v1808_v3 = vmul.f32 %v7847_v17, %v7847_v17 }
 0x1ed   : > { %v7856_v7 = vsub.f32 %v7663_v36, %v1745_v37  ;;  %v7859_v10 = vsub.f32 %v7650_v22, %v1746_v48  ;;  %v1893_v58 = vsel %vm1618_vm3, %v1807_v57, 0.0  ;;  %v1896_v16 = vsel %vm1618_vm3, %v1808_v3, 0.0 }
 0x1ee   : > { %v1714_v26 = vpop.xlane.xlu1 %1713  ;;  %1894 = vadd.xlane.f32.xlu1 %v1893_v58  ;;  %1897 = vadd.xlane.f32.xlu0 %v1896_v16  ;;  %v7878_v58 = vld [vmem:[%s11056_s9 + $0x8] sm:$0xff]  }
 0x1ef   : > { %v1747_v25 = vmul.f32 0.03125, %v1714_v26  ;;  %v1809_v27 = vmul.f32 %v7856_v7, %v7856_v7  ;;  %v1810_v46 = vmul.f32 %v7859_v10, %v7859_v10  ;;  %6413 = vmatprep.subr.bf16.mxu0 %v7878_v58 }
 0x1f1   : > { %v7868_v37 = vsub.f32 %v7660_v35, %v1747_v25  ;;  %v1899_v48 = vsel %vm1618_vm3, %v1809_v27, 0.0  ;;  %v1902_v36 = vsel %vm1618_vm3, %v1810_v46, 0.0 }
 0x1f2   : > { %1900 = vadd.xlane.f32.xlu1 %v1899_v48  ;;  %1903 = vadd.xlane.f32.xlu0 %v1902_v36 }
 0x1f3   : > { %v1811_v57 = vmul.f32 %v7868_v37, %v7868_v37 }
 0x1f5   : > { %v1905_v3 = vsel %vm1618_vm3, %v1811_v57, 0.0 }
 0x1f6   : > { %1906 = vadd.xlane.f32.xlu1 %v1905_v3 }
 0x23f   : > { %v1814_v16 = vpop.xlane.xlu0 %1813 }
 0x240   : > { %v1908_v26 = vmul.f32 0.03125, %v1814_v16 }
 0x242   : > { %v1940_v25 = vadd.f32 1e-05, %v1908_v26 }
 0x243   : > { %v1817_v27 = vpop.xlane.xlu1 %1816  ;;  %v1820_v46 = vpop.xlane.xlu0 %1819 }
 0x244   : > { %6627 = vrsqrt.f32 %v1940_v25  ;;  %v1909_v36 = vmul.f32 0.03125, %v1817_v27  ;;  %v1910_v48 = vmul.f32 0.03125, %v1820_v46 }
 0x246   : > { %v1941_v35 = vadd.f32 1e-05, %v1909_v36  ;;  %v1942_v22 = vadd.f32 1e-05, %v1910_v48 }
 0x247   : > { %v1823_v24 = vpop.xlane.xlu1 %1822  ;;  %v1826_v57 = vpop.xlane.xlu0 %1825 }
 0x248   : > { %6629 = vrsqrt.f32 %v1941_v35  ;;  %v1911_v3 = vmul.f32 0.03125, %v1823_v24  ;;  %v1912_v15 = vmul.f32 0.03125, %v1826_v57 }
 0x249   : > { %6631 = vrsqrt.f32 %v1942_v22 }
 0x24a   : > { %v1943_v1 = vadd.f32 1e-05, %v1911_v3  ;;  %v1944_v2 = vadd.f32 1e-05, %v1912_v15 }
 0x24b   : > { %v1829_v53 = vpop.xlane.xlu1 %1828  ;;  %v1832_v54 = vpop.xlane.xlu0 %1831 }
 0x24c   : > { %6633 = vrsqrt.f32 %v1943_v1  ;;  %v1913_v16 = vmul.f32 0.03125, %v1829_v53  ;;  %v1914_v26 = vmul.f32 0.03125, %v1832_v54  ;;  %v7885_v53 = vld [vmem:[%s11371_s6] ss:$0 sm:$0xff] }
 0x24d   : > { %6635 = vrsqrt.f32 %v1944_v2 }
 0x24e   : > { %v1945_v40 = vadd.f32 1e-05, %v1913_v16  ;;  %v1946_v25 = vadd.f32 1e-05, %v1914_v26 }
 0x24f   : > { %v1835_v27 = vpop.xlane.xlu1 %1834  ;;  %v1838_v46 = vpop.xlane.xlu0 %1837 }
 0x250   : > { %6637 = vrsqrt.f32 %v1945_v40  ;;  %v1915_v36 = vmul.f32 0.03125, %v1835_v27  ;;  %v1916_v48 = vmul.f32 0.03125, %v1838_v46 }
 0x251   : > { %v6628_v42 = vpop.eup %6627  ;;  %6639 = vrsqrt.f32 %v1946_v25 }
 0x252   : > { %v1947_v24 = vadd.f32 1e-05, %v1915_v36  ;;  %v1948_v35 = vadd.f32 1e-05, %v1916_v48  ;;  %v2004_v15 = vmul.f32 %v6628_v42, %v7681_v60  ;;  %v7893_v48 = vld [vmem:[%s11372_s30] ss:$0 sm:$0xff] }
 0x253   : > { %v1841_v22 = vpop.xlane.xlu1 %1840  ;;  %v1844_v57 = vpop.xlane.xlu0 %1843 }
 0x254   : > { %6641 = vrsqrt.f32 %v1947_v24  ;;  %v1917_v54 = vmul.f32 0.03125, %v1841_v22  ;;  %v1918_v1 = vmul.f32 0.03125, %v1844_v57  ;;  %v2042_v42 = vmul.f32 %v7885_v53, %v2004_v15 }
 0x255   : > { %v6630_v2 = vpop.eup %6629  ;;  %6643 = vrsqrt.f32 %v1948_v35 }
 0x256   : > { %v6632_v40 = vpop.eup %6631  ;;  %v1949_v3 = vadd.f32 1e-05, %v1917_v54  ;;  %v1950_v16 = vadd.f32 1e-05, %v1918_v1  ;;  %v2005_v26 = vmul.f32 %v6630_v2, %v7689_v6 }
 0x257   : > { %v2006_v25 = vmul.f32 %v6632_v40, %v7678_v59  ;;  %v1847_v27 = vpop.xlane.xlu1 %1846  ;;  %v1850_v46 = vpop.xlane.xlu0 %1849  ;;  %v2080_v40 = vadd.f32 %v7893_v48, %v2042_v42 }
 0x258   : > { %6645 = vrsqrt.f32 %v1949_v3  ;;  %v1919_v60 = vmul.f32 0.03125, %v1847_v27  ;;  %v1920_v36 = vmul.f32 0.03125, %v1850_v46  ;;  %v2043_v24 = vmul.f32 %v7885_v53, %v2005_v26 }
 0x259   : > { %v6634_v35 = vpop.eup %6633  ;;  %v2044_v22 = vmul.f32 %v7885_v53, %v2006_v25  ;;  %6647 = vrsqrt.f32 %v1950_v16 }
 0x25a   : > { %v6636_v6 = vpop.eup %6635  ;;  %v2007_v59 = vmul.f32 %v6634_v35, %v7686_v5  ;;  %v1951_v57 = vadd.f32 1e-05, %v1919_v60  ;;  %v1952_v54 = vadd.f32 1e-05, %v1920_v36  ;;  %v2081_v15 = vadd.f32 %v7893_v48, %v2043_v24 }
 0x25b   : > { %v1853_v1 = vpop.xlane.xlu1 %1852  ;;  %v1856_v2 = vpop.xlane.xlu0 %1855  ;;  %v2008_v3 = vmul.f32 %v6636_v6, %v7697_v18  ;;  %v2082_v5 = vadd.f32 %v7893_v48, %v2044_v22 }
 0x25c   : > { %v2045_v27 = vmul.f32 %v7885_v53, %v2007_v59  ;;  %6649 = vrsqrt.f32 %v1951_v57  ;;  %v1921_v26 = vmul.f32 0.03125, %v1853_v1  ;;  %v1922_v46 = vmul.f32 0.03125, %v1856_v2 }
 0x25d   : > { %v6638_v25 = vpop.eup %6637  ;;  %6651 = vrsqrt.f32 %v1952_v54  ;;  %v7902_v16 = vpack.c.bf16 %v2081_v15, %v2080_v40  ;;  %v2046_v59 = vmul.f32 %v7885_v53, %v2008_v3 }
 0x25e   : > { %v6640_v60 = vpop.eup %6639  ;;  %v1953_v36 = vadd.f32 1e-05, %v1921_v26  ;;  %v1954_v24 = vadd.f32 1e-05, %v1922_v46  ;;  %v2083_v35 = vadd.f32 %v7893_v48, %v2045_v27  ;;  %v2009_v42 = vmul.f32 %v6638_v25, %v7706_v38  ;;  %v6615_v38 = vld [vmem:[%s11056_s9] sm:$0xff]  }
 0x25f   : > { %6345 = vmatprep.mubr.msk.bf16.mxu0 %vm1618_vm3, %v7902_v16  ;;  %6381 = vmatprep.mubr.msk.bf16.mxu1 %vm1618_vm3, %v7902_v16  ;;  %v1859_v18 = vpop.xlane.xlu1 %1858  ;;  %v1862_v6 = vpop.xlane.xlu0 %1861  ;;  %v2010_v57 = vmul.f32 %v6640_v60, %v7709_v44 }
 0x260   : > { %6653 = vrsqrt.f32 %v1953_v36  ;;  %v1923_v22 = vmul.f32 0.03125, %v1859_v18  ;;  %v1924_v54 = vmul.f32 0.03125, %v1862_v6  ;;  %v7913_v15 = vpack.c.bf16 %v2083_v35, %v2082_v5 }
 0x261   : > { %v6642_v1 = vpop.eup %6641  ;;  %6655 = vrsqrt.f32 %v1954_v24  ;;  %v2047_v2 = vmul.f32 %v7885_v53, %v2009_v42  ;;  %v2048_v40 = vmul.f32 %v7885_v53, %v2010_v57  ;;  %v2084_v5 = vadd.f32 %v7893_v48, %v2046_v59 }
 0x262   : > { %v6644_v27 = vpop.eup %6643  ;;  %v1955_v26 = vadd.f32 1e-05, %v1923_v22  ;;  %v1956_v3 = vadd.f32 1e-05, %v1924_v54  ;;  %6346 = vmatmul.mubr.msk.bf16.vlgmr.msra.gmra.mxu0 %vm1618_vm3, %v7913_v15  ;;  %6382 = vmatmul.mubr.msk.bf16.vlgmr.msra.gmra.mxu1 %vm1618_vm3, %v7913_v15  ;;  %v2011_v44 = vmul.f32 %v6642_v1, %v7718_v61 }
 0x263   : > { %v1865_v46 = vpop.xlane.xlu1 %1864  ;;  %v1868_v25 = vpop.xlane.xlu0 %1867  ;;  %v2085_v60 = vadd.f32 %v7893_v48, %v2047_v2  ;;  %v2012_v36 = vmul.f32 %v6644_v27, %v7721_v62  ;;  %6414 = vmatpush3.bf16.msra.mxu0 %v7878_v58  ;;  %v2086_v61 = vadd.f32 %v7893_v48, %v2048_v40 }
 0x264   : > { %6657 = vrsqrt.f32 %v1955_v26  ;;  %v1925_v24 = vmul.f32 0.03125, %v1865_v46  ;;  %v1926_v35 = vmul.f32 0.03125, %v1868_v25  ;;  %v2049_v42 = vmul.f32 %v7885_v53, %v2011_v44  ;;  %6415 = vmatprep.subr.bf16.mxu0 %v6615_v38 }
 0x265   : > { %v6646_v18 = vpop.eup %6645  ;;  %6659 = vrsqrt.f32 %v1956_v3  ;;  %v7930_v6 = vpack.c.bf16 %v2085_v60, %v2084_v5  ;;  %v2050_v2 = vmul.f32 %v7885_v53, %v2012_v36 }
 0x266   : > { %v6648_v57 = vpop.eup %6647  ;;  %v1957_v59 = vadd.f32 1e-05, %v1925_v24  ;;  %v1958_v22 = vadd.f32 1e-05, %v1926_v35  ;;  %v2087_v54 = vadd.f32 %v7893_v48, %v2049_v42  ;;  %v2013_v62 = vmul.f32 %v6646_v18, %v7736_v28 }
 0x267   : > { %6349 = vmatprep.mubr.msk.bf16.mxu0 %vm1618_vm3, %v7930_v6  ;;  %6385 = vmatprep.mubr.msk.bf16.mxu1 %vm1618_vm3, %v7930_v6  ;;  %v1871_v58 = vpop.xlane.xlu1 %1870  ;;  %v1874_v1 = vpop.xlane.xlu0 %1873  ;;  %v2014_v27 = vmul.f32 %v6648_v57, %v7739_v30 }
 0x268   : > { %6661 = vrsqrt.f32 %v1957_v59  ;;  %v1927_v40 = vmul.f32 0.03125, %v1871_v58  ;;  %v1928_v26 = vmul.f32 0.03125, %v1874_v1  ;;  %v7941_v3 = vpack.c.bf16 %v2087_v54, %v2086_v61  ;;  %6416 = vmatpush3.bf16.msra.mxu0 %v6615_v38 }
 0x269   : > { %v6650_v44 = vpop.eup %6649  ;;  %6663 = vrsqrt.f32 %v1958_v22  ;;  %v2051_v28 = vmul.f32 %v7885_v53, %v2013_v62  ;;  %v2052_v46 = vmul.f32 %v7885_v53, %v2014_v27  ;;  %v2088_v38 = vadd.f32 %v7893_v48, %v2050_v2 }
 0x26a   : > { %v6652_v25 = vpop.eup %6651  ;;  %v1959_v5 = vadd.f32 1e-05, %v1927_v40  ;;  %v1960_v60 = vadd.f32 1e-05, %v1928_v26  ;;  %6350 = vmatmul.mubr.msk.bf16.gmra.mxu0 %vm1618_vm3, %v7941_v3  ;;  %6386 = vmatmul.mubr.msk.bf16.gmra.mxu1 %vm1618_vm3, %v7941_v3  ;;  %v2015_v30 = vmul.f32 %v6650_v44, %v7748_v51 }
 0x26b   : > { %v1877_v36 = vpop.xlane.xlu1 %1876  ;;  %v1880_v24 = vpop.xlane.xlu0 %1879  ;;  %v2089_v35 = vadd.f32 %v7893_v48, %v2051_v28  ;;  %v2016_v42 = vmul.f32 %v6652_v25, %v7751_v52  ;;  %v2090_v54 = vadd.f32 %v7893_v48, %v2052_v46 }
 0x26c   : > { %6665 = vrsqrt.f32 %v1959_v5  ;;  %v1929_v18 = vmul.f32 0.03125, %v1877_v36  ;;  %v1930_v61 = vmul.f32 0.03125, %v1880_v24  ;;  %v2053_v57 = vmul.f32 %v7885_v53, %v2015_v30 }
 0x26d   : > { %v6654_v59 = vpop.eup %6653  ;;  %6667 = vrsqrt.f32 %v1960_v60  ;;  %v7954_v22 = vpack.c.bf16 %v2089_v35, %v2088_v38  ;;  %v2054_v40 = vmul.f32 %v7885_v53, %v2016_v42 }
 0x26e   : > { %v6656_v51 = vpop.eup %6655  ;;  %v1961_v62 = vadd.f32 1e-05, %v1929_v18  ;;  %v1962_v58 = vadd.f32 1e-05, %v1930_v61  ;;  %v2091_v1 = vadd.f32 %v7893_v48, %v2053_v57  ;;  %v2017_v2 = vmul.f32 %v6654_v59, %v7760_v20 }
 0x26f   : > { %6353 = vmatprep.mubr.msk.bf16.mxu0 %vm1618_vm3, %v7954_v22  ;;  %6389 = vmatprep.mubr.msk.bf16.mxu1 %vm1618_vm3, %v7954_v22  ;;  %v1883_v52 = vpop.xlane.xlu1 %1882  ;;  %v1886_v27 = vpop.xlane.xlu0 %1885  ;;  %v2018_v26 = vmul.f32 %v6656_v51, %v7763_v21  ;;  %v2092_v35 = vadd.f32 %v7893_v48, %v2054_v40 }
 0x270   : > { %6669 = vrsqrt.f32 %v1961_v62  ;;  %v1931_v44 = vmul.f32 0.03125, %v1883_v52  ;;  %v1932_v28 = vmul.f32 0.03125, %v1886_v27  ;;  %v7965_v46 = vpack.c.bf16 %v2091_v1, %v2090_v54 }
 0x271   : > { %v6658_v25 = vpop.eup %6657  ;;  %6671 = vrsqrt.f32 %v1962_v58  ;;  %v2055_v20 = vmul.f32 %v7885_v53, %v2017_v2  ;;  %v2056_v5 = vmul.f32 %v7885_v53, %v2018_v26 }
 0x272   : > { %v6660_v60 = vpop.eup %6659  ;;  %v1963_v30 = vadd.f32 1e-05, %v1931_v44  ;;  %v1964_v36 = vadd.f32 1e-05, %v1932_v28  ;;  %6354 = vmatmul.mubr.msk.bf16.gmra.mxu0 %vm1618_vm3, %v7965_v46  ;;  %6390 = vmatmul.mubr.msk.bf16.gmra.mxu1 %vm1618_vm3, %v7965_v46  ;;  %v2019_v21 = vmul.f32 %v6658_v25, %v7772_v49 }
 0x273   : > { %v1889_v24 = vpop.xlane.xlu1 %1888  ;;  %v1892_v38 = vpop.xlane.xlu0 %1891  ;;  %v2093_v42 = vadd.f32 %v7893_v48, %v2055_v20  ;;  %v2020_v18 = vmul.f32 %v6660_v60, %v7775_v56  ;;  %v2094_v62 = vadd.f32 %v7893_v48, %v2056_v5 }
 0x274   : > { %6673 = vrsqrt.f32 %v1963_v30  ;;  %v1933_v61 = vmul.f32 0.03125, %v1889_v24  ;;  %v1934_v57 = vmul.f32 0.03125, %v1892_v38  ;;  %v2057_v59 = vmul.f32 %v7885_v53, %v2019_v21 }
 0x275   : > { %v6662_v54 = vpop.eup %6661  ;;  %6675 = vrsqrt.f32 %v1964_v36  ;;  %v7978_v51 = vpack.c.bf16 %v2093_v42, %v2092_v35  ;;  %v2058_v40 = vmul.f32 %v7885_v53, %v2020_v18 }
 0x276   : > { %v6664_v49 = vpop.eup %6663  ;;  %v1965_v58 = vadd.f32 1e-05, %v1933_v61  ;;  %v1966_v1 = vadd.f32 1e-05, %v1934_v57  ;;  %v2095_v2 = vadd.f32 %v7893_v48, %v2057_v59  ;;  %v2021_v52 = vmul.f32 %v6662_v54, %v7784_v31 }
 0x277   : > { %6357 = vmatprep.mubr.msk.bf16.mxu0 %vm1618_vm3, %v7978_v51  ;;  %6393 = vmatprep.mubr.msk.bf16.mxu1 %vm1618_vm3, %v7978_v51  ;;  %v1895_v56 = vpop.xlane.xlu1 %1894  ;;  %v1898_v27 = vpop.xlane.xlu0 %1897  ;;  %v2022_v26 = vmul.f32 %v6664_v49, %v7787_v32  ;;  %v2096_v38 = vadd.f32 %v7893_v48, %v2058_v40 }
 0x278   : > { %6677 = vrsqrt.f32 %v1965_v58  ;;  %v1935_v44 = vmul.f32 0.03125, %v1895_v56  ;;  %v1936_v28 = vmul.f32 0.03125, %v1898_v27  ;;  %v7989_v25 = vpack.c.bf16 %v2095_v2, %v2094_v62 }
 0x279   : > { %v6666_v20 = vpop.eup %6665  ;;  %6679 = vrsqrt.f32 %v1966_v1  ;;  %v2059_v31 = vmul.f32 %v7885_v53, %v2021_v52  ;;  %v2060_v5 = vmul.f32 %v7885_v53, %v2022_v26 }
 0x27a   : > { %v6668_v60 = vpop.eup %6667  ;;  %v1967_v30 = vadd.f32 1e-05, %v1935_v44  ;;  %v1968_v36 = vadd.f32 1e-05, %v1936_v28  ;;  %6358 = vmatmul.mubr.msk.bf16.gmra.mxu0 %vm1618_vm3, %v7989_v25  ;;  %6394 = vmatmul.mubr.msk.bf16.gmra.mxu1 %vm1618_vm3, %v7989_v25  ;;  %v2023_v32 = vmul.f32 %v6666_v20, %v7796_v12 }
 0x27b   : > { %v1901_v21 = vpop.xlane.xlu1 %1900  ;;  %v1904_v24 = vpop.xlane.xlu0 %1903  ;;  %v2097_v35 = vadd.f32 %v7893_v48, %v2059_v31  ;;  %v2024_v42 = vmul.f32 %v6668_v60, %v7799_v13  ;;  %v2098_v62 = vadd.f32 %v7893_v48, %v2060_v5 }
 0x27c   : > { %6681 = vrsqrt.f32 %v1967_v30  ;;  %v1937_v18 = vmul.f32 0.03125, %v1901_v21  ;;  %v1938_v61 = vmul.f32 0.03125, %v1904_v24  ;;  %v2061_v57 = vmul.f32 %v7885_v53, %v2023_v32 }
 0x27d   : > { %v6670_v59 = vpop.eup %6669  ;;  %6683 = vrsqrt.f32 %v1968_v36  ;;  %v8002_v54 = vpack.c.bf16 %v2097_v35, %v2096_v38  ;;  %v2062_v12 = vmul.f32 %v7885_v53, %v2024_v42 }
 0x27e   : > { %v6672_v49 = vpop.eup %6671  ;;  %v1969_v58 = vadd.f32 1e-05, %v1937_v18  ;;  %v1970_v1 = vadd.f32 1e-05, %v1938_v61  ;;  %v2099_v2 = vadd.f32 %v7893_v48, %v2061_v57  ;;  %v2025_v13 = vmul.f32 %v6670_v59, %v7808_v14 }
 0x27f   : > { %6361 = vmatprep.mubr.msk.bf16.mxu0 %vm1618_vm3, %v8002_v54  ;;  %6397 = vmatprep.mubr.msk.bf16.mxu1 %vm1618_vm3, %v8002_v54  ;;  %v1907_v52 = vpop.xlane.xlu1 %1906  ;;  %v2026_v56 = vmul.f32 %v6672_v49, %v7811_v63  ;;  %v2100_v28 = vadd.f32 %v7893_v48, %v2062_v12 }
 0x280   : > { %6685 = vrsqrt.f32 %v1969_v58  ;;  %v1939_v27 = vmul.f32 0.03125, %v1907_v52  ;;  %v8013_v40 = vpack.c.bf16 %v2099_v2, %v2098_v62  ;;  %v2063_v26 = vmul.f32 %v7885_v53, %v2025_v13 }
 0x281   : > { %v6674_v44 = vpop.eup %6673  ;;  %6687 = vrsqrt.f32 %v1970_v1  ;;  %v2064_v5 = vmul.f32 %v7885_v53, %v2026_v56 }
 0x282   : > { %v6676_v14 = vpop.eup %6675  ;;  %v1971_v20 = vadd.f32 1e-05, %v1939_v27  ;;  %6362 = vmatmul.mubr.msk.bf16.gmra.mxu0 %vm1618_vm3, %v8013_v40  ;;  %6398 = vmatmul.mubr.msk.bf16.gmra.mxu1 %vm1618_vm3, %v8013_v40  ;;  %v2101_v63 = vadd.f32 %v7893_v48, %v2063_v26  ;;  %v2027_v31 = vmul.f32 %v6674_v44, %v7820_v43 }
 0x283   : > { %v2028_v60 = vmul.f32 %v6676_v14, %v7823_v47  ;;  %v2102_v38 = vadd.f32 %v7893_v48, %v2064_v5 }
 0x284   : > { %6689 = vrsqrt.f32 %v1971_v20  ;;  %v2122_v30 = vpack.c.bf16 %v2101_v63, %v2100_v28  ;;  %v2065_v36 = vmul.f32 %v7885_v53, %v2027_v31 }
 0x285   : > { %v6678_v32 = vpop.eup %6677  ;;  %v2066_v21 = vmul.f32 %v7885_v53, %v2028_v60 }
 0x286   : > { %v6680_v24 = vpop.eup %6679  ;;  %6365 = vmatprep.mubr.msk.bf16.mxu0 %vm1618_vm3, %v2122_v30  ;;  %6401 = vmatprep.mubr.msk.bf16.mxu1 %vm1618_vm3, %v2122_v30  ;;  %v2103_v43 = vadd.f32 %v7893_v48, %v2065_v36  ;;  %v2029_v35 = vmul.f32 %v6678_v32, %v7832_v39 }
 0x287   : > { %v2030_v47 = vmul.f32 %v6680_v24, %v7835_v34  ;;  %v2104_v57 = vadd.f32 %v7893_v48, %v2066_v21 }
 0x288   : > { %v2123_v42 = vpack.c.bf16 %v2103_v43, %v2102_v38  ;;  %v2067_v18 = vmul.f32 %v7885_v53, %v2029_v35 }
 0x289   : > { %v6682_v61 = vpop.eup %6681  ;;  %v2068_v49 = vmul.f32 %v7885_v53, %v2030_v47 }
 0x28a   : > { %v6684_v59 = vpop.eup %6683  ;;  %6366 = vmatmul.mubr.msk.bf16.gmra.mxu0 %vm1618_vm3, %v2123_v42  ;;  %6402 = vmatmul.mubr.msk.bf16.gmra.mxu1 %vm1618_vm3, %v2123_v42  ;;  %v2105_v62 = vadd.f32 %v7893_v48, %v2067_v18  ;;  %v2031_v12 = vmul.f32 %v6682_v61, %v7844_v8 }
 0x28b   : > { %v2032_v39 = vmul.f32 %v6684_v59, %v7847_v17  ;;  %v2106_v52 = vadd.f32 %v7893_v48, %v2068_v49 }
 0x28c   : > { %v2124_v34 = vpack.c.bf16 %v2105_v62, %v2104_v57  ;;  %v2069_v58 = vmul.f32 %v7885_v53, %v2031_v12 }
 0x28d   : > { %v6686_v1 = vpop.eup %6685  ;;  %v2070_v2 = vmul.f32 %v7885_v53, %v2032_v39 }
 0x28e   : > { %v6688_v13 = vpop.eup %6687  ;;  %6369 = vmatprep.mubr.msk.bf16.mxu0 %vm1618_vm3, %v2124_v34  ;;  %6405 = vmatprep.mubr.msk.bf16.mxu1 %vm1618_vm3, %v2124_v34  ;;  %v2107_v56 = vadd.f32 %v7893_v48, %v2069_v58  ;;  %v2033_v8 = vmul.f32 %v6686_v1, %v7856_v7 }
 0x28f   : > { %v2034_v27 = vmul.f32 %v6688_v13, %v7859_v10  ;;  %v2108_v28 = vadd.f32 %v7893_v48, %v2070_v2 }
 0x290   : > { %v2125_v17 = vpack.c.bf16 %v2107_v56, %v2106_v52  ;;  %v2071_v26 = vmul.f32 %v7885_v53, %v2033_v8 }
 0x291   : > { %v6690_v44 = vpop.eup %6689  ;;  %v2072_v63 = vmul.f32 %v7885_v53, %v2034_v27 }
 0x292   : > { %6370 = vmatmul.mubr.msk.bf16.gmra.mxu0 %vm1618_vm3, %v2125_v17  ;;  %6406 = vmatmul.mubr.msk.bf16.gmra.mxu1 %vm1618_vm3, %v2125_v17  ;;  %v2109_v14 = vadd.f32 %v7893_v48, %v2071_v26  ;;  %v2035_v20 = vmul.f32 %v6690_v44, %v7868_v37 }
 0x293   : > { %v2110_v10 = vadd.f32 %v7893_v48, %v2072_v63 }
 0x294   : > { %v2126_v31 = vpack.c.bf16 %v2109_v14, %v2108_v28  ;;  %v2073_v7 = vmul.f32 %v7885_v53, %v2035_v20 }
 0x296   : > { %6373 = vmatprep.mubr.msk.bf16.mxu0 %vm1618_vm3, %v2126_v31  ;;  %6409 = vmatprep.mubr.msk.bf16.mxu1 %vm1618_vm3, %v2126_v31  ;;  %v2111_v5 = vadd.f32 %v7893_v48, %v2073_v7 }
 0x298   : > { %v2127_v60 = vpack.c.bf16 %v2111_v5, %v2110_v10 }
 0x29a   : > { %6374 = vmatmul.mubr.msk.bf16.gmra.mxu0 %vm1618_vm3, %v2127_v60  ;;  %6410 = vmatmul.mubr.msk.bf16.gmra.mxu1 %vm1618_vm3, %v2127_v60 }
 0x29b   : > { %6417 = vmatprep.mubr.msk.bf16.mxu0 %vm1618_vm3, %v7902_v16 }
 0x2a2   : > { %6418 = vmatmul.mubr.msk.bf16.vlgmr.msra.gmra.mxu0 %vm1618_vm3, %v7913_v15 }
 0x2a3   : > { %6421 = vmatprep.mubr.msk.bf16.mxu0 %vm1618_vm3, %v7930_v6 }
 0x2aa   : > { %6422 = vmatmul.mubr.msk.bf16.gmra.mxu0 %vm1618_vm3, %v7941_v3 }
 0x2ab   : > { %6425 = vmatprep.mubr.msk.bf16.mxu0 %vm1618_vm3, %v7954_v22 }
 0x2b2   : > { %6426 = vmatmul.mubr.msk.bf16.gmra.mxu0 %vm1618_vm3, %v7965_v46 }
 0x2b3   : > { %6429 = vmatprep.mubr.msk.bf16.mxu0 %vm1618_vm3, %v7978_v51 }
 0x2ba   : > { %6430 = vmatmul.mubr.msk.bf16.gmra.mxu0 %vm1618_vm3, %v7989_v25 }
 0x2bb   : > { %6433 = vmatprep.mubr.msk.bf16.mxu0 %vm1618_vm3, %v8002_v54 }
 0x2c2   : > { %6434 = vmatmul.mubr.msk.bf16.gmra.mxu0 %vm1618_vm3, %v8013_v40 }
 0x2c3   : > { %6437 = vmatprep.mubr.msk.bf16.mxu0 %vm1618_vm3, %v2122_v30 }
 0x2ca   : > { %6438 = vmatmul.mubr.msk.bf16.gmra.mxu0 %vm1618_vm3, %v2123_v42 }
 0x2cb   : > { %6441 = vmatprep.mubr.msk.bf16.mxu0 %vm1618_vm3, %v2124_v34 }
 0x2d2   : > { %6442 = vmatmul.mubr.msk.bf16.gmra.mxu0 %vm1618_vm3, %v2125_v17 }
 0x2d3   : > { %6445 = vmatprep.mubr.msk.bf16.mxu0 %vm1618_vm3, %v2126_v31 }
 0x2da   : > { %6446 = vmatmul.mubr.msk.bf16.gmra.mxu0 %vm1618_vm3, %v2127_v60 }
 0x322   : > { %v8089_v37 = vpop.f32.mrf.mxu0  ;;  %v8091_v53 = vpop.f32.mrf.mxu1 }
 0x323   : > { %v2709_v48 = vmul.f32 %v8091_v53, %v8089_v37 }
 0x324   : > { %v8095_v16 = vpop.f32.mrf.mxu0  ;;  %v8097_v15 = vpop.f32.mrf.mxu1 }
 0x325   : > { %v2721_v6 = vsel %vm1618_vm3, %v2709_v48, 0.0  ;;  %v2707_v3 = vmul.f32 %v8097_v15, %v8095_v16 }
 0x326   : > { %v8102_v22 = vpop.f32.mrf.mxu1  ;;  %2722 = vadd.xlane.f32.xlu0 %v2721_v6  ;;  %v8104_v46 = vpop.f32.mrf.mxu0 }
 0x327   : > { %v2710_v51 = vmul.f32 %v8102_v22, %v8104_v46  ;;  %v2715_v40 = vsel %vm1618_vm3, %v2707_v3, 0.0 }
 0x328   : > { %v8108_v25 = vpop.f32.mrf.mxu0  ;;  %v8110_v54 = vpop.f32.mrf.mxu1 }
 0x329   : > { %v2724_v30 = vsel %vm1618_vm3, %v2710_v51, 0.0  ;;  %v2708_v36 = vmul.f32 %v8110_v54, %v8108_v25 }
 0x32a   : > { %2716 = vadd.xlane.f32.xlu0 %v2715_v40  ;;  %2725 = vadd.xlane.f32.xlu1 %v2724_v30  ;;  %v8116_v32 = vpop.f32.mrf.mxu0  ;;  %v8118_v21 = vpop.f32.mrf.mxu1 }
 0x32b   : > { %v2713_v24 = vmul.f32 %v8118_v21, %v8116_v32  ;;  %v2718_v35 = vsel %vm1618_vm3, %v2708_v36, 0.0 }
 0x32c   : > { %v8122_v38 = vpop.f32.mrf.mxu0  ;;  %v8124_v43 = vpop.f32.mrf.mxu1 }
 0x32d   : > { %v2733_v47 = vsel %vm1618_vm3, %v2713_v24, 0.0  ;;  %v2711_v42 = vmul.f32 %v8124_v43, %v8122_v38 }
 0x32e   : > { %2719 = vadd.xlane.f32.xlu1 %v2718_v35  ;;  %v8130_v18 = vpop.f32.mrf.mxu1  ;;  %2734 = vadd.xlane.f32.xlu0 %v2733_v47  ;;  %v8132_v61 = vpop.f32.mrf.mxu0 }
 0x32f   : > { %v2714_v57 = vmul.f32 %v8130_v18, %v8132_v61  ;;  %v2727_v12 = vsel %vm1618_vm3, %v2711_v42, 0.0 }
 0x330   : > { %v8136_v59 = vpop.f32.mrf.mxu0  ;;  %v8138_v62 = vpop.f32.mrf.mxu1 }
 0x331   : > { %v2736_v49 = vsel %vm1618_vm3, %v2714_v57, 0.0  ;;  %v2712_v39 = vmul.f32 %v8138_v62, %v8136_v59 }
 0x332   : > { %2728 = vadd.xlane.f32.xlu0 %v2727_v12  ;;  %2737 = vadd.xlane.f32.xlu1 %v2736_v49  ;;  %v8144_v34 = vpop.f32.mrf.mxu0  ;;  %v8146_v58 = vpop.f32.mrf.mxu1 }
 0x333   : > { %v2741_v1 = vmul.f32 %v8146_v58, %v8089_v37  ;;  %v2730_v52 = vsel %vm1618_vm3, %v2712_v39, 0.0  ;;  %v3077_v8 = vmul.f32 %v8091_v53, %v8144_v34  ;;  %v3109_v63 = vmul.f32 %v8146_v58, %v8144_v34 }
 0x334   : > { %v8150_v2 = vpop.f32.mrf.mxu0  ;;  %v8152_v13 = vpop.f32.mrf.mxu1 }
 0x335   : > { %v2753_v56 = vsel %vm1618_vm3, %v2741_v1, 0.0  ;;  %v3089_v20 = vsel %vm1618_vm3, %v3077_v8, 0.0  ;;  %v3121_v48 = vsel %vm1618_vm3, %v3109_v63, 0.0  ;;  %v2739_v3 = vmul.f32 %v8152_v13, %v8095_v16 }
 0x336   : > { %2731 = vadd.xlane.f32.xlu1 %v2730_v52  ;;  %2754 = vadd.xlane.f32.xlu0 %v2753_v56  ;;  %v8158_v27 = vpop.f32.mrf.mxu0  ;;  %v8160_v17 = vpop.f32.mrf.mxu1  ;;  %v3075_v35 = vmul.f32 %v8097_v15, %v8150_v2  ;;  %v3107_v39 = vmul.f32 %v8152_v13, %v8150_v2 }
 0x337   : > { %v2742_v26 = vmul.f32 %v8160_v17, %v8104_v46  ;;  %v3078_v31 = vmul.f32 %v8102_v22, %v8158_v27  ;;  %v3110_v51 = vmul.f32 %v8160_v17, %v8158_v27  ;;  %v2747_v36 = vsel %vm1618_vm3, %v2739_v3, 0.0 }
 0x338   : > { %v8164_v44 = vpop.f32.mrf.mxu0  ;;  %v8166_v28 = vpop.f32.mrf.mxu1  ;;  %v3083_v12 = vsel %vm1618_vm3, %v3075_v35, 0.0  ;;  %v3115_v8 = vsel %vm1618_vm3, %v3107_v39, 0.0 }
 0x339   : > { %v2756_v14 = vsel %vm1618_vm3, %v2742_v26, 0.0  ;;  %v3092_v6 = vsel %vm1618_vm3, %v3078_v31, 0.0  ;;  %v3124_v24 = vsel %vm1618_vm3, %v3110_v51, 0.0  ;;  %v2740_v47 = vmul.f32 %v8166_v28, %v8108_v25 }
 0x33a   : > { %2757 = vadd.xlane.f32.xlu1 %v2756_v14  ;;  %3090 = vadd.xlane.f32.xlu0 %v3089_v20  ;;  %v8174_v7 = vpop.f32.mrf.mxu0  ;;  %v8176_v10 = vpop.f32.mrf.mxu1  ;;  %v3076_v1 = vmul.f32 %v8110_v54, %v8164_v44  ;;  %v3108_v14 = vmul.f32 %v8166_v28, %v8164_v44 }
 0x33b   : > { %v2750_v49 = vsel %vm1618_vm3, %v2740_v47, 0.0  ;;  %v2745_v20 = vmul.f32 %v8176_v10, %v8116_v32  ;;  %v3081_v51 = vmul.f32 %v8118_v21, %v8174_v7 }
 0x33c   : > { %v8178_v5 = vpop.f32.mrf.mxu0  ;;  %v8180_v60 = vpop.f32.mrf.mxu1  ;;  %v3086_v26 = vsel %vm1618_vm3, %v3076_v1, 0.0 }
 0x33d   : > { %v3101_v47 = vsel %vm1618_vm3, %v3081_v51, 0.0 }
 0x33e   : > { %3122 = vadd.xlane.f32.xlu0 %v3121_v48  ;;  %3093 = vadd.xlane.f32.xlu1 %v3092_v6  ;;  %v8188_v40 = vpop.f32.mrf.mxu0  ;;  %v8190_v30 = vpop.f32.mrf.mxu1  ;;  %v3118_v48 = vsel %vm1618_vm3, %v3108_v14, 0.0  ;;  %v2765_v6 = vsel %vm1618_vm3, %v2745_v20, 0.0  ;;  %v2743_v14 = vmul.f32 %v8180_v60, %v8122_v38 }
 0x33f   : > { %v2746_v3 = vmul.f32 %v8190_v30, %v8132_v61  ;;  %v3114_v20 = vmul.f32 %v8190_v30, %v8188_v40 }
 0x340   : > { %v8198_v42 = vpop.f32.mrf.mxu0  ;;  %v8200_v57 = vpop.f32.mrf.mxu1 }
 0x341   : > { %v2768_v35 = vsel %vm1618_vm3, %v2746_v3, 0.0  ;;  %v2759_v3 = vsel %vm1618_vm3, %v2743_v14, 0.0  ;;  %v3136_v51 = vsel %vm1618_vm3, %v3114_v20, 0.0  ;;  %v3111_v14 = vmul.f32 %v8180_v60, %v8178_v5 }
 0x342   : > { %2748 = vadd.xlane.f32.xlu0 %v2747_v36  ;;  %3125 = vadd.xlane.f32.xlu1 %v3124_v24  ;;  %v8208_v52 = vpop.f32.mrf.mxu0  ;;  %v8210_v56 = vpop.f32.mrf.mxu1  ;;  %v3080_v20 = vmul.f32 %v8138_v62, %v8198_v42 }
 0x344   : > { %v8218_v63 = vpop.f32.mrf.mxu0  ;;  %v8220_v31 = vpop.f32.mrf.mxu1  ;;  %v3098_v29 = vsel %vm1618_vm3, %v3080_v20, 0.0 }
 0x346   : > { %3084 = vadd.xlane.f32.xlu0 %v3083_v12  ;;  %2751 = vadd.xlane.f32.xlu1 %v2750_v49  ;;  %v8228_v36 = vpop.f32.mrf.mxu0  ;;  %v8230_v24 = vpop.f32.mrf.mxu1  ;;  %v3113_v12 = vmul.f32 %v8176_v10, %v8174_v7  ;;  %v3082_v49 = vmul.f32 %v8130_v18, %v8188_v40 }
 0x347   : > { %v2774_v20 = vmul.f32 %v8230_v24, %v8104_v46 }
 0x348   : > { %v8238_v39 = vpop.f32.mrf.mxu0  ;;  %v8240_v1 = vpop.f32.mrf.mxu1 }
 0x349   : > { %v2788_v9 = vsel %vm1618_vm3, %v2774_v20, 0.0  ;;  %v3446_v20 = vmul.f32 %v8102_v22, %v8228_v36 }
 0x34a   : > { %3116 = vadd.xlane.f32.xlu0 %v3115_v8  ;;  %3087 = vadd.xlane.f32.xlu1 %v3086_v26  ;;  %v3133_v8 = vsel %vm1618_vm3, %v3113_v12, 0.0  ;;  %v3104_v26 = vsel %vm1618_vm3, %v3082_v49, 0.0 }
 0x34e   : > { %3119 = vadd.xlane.f32.xlu1 %v3118_v48  ;;  %2766 = vadd.xlane.f32.xlu0 %v2765_v6  ;;  %v8248_v48 = vpop.f32.mrf.mxu0  ;;  %v8250_v6 = vpop.f32.mrf.mxu1 }
 0x350   : > { %v8258_v12 = vpop.f32.mrf.mxu0  ;;  %v8260_v49 = vpop.f32.mrf.mxu1 }
 0x352   : > { %2769 = vadd.xlane.f32.xlu1 %v2768_v35  ;;  %3102 = vadd.xlane.f32.xlu0 %v3101_v47  ;;  %v3079_v35 = vmul.f32 %v8124_v43, %v8178_v5  ;;  %v2744_v47 = vmul.f32 %v8200_v57, %v8136_v59  ;;  %v8268_v33 = vpop.f32.mrf.mxu0 }
 0x354   : > { %v8278_v23 = vpop.f32.mrf.mxu0 }
 0x356   : > { %3134 = vadd.xlane.f32.xlu0 %v3133_v8  ;;  %3105 = vadd.xlane.f32.xlu1 %v3104_v26  ;;  %v3095_v8 = vsel %vm1618_vm3, %v3079_v35, 0.0  ;;  %v2762_v26 = vsel %vm1618_vm3, %v2744_v47, 0.0  ;;  %v3112_v35 = vmul.f32 %v8200_v57, %v8198_v42  ;;  %v2773_v47 = vmul.f32 %v8210_v56, %v8089_v37  ;;  %v8288_v11 = vpop.f32.mrf.mxu0 }
 0x358   : > { %v2785_v19 = vsel %vm1618_vm3, %v2773_v47, 0.0  ;;  %v3445_v47 = vmul.f32 %v8091_v53, %v8208_v52 }
 0x35a   : > { %2760 = vadd.xlane.f32.xlu0 %v2759_v3  ;;  %3137 = vadd.xlane.f32.xlu1 %v3136_v51  ;;  %v8270_v3 = vpop.f32.mrf.mxu1  ;;  %v3127_v51 = vsel %vm1618_vm3, %v3111_v14, 0.0  ;;  %v3141_v14 = vmul.f32 %v8210_v56, %v8144_v34  ;;  %v3457_v4 = vsel %vm1618_vm3, %v3445_v47, 0.0 }
 0x35e   : > { %3096 = vadd.xlane.f32.xlu0 %v3095_v8  ;;  %2763 = vadd.xlane.f32.xlu1 %v2762_v26  ;;  %v8280_v8 = vpop.f32.mrf.mxu1  ;;  %v3130_v26 = vsel %vm1618_vm3, %v3112_v35, 0.0  ;;  %v3142_v35 = vmul.f32 %v8230_v24, %v8158_v27 }
 0x362   : > { %3128 = vadd.xlane.f32.xlu0 %v3127_v51  ;;  %3099 = vadd.xlane.f32.xlu1 %v3098_v29  ;;  %v8290_v51 = vpop.f32.mrf.mxu1  ;;  %v3153_v29 = vsel %vm1618_vm3, %v3141_v14, 0.0  ;;  %v3477_v14 = vmul.f32 %v8146_v58, %v8208_v52 }
 0x364   : > { %v3489_v0 = vsel %vm1618_vm3, %v3477_v14, 0.0 }
 0x366   : > { %3131 = vadd.xlane.f32.xlu1 %v3130_v26  ;;  %2786 = vadd.xlane.f32.xlu0 %v2785_v19  ;;  %v8300_v26 = vmul.f32 %v8290_v51, %v8288_v11  ;;  %v3156_v19 = vsel %vm1618_vm3, %v3142_v35, 0.0  ;;  %v3478_v35 = vmul.f32 %v8160_v17, %v8228_v36 }
 0x368   : > { %v3492_v50 = vsel %vm1618_vm3, %v3478_v35, 0.0 }
 0x36a   : > { %3154 = vadd.xlane.f32.xlu0 %v3153_v29  ;;  %2789 = vadd.xlane.f32.xlu1 %v2788_v9  ;;  %v3460_v9 = vsel %vm1618_vm3, %v3446_v20, 0.0  ;;  %v3509_v29 = vmul.f32 %v8210_v56, %v8208_v52 }
 0x36c   : > { %v3521_v47 = vsel %vm1618_vm3, %v3509_v29, 0.0 }
 0x36e   : > { %3157 = vadd.xlane.f32.xlu1 %v3156_v19  ;;  %3458 = vadd.xlane.f32.xlu0 %v3457_v4  ;;  %v2771_v19 = vmul.f32 %v8220_v31, %v8095_v16  ;;  %v3510_v4 = vmul.f32 %v8230_v24, %v8228_v36 }
 0x370   : > { %v2779_v14 = vsel %vm1618_vm3, %v2771_v19, 0.0  ;;  %v3524_v20 = vsel %vm1618_vm3, %v3510_v4, 0.0 }
 0x372   : > { %3490 = vadd.xlane.f32.xlu0 %v3489_v0  ;;  %3461 = vadd.xlane.f32.xlu1 %v3460_v9  ;;  %v3139_v0 = vmul.f32 %v8220_v31, %v8150_v2  ;;  %v2772_v9 = vmul.f32 %v8240_v1, %v8108_v25 }
 0x374   : > { %v3147_v29 = vsel %vm1618_vm3, %v3139_v0, 0.0  ;;  %v2782_v35 = vsel %vm1618_vm3, %v2772_v9, 0.0 }
 0x376   : > { %3522 = vadd.xlane.f32.xlu0 %v3521_v47  ;;  %3493 = vadd.xlane.f32.xlu1 %v3492_v50  ;;  %v3443_v47 = vmul.f32 %v8097_v15, %v8218_v63  ;;  %v3140_v50 = vmul.f32 %v8240_v1, %v8164_v44 }
 0x378   : > { %v3451_v19 = vsel %vm1618_vm3, %v3443_v47, 0.0  ;;  %v3150_v4 = vsel %vm1618_vm3, %v3140_v50, 0.0 }
 0x37a   : > { %2780 = vadd.xlane.f32.xlu0 %v2779_v14  ;;  %3525 = vadd.xlane.f32.xlu1 %v3524_v20  ;;  %v3475_v14 = vmul.f32 %v8152_v13, %v8218_v63  ;;  %v3444_v20 = vmul.f32 %v8110_v54, %v8238_v39 }
 0x37c   : > { %v3483_v0 = vsel %vm1618_vm3, %v3475_v14, 0.0  ;;  %v3454_v9 = vsel %vm1618_vm3, %v3444_v20, 0.0 }
 0x37e   : > { %3148 = vadd.xlane.f32.xlu0 %v3147_v29  ;;  %2783 = vadd.xlane.f32.xlu1 %v2782_v35  ;;  %v3507_v29 = vmul.f32 %v8220_v31, %v8218_v63  ;;  %v3476_v35 = vmul.f32 %v8166_v28, %v8238_v39 }
 0x380   : > { %v3515_v47 = vsel %vm1618_vm3, %v3507_v29, 0.0  ;;  %v3486_v50 = vsel %vm1618_vm3, %v3476_v35, 0.0 }
 0x382   : > { %3452 = vadd.xlane.f32.xlu0 %v3451_v19  ;;  %3151 = vadd.xlane.f32.xlu1 %v3150_v4  ;;  %v3508_v19 = vmul.f32 %v8240_v1, %v8238_v39  ;;  %v2777_v4 = vmul.f32 %v8250_v6, %v8116_v32 }
 0x384   : > { %v3518_v14 = vsel %vm1618_vm3, %v3508_v19, 0.0  ;;  %v2797_v20 = vsel %vm1618_vm3, %v2777_v4, 0.0 }
 0x386   : > { %3484 = vadd.xlane.f32.xlu0 %v3483_v0  ;;  %3455 = vadd.xlane.f32.xlu1 %v3454_v9  ;;  %v3145_v0 = vmul.f32 %v8250_v6, %v8174_v7  ;;  %v2778_v9 = vmul.f32 %v8270_v3, %v8132_v61 }
 0x388   : > { %v3165_v29 = vsel %vm1618_vm3, %v3145_v0, 0.0  ;;  %v2800_v35 = vsel %vm1618_vm3, %v2778_v9, 0.0 }
 0x38a   : > { %3516 = vadd.xlane.f32.xlu0 %v3515_v47  ;;  %3487 = vadd.xlane.f32.xlu1 %v3486_v50  ;;  %v3146_v47 = vmul.f32 %v8270_v3, %v8188_v40  ;;  %v3449_v50 = vmul.f32 %v8118_v21, %v8248_v48 }
 0x38c   : > { %v3168_v19 = vsel %vm1618_vm3, %v3146_v47, 0.0  ;;  %v3469_v4 = vsel %vm1618_vm3, %v3449_v50, 0.0 }
 0x38e   : > { %3519 = vadd.xlane.f32.xlu1 %v3518_v14  ;;  %2798 = vadd.xlane.f32.xlu0 %v2797_v20  ;;  %v3481_v14 = vmul.f32 %v8176_v10, %v8248_v48  ;;  %v3450_v20 = vmul.f32 %v8130_v18, %v8268_v33 }
 0x390   : > { %v3501_v0 = vsel %vm1618_vm3, %v3481_v14, 0.0  ;;  %v3472_v9 = vsel %vm1618_vm3, %v3450_v20, 0.0 }
 0x392   : > { %3166 = vadd.xlane.f32.xlu0 %v3165_v29  ;;  %2801 = vadd.xlane.f32.xlu1 %v2800_v35  ;;  %v3513_v29 = vmul.f32 %v8250_v6, %v8248_v48  ;;  %v3482_v35 = vmul.f32 %v8190_v30, %v8268_v33 }
 0x394   : > { %v3533_v47 = vsel %vm1618_vm3, %v3513_v29, 0.0  ;;  %v3504_v50 = vsel %vm1618_vm3, %v3482_v35, 0.0 }
 0x396   : > { %3169 = vadd.xlane.f32.xlu1 %v3168_v19  ;;  %3470 = vadd.xlane.f32.xlu0 %v3469_v4  ;;  %v2775_v19 = vmul.f32 %v8260_v49, %v8122_v38  ;;  %v3514_v4 = vmul.f32 %v8270_v3, %v8268_v33 }
 0x398   : > { %v2791_v14 = vsel %vm1618_vm3, %v2775_v19, 0.0  ;;  %v3536_v20 = vsel %vm1618_vm3, %v3514_v4, 0.0 }
 0x39a   : > { %3502 = vadd.xlane.f32.xlu0 %v3501_v0  ;;  %3473 = vadd.xlane.f32.xlu1 %v3472_v9  ;;  %v3143_v0 = vmul.f32 %v8260_v49, %v8178_v5  ;;  %v2776_v9 = vmul.f32 %v8280_v8, %v8136_v59 }
 0x39c   : > { %v3159_v29 = vsel %vm1618_vm3, %v3143_v0, 0.0  ;;  %v2794_v35 = vsel %vm1618_vm3, %v2776_v9, 0.0 }
 0x39e   : > { %3534 = vadd.xlane.f32.xlu0 %v3533_v47  ;;  %3505 = vadd.xlane.f32.xlu1 %v3504_v50  ;;  %v3447_v47 = vmul.f32 %v8124_v43, %v8258_v12  ;;  %v3144_v50 = vmul.f32 %v8280_v8, %v8198_v42 }
 0x3a0   : > { %v3463_v19 = vsel %vm1618_vm3, %v3447_v47, 0.0  ;;  %v3162_v4 = vsel %vm1618_vm3, %v3144_v50, 0.0  ;;  %v8404_v47 = vpop.f32.mrf.mxu1 }
 0x3a2   : > { %2792 = vadd.xlane.f32.xlu0 %v2791_v14  ;;  %3537 = vadd.xlane.f32.xlu1 %v3536_v20  ;;  %v3479_v14 = vmul.f32 %v8180_v60, %v8258_v12  ;;  %v3448_v20 = vmul.f32 %v8138_v62, %v8278_v23 }
 0x3a4   : > { %v3495_v0 = vsel %vm1618_vm3, %v3479_v14, 0.0  ;;  %v3466_v9 = vsel %vm1618_vm3, %v3448_v20, 0.0  ;;  %v2805_v14 = vmul.f32 %v8290_v51, %v8089_v37  ;;  %v8414_v20 = vpop.f32.mrf.mxu1 }
 0x3a5   : > { %v2806_v45 = vmul.f32 %v8414_v20, %v8104_v46 }
 0x3a6   : > { %3160 = vadd.xlane.f32.xlu0 %v3159_v29  ;;  %2795 = vadd.xlane.f32.xlu1 %v2794_v35  ;;  %v3511_v29 = vmul.f32 %v8260_v49, %v8258_v12  ;;  %v3480_v35 = vmul.f32 %v8200_v57, %v8278_v23 }
 0x3a8   : > { %v3527_v55 = vsel %vm1618_vm3, %v3511_v29, 0.0  ;;  %v2817_v29 = vsel %vm1618_vm3, %v2805_v14, 0.0  ;;  %v3174_v14 = vmul.f32 %v8414_v20, %v8158_v27 }
 0x3aa   : > { %3464 = vadd.xlane.f32.xlu0 %v3463_v19  ;;  %3163 = vadd.xlane.f32.xlu1 %v3162_v4  ;;  %v3498_v19 = vsel %vm1618_vm3, %v3480_v35, 0.0  ;;  %v3512_v4 = vmul.f32 %v8280_v8, %v8278_v23  ;;  %v3173_v35 = vmul.f32 %v8290_v51, %v8144_v34  ;;  %v8436_v34 = vpop.f32.mrf.mxu0 }
 0x3ae   : > { %3496 = vadd.xlane.f32.xlu0 %v3495_v0  ;;  %3467 = vadd.xlane.f32.xlu1 %v3466_v9  ;;  %v3530_v9 = vsel %vm1618_vm3, %v3512_v4, 0.0  ;;  %v3541_v4 = vmul.f32 %v8290_v51, %v8208_v52  ;;  %v3813_v52 = vmul.f32 %v8091_v53, %v8288_v11  ;;  %v8448_v51 = vpop.f32.mrf.mxu0 }
 0x3af   : > { %v8406_v50 = vpop.xlane.xlu0 %2722 }
 0x3b2   : > { %3528 = vadd.xlane.f32.xlu0 %v3527_v55  ;;  %3499 = vadd.xlane.f32.xlu1 %v3498_v19  ;;  %v3185_v19 = vsel %vm1618_vm3, %v3173_v35, 0.0  ;;  %v3188_v35 = vsel %vm1618_vm3, %v3174_v14, 0.0  ;;  %v3845_v14 = vmul.f32 %v8146_v58, %v8288_v11  ;;  %v8470_v58 = vpop.f32.mrf.mxu1 }
 0x3b3   : > { %v8416_v41 = vpop.xlane.xlu1 %2725  ;;  %v8418_v0 = vpop.xlane.xlu0 %2716 }
 0x3b4   : > { %11373 = vst [vmem:[#allocation36_spill] sm:$0xff] %v8416_v41  ;;  %11374 = vst [vmem:[#allocation37_spill] sm:$0xff] %v8418_v0  ;;  %v2820_v0 = vsel %vm1618_vm3, %v2806_v45, 0.0  ;;  %v3542_v45 = vmul.f32 %v8414_v20, %v8228_v36  ;;  %v3814_v36 = vmul.f32 %v8102_v22, %v8448_v51 }
 0x3b6   : > { %3531 = vadd.xlane.f32.xlu1 %v3530_v9  ;;  %2818 = vadd.xlane.f32.xlu0 %v2817_v29  ;;  %v3553_v29 = vsel %vm1618_vm3, %v3541_v4, 0.0  ;;  %v3825_v4 = vsel %vm1618_vm3, %v3813_v52, 0.0  ;;  %v3846_v52 = vmul.f32 %v8160_v17, %v8448_v51 }
 0x3b7   : > { %v8426_v37 = vpop.xlane.xlu1 %2719  ;;  %v8428_v55 = vpop.xlane.xlu0 %2734 }
 0x3b8   : > { %11375 = vst [vmem:[#allocation38_spill] sm:$0xff] %v8426_v37  ;;  %11376 = vst [vmem:[#allocation39_spill] sm:$0xff] %v8428_v55 }
 0x3ba   : > { %3186 = vadd.xlane.f32.xlu0 %v3185_v19  ;;  %2821 = vadd.xlane.f32.xlu1 %v2820_v0  ;;  %v3556_v19 = vsel %vm1618_vm3, %v3542_v45, 0.0  ;;  %v2803_v45 = vmul.f32 %v8404_v47, %v8095_v16  ;;  %v2804_v16 = vmul.f32 %v8470_v58, %v8108_v25 }
 0x3bb   : > { %v8438_v46 = vpop.xlane.xlu1 %2737  ;;  %v8440_v9 = vpop.xlane.xlu0 %2728 }
 0x3bc   : > { %11377 = vst [vmem:[#allocation40_spill] sm:$0xff] %v8438_v46  ;;  %11378 = vst [vmem:[#allocation41_spill] sm:$0xff] %v8440_v9  ;;  %v2814_v9 = vsel %vm1618_vm3, %v2804_v16, 0.0  ;;  %v3540_v16 = vmul.f32 %v8470_v58, %v8238_v39  ;;  %v8514_v46 = vpop.f32.mrf.mxu1 }
 0x3be   : > { %3554 = vadd.xlane.f32.xlu0 %v3553_v29  ;;  %3189 = vadd.xlane.f32.xlu1 %v3188_v35  ;;  %v3857_v35 = vsel %vm1618_vm3, %v3845_v14, 0.0  ;;  %v3860_v14 = vsel %vm1618_vm3, %v3846_v52, 0.0  ;;  %v3172_v52 = vmul.f32 %v8470_v58, %v8164_v44  ;;  %v8526_v55 = vpop.f32.mrf.mxu1 }
 0x3bf   : > { %v8450_v27 = vpop.xlane.xlu1 %2731  ;;  %v8452_v0 = vpop.xlane.xlu0 %2754 }
 0x3c0   : > { %11379 = vst [vmem:[#allocation42_spill] sm:$0xff] %v8450_v27  ;;  %v3828_v27 = vsel %vm1618_vm3, %v3814_v36, 0.0  ;;  %v3171_v36 = vmul.f32 %v8404_v47, %v8150_v2 }
 0x3c2   : > { %3557 = vadd.xlane.f32.xlu1 %v3556_v19  ;;  %3826 = vadd.xlane.f32.xlu0 %v3825_v4  ;;  %v2811_v4 = vsel %vm1618_vm3, %v2803_v45, 0.0  ;;  %v3539_v45 = vmul.f32 %v8404_v47, %v8218_v63  ;;  %v8502_v63 = vpop.f32.mrf.mxu0 }
 0x3c3   : > { %v8460_v53 = vpop.xlane.xlu1 %2757  ;;  %v8462_v29 = vpop.xlane.xlu0 %3090 }
 0x3c4   : > { %11380 = vst [vmem:[#allocation43_spill] sm:$0xff] %v8460_v53 }
 0x3c6   : > { %3858 = vadd.xlane.f32.xlu0 %v3857_v35  ;;  %3829 = vadd.xlane.f32.xlu1 %v3828_v27  ;;  %v3179_v27 = vsel %vm1618_vm3, %v3171_v36, 0.0  ;;  %v3811_v36 = vmul.f32 %v8097_v15, %v8436_v34  ;;  %v3812_v15 = vmul.f32 %v8110_v54, %v8502_v63 }
 0x3c7   : > { %v8472_v22 = vpop.xlane.xlu1 %3093  ;;  %v8474_v19 = vpop.xlane.xlu0 %3122 }
 0x3c8   : > { %11381 = vst [vmem:[#allocation44_spill] sm:$0xff] %v8472_v22  ;;  %11382 = vst [vmem:[#allocation45_spill] sm:$0xff] %v8474_v19 }
 0x3ca   : > { %2812 = vadd.xlane.f32.xlu0 %v2811_v4  ;;  %3861 = vadd.xlane.f32.xlu1 %v3860_v14  ;;  %v3547_v4 = vsel %vm1618_vm3, %v3539_v45, 0.0  ;;  %v3182_v14 = vsel %vm1618_vm3, %v3172_v52, 0.0  ;;  %v3550_v45 = vsel %vm1618_vm3, %v3540_v16, 0.0  ;;  %v3843_v52 = vmul.f32 %v8152_v13, %v8436_v34 }
 0x3cb   : > { %v8482_v17 = vpop.xlane.xlu1 %3125  ;;  %v8484_v35 = vpop.xlane.xlu0 %2748  ;;  %v3875_v16 = vmul.f32 %v8220_v31, %v8436_v34  ;;  %v3844_v13 = vmul.f32 %v8166_v28, %v8502_v63  ;;  %v2809_v31 = vmul.f32 %v8514_v46, %v8116_v32 }
 0x3cc   : > { %11383 = vst [vmem:[#allocation46_spill] sm:$0xff] %v8482_v17  ;;  %11384 = vst [vmem:[#allocation47_spill] sm:$0xff] %v8484_v35 }
 0x3ce   : > { %3180 = vadd.xlane.f32.xlu0 %v3179_v27  ;;  %2815 = vadd.xlane.f32.xlu1 %v2814_v9  ;;  %v3819_v27 = vsel %vm1618_vm3, %v3811_v36, 0.0  ;;  %v3822_v36 = vsel %vm1618_vm3, %v3812_v15, 0.0  ;;  %v3876_v15 = vmul.f32 %v8240_v1, %v8502_v63 }
 0x3cf   : > { %v8492_v2 = vpop.xlane.xlu1 %2751  ;;  %v8494_v25 = vpop.xlane.xlu0 %3084 }
 0x3d0   : > { %11385 = vst [vmem:[#allocation48_spill] sm:$0xff] %v8492_v2  ;;  %11386 = vst [vmem:[#allocation49_spill] sm:$0xff] %v8494_v25 }
 0x3d2   : > { %3548 = vadd.xlane.f32.xlu0 %v3547_v4  ;;  %3183 = vadd.xlane.f32.xlu1 %v3182_v14  ;;  %v3851_v14 = vsel %vm1618_vm3, %v3843_v52, 0.0  ;;  %v3854_v52 = vsel %vm1618_vm3, %v3844_v13, 0.0  ;;  %v3177_v13 = vmul.f32 %v8514_v46, %v8174_v7 }
 0x3d3   : > { %v8504_v44 = vpop.xlane.xlu1 %3087  ;;  %v8506_v9 = vpop.xlane.xlu0 %3116 }
 0x3d4   : > { %11387 = vst [vmem:[#allocation50_spill] sm:$0xff] %v8506_v9 }
 0x3d6   : > { %3820 = vadd.xlane.f32.xlu0 %v3819_v27  ;;  %3551 = vadd.xlane.f32.xlu1 %v3550_v45  ;;  %v3883_v45 = vsel %vm1618_vm3, %v3875_v16, 0.0  ;;  %v2829_v16 = vsel %vm1618_vm3, %v2809_v31, 0.0  ;;  %v3545_v31 = vmul.f32 %v8514_v46, %v8248_v48 }
 0x3d7   : > { %v8516_v39 = vpop.xlane.xlu1 %3119  ;;  %v8518_v4 = vpop.xlane.xlu0 %2766 }
 0x3d8   : > { %11388 = vst [vmem:[#allocation51_spill] sm:$0xff] %v8518_v4  ;;  %v8538_v4 = vpop.f32.mrf.mxu1 }
 0x3d9   : > { %v2810_v1 = vmul.f32 %v8538_v4, %v8132_v61 }
 0x3da   : > { %3852 = vadd.xlane.f32.xlu0 %v3851_v14  ;;  %3823 = vadd.xlane.f32.xlu1 %v3822_v36  ;;  %v3886_v36 = vsel %vm1618_vm3, %v3876_v15, 0.0  ;;  %v3178_v15 = vmul.f32 %v8538_v4, %v8188_v40  ;;  %v8570_v40 = vpop.f32.mrf.mxu1 }
 0x3db   : > { %v8528_v54 = vpop.xlane.xlu1 %2769  ;;  %v8530_v27 = vpop.xlane.xlu0 %3102 }
 0x3dc   : > { %11389 = vst [vmem:[#allocation52_spill] sm:$0xff] %v8528_v54  ;;  %11390 = vst [vmem:[#allocation53_spill] sm:$0xff] %v8530_v27 }
 0x3de   : > { %3884 = vadd.xlane.f32.xlu0 %v3883_v45  ;;  %3855 = vadd.xlane.f32.xlu1 %v3854_v52  ;;  %v3197_v52 = vsel %vm1618_vm3, %v3177_v13, 0.0  ;;  %v3546_v13 = vmul.f32 %v8538_v4, %v8268_v33  ;;  %v3877_v33 = vmul.f32 %v8210_v56, %v8288_v11 }
 0x3df   : > { %v8540_v28 = vpop.xlane.xlu1 %3105  ;;  %v8542_v14 = vpop.xlane.xlu0 %3134 }
 0x3e0   : > { %11391 = vst [vmem:[#allocation54_spill] sm:$0xff] %v8540_v28  ;;  %11392 = vst [vmem:[#allocation55_spill] sm:$0xff] %v8542_v14  ;;  %v2832_v28 = vsel %vm1618_vm3, %v2810_v1, 0.0  ;;  %v2807_v1 = vmul.f32 %v8526_v55, %v8122_v38 }
 0x3e2   : > { %3887 = vadd.xlane.f32.xlu1 %v3886_v36  ;;  %2830 = vadd.xlane.f32.xlu0 %v2829_v16  ;;  %v3200_v36 = vsel %vm1618_vm3, %v3178_v15, 0.0  ;;  %v3565_v16 = vsel %vm1618_vm3, %v3545_v31, 0.0  ;;  %v2823_v15 = vsel %vm1618_vm3, %v2807_v1, 0.0  ;;  %v2808_v31 = vmul.f32 %v8570_v40, %v8136_v59 }
 0x3e3   : > { %v8550_v32 = vpop.xlane.xlu1 %3137  ;;  %v8552_v45 = vpop.xlane.xlu0 %2760  ;;  %v3175_v1 = vmul.f32 %v8526_v55, %v8178_v5 }
 0x3e4   : > { %11393 = vst [vmem:[#allocation56_spill] sm:$0xff] %v8550_v32  ;;  %11394 = vst [vmem:[#allocation57_spill] sm:$0xff] %v8552_v45 }
 0x3e6   : > { %3198 = vadd.xlane.f32.xlu0 %v3197_v52  ;;  %2833 = vadd.xlane.f32.xlu1 %v2832_v28  ;;  %v3568_v52 = vsel %vm1618_vm3, %v3546_v13, 0.0  ;;  %v3878_v13 = vmul.f32 %v8230_v24, %v8448_v51  ;;  %v8602_v24 = vpop.f32.mrf.mxu0 }
 0x3e7   : > { %v8560_v7 = vpop.xlane.xlu1 %2763  ;;  %v8562_v61 = vpop.xlane.xlu0 %3096 }
 0x3e8   : > { %11395 = vst [vmem:[#allocation58_spill] sm:$0xff] %v8560_v7  ;;  %11396 = vst [vmem:[#allocation59_spill] sm:$0xff] %v8562_v61  ;;  %v3892_v56 = vsel %vm1618_vm3, %v3878_v13, 0.0  ;;  %v3910_v13 = vmul.f32 %v8414_v20, %v8448_v51  ;;  %v3921_v51 = vsel %vm1618_vm3, %v8300_v26, 0.0 }
 0x3ea   : > { %3201 = vadd.xlane.f32.xlu1 %v3200_v36  ;;  %3566 = vadd.xlane.f32.xlu0 %v3565_v16  ;;  %v2826_v16 = vsel %vm1618_vm3, %v2808_v31, 0.0  ;;  %v3543_v31 = vmul.f32 %v8526_v55, %v8258_v12 }
 0x3eb   : > { %v8572_v48 = vpop.xlane.xlu1 %3099  ;;  %v8574_v28 = vpop.xlane.xlu0 %3128 }
 0x3ec   : > { %11397 = vst [vmem:[#allocation60_spill] sm:$0xff] %v8572_v48  ;;  %11398 = vst [vmem:[#allocation61_spill] sm:$0xff] %v8574_v28  ;;  %v3889_v48 = vsel %vm1618_vm3, %v3877_v33, 0.0 }
 0x3ee   : > { %3569 = vadd.xlane.f32.xlu1 %v3568_v52  ;;  %2824 = vadd.xlane.f32.xlu0 %v2823_v15  ;;  %v3191_v52 = vsel %vm1618_vm3, %v3175_v1, 0.0  ;;  %v3908_v15 = vmul.f32 %v8470_v58, %v8502_v63  ;;  %v3907_v58 = vmul.f32 %v8404_v47, %v8436_v34  ;;  %v8614_v63 = vpop.f32.mrf.mxu0 }
 0x3ef   : > { %v8582_v38 = vpop.xlane.xlu1 %3131  ;;  %v8584_v36 = vpop.xlane.xlu0 %2786 }
 0x3f0   : > { %11399 = vst [vmem:[#allocation62_spill] sm:$0xff] %v8582_v38  ;;  %v3918_v33 = vsel %vm1618_vm3, %v3908_v15, 0.0  ;;  %v3176_v15 = vmul.f32 %v8570_v40, %v8198_v42 }
 0x3f2   : > { %2827 = vadd.xlane.f32.xlu1 %v2826_v16  ;;  %3890 = vadd.xlane.f32.xlu0 %v3889_v48  ;;  %v3559_v16 = vsel %vm1618_vm3, %v3543_v31, 0.0  ;;  %v8624_v31 = vpop.f32.mrf.mxu0  ;;  %v3194_v34 = vsel %vm1618_vm3, %v3176_v15, 0.0 }
 0x3f3   : > { %v8592_v59 = vpop.xlane.xlu1 %2789  ;;  %v8594_v11 = vpop.xlane.xlu0 %3154  ;;  %v3850_v26 = vmul.f32 %v8190_v30, %v8624_v31  ;;  %v3817_v30 = vmul.f32 %v8118_v21, %v8602_v24 }
 0x3f4   : > { %v8637_v42 = vpop.f32.mrf.mxu0 }
 0x3f6   : > { %3893 = vadd.xlane.f32.xlu1 %v3892_v56  ;;  %3192 = vadd.xlane.f32.xlu0 %v3191_v52  ;;  %v3924_v56 = vsel %vm1618_vm3, %v3910_v13, 0.0  ;;  %v3915_v52 = vsel %vm1618_vm3, %v3907_v58, 0.0  ;;  %v8649_v15 = vpop.f32.mrf.mxu0 }
 0x3f7   : > { %v8604_v5 = vpop.xlane.xlu1 %3157  ;;  %v8606_v48 = vpop.xlane.xlu0 %3458  ;;  %11401 = vst [vmem:[#allocation64_spill] sm:$0xff] %v8649_v15 }
 0x3fa   : > { %3919 = vadd.xlane.f32.xlu1 %v3918_v33  ;;  %3560 = vadd.xlane.f32.xlu0 %v3559_v16  ;;  %v3818_v33 = vmul.f32 %v8130_v18, %v8624_v31  ;;  %v3815_v16 = vmul.f32 %v8124_v43, %v8614_v63  ;;  %v3847_v18 = vmul.f32 %v8180_v60, %v8614_v63 }
 0x3fb   : > { %v8616_v12 = vpop.xlane.xlu1 %3461  ;;  %v8618_v1 = vpop.xlane.xlu0 %3490 }
 0x3fe   : > { %3925 = vadd.xlane.f32.xlu1 %v3924_v56  ;;  %3916 = vadd.xlane.f32.xlu0 %v3915_v52  ;;  %v3840_v56 = vsel %vm1618_vm3, %v3818_v33, 0.0  ;;  %v3831_v52 = vsel %vm1618_vm3, %v3815_v16, 0.0  ;;  %v3863_v33 = vsel %vm1618_vm3, %v3847_v18, 0.0  ;;  %v3882_v16 = vmul.f32 %v8270_v3, %v8624_v31 }
 0x3ff   : > { %v8626_v47 = vpop.xlane.xlu1 %3493  ;;  %v8628_v20 = vpop.xlane.xlu0 %3522  ;;  %v3544_v18 = vmul.f32 %v8570_v40, %v8278_v23  ;;  %v3849_v3 = vmul.f32 %v8176_v10, %v8602_v24  ;;  %v3816_v23 = vmul.f32 %v8138_v62, %v8637_v42  ;;  %v3879_v10 = vmul.f32 %v8260_v49, %v8614_v63 }
 0x400   : > { %v3848_v62 = vmul.f32 %v8200_v57, %v8637_v42  ;;  %v3881_v49 = vmul.f32 %v8250_v6, %v8602_v24  ;;  %v3911_v57 = vmul.f32 %v8526_v55, %v8614_v63 }
 0x402   : > { %3195 = vadd.xlane.f32.xlu1 %v3194_v34  ;;  %3922 = vadd.xlane.f32.xlu0 %v3921_v51  ;;  %v3872_v51 = vsel %vm1618_vm3, %v3850_v26, 0.0  ;;  %v3837_v26 = vsel %vm1618_vm3, %v3817_v30, 0.0  ;;  %v3869_v30 = vsel %vm1618_vm3, %v3849_v3, 0.0  ;;  %v3895_v3 = vsel %vm1618_vm3, %v3879_v10, 0.0 }
 0x403   : > { %v8639_v13 = vpop.xlane.xlu1 %3525  ;;  %v8641_v58 = vpop.xlane.xlu0 %2780  ;;  %v3880_v10 = vmul.f32 %v8280_v8, %v8637_v42  ;;  %v3913_v8 = vmul.f32 %v8514_v46, %v8602_v24 }
 0x404   : > { %11400 = vst [vmem:[#allocation63_spill] sm:$0xff] %v8641_v58  ;;  %v8661_v58 = vpop.f32.mrf.mxu0 }
 0x405   : > { %11402 = vst [vmem:[#allocation65_spill] sm:$0xff] %v8661_v58 }
 0x406   : > { %3841 = vadd.xlane.f32.xlu1 %v3840_v56  ;;  %3832 = vadd.xlane.f32.xlu0 %v3831_v52  ;;  %v3904_v52 = vsel %vm1618_vm3, %v3882_v16, 0.0  ;;  %v8673_v15 = vpop.f32.mrf.mxu0  ;;  %v3562_v16 = vsel %vm1618_vm3, %v3544_v18, 0.0  ;;  %v3834_v18 = vsel %vm1618_vm3, %v3816_v23, 0.0  ;;  %v3901_v23 = vsel %vm1618_vm3, %v3881_v49, 0.0 }
 0x407   : > { %v8651_v43 = vpop.xlane.xlu1 %2783  ;;  %v8653_v34 = vpop.xlane.xlu0 %3148  ;;  %11404 = vst [vmem:[#allocation67_spill] sm:$0xff] %v8673_v15  ;;  %v3912_v49 = vmul.f32 %v8570_v40, %v8637_v42 }
 0x40a   : > { %3873 = vadd.xlane.f32.xlu1 %v3872_v51  ;;  %3864 = vadd.xlane.f32.xlu0 %v3863_v33  ;;  %v6616_v33 = vld [vmem:[%s11057_s10 + $0x8] sm:$0xff]  }
 0x40b   : > { %v8663_v60 = vpop.xlane.xlu1 %3151  ;;  %v8665_v56 = vpop.xlane.xlu0 %3452  ;;  %6449 = vmatprep.subr.bf16.mxu1 %v6616_v33 }
 0x40c   : > { %11403 = vst [vmem:[#allocation66_spill] sm:$0xff] %v8665_v56  ;;  %6450 = vmatpush3.bf16.msra.mxu1 %v6616_v33  ;;  %v3866_v33 = vsel %vm1618_vm3, %v3848_v62, 0.0  ;;  %v3927_v62 = vsel %vm1618_vm3, %v3911_v57, 0.0 }
 0x40e   : > { %3905 = vadd.xlane.f32.xlu1 %v3904_v52  ;;  %3838 = vadd.xlane.f32.xlu0 %v3837_v26  ;;  %v8688_v52 = vpop.f32.mrf.mxu0 }
 0x40f   : > { %v8675_v21 = vpop.xlane.xlu1 %3455  ;;  %v8677_v51 = vpop.xlane.xlu0 %3484  ;;  %11407 = vst [vmem:[#allocation70_spill] sm:$0xff] %v8688_v52 }
 0x410   : > { %11405 = vst [vmem:[#allocation68_spill] sm:$0xff] %v8675_v21  ;;  %11406 = vst [vmem:[#allocation69_spill] sm:$0xff] %v8677_v51  ;;  %v8700_v58 = vpop.f32.mrf.mxu0 }
 0x411   : > { %11409 = vst [vmem:[#allocation72_spill] sm:$0xff] %v8700_v58 }
 0x412   : > { %3563 = vadd.xlane.f32.xlu1 %v3562_v16  ;;  %3870 = vadd.xlane.f32.xlu0 %v3869_v30  ;;  %v8712_v52 = vpop.f32.mrf.mxu0 }
 0x413   : > { %v8690_v26 = vpop.xlane.xlu1 %3487  ;;  %v8692_v15 = vpop.xlane.xlu0 %3516  ;;  %11411 = vst [vmem:[#allocation74_spill] sm:$0xff] %v8712_v52 }
 0x414   : > { %11408 = vst [vmem:[#allocation71_spill] sm:$0xff] %v8690_v26  ;;  %v8724_v58 = vpop.f32.mrf.mxu0 }
 0x415   : > { %11413 = vst [vmem:[#allocation76_spill] sm:$0xff] %v8724_v58 }
 0x416   : > { %3835 = vadd.xlane.f32.xlu1 %v3834_v18  ;;  %3896 = vadd.xlane.f32.xlu0 %v3895_v3  ;;  %v3898_v3 = vsel %vm1618_vm3, %v3880_v10, 0.0  ;;  %v3914_v10 = vmul.f32 %v8538_v4, %v8624_v31  ;;  %v8734_v57 = vpop.f32.mrf.mxu0 }
 0x417   : > { %v8702_v16 = vpop.xlane.xlu1 %3519  ;;  %v8704_v30 = vpop.xlane.xlu0 %2798  ;;  %11416 = vst [vmem:[#allocation79_spill] sm:$0xff] %v8734_v57 }
 0x418   : > { %11410 = vst [vmem:[#allocation73_spill] sm:$0xff] %v8702_v16  ;;  %v3936_v24 = vsel %vm1618_vm3, %v3914_v10, 0.0  ;;  %v8741_v42 = vpop.f32.mrf.mxu0 }
 0x419   : > { %11419 = vst [vmem:[#allocation82_spill] sm:$0xff] %v8741_v42 }
 0x41a   : > { %3867 = vadd.xlane.f32.xlu1 %v3866_v33  ;;  %3902 = vadd.xlane.f32.xlu0 %v3901_v23  ;;  %v3930_v33 = vsel %vm1618_vm3, %v3912_v49, 0.0  ;;  %v3933_v23 = vsel %vm1618_vm3, %v3913_v8, 0.0  ;;  %v8747_v49 = vpop.f32.mrf.mxu0 }
 0x41b   : > { %v8714_v6 = vpop.xlane.xlu1 %2801  ;;  %v8716_v18 = vpop.xlane.xlu0 %3166  ;;  %11422 = vst [vmem:[#allocation85_spill] sm:$0xff] %v8747_v49  ;;  %v2837_v49 = vmax.f32 %v8406_v50, %v8452_v0 }
 0x41c   : > { %11412 = vst [vmem:[#allocation75_spill] sm:$0xff] %v8714_v6  ;;  %v8753_v8 = vpop.f32.mrf.mxu0 }
 0x41d   : > { %11425 = vst [vmem:[#allocation88_spill] sm:$0xff] %v8753_v8  ;;  %v6617_v8 = vld [vmem:[%s11057_s10] sm:$0xff]  }
 0x41e   : > { %3899 = vadd.xlane.f32.xlu1 %v3898_v3  ;;  %3928 = vadd.xlane.f32.xlu0 %v3927_v62  ;;  %v8759_v10 = vpop.f32.mrf.mxu0 }
 0x41f   : > { %v8726_v55 = vpop.xlane.xlu1 %3169  ;;  %v8728_v63 = vpop.xlane.xlu0 %3470  ;;  %11428 = vst [vmem:[#allocation91_spill] sm:$0xff] %v8759_v10  ;;  %v2838_v10 = vmax.f32 %v8416_v41, %v8460_v53  ;;  %v3204_v53 = vmax.f32 %v8504_v44, %v8516_v39  ;;  %v11436_v41 = vld [vmem:[#allocation51_spill] sm:$0xff]  ;;  %6451 = vmatprep.subr.bf16.mxu1 %v6617_v8 }
 0x420   : > { %11414 = vst [vmem:[#allocation77_spill] sm:$0xff] %v8726_v55  ;;  %11415 = vst [vmem:[#allocation78_spill] sm:$0xff] %v8728_v63  ;;  %v8765_v57 = vpop.f32.mrf.mxu0  ;;  %6452 = vmatpush3.bf16.msra.mxu1 %v6617_v8  ;;  %v3574_v8 = vmax.f32 %v8616_v12, %v8626_v47 }
 0x421   : > { %11431 = vst [vmem:[#allocation94_spill] sm:$0xff] %v8765_v57  ;;  %v3206_v57 = vmax.f32 %v8472_v22, %v8482_v17  ;;  %v11438_v17 = vld [vmem:[#allocation40_spill] sm:$0xff] }
 0x422   : > { %3931 = vadd.xlane.f32.xlu1 %v3930_v33  ;;  %3934 = vadd.xlane.f32.xlu0 %v3933_v23  ;;  %v2842_v22 = vmax.f32 %v11438_v17, %v8528_v54  ;;  %v3207_v54 = vmax.f32 %v8562_v61, %v8574_v28  ;;  %v11443_v17 = vld [vmem:[#allocation60_spill] sm:$0xff] }
 0x423   : > { %v8736_v46 = vpop.xlane.xlu1 %3473  ;;  %v8738_v40 = vpop.xlane.xlu0 %3502 }
 0x424   : > { %11417 = vst [vmem:[#allocation80_spill] sm:$0xff] %v8736_v46  ;;  %11418 = vst [vmem:[#allocation81_spill] sm:$0xff] %v8738_v40 }
 0x426   : > { %3937 = vadd.xlane.f32.xlu1 %v3936_v24 }
 0x427   : > { %v8743_v3 = vpop.xlane.xlu1 %3505  ;;  %v8745_v62 = vpop.xlane.xlu0 %3534 }
 0x428   : > { %11420 = vst [vmem:[#allocation83_spill] sm:$0xff] %v8743_v3  ;;  %11421 = vst [vmem:[#allocation84_spill] sm:$0xff] %v8745_v62 }
 0x42b   : > { %v8749_v4 = vpop.xlane.xlu1 %3537  ;;  %v8751_v31 = vpop.xlane.xlu0 %2792 }
 0x42c   : > { %11423 = vst [vmem:[#allocation86_spill] sm:$0xff] %v8749_v4  ;;  %11424 = vst [vmem:[#allocation87_spill] sm:$0xff] %v8751_v31  ;;  %v11437_v31 = vld [vmem:[#allocation39_spill] sm:$0xff] }
 0x42f   : > { %v8755_v33 = vpop.xlane.xlu1 %2795  ;;  %v8757_v23 = vpop.xlane.xlu0 %3160 }
 0x430   : > { %11426 = vst [vmem:[#allocation89_spill] sm:$0xff] %v8755_v33  ;;  %11427 = vst [vmem:[#allocation90_spill] sm:$0xff] %v8757_v23  ;;  %v2836_v23 = vmax.f32 %v8426_v37, %v8492_v2  ;;  %v3203_v33 = vmax.f32 %v8494_v25, %v8506_v9  ;;  %v11440_v2 = vld [vmem:[#allocation41_spill] sm:$0xff] }
 0x431   : > { %v2839_v37 = vmax.f32 %v11440_v2, %v8552_v45  ;;  %v2846_v45 = vmax.f32 %v2838_v10, %v8592_v59  ;;  %v8830_v10 = vmax.f32 %v3574_v8, %v8639_v13 }
 0x433   : > { %v8761_v58 = vpop.xlane.xlu1 %3163  ;;  %v8763_v24 = vpop.xlane.xlu0 %3464 }
 0x434   : > { %11429 = vst [vmem:[#allocation92_spill] sm:$0xff] %v8761_v58  ;;  %11430 = vst [vmem:[#allocation93_spill] sm:$0xff] %v8763_v24  ;;  %v3205_v58 = vmax.f32 %v8462_v29, %v8474_v19  ;;  %v2841_v19 = vmax.f32 %v11437_v31, %v11436_v41  ;;  %v11442_v41 = vld [vmem:[#allocation42_spill] sm:$0xff] }
 0x435   : > { %v2840_v31 = vmax.f32 %v11442_v41, %v8560_v7  ;;  %v3214_v7 = vmax.f32 %v3206_v57, %v8604_v5  ;;  %v8836_v41 = vmax.f32 %v2836_v23, %v8651_v43  ;;  %v8839_v57 = vmax.f32 %v3203_v33, %v8653_v34 }
 0x436   : > { %v3213_v2 = vmax.f32 %v3205_v58, %v8594_v11  ;;  %v11445_v58 = vld [vmem:[#allocation63_spill] sm:$0xff]  ;;  %v8856_v23 = vmax.f32 %v2842_v22, %v8714_v6  ;;  %v3577_v33 = vmax.f32 %v8728_v63, %v8738_v40 }
 0x437   : > { %v8767_v52 = vpop.xlane.xlu1 %3467  ;;  %v8769_v42 = vpop.xlane.xlu0 %3496 }
 0x438   : > { %11432 = vst [vmem:[#allocation95_spill] sm:$0xff] %v8767_v52  ;;  %11433 = vst [vmem:[#allocation96_spill] sm:$0xff] %v8769_v42  ;;  %v11434_v52 = vld [vmem:[#allocation37_spill] sm:$0xff]  ;;  %v8784_v42 = vpop.f32.mrf.mxu0  ;;  %v8874_v40 = vmax.f32 %v3577_v33, %v8745_v62  ;;  %v11453_v33 = vld [vmem:[#allocation36_spill] sm:$0xff] }
 0x439   : > { %v2835_v24 = vmax.f32 %v11434_v52, %v8484_v35  ;;  %11435 = vst [vmem:[#allocation97_spill] sm:$0xff] %v8784_v42  ;;  %v3209_v35 = vmax.f32 %v8530_v27, %v8542_v14  ;;  %v11439_v42 = vld [vmem:[#allocation54_spill] sm:$0xff]  ;;  %v3571_v14 = vmax.f32 %v8665_v56, %v8677_v51  ;;  %v8844_v51 = vmax.f32 %v3204_v53, %v8663_v60 }
 0x43a   : > { %v3210_v52 = vmax.f32 %v11439_v42, %v8550_v32  ;;  %v3573_v32 = vmax.f32 %v8606_v48, %v8618_v1  ;;  %v2845_v42 = vmax.f32 %v2837_v49, %v8584_v36  ;;  %v8819_v27 = vpop.f32.mrf.mxu0  ;;  %v3572_v49 = vmax.f32 %v8675_v21, %v8690_v26 }
 0x43b   : > { %v8802_v9 = vpop.xlane.xlu1 %3499  ;;  %v8804_v25 = vpop.xlane.xlu0 %3528  ;;  %11444 = vst [vmem:[#allocation60_spill] sm:$0xff] %v8819_v27  ;;  %v8833_v61 = vmax.f32 %v2835_v24, %v11445_v58  ;;  %v8847_v26 = vmax.f32 %v3571_v14, %v8692_v15  ;;  %v8853_v21 = vmax.f32 %v2841_v19, %v8704_v30  ;;  %v3578_v53 = vmax.f32 %v8736_v46, %v8743_v3 }
 0x43c   : > { %11441 = vst [vmem:[#allocation98_spill] sm:$0xff] %v8802_v9  ;;  %v8823_v28 = vmax.f32 %v3573_v32, %v8628_v20  ;;  %v8850_v8 = vmax.f32 %v3572_v49, %v8702_v16  ;;  %v8862_v56 = vpop.f32.mrf.mxu0  ;;  %v8868_v19 = vmax.f32 %v3209_v35, %v8716_v18  ;;  %v8871_v22 = vmax.f32 %v3210_v52, %v8726_v55  ;;  %v11450_v35 = vld [vmem:[#allocation89_spill] sm:$0xff] }
 0x43d   : > { %11447 = vst [vmem:[#allocation99_spill] sm:$0xff] %v8862_v56  ;;  %v8877_v3 = vmax.f32 %v3578_v53, %v8749_v4  ;;  %v11454_v4 = vld [vmem:[#allocation43_spill] sm:$0xff] }
 0x43e   : > { %11448 = vst [vmem:[#allocation100_spill] sm:$0xff] %v8871_v22  ;;  %v8885_v22 = vpop.f32.mrf.mxu0 }
 0x43f   : > { %v8841_v32 = vpop.xlane.xlu1 %3531  ;;  %v2819_v27 = vpop.xlane.xlu0 %2818  ;;  %11452 = vst [vmem:[#allocation102_spill] sm:$0xff] %v8885_v22 }
 0x440   : > { %11446 = vst [vmem:[#allocation63_spill] sm:$0xff] %v8841_v32  ;;  %v2853_v24 = vmax.f32 %v2845_v42, %v2819_v27 }
 0x442   : > { %v2861_v14 = vsub.f32 %v8406_v50, %v2853_v24  ;;  %v2885_v49 = vsub.f32 %v8452_v0, %v2853_v24  ;;  %v2909_v42 = vsub.f32 %v8584_v36, %v2853_v24  ;;  %v2933_v16 = vsub.f32 %v2819_v27, %v2853_v24  ;;  %v11449_v36 = vld [vmem:[#allocation87_spill] sm:$0xff] }
 0x443   : > { %v2822_v56 = vpop.xlane.xlu1 %2821  ;;  %v3187_v46 = vpop.xlane.xlu0 %3186  ;;  %v8880_v27 = vmax.f32 %v2839_v37, %v11449_v36  ;;  %v8883_v24 = vmax.f32 %v2840_v31, %v11450_v35  ;;  %v11455_v37 = vld [vmem:[#allocation45_spill] sm:$0xff] }
 0x444   : > { %v2871_v50 = vmul.f32 1.442695, %v2861_v14  ;;  %v2895_v63 = vmul.f32 1.442695, %v2885_v49  ;;  %v2919_v0 = vmul.f32 1.442695, %v2909_v42  ;;  %v2854_v6 = vmax.f32 %v2846_v45, %v2822_v56 }
 0x445   : > { %11451 = vst [vmem:[#allocation101_spill] sm:$0xff] %v8883_v24  ;;  %v2943_v52 = vmul.f32 1.442695, %v2933_v16  ;;  %v3221_v55 = vmax.f32 %v3213_v2, %v3187_v46 }
 0x446   : > { %6691 = vpow2.f32 %v2871_v50  ;;  %v2862_v53 = vsub.f32 %v11453_v33, %v2854_v6  ;;  %v2886_v62 = vsub.f32 %v11454_v4, %v2854_v6  ;;  %v2910_v14 = vsub.f32 %v8592_v59, %v2854_v6  ;;  %v11456_v50 = vld [vmem:[#allocation90_spill] sm:$0xff]  ;;  %v8897_v59 = vpop.f32.mrf.mxu0 }
 0x447   : > { %6693 = vpow2.f32 %v2895_v63  ;;  %v2934_v49 = vsub.f32 %v2822_v56, %v2854_v6  ;;  %v3229_v45 = vsub.f32 %v8462_v29, %v3221_v55  ;;  %v3253_v42 = vsub.f32 %v11455_v37, %v3221_v55  ;;  %v3190_v36 = vpop.xlane.xlu1 %3189  ;;  %v8892_v31 = vpop.xlane.xlu0 %3554  ;;  %11457 = vst [vmem:[#allocation36_spill] sm:$0xff] %v8897_v59  ;;  %v11458_v63 = vld [vmem:[#allocation96_spill] sm:$0xff]  ;;  %v11459_v37 = vld [vmem:[#allocation93_spill] sm:$0xff] }
 0x448   : > { %6695 = vpow2.f32 %v2919_v0  ;;  %v2873_v2 = vmul.f32 1.442695, %v2862_v53  ;;  %v2897_v16 = vmul.f32 1.442695, %v2886_v62  ;;  %v2921_v22 = vmul.f32 1.442695, %v2910_v14 }
 0x449   : > { %v8895_v35 = vmax.f32 %v3207_v54, %v11456_v50  ;;  %6697 = vpow2.f32 %v2943_v52  ;;  %v2945_v4 = vmul.f32 1.442695, %v2934_v49  ;;  %v3239_v33 = vmul.f32 1.442695, %v3229_v45  ;;  %v11460_v49 = vld [vmem:[#allocation44_spill] sm:$0xff] }
 0x44a   : > { %6699 = vpow2.f32 %v2873_v2  ;;  %v3277_v29 = vsub.f32 %v8594_v11, %v3221_v55  ;;  %v3301_v56 = vsub.f32 %v3187_v46, %v3221_v55  ;;  %v3222_v6 = vmax.f32 %v3214_v7, %v3190_v36  ;;  %v11461_v11 = vld [vmem:[#allocation46_spill] sm:$0xff]  ;;  %v8909_v2 = vpop.f32.mrf.mxu0  ;;  %v11463_v59 = vld [vmem:[#allocation92_spill] sm:$0xff] }
 0x44b   : > { %v3575_v24 = vmax.f32 %v11459_v37, %v11458_v63  ;;  %6701 = vpow2.f32 %v2897_v16  ;;  %v3263_v0 = vmul.f32 1.442695, %v3253_v42  ;;  %v3589_v62 = vmax.f32 %v8823_v28, %v8892_v31  ;;  %v3558_v54 = vpop.xlane.xlu1 %3557  ;;  %v8904_v53 = vpop.xlane.xlu0 %3826  ;;  %11462 = vst [vmem:[#allocation43_spill] sm:$0xff] %v8909_v2 }
 0x44c   : > { %6703 = vpow2.f32 %v2921_v22  ;;  %v3287_v52 = vmul.f32 1.442695, %v3277_v29  ;;  %v3311_v14 = vmul.f32 1.442695, %v3301_v56  ;;  %v3230_v45 = vsub.f32 %v11460_v49, %v3222_v6 }
 0x44d   : > { %6705 = vpow2.f32 %v2945_v4  ;;  %v3254_v55 = vsub.f32 %v11461_v11, %v3222_v6  ;;  %v3278_v7 = vsub.f32 %v8604_v5, %v3222_v6  ;;  %v3302_v46 = vsub.f32 %v3190_v36, %v3222_v6  ;;  %v11465_v4 = vld [vmem:[#allocation95_spill] sm:$0xff] }
 0x44e   : > { %6707 = vpow2.f32 %v3239_v33  ;;  %v3241_v42 = vmul.f32 1.442695, %v3230_v45  ;;  %v3597_v28 = vsub.f32 %v8606_v48, %v3589_v62  ;;  %v3621_v16 = vsub.f32 %v8618_v1, %v3589_v62 }
 0x44f   : > { %v11464_v22 = vmax.f32 %v11443_v17, %v8582_v38  ;;  %v3576_v56 = vmax.f32 %v11465_v4, %v8802_v9  ;;  %6709 = vpow2.f32 %v3263_v0  ;;  %v3265_v5 = vmul.f32 1.442695, %v3254_v55  ;;  %v8921_v36 = vpop.xlane.xlu1 %3829  ;;  %v8923_v6 = vpop.xlane.xlu0 %3858  ;;  %v11470_v4 = vld [vmem:[#allocation37_spill] sm:$0xff] }
 0x450   : > { %v8926_v33 = vmax.f32 %v3575_v24, %v8804_v25  ;;  %6711 = vpow2.f32 %v3287_v52  ;;  %v3289_v48 = vmul.f32 1.442695, %v3278_v7  ;;  %v3645_v1 = vsub.f32 %v8628_v20, %v3589_v62 }
 0x451   : > { %v8917_v29 = vmax.f32 %v11464_v22, %v11463_v59  ;;  %6713 = vpow2.f32 %v3311_v14  ;;  %v3313_v49 = vmul.f32 1.442695, %v3302_v46  ;;  %v3669_v45 = vsub.f32 %v8892_v31, %v3589_v62  ;;  %v8931_v22 = vpop.f32.mrf.mxu0 }
 0x452   : > { %v3590_v11 = vmax.f32 %v8830_v10, %v3558_v54  ;;  %11466 = vst [vmem:[#allocation45_spill] sm:$0xff] %v8931_v22  ;;  %v8934_v0 = vmax.f32 %v3576_v56, %v8841_v32  ;;  %6715 = vpow2.f32 %v3241_v42  ;;  %v3607_v55 = vmul.f32 1.442695, %v3597_v28 }
 0x453   : > { %v3631_v9 = vmul.f32 1.442695, %v3621_v16  ;;  %v8936_v24 = vpop.eup %6691  ;;  %6717 = vpow2.f32 %v3265_v5  ;;  %v8942_v62 = vpop.xlane.xlu1 %3861  ;;  %v3655_v7 = vmul.f32 1.442695, %v3645_v1 }
 0x454   : > { %11467 = vst [vmem:[#allocation90_spill] sm:$0xff] %v8934_v0  ;;  %v3598_v52 = vsub.f32 %v8616_v12, %v3590_v11  ;;  %v3622_v20 = vsub.f32 %v8626_v47, %v3590_v11  ;;  %v2813_v10 = vpop.xlane.xlu0 %2812  ;;  %v8944_v14 = vpop.eup %6693  ;;  %6719 = vpow2.f32 %v3289_v48  ;;  %v3646_v46 = vsub.f32 %v8639_v13, %v3590_v11 }
 0x455   : > { %v3670_v42 = vsub.f32 %v3558_v54, %v3590_v11  ;;  %v8947_v28 = vpop.eup %6695  ;;  %v2957_v12 = vadd.f32 %v8944_v14, %v8936_v24  ;;  %6721 = vpow2.f32 %v3313_v49  ;;  %v3679_v47 = vmul.f32 1.442695, %v3669_v45  ;;  %v8955_v5 = vpop.f32.mrf.mxu0 }
 0x456   : > { %11468 = vst [vmem:[#allocation96_spill] sm:$0xff] %v8947_v28  ;;  %v8953_v56 = vpop.eup %6697  ;;  %11469 = vst [vmem:[#allocation93_spill] sm:$0xff] %v8955_v5  ;;  %6723 = vpow2.f32 %v3607_v55  ;;  %v3609_v48 = vmul.f32 1.442695, %v3598_v52  ;;  %v3633_v1 = vmul.f32 1.442695, %v3622_v20  ;;  %v2851_v13 = vmax.f32 %v8833_v61, %v2813_v10 }
 0x457   : > { %v8958_v54 = vpop.eup %6699  ;;  %v2965_v11 = vadd.f32 %v8947_v28, %v2957_v12  ;;  %6725 = vpow2.f32 %v3631_v9  ;;  %v3657_v31 = vmul.f32 1.442695, %v3646_v46  ;;  %v3681_v49 = vmul.f32 1.442695, %v3670_v42  ;;  %v2816_v45 = vpop.xlane.xlu1 %2815  ;;  %v11471_v55 = vld [vmem:[#allocation47_spill] sm:$0xff] }
 0x458   : > { %v8961_v32 = vpop.xlane.xlu0 %3180  ;;  %v8963_v16 = vpop.eup %6701  ;;  %6727 = vpow2.f32 %v3655_v7  ;;  %v2859_v5 = vsub.f32 %v11470_v4, %v2851_v13  ;;  %v2883_v52 = vsub.f32 %v11471_v55, %v2851_v13  ;;  %v2907_v20 = vsub.f32 %v11445_v58, %v2851_v13 }
 0x459   : > { %v8968_v61 = vpop.eup %6703  ;;  %v2973_v0 = vadd.f32 %v8953_v56, %v2965_v11  ;;  %v2958_v9 = vadd.f32 %v8963_v16, %v8958_v54  ;;  %6729 = vpow2.f32 %v3679_v47  ;;  %v2931_v46 = vsub.f32 %v2813_v10, %v2851_v13  ;;  %v8975_v12 = vpop.f32.mrf.mxu0 }
 0x45a   : > { %11472 = vst [vmem:[#allocation44_spill] sm:$0xff] %v8968_v61  ;;  %v8973_v42 = vpop.eup %6705  ;;  %11473 = vst [vmem:[#allocation46_spill] sm:$0xff] %v8975_v12  ;;  %6731 = vpow2.f32 %v3609_v48  ;;  %v2867_v7 = vmul.f32 1.442695, %v2859_v5  ;;  %v2891_v4 = vmul.f32 1.442695, %v2883_v52  ;;  %v2852_v11 = vmax.f32 %v8836_v41, %v2816_v45 }
 0x45b   : > { %v2915_v2 = vmul.f32 1.442695, %v2907_v20  ;;  %v8977_v55 = vpop.eup %6707  ;;  %6733 = vrcp.f32 %v2973_v0  ;;  %v2966_v58 = vadd.f32 %v8968_v61, %v2958_v9  ;;  %v2939_v28 = vmul.f32 1.442695, %v2931_v46  ;;  %v8981_v22 = vpop.xlane.xlu1 %3183 }
 0x45c   : > { %11474 = vst [vmem:[#allocation37_spill] sm:$0xff] %v8977_v55  ;;  %v8983_v47 = vpop.xlane.xlu0 %3548  ;;  %v8985_v10 = vpop.eup %6709  ;;  %6735 = vpow2.f32 %v3633_v1  ;;  %v3219_v5 = vmax.f32 %v8839_v57, %v8961_v32  ;;  %v8991_v48 = vmax.f32 %v8844_v51, %v8981_v22  ;;  %v11477_v1 = vld [vmem:[#allocation38_spill] sm:$0xff]  ;;  %v11480_v51 = vld [vmem:[#allocation48_spill] sm:$0xff]  ;;  %v2932_v12 = vsub.f32 %v2816_v45, %v2852_v11 }
 0x45d   : > { %11475 = vst [vmem:[#allocation47_spill] sm:$0xff] %v8985_v10  ;;  %v8995_v0 = vmax.f32 %v8847_v26, %v8983_v47  ;;  %v8997_v13 = vpop.eup %6711  ;;  %v2974_v41 = vadd.f32 %v8973_v42, %v2966_v58  ;;  %v3325_v52 = vadd.f32 %v8985_v10, %v8977_v55  ;;  %6737 = vpow2.f32 %v3657_v31  ;;  %v9005_v57 = vpop.f32.mrf.mxu0  ;;  %v11482_v10 = vld [vmem:[#allocation49_spill] sm:$0xff] }
 0x45e   : > { %11476 = vst [vmem:[#allocation103_spill] sm:$0xff] %v8997_v13  ;;  %v2860_v20 = vsub.f32 %v11477_v1, %v2852_v11  ;;  %v9003_v9 = vpop.eup %6713  ;;  %11479 = vst [vmem:[#allocation104_spill] sm:$0xff] %v9005_v57  ;;  %6739 = vpow2.f32 %v3681_v49  ;;  %v2884_v46 = vsub.f32 %v11480_v51, %v2852_v11  ;;  %v2908_v26 = vsub.f32 %v8651_v43, %v2852_v11 }
 0x45f   : > { %11478 = vst [vmem:[#allocation38_spill] sm:$0xff] %v9003_v9  ;;  %v9009_v61 = vpop.eup %6715  ;;  %6741 = vrcp.f32 %v2974_v41  ;;  %v3333_v58 = vadd.f32 %v8997_v13, %v3325_v52  ;;  %v3227_v31 = vsub.f32 %v11482_v10, %v3219_v5  ;;  %v9013_v55 = vpop.xlane.xlu1 %3551  ;;  %v2941_v57 = vmul.f32 1.442695, %v2932_v12 }
 0x460   : > { %11481 = vst [vmem:[#allocation48_spill] sm:$0xff] %v9009_v61  ;;  %v2869_v59 = vmul.f32 1.442695, %v2860_v20  ;;  %v9015_v1 = vpop.xlane.xlu0 %3820  ;;  %v9017_v38 = vpop.eup %6717  ;;  %6743 = vpow2.f32 %v2867_v7  ;;  %v2893_v49 = vmul.f32 1.442695, %v2884_v46  ;;  %v11487_v20 = vld [vmem:[#allocation50_spill] sm:$0xff]  ;;  %v3275_v7 = vsub.f32 %v8653_v34, %v3219_v5 }
 0x461   : > { %11483 = vst [vmem:[#allocation49_spill] sm:$0xff] %v9017_v38  ;;  %v2917_v51 = vmul.f32 1.442695, %v2908_v26  ;;  %v9019_v43 = vpop.eup %6719  ;;  %v3341_v45 = vadd.f32 %v9003_v9, %v3333_v58  ;;  %v3326_v11 = vadd.f32 %v9017_v38, %v9009_v61  ;;  %6745 = vpow2.f32 %v2891_v4  ;;  %v9026_v52 = vpop.f32.mrf.mxu0 }
 0x462   : > { %11484 = vst [vmem:[#allocation105_spill] sm:$0xff] %v9019_v43  ;;  %v3235_v41 = vmul.f32 1.442695, %v3227_v31  ;;  %v9024_v10 = vpop.eup %6721  ;;  %11486 = vst [vmem:[#allocation107_spill] sm:$0xff] %v9026_v52  ;;  %6747 = vpow2.f32 %v2915_v2  ;;  %v3251_v13 = vsub.f32 %v11487_v20, %v3219_v5  ;;  %v3299_v12 = vsub.f32 %v8961_v32, %v3219_v5 }
 0x463   : > { %11485 = vst [vmem:[#allocation106_spill] sm:$0xff] %v9024_v10  ;;  %v9031_v46 = vpop.eup %6723  ;;  %6749 = vrcp.f32 %v3341_v45  ;;  %v3334_v26 = vadd.f32 %v9019_v43, %v3326_v11  ;;  %v3228_v4 = vsub.f32 %v8504_v44, %v8991_v48  ;;  %v3252_v58 = vsub.f32 %v8516_v39, %v8991_v48  ;;  %v9038_v31 = vpop.xlane.xlu1 %3823 }
 0x464   : > { %11488 = vst [vmem:[#allocation50_spill] sm:$0xff] %v9031_v46  ;;  %v9040_v2 = vpop.xlane.xlu0 %3852  ;;  %v9042_v20 = vpop.eup %6725  ;;  %6751 = vpow2.f32 %v2939_v28  ;;  %v3259_v34 = vmul.f32 1.442695, %v3251_v13  ;;  %v3283_v32 = vmul.f32 1.442695, %v3275_v7  ;;  %v3276_v28 = vsub.f32 %v8663_v60, %v8991_v48 }
 0x465   : > { %11489 = vst [vmem:[#allocation108_spill] sm:$0xff] %v9042_v20  ;;  %v3307_v5 = vmul.f32 1.442695, %v3299_v12  ;;  %v9044_v9 = vpop.eup %6727  ;;  %v3342_v45 = vadd.f32 %v9024_v10, %v3334_v26  ;;  %v3693_v44 = vadd.f32 %v9042_v20, %v9031_v46  ;;  %6753 = vpow2.f32 %v2869_v59  ;;  %v9053_v43 = vpop.f32.mrf.mxu0  ;;  %v11494_v12 = vld [vmem:[#allocation66_spill] sm:$0xff] }
 0x466   : > { %11490 = vst [vmem:[#allocation109_spill] sm:$0xff] %v9044_v9  ;;  %v9049_v11 = vmul.f32 1.442695, %v3228_v4  ;;  %v9051_v39 = vpop.eup %6729  ;;  %11492 = vst [vmem:[#allocation111_spill] sm:$0xff] %v9053_v43  ;;  %6755 = vpow2.f32 %v2893_v49  ;;  %v9055_v38 = vmul.f32 1.442695, %v3252_v58  ;;  %v3300_v13 = vsub.f32 %v8981_v22, %v8991_v48 }
 0x467   : > { %11491 = vst [vmem:[#allocation110_spill] sm:$0xff] %v9051_v39  ;;  %v9061_v7 = vpop.eup %6731  ;;  %6757 = vrcp.f32 %v3342_v45  ;;  %v3701_v59 = vadd.f32 %v9044_v9, %v3693_v44  ;;  %v3595_v26 = vsub.f32 %v11494_v12, %v8995_v0  ;;  %v11495_v4 = vld [vmem:[#allocation69_spill] sm:$0xff]  ;;  %v9068_v49 = vpop.xlane.xlu1 %3855  ;;  %v3285_v60 = vmul.f32 1.442695, %v3276_v28 }
 0x468   : > { %11493 = vst [vmem:[#allocation112_spill] sm:$0xff] %v9061_v7  ;;  %v3619_v20 = vsub.f32 %v11495_v4, %v8995_v0  ;;  %v9070_v58 = vpop.xlane.xlu0 %3884  ;;  %v9072_v46 = vpop.eup %6733  ;;  %6759 = vpow2.f32 %v2917_v51  ;;  %v9074_v22 = vmul.f32 1.442695, %v3300_v13  ;;  %v3643_v48 = vsub.f32 %v8692_v15, %v8995_v0 }
 0x469   : > { %11496 = vst [vmem:[#allocation66_spill] sm:$0xff] %v9072_v46  ;;  %v9078_v45 = vpop.eup %6735  ;;  %v9082_v44 = vmul.f32 %v9072_v46, %v8936_v24  ;;  %v9086_v12 = vmul.f32 %v9072_v46, %v8944_v14  ;;  %v3053_v4 = vmul.f32 %v9072_v46, %v8953_v56  ;;  %v3709_v51 = vadd.f32 %v9051_v39, %v3701_v59  ;;  %v9093_v13 = vpop.f32.mrf.mxu0 }
 0x46a   : > { %11497 = vst [vmem:[#allocation69_spill] sm:$0xff] %v9078_v45  ;;  %v9091_v28 = vpop.eup %6737  ;;  %11501 = vst [vmem:[#allocation116_spill] sm:$0xff] %v9093_v13  ;;  %v3694_v15 = vadd.f32 %v9078_v45, %v9061_v7  ;;  %6761 = vpow2.f32 %v2941_v57  ;;  %v9097_v9 = vmul.f32 1.442695, %v3595_v26  ;;  %v9099_v24 = vmul.f32 1.442695, %v3619_v20 }
 0x46b   : > { %11498 = vst [vmem:[#allocation113_spill] sm:$0xff] %v9082_v44  ;;  %11499 = vst [vmem:[#allocation114_spill] sm:$0xff] %v9086_v12  ;;  %v9101_v10 = vpop.eup %6739  ;;  %v9104_v14 = vmul.f32 %v9053_v43, %v3053_v4  ;;  %6763 = vrcp.f32 %v3709_v51  ;;  %v9106_v56 = vmul.f32 1.442695, %v3643_v48  ;;  %v3667_v59 = vsub.f32 %v8983_v47, %v8995_v0  ;;  %v9110_v39 = vpop.xlane.xlu1 %3887  ;;  %v11509_v45 = vld [vmem:[#allocation68_spill] sm:$0xff] }
 0x46c   : > { %11500 = vst [vmem:[#allocation115_spill] sm:$0xff] %v9091_v28  ;;  %11502 = vst [vmem:[#allocation117_spill] sm:$0xff] %v9101_v10  ;;  %v9112_v61 = vpop.xlane.xlu0 %2830  ;;  %v9114_v57 = vpop.eup %6741  ;;  %v3702_v20 = vadd.f32 %v9091_v28, %v3694_v15  ;;  %6765 = vpow2.f32 %v3235_v41  ;;  %v3588_v26 = vmax.f32 %v8850_v8, %v9013_v55  ;;  %v3939_v4 = vmax.f32 %v9015_v1, %v9040_v2 }
 0x46d   : > { %11503 = vst [vmem:[#allocation118_spill] sm:$0xff] %v9104_v14  ;;  %11504 = vst [vmem:[#allocation119_spill] sm:$0xff] %v9114_v57  ;;  %v9121_v48 = vpop.eup %6743  ;;  %v9125_v47 = vmul.f32 %v9114_v57, %v8958_v54  ;;  %v9129_v0 = vmul.f32 %v9114_v57, %v8963_v16  ;;  %v3054_v51 = vmul.f32 %v9114_v57, %v8973_v42  ;;  %6767 = vpow2.f32 %v3259_v34  ;;  %v9135_v8 = vpop.f32.mrf.mxu0  ;;  %v11512_v42 = vld [vmem:[#allocation71_spill] sm:$0xff] }
 0x46e   : > { %v9133_v41 = vpop.eup %6745  ;;  %11508 = vst [vmem:[#allocation123_spill] sm:$0xff] %v9135_v8  ;;  %v3710_v15 = vadd.f32 %v9101_v10, %v3702_v20  ;;  %6769 = vpow2.f32 %v3283_v32  ;;  %v3675_v28 = vmul.f32 1.442695, %v3667_v59  ;;  %v3596_v7 = vsub.f32 %v11509_v45, %v3588_v26  ;;  %v11514_v45 = vld [vmem:[#allocation73_spill] sm:$0xff] }
 0x46f   : > { %11505 = vst [vmem:[#allocation120_spill] sm:$0xff] %v9125_v47  ;;  %11506 = vst [vmem:[#allocation121_spill] sm:$0xff] %v9129_v0  ;;  %v9139_v54 = vpop.eup %6747  ;;  %v9142_v43 = vmul.f32 %v9135_v8, %v3054_v51  ;;  %v2955_v16 = vadd.f32 %v9133_v41, %v9121_v48  ;;  %6771 = vpow2.f32 %v3307_v5  ;;  %v3620_v34 = vsub.f32 %v11512_v42, %v3588_v26  ;;  %v9147_v52 = vpop.xlane.xlu1 %2833  ;;  %v11522_v0 = vld [vmem:[#allocation40_spill] sm:$0xff] }
 0x470   : > { %11507 = vst [vmem:[#allocation122_spill] sm:$0xff] %v9133_v41  ;;  %11510 = vst [vmem:[#allocation68_spill] sm:$0xff] %v9139_v54  ;;  %v9149_v14 = vpop.xlane.xlu0 %3198  ;;  %v9151_v20 = vpop.eup %6749  ;;  %6773 = vrcp.f32 %v3710_v15  ;;  %v3605_v32 = vmul.f32 1.442695, %v3596_v7  ;;  %v3644_v59 = vsub.f32 %v11514_v45, %v3588_v26  ;;  %v3668_v10 = vsub.f32 %v9013_v55, %v3588_v26 }
 0x471   : > { %11511 = vst [vmem:[#allocation124_spill] sm:$0xff] %v9142_v43  ;;  %11513 = vst [vmem:[#allocation71_spill] sm:$0xff] %v9151_v20  ;;  %v9155_v51 = vpop.eup %6751  ;;  %v2963_v8 = vadd.f32 %v9139_v54, %v2955_v16  ;;  %6775 = vpow2.f32 %v9049_v11  ;;  %v3629_v5 = vmul.f32 1.442695, %v3620_v34  ;;  %v3940_v42 = vmax.f32 %v9038_v31, %v9068_v49 }
 0x472   : > { %11515 = vst [vmem:[#allocation73_spill] sm:$0xff] %v9155_v51  ;;  %v9161_v43 = vpop.eup %6753  ;;  %6777 = vpow2.f32 %v9055_v38  ;;  %v3653_v15 = vmul.f32 1.442695, %v3644_v59  ;;  %v3677_v7 = vmul.f32 1.442695, %v3668_v10  ;;  %v9165_v45 = vmax.f32 %v3939_v4, %v9070_v58 }
 0x473   : > { %11516 = vst [vmem:[#allocation125_spill] sm:$0xff] %v9161_v43  ;;  %v9167_v55 = vpop.eup %6755  ;;  %v2971_v26 = vadd.f32 %v9155_v51, %v2963_v8  ;;  %6779 = vpow2.f32 %v3285_v60  ;;  %v9171_v11 = vmax.f32 %v3940_v42, %v9110_v39  ;;  %v2857_v16 = vmax.f32 %v8853_v21, %v9112_v61  ;;  %v9175_v34 = vpop.xlane.xlu1 %3201  ;;  %v11520_v21 = vld [vmem:[#allocation39_spill] sm:$0xff] }
 0x474   : > { %11517 = vst [vmem:[#allocation126_spill] sm:$0xff] %v9167_v55  ;;  %v9177_v20 = vpop.xlane.xlu0 %3566  ;;  %v9179_v38 = vpop.eup %6757  ;;  %v2956_v10 = vadd.f32 %v9167_v55, %v9161_v43  ;;  %6781 = vpow2.f32 %v9074_v22  ;;  %v2858_v60 = vmax.f32 %v8856_v23, %v9147_v52  ;;  %v3225_v4 = vmax.f32 %v8868_v19, %v9149_v14  ;;  %v11521_v42 = vld [vmem:[#allocation51_spill] sm:$0xff]  ;;  %v11570_v43 = vld [vmem:[#allocation89_spill] sm:$0xff] }
 0x475   : > { %11518 = vst [vmem:[#allocation127_spill] sm:$0xff] %v9179_v38  ;;  %v9188_v8 = vpop.eup %6759  ;;  %6783 = vrcp.f32 %v2971_v26  ;;  %v2865_v59 = vsub.f32 %v11520_v21, %v2857_v16  ;;  %v2889_v57 = vsub.f32 %v11521_v42, %v2857_v16  ;;  %v2913_v38 = vsub.f32 %v8704_v30, %v2857_v16 }
 0x476   : > { %11519 = vst [vmem:[#allocation128_spill] sm:$0xff] %v9188_v8  ;;  %v2964_v46 = vadd.f32 %v9188_v8, %v2956_v10  ;;  %6785 = vpow2.f32 %v9097_v9  ;;  %v2937_v22 = vsub.f32 %v9112_v61, %v2857_v16  ;;  %v2866_v23 = vsub.f32 %v11522_v0, %v2858_v60 }
 0x477   : > { %v9197_v12 = vpop.eup %6761  ;;  %6787 = vpow2.f32 %v9099_v24  ;;  %v2879_v19 = vmul.f32 1.442695, %v2865_v59  ;;  %v2903_v26 = vmul.f32 1.442695, %v2889_v57  ;;  %v2927_v47 = vmul.f32 1.442695, %v2913_v38  ;;  %v9200_v21 = vpop.xlane.xlu1 %3569 }
 0x478   : > { %11523 = vst [vmem:[#allocation39_spill] sm:$0xff] %v9197_v12  ;;  %v9202_v42 = vpop.xlane.xlu0 %2824  ;;  %v9204_v30 = vpop.eup %6763  ;;  %v2972_v10 = vadd.f32 %v9197_v12, %v2964_v46  ;;  %6789 = vpow2.f32 %v9106_v56  ;;  %v2951_v61 = vmul.f32 1.442695, %v2937_v22  ;;  %v9208_v9 = vmul.f32 1.442695, %v2866_v23  ;;  %v11526_v24 = vld [vmem:[#allocation52_spill] sm:$0xff] }
 0x479   : > { %11524 = vst [vmem:[#allocation51_spill] sm:$0xff] %v9204_v30  ;;  %v9210_v0 = vpop.eup %6765  ;;  %6791 = vpow2.f32 %v3675_v28  ;;  %v2890_v16 = vsub.f32 %v11526_v24, %v2858_v60  ;;  %v11527_v57 = vld [vmem:[#allocation75_spill] sm:$0xff]  ;;  %v2938_v59 = vsub.f32 %v9147_v52, %v2858_v60  ;;  %v11529_v30 = vld [vmem:[#allocation53_spill] sm:$0xff]  ;;  %v3281_v56 = vsub.f32 %v8716_v18, %v3225_v4 }
 0x47a   : > { %11525 = vst [vmem:[#allocation40_spill] sm:$0xff] %v9210_v0  ;;  %v2914_v38 = vsub.f32 %v11527_v57, %v2858_v60  ;;  %v9215_v44 = vpop.eup %6767  ;;  %6793 = vrcp.f32 %v2972_v10  ;;  %v3233_v13 = vsub.f32 %v11529_v30, %v3225_v4  ;;  %v11530_v46 = vld [vmem:[#allocation55_spill] sm:$0xff] }
 0x47b   : > { %11528 = vst [vmem:[#allocation52_spill] sm:$0xff] %v9215_v44  ;;  %v3257_v12 = vsub.f32 %v11530_v46, %v3225_v4  ;;  %v9220_v22 = vpop.eup %6769  ;;  %v3323_v28 = vadd.f32 %v9215_v44, %v9210_v0  ;;  %6795 = vpow2.f32 %v3605_v32  ;;  %v2905_v23 = vmul.f32 1.442695, %v2890_v16  ;;  %v9226_v57 = vpop.xlane.xlu1 %2827  ;;  %v11543_v0 = vld [vmem:[#allocation78_spill] sm:$0xff] }
 0x47c   : > { %11531 = vst [vmem:[#allocation75_spill] sm:$0xff] %v9220_v22  ;;  %v9224_v24 = vmul.f32 1.442695, %v2914_v38  ;;  %v9228_v52 = vpop.xlane.xlu0 %3890  ;;  %v9230_v60 = vpop.eup %6771  ;;  %6797 = vpow2.f32 %v3629_v5  ;;  %v9232_v30 = vmul.f32 1.442695, %v2938_v59  ;;  %v3305_v38 = vsub.f32 %v9149_v14, %v3225_v4  ;;  %v11536_v5 = vld [vmem:[#allocation100_spill] sm:$0xff] }
 0x47d   : > { %11532 = vst [vmem:[#allocation53_spill] sm:$0xff] %v9228_v52  ;;  %11533 = vst [vmem:[#allocation55_spill] sm:$0xff] %v9230_v60  ;;  %v9234_v10 = vmul.f32 1.442695, %v3233_v13  ;;  %v9236_v18 = vmul.f32 1.442695, %v3257_v12  ;;  %v9238_v46 = vpop.eup %6773  ;;  %v3331_v32 = vadd.f32 %v9220_v22, %v3323_v28  ;;  %6799 = vpow2.f32 %v3653_v15 }
 0x47e   : > { %11534 = vst [vmem:[#allocation129_spill] sm:$0xff] %v9238_v46  ;;  %v9241_v16 = vmul.f32 1.442695, %v3281_v56  ;;  %v9244_v44 = vpop.eup %6775  ;;  %6801 = vpow2.f32 %v3677_v7  ;;  %v3226_v59 = vmax.f32 %v11536_v5, %v9175_v34  ;;  %v3593_v13 = vmax.f32 %v8874_v40, %v9177_v20  ;;  %v11539_v28 = vld [vmem:[#allocation54_spill] sm:$0xff] }
 0x47f   : > { %11535 = vst [vmem:[#allocation130_spill] sm:$0xff] %v9244_v44  ;;  %v9252_v12 = vmax.f32 %v8877_v3, %v9200_v21  ;;  %v9254_v46 = vpop.eup %6777  ;;  %v3339_v15 = vadd.f32 %v9230_v60, %v3331_v32  ;;  %6803 = vpow2.f32 %v2879_v19  ;;  %v9257_v56 = vmul.f32 1.442695, %v3305_v38  ;;  %v9263_v7 = vpop.xlane.xlu1 %3893  ;;  %v11540_v32 = vld [vmem:[#allocation56_spill] sm:$0xff]  ;;  %v11542_v60 = vld [vmem:[#allocation77_spill] sm:$0xff] }
 0x480   : > { %11537 = vst [vmem:[#allocation100_spill] sm:$0xff] %v9254_v46  ;;  %v9261_v14 = vmax.f32 %v8880_v27, %v9202_v42  ;;  %v9265_v4 = vpop.xlane.xlu0 %3192  ;;  %v9267_v40 = vpop.eup %6779  ;;  %v3324_v3 = vadd.f32 %v9254_v46, %v9244_v44  ;;  %6805 = vpow2.f32 %v2903_v26  ;;  %v3234_v5 = vsub.f32 %v11539_v28, %v3226_v59 }
 0x481   : > { %11538 = vst [vmem:[#allocation131_spill] sm:$0xff] %v9267_v40  ;;  %v3258_v19 = vsub.f32 %v11540_v32, %v3226_v59  ;;  %v9273_v38 = vpop.eup %6781  ;;  %6807 = vrcp.f32 %v3339_v15  ;;  %v3282_v27 = vsub.f32 %v11542_v60, %v3226_v59  ;;  %v3306_v22 = vsub.f32 %v9175_v34, %v3226_v59 }
 0x482   : > { %11541 = vst [vmem:[#allocation54_spill] sm:$0xff] %v9273_v38  ;;  %v3601_v51 = vsub.f32 %v11543_v0, %v3593_v13  ;;  %v9278_v8 = vpop.eup %6783  ;;  %v3332_v54 = vadd.f32 %v9267_v40, %v3324_v3  ;;  %6809 = vpow2.f32 %v2927_v47  ;;  %v9281_v46 = vmul.f32 1.442695, %v3234_v5  ;;  %v11546_v47 = vld [vmem:[#allocation81_spill] sm:$0xff]  ;;  %v11547_v5 = vld [vmem:[#allocation84_spill] sm:$0xff] }
 0x483   : > { %v9283_v26 = vmul.f32 1.442695, %v3258_v19  ;;  %v9285_v28 = vpop.eup %6785  ;;  %6811 = vpow2.f32 %v2951_v61  ;;  %v9287_v32 = vmul.f32 1.442695, %v3282_v27  ;;  %v9289_v15 = vmul.f32 1.442695, %v3306_v22  ;;  %v9293_v34 = vpop.xlane.xlu1 %3919 }
 0x484   : > { %11544 = vst [vmem:[#allocation56_spill] sm:$0xff] %v9285_v28  ;;  %v9291_v60 = vmul.f32 1.442695, %v3601_v51  ;;  %v9295_v0 = vpop.eup %6787  ;;  %v3340_v59 = vadd.f32 %v9273_v38, %v3332_v54  ;;  %6813 = vpow2.f32 %v9208_v9  ;;  %v3625_v3 = vsub.f32 %v11546_v47, %v3593_v13  ;;  %v11549_v22 = vld [vmem:[#allocation80_spill] sm:$0xff]  ;;  %v9308_v44 = vpop.xlane.xlu0 %3560 }
 0x485   : > { %11545 = vst [vmem:[#allocation77_spill] sm:$0xff] %v9295_v0  ;;  %v3649_v19 = vsub.f32 %v11547_v5, %v3593_v13  ;;  %v9301_v40 = vpop.eup %6789  ;;  %v3691_v61 = vadd.f32 %v9295_v0, %v9285_v28  ;;  %6815 = vpow2.f32 %v2905_v23  ;;  %v3673_v51 = vsub.f32 %v9177_v20, %v3593_v13  ;;  %v11551_v5 = vld [vmem:[#allocation83_spill] sm:$0xff]  ;;  %v11557_v0 = vld [vmem:[#allocation57_spill] sm:$0xff] }
 0x486   : > { %11548 = vst [vmem:[#allocation78_spill] sm:$0xff] %v9301_v40  ;;  %v3602_v27 = vsub.f32 %v11549_v22, %v9252_v12  ;;  %v9310_v54 = vpop.eup %6791  ;;  %6817 = vrcp.f32 %v3340_v59  ;;  %v9312_v9 = vmul.f32 1.442695, %v3625_v3  ;;  %v3626_v38 = vsub.f32 %v11551_v5, %v9252_v12 }
 0x487   : > { %11550 = vst [vmem:[#allocation81_spill] sm:$0xff] %v9310_v54  ;;  %v9314_v47 = vmul.f32 1.442695, %v3649_v19  ;;  %v9318_v55 = vpop.eup %6793  ;;  %v3699_v23 = vadd.f32 %v9301_v40, %v3691_v61  ;;  %6819 = vpow2.f32 %v9224_v24  ;;  %v9322_v20 = vmul.f32 1.442695, %v3673_v51  ;;  %v9326_v22 = vpop.xlane.xlu1 %3925  ;;  %v11554_v19 = vld [vmem:[#allocation86_spill] sm:$0xff] }
 0x488   : > { %11552 = vst [vmem:[#allocation84_spill] sm:$0xff] %v9318_v55  ;;  %v9324_v13 = vmul.f32 1.442695, %v3602_v27  ;;  %v9328_v59 = vpop.eup %6795  ;;  %6821 = vpow2.f32 %v9232_v30  ;;  %v9331_v3 = vmul.f32 1.442695, %v3626_v38  ;;  %v3650_v5 = vsub.f32 %v11554_v19, %v9252_v12  ;;  %v11556_v51 = vld [vmem:[#allocation41_spill] sm:$0xff]  ;;  %v9362_v28 = vpop.xlane.xlu0 %3916 }
 0x489   : > { %11553 = vst [vmem:[#allocation80_spill] sm:$0xff] %v9328_v59  ;;  %v3674_v61 = vsub.f32 %v9200_v21, %v9252_v12  ;;  %v9337_v40 = vpop.eup %6797  ;;  %v3707_v24 = vadd.f32 %v9310_v54, %v3699_v23  ;;  %6823 = vpow2.f32 %v9234_v10  ;;  %v2863_v27 = vsub.f32 %v11556_v51, %v9261_v14  ;;  %v11569_v55 = vld [vmem:[#allocation58_spill] sm:$0xff] }
 0x48a   : > { %11555 = vst [vmem:[#allocation83_spill] sm:$0xff] %v9337_v40  ;;  %v2887_v30 = vsub.f32 %v11557_v0, %v9261_v14  ;;  %v9345_v38 = vpop.eup %6799  ;;  %v3692_v19 = vadd.f32 %v9337_v40, %v9328_v59  ;;  %6825 = vpow2.f32 %v9236_v18  ;;  %v9350_v21 = vmul.f32 1.442695, %v3650_v5  ;;  %v11560_v0 = vld [vmem:[#allocation87_spill] sm:$0xff] }
 0x48b   : > { %11558 = vst [vmem:[#allocation86_spill] sm:$0xff] %v9345_v38  ;;  %v9352_v12 = vmul.f32 1.442695, %v3674_v61  ;;  %v9354_v23 = vpop.eup %6801  ;;  %6827 = vrcp.f32 %v3707_v24  ;;  %v9356_v10 = vmul.f32 1.442695, %v2863_v27  ;;  %v2911_v54 = vsub.f32 %v11560_v0, %v9261_v14  ;;  %v9364_v41 = vpop.xlane.xlu1 %3195  ;;  %v11562_v61 = vld [vmem:[#allocation101_spill] sm:$0xff] }
 0x48c   : > { %11559 = vst [vmem:[#allocation41_spill] sm:$0xff] %v9354_v23  ;;  %v9358_v51 = vmul.f32 1.442695, %v2887_v30  ;;  %v9366_v40 = vpop.eup %6803  ;;  %v3700_v18 = vadd.f32 %v9345_v38, %v3692_v19  ;;  %6829 = vpow2.f32 %v9241_v16  ;;  %v2935_v5 = vsub.f32 %v9202_v42, %v9261_v14 }
 0x48d   : > { %11561 = vst [vmem:[#allocation57_spill] sm:$0xff] %v9366_v40  ;;  %v2856_v24 = vmax.f32 %v11562_v61, %v9226_v57  ;;  %v9374_v27 = vpop.eup %6805  ;;  %6831 = vpow2.f32 %v9257_v56  ;;  %v9377_v30 = vmul.f32 1.442695, %v2911_v54  ;;  %v11564_v0 = vmax.f32 %v8904_v53, %v8923_v6 }
 0x48e   : > { %11563 = vst [vmem:[#allocation87_spill] sm:$0xff] %v9374_v27  ;;  %v11565_v16 = vmax.f32 %v8921_v36, %v8942_v62  ;;  %v9391_v14 = vpop.eup %6807  ;;  %v3708_v19 = vadd.f32 %v9354_v23, %v3700_v18  ;;  %v2961_v56 = vadd.f32 %v9374_v27, %v9366_v40  ;;  %6833 = vpow2.f32 %v9281_v46 }
 0x48f   : > { %v9383_v59 = vmax.f32 %v11564_v0, %v9228_v52  ;;  %11566 = vst [vmem:[#allocation101_spill] sm:$0xff] %v9391_v14  ;;  %v9397_v54 = vmul.f32 1.442695, %v2935_v5  ;;  %v9399_v61 = vpop.eup %6809  ;;  %6835 = vpow2.f32 %v9283_v26  ;;  %v11568_v0 = vld [vmem:[#allocation42_spill] sm:$0xff]  ;;  %v2912_v52 = vsub.f32 %v11570_v43, %v2856_v24  ;;  %v9405_v14 = vpop.xlane.xlu1 %3841 }
 0x490   : > { %v9389_v42 = vmax.f32 %v11565_v16, %v9263_v7  ;;  %11567 = vst [vmem:[#allocation132_spill] sm:$0xff] %v9399_v61  ;;  %v2864_v38 = vsub.f32 %v11568_v0, %v2856_v24  ;;  %v2888_v16 = vsub.f32 %v11569_v55, %v2856_v24  ;;  %v9407_v18 = vpop.eup %6811  ;;  %6837 = vrcp.f32 %v3708_v19  ;;  %v9422_v0 = vpop.xlane.xlu0 %3922 }
 0x491   : > { %11571 = vst [vmem:[#allocation42_spill] sm:$0xff] %v9407_v18  ;;  %v2969_v23 = vadd.f32 %v9399_v61, %v2961_v56  ;;  %v2936_v46 = vsub.f32 %v9226_v57, %v2856_v24  ;;  %v3223_v5 = vmax.f32 %v8895_v35, %v9265_v4  ;;  %v9413_v27 = vpop.eup %6813  ;;  %6839 = vpow2.f32 %v9287_v32  ;;  %v11573_v35 = vld [vmem:[#allocation59_spill] sm:$0xff] }
 0x492   : > { %v9416_v26 = vmul.f32 1.442695, %v2864_v38  ;;  %v9418_v55 = vmul.f32 1.442695, %v2888_v16  ;;  %v9420_v43 = vmul.f32 1.442695, %v2912_v52  ;;  %v9424_v19 = vpop.eup %6815  ;;  %6841 = vpow2.f32 %v9289_v15 }
 0x493   : > { %11572 = vst [vmem:[#allocation58_spill] sm:$0xff] %v9424_v19  ;;  %v2977_v56 = vadd.f32 %v9407_v18, %v2969_v23  ;;  %v9428_v57 = vmul.f32 1.442695, %v2936_v46  ;;  %v3231_v24 = vsub.f32 %v11573_v35, %v3223_v5  ;;  %v9431_v61 = vpop.eup %6817  ;;  %v2962_v32 = vadd.f32 %v9424_v19, %v9413_v27  ;;  %v11575_v52 = vld [vmem:[#allocation61_spill] sm:$0xff] }
 0x494   : > { %11574 = vst [vmem:[#allocation89_spill] sm:$0xff] %v9431_v61  ;;  %6843 = vpow2.f32 %v9291_v60  ;;  %v3255_v38 = vsub.f32 %v11575_v52, %v3223_v5  ;;  %v3279_v16 = vsub.f32 %v11456_v50, %v3223_v5  ;;  %v9438_v40 = vpop.eup %6819  ;;  %v3303_v15 = vsub.f32 %v9265_v4, %v3223_v5  ;;  %v9453_v50 = vpop.xlane.xlu1 %3873 }
 0x495   : > { %11576 = vst [vmem:[#allocation59_spill] sm:$0xff] %v9438_v40  ;;  %6845 = vrcp.f32 %v2977_v56  ;;  %v9440_v23 = vmul.f32 1.442695, %v3231_v24  ;;  %v3956_v46 = vmax.f32 %v9171_v11, %v9293_v34  ;;  %v9445_v35 = vpop.eup %6821  ;;  %v2970_v61 = vadd.f32 %v9438_v40, %v2962_v32 }
 0x496   : > { %11577 = vst [vmem:[#allocation61_spill] sm:$0xff] %v9445_v35  ;;  %6847 = vpow2.f32 %v9312_v9  ;;  %v9449_v60 = vmul.f32 1.442695, %v3255_v38  ;;  %v9451_v52 = vmul.f32 1.442695, %v3279_v16  ;;  %v9455_v56 = vpop.eup %6823  ;;  %v9468_v16 = vpop.xlane.xlu0 %3832 }
 0x497   : > { %11578 = vst [vmem:[#allocation133_spill] sm:$0xff] %v9455_v56  ;;  %6849 = vpow2.f32 %v9314_v47  ;;  %v9458_v4 = vmul.f32 1.442695, %v3303_v15  ;;  %v3964_v11 = vsub.f32 %v9038_v31, %v3956_v46  ;;  %v3988_v5 = vsub.f32 %v9068_v49, %v3956_v46  ;;  %v9462_v24 = vpop.eup %6825 }
 0x498   : > { %11579 = vst [vmem:[#allocation134_spill] sm:$0xff] %v9462_v24  ;;  %v2978_v9 = vadd.f32 %v9445_v35, %v2970_v61  ;;  %6851 = vpow2.f32 %v9322_v20  ;;  %v4012_v32 = vsub.f32 %v9110_v39, %v3956_v46  ;;  %v4036_v38 = vsub.f32 %v9293_v34, %v3956_v46  ;;  %v9470_v18 = vpop.eup %6827 }
 0x499   : > { %11580 = vst [vmem:[#allocation135_spill] sm:$0xff] %v9470_v18  ;;  %v3329_v47 = vadd.f32 %v9462_v24, %v9455_v56  ;;  %6853 = vpow2.f32 %v9324_v13  ;;  %v9475_v31 = vmul.f32 1.442695, %v3964_v11  ;;  %v9477_v49 = vmul.f32 1.442695, %v3988_v5  ;;  %v9479_v61 = vpop.eup %6829  ;;  %v11608_v24 = vld [vmem:[#allocation73_spill] sm:$0xff] }
 0x49a   : > { %11581 = vst [vmem:[#allocation136_spill] sm:$0xff] %v9479_v61  ;;  %6855 = vrcp.f32 %v2978_v9  ;;  %v9481_v20 = vmul.f32 1.442695, %v4012_v32  ;;  %v9483_v39 = vmul.f32 1.442695, %v4036_v38  ;;  %v3591_v34 = vmax.f32 %v8926_v33, %v9308_v44  ;;  %v9487_v15 = vpop.eup %6831  ;;  %v9501_v38 = vpop.xlane.xlu1 %3905 }
 0x49b   : > { %11582 = vst [vmem:[#allocation137_spill] sm:$0xff] %v9487_v15  ;;  %v3337_v46 = vadd.f32 %v9479_v61, %v3329_v47  ;;  %6857 = vpow2.f32 %v9331_v3  ;;  %v3958_v13 = vmax.f32 %v9389_v42, %v9326_v22  ;;  %v3955_v11 = vmax.f32 %v9165_v45, %v9362_v28  ;;  %v9495_v5 = vpop.eup %6833 }
 0x49c   : > { %11583 = vst [vmem:[#allocation138_spill] sm:$0xff] %v9495_v5  ;;  %6859 = vpow2.f32 %v9350_v21  ;;  %v3599_v9 = vsub.f32 %v11459_v37, %v3591_v34  ;;  %v3623_v33 = vsub.f32 %v11458_v63, %v3591_v34  ;;  %v3647_v32 = vsub.f32 %v8804_v25, %v3591_v34  ;;  %v9503_v47 = vpop.eup %6835  ;;  %v9518_v21 = vpop.xlane.xlu0 %3864 }
 0x49d   : > { %11584 = vst [vmem:[#allocation139_spill] sm:$0xff] %v9503_v47  ;;  %v3345_v3 = vadd.f32 %v9487_v15, %v3337_v46  ;;  %6861 = vpow2.f32 %v9352_v12  ;;  %v3671_v45 = vsub.f32 %v9308_v44, %v3591_v34  ;;  %v3966_v42 = vsub.f32 %v8921_v36, %v3958_v13  ;;  %v9509_v18 = vpop.eup %6837 }
 0x49e   : > { %11585 = vst [vmem:[#allocation140_spill] sm:$0xff] %v9509_v18  ;;  %v3330_v37 = vadd.f32 %v9503_v47, %v9495_v5  ;;  %6863 = vpow2.f32 %v9356_v10  ;;  %v9514_v25 = vmul.f32 1.442695, %v3599_v9  ;;  %v9516_v63 = vmul.f32 1.442695, %v3623_v33  ;;  %v9520_v46 = vpop.eup %6839 }
 0x49f   : > { %11586 = vst [vmem:[#allocation141_spill] sm:$0xff] %v9520_v46  ;;  %6865 = vrcp.f32 %v3345_v3  ;;  %v9522_v12 = vmul.f32 1.442695, %v3647_v32  ;;  %v9524_v44 = vmul.f32 1.442695, %v3671_v45  ;;  %v9528_v34 = vpop.eup %6841  ;;  %v3990_v10 = vsub.f32 %v8942_v62, %v3958_v13 }
 0x4a0   : > { %v9526_v36 = vmul.f32 1.442695, %v3966_v42  ;;  %11587 = vst [vmem:[#allocation142_spill] sm:$0xff] %v9528_v34  ;;  %v3338_v18 = vadd.f32 %v9520_v46, %v3330_v37  ;;  %6867 = vpow2.f32 %v9358_v51  ;;  %v4014_v9 = vsub.f32 %v9263_v7, %v3958_v13  ;;  %v9548_v7 = vpop.xlane.xlu1 %3563 }
 0x4a1   : > { %v9534_v33 = vpop.eup %6843  ;;  %6869 = vpow2.f32 %v9377_v30  ;;  %v4038_v32 = vsub.f32 %v9326_v22, %v3958_v13  ;;  %v3963_v3 = vsub.f32 %v9015_v1, %v3955_v11  ;;  %v3987_v45 = vsub.f32 %v9040_v2, %v3955_v11 }
 0x4a2   : > { %11588 = vst [vmem:[#allocation143_spill] sm:$0xff] %v9534_v33  ;;  %v9540_v42 = vpop.eup %6845  ;;  %v3346_v37 = vadd.f32 %v9528_v34, %v3338_v18  ;;  %6871 = vpow2.f32 %v9397_v54  ;;  %v9544_v51 = vmul.f32 1.442695, %v3990_v10  ;;  %v9546_v62 = vmul.f32 1.442695, %v4014_v9  ;;  %v9565_v10 = vpop.xlane.xlu0 %3838 }
 0x4a3   : > { %v9550_v15 = vpop.eup %6847  ;;  %6873 = vpow2.f32 %v9416_v26  ;;  %v9553_v22 = vmul.f32 1.442695, %v4038_v32  ;;  %v9555_v1 = vmul.f32 1.442695, %v3963_v3  ;;  %v9557_v2 = vmul.f32 1.442695, %v3987_v45 }
 0x4a4   : > { %11589 = vst [vmem:[#allocation144_spill] sm:$0xff] %v9550_v15  ;;  %v9559_v30 = vpop.eup %6849  ;;  %6875 = vrcp.f32 %v3346_v37  ;;  %v3697_v54 = vadd.f32 %v9550_v15, %v9534_v33  ;;  %v4011_v18 = vsub.f32 %v9070_v58, %v3955_v11  ;;  %v4035_v13 = vsub.f32 %v9362_v28, %v3955_v11  ;;  %v11594_v15 = vld [vmem:[#allocation92_spill] sm:$0xff] }
 0x4a5   : > { %11590 = vst [vmem:[#allocation145_spill] sm:$0xff] %v9559_v30  ;;  %v9567_v9 = vpop.eup %6851  ;;  %6877 = vpow2.f32 %v9418_v55  ;;  %v3224_v26 = vmax.f32 %v8917_v29, %v9364_v41  ;;  %v3957_v32 = vmax.f32 %v9383_v59, %v9422_v0  ;;  %v2987_v3 = vmul.f32 %v9278_v8, %v9121_v48  ;;  %v11593_v59 = vld [vmem:[#allocation62_spill] sm:$0xff] }
 0x4a6   : > { %11591 = vst [vmem:[#allocation146_spill] sm:$0xff] %v9567_v9  ;;  %v9576_v45 = vpop.eup %6853  ;;  %v3705_v58 = vadd.f32 %v9559_v30, %v3697_v54  ;;  %6879 = vpow2.f32 %v9420_v43  ;;  %v9580_v28 = vmul.f32 1.442695, %v4011_v18  ;;  %v9582_v11 = vmul.f32 1.442695, %v4035_v13  ;;  %v9596_v13 = vpop.xlane.xlu1 %3835 }
 0x4a7   : > { %11592 = vst [vmem:[#allocation147_spill] sm:$0xff] %v9576_v45  ;;  %v9584_v55 = vpop.eup %6855  ;;  %6881 = vpow2.f32 %v9428_v57  ;;  %v3232_v29 = vsub.f32 %v11443_v17, %v3224_v26  ;;  %v3256_v37 = vsub.f32 %v11593_v59, %v3224_v26  ;;  %v3280_v48 = vsub.f32 %v11594_v15, %v3224_v26 }
 0x4a8   : > { %v9590_v33 = vpop.eup %6857  ;;  %v3713_v54 = vadd.f32 %v9567_v9, %v3705_v58  ;;  %6883 = vpow2.f32 %v9440_v23  ;;  %v3304_v43 = vsub.f32 %v9364_v41, %v3224_v26  ;;  %v3965_v18 = vsub.f32 %v8904_v53, %v3957_v32  ;;  %v9615_v26 = vpop.xlane.xlu0 %3870 }
 0x4a9   : > { %11595 = vst [vmem:[#allocation62_spill] sm:$0xff] %v9590_v33  ;;  %v9598_v30 = vpop.eup %6859  ;;  %v3698_v17 = vadd.f32 %v9590_v33, %v9576_v45  ;;  %6885 = vpow2.f32 %v9449_v60  ;;  %v9603_v57 = vmul.f32 1.442695, %v3232_v29  ;;  %v9605_v15 = vmul.f32 1.442695, %v3256_v37  ;;  %v11598_v29 = vld [vmem:[#allocation53_spill] sm:$0xff] }
 0x4aa   : > { %11596 = vst [vmem:[#allocation92_spill] sm:$0xff] %v9598_v30  ;;  %v9607_v58 = vpop.eup %6861  ;;  %6887 = vrcp.f32 %v3713_v54  ;;  %v9609_v23 = vmul.f32 1.442695, %v3280_v48  ;;  %v9611_v41 = vmul.f32 1.442695, %v3304_v43  ;;  %v3989_v60 = vsub.f32 %v8923_v6, %v3957_v32  ;;  %v11600_v54 = vld [vmem:[#allocation125_spill] sm:$0xff] }
 0x4ab   : > { %11597 = vst [vmem:[#allocation148_spill] sm:$0xff] %v9607_v58  ;;  %v9613_v53 = vmul.f32 1.442695, %v3965_v18  ;;  %v9617_v59 = vpop.eup %6863  ;;  %v3706_v9 = vadd.f32 %v9598_v30, %v3698_v17  ;;  %6889 = vpow2.f32 %v9451_v52  ;;  %v4013_v37 = vsub.f32 %v11598_v29, %v3957_v32  ;;  %v11601_v43 = vld [vmem:[#allocation84_spill] sm:$0xff]  ;;  %v11602_v45 = vld [vmem:[#allocation65_spill] sm:$0xff] }
 0x4ac   : > { %v9623_v33 = vpop.eup %6865  ;;  %6891 = vpow2.f32 %v9458_v4  ;;  %v4037_v48 = vsub.f32 %v9422_v0, %v3957_v32  ;;  %v2988_v18 = vmul.f32 %v11601_v43, %v11600_v54  ;;  %v2995_v34 = vmul.f32 %v2987_v3, %v11602_v45  ;;  %v11603_v32 = vld [vmem:[#allocation70_spill] sm:$0xff]  ;;  %v9646_v54 = vpop.xlane.xlu1 %3867  ;;  %v11606_v30 = vld [vmem:[#allocation68_spill] sm:$0xff] }
 0x4ad   : > { %11599 = vst [vmem:[#allocation53_spill] sm:$0xff] %v9623_v33  ;;  %v9630_v46 = vpop.eup %6867  ;;  %v3714_v17 = vadd.f32 %v9607_v58, %v3706_v9  ;;  %6893 = vpow2.f32 %v9475_v31  ;;  %v9634_v6 = vmul.f32 1.442695, %v3989_v60  ;;  %v9636_v52 = vmul.f32 1.442695, %v4013_v37  ;;  %v11604_v31 = vld [vmem:[#allocation122_spill] sm:$0xff]  ;;  %v9664_v5 = vpop.xlane.xlu0 %3896 }
 0x4ae   : > { %v9638_v29 = vpop.eup %6869  ;;  %v2959_v0 = vadd.f32 %v9630_v46, %v9617_v59  ;;  %6895 = vpow2.f32 %v9477_v49  ;;  %v9643_v4 = vmul.f32 1.442695, %v4037_v48  ;;  %v2996_v3 = vmul.f32 %v2988_v18, %v11603_v32  ;;  %v11605_v37 = vld [vmem:[#allocation126_spill] sm:$0xff]  ;;  %v11607_v48 = vld [vmem:[#allocation128_spill] sm:$0xff]  ;;  %v11611_v33 = vld [vmem:[#allocation91_spill] sm:$0xff] }
 0x4af   : > { %v9648_v9 = vpop.eup %6871  ;;  %6897 = vrcp.f32 %v3714_v17  ;;  %v3003_v60 = vmul.f32 %v9278_v8, %v11604_v31  ;;  %v3004_v58 = vmul.f32 %v11601_v43, %v11605_v37  ;;  %v3027_v61 = vmul.f32 %v9278_v8, %v11606_v30  ;;  %v11610_v37 = vld [vmem:[#allocation85_spill] sm:$0xff]  ;;  %v11612_v32 = vld [vmem:[#allocation36_spill] sm:$0xff] }
 0x4b0   : > { %v9656_v47 = vpop.eup %6873  ;;  %v2967_v49 = vadd.f32 %v9638_v29, %v2959_v0  ;;  %6899 = vpow2.f32 %v9481_v20  ;;  %v3028_v18 = vmul.f32 %v11601_v43, %v11607_v48  ;;  %v3051_v17 = vmul.f32 %v9278_v8, %v11608_v24  ;;  %v11613_v48 = vld [vmem:[#allocation45_spill] sm:$0xff]  ;;  %v11614_v24 = vld [vmem:[#allocation39_spill] sm:$0xff] }
 0x4b1   : > { %v9666_v31 = vpop.eup %6875  ;;  %6901 = vpow2.f32 %v9483_v39  ;;  %v3011_v30 = vmul.f32 %v3003_v60, %v11610_v37  ;;  %v3012_v56 = vmul.f32 %v3004_v58, %v11611_v33  ;;  %v3035_v0 = vmul.f32 %v3027_v61, %v11612_v32  ;;  %v9681_v39 = vpop.f32.mrf.mxu0 }
 0x4b2   : > { %11609 = vst [vmem:[#allocation125_spill] sm:$0xff] %v9666_v31  ;;  %v9672_v45 = vpop.eup %6877  ;;  %v2975_v20 = vadd.f32 %v9648_v9, %v2967_v49  ;;  %6903 = vpow2.f32 %v9514_v25  ;;  %v3036_v8 = vmul.f32 %v3028_v18, %v11613_v48  ;;  %v3052_v35 = vmul.f32 %v11601_v43, %v11614_v24  ;;  %11615 = vst [vmem:[#allocation84_spill] sm:$0xff] %v9681_v39  ;;  %v11616_v25 = vld [vmem:[#allocation116_spill] sm:$0xff]  ;;  %v11617_v48 = vld [vmem:[#allocation113_spill] sm:$0xff]  ;;  %v9692_v33 = vpop.xlane.xlu1 %3899 }
 0x4b3   : > { %v9679_v31 = vpop.eup %6879  ;;  %v2960_v58 = vadd.f32 %v9672_v45, %v9656_v47  ;;  %6905 = vpow2.f32 %v9516_v63  ;;  %v3019_v61 = vadd.f32 %v3011_v30, %v2995_v34  ;;  %v3020_v60 = vadd.f32 %v3012_v56, %v2996_v3  ;;  %v11618_v43 = vld [vmem:[#allocation64_spill] sm:$0xff]  ;;  %v11623_v30 = vld [vmem:[#allocation114_spill] sm:$0xff]  ;;  %v9707_v19 = vpop.xlane.xlu0 %3902 }
 0x4b4   : > { %v9686_v32 = vpop.eup %6881  ;;  %6907 = vrcp.f32 %v2975_v20  ;;  %v3059_v49 = vmul.f32 %v3051_v17, %v11616_v25  ;;  %v3060_v18 = vmul.f32 %v3052_v35, %v9681_v39  ;;  %v2997_v24 = vmul.f32 %v11618_v43, %v11617_v48  ;;  %v11621_v3 = vld [vmem:[#allocation120_spill] sm:$0xff]  ;;  %v11622_v17 = vld [vmem:[#allocation67_spill] sm:$0xff]  ;;  %v11624_v20 = vld [vmem:[#allocation82_spill] sm:$0xff] }
 0x4b5   : > { %v9694_v37 = vpop.eup %6883  ;;  %v2968_v40 = vadd.f32 %v9679_v31, %v2960_v58  ;;  %6909 = vpow2.f32 %v9522_v12  ;;  %v3043_v63 = vadd.f32 %v3035_v0, %v3019_v61  ;;  %v3044_v56 = vadd.f32 %v3036_v8, %v3020_v60  ;;  %v11625_v43 = vld [vmem:[#allocation121_spill] sm:$0xff]  ;;  %v11626_v39 = vld [vmem:[#allocation88_spill] sm:$0xff] }
 0x4b6   : > { %11619 = vst [vmem:[#allocation122_spill] sm:$0xff] %v9694_v37  ;;  %v9698_v34 = vpop.eup %6885  ;;  %6911 = vpow2.f32 %v9524_v44  ;;  %v2998_v35 = vmul.f32 %v11622_v17, %v11621_v3  ;;  %v3013_v48 = vmul.f32 %v11624_v20, %v11623_v30  ;;  %v3014_v25 = vmul.f32 %v11626_v39, %v11625_v43  ;;  %v11630_v20 = vld [vmem:[#allocation44_spill] sm:$0xff] }
 0x4b7   : > { %11620 = vst [vmem:[#allocation126_spill] sm:$0xff] %v9698_v34  ;;  %v9709_v58 = vpop.eup %6887  ;;  %v2976_v12 = vadd.f32 %v9686_v32, %v2968_v40  ;;  %v3327_v0 = vadd.f32 %v9698_v34, %v9694_v37  ;;  %6913 = vpow2.f32 %v9526_v36  ;;  %v3067_v44 = vadd.f32 %v3059_v49, %v3043_v63  ;;  %v11629_v40 = vld [vmem:[#allocation66_spill] sm:$0xff]  ;;  %v11631_v34 = vld [vmem:[#allocation119_spill] sm:$0xff] }
 0x4b8   : > { %11627 = vst [vmem:[#allocation68_spill] sm:$0xff] %v9709_v58  ;;  %v9715_v8 = vpop.eup %6889  ;;  %6915 = vpow2.f32 %v9544_v51  ;;  %v3068_v61 = vadd.f32 %v3060_v18, %v3044_v56  ;;  %v3021_v60 = vadd.f32 %v3013_v48, %v2997_v24  ;;  %v3022_v3 = vadd.f32 %v3014_v25, %v2998_v35  ;;  %v11628_v58 = vld [vmem:[#allocation96_spill] sm:$0xff]  ;;  %v9732_v18 = vpop.xlane.xlu1 %3931  ;;  %v11634_v56 = vld [vmem:[#allocation102_spill] sm:$0xff]  ;;  %v11635_v35 = vld [vmem:[#allocation43_spill] sm:$0xff] }
 0x4b9   : > { %v9718_v43 = vpop.eup %6891  ;;  %6917 = vrcp.f32 %v2976_v12  ;;  %v3335_v30 = vadd.f32 %v9715_v8, %v3327_v0  ;;  %v3029_v39 = vmul.f32 %v11629_v40, %v11628_v58  ;;  %v3030_v37 = vmul.f32 %v11631_v34, %v11630_v20  ;;  %v11637_v12 = vld [vmem:[#allocation90_spill] sm:$0xff]  ;;  %v11640_v40 = vld [vmem:[#allocation95_spill] sm:$0xff] }
 0x4ba   : > { %v9725_v36 = vpop.eup %6893  ;;  %6919 = vpow2.f32 %v9546_v62  ;;  %v4179_v49 = vpack.c.bf16 %v3068_v61, %v3067_v44  ;;  %v3946_v51 = vmax.f32 %v9405_v14, %v9453_v50  ;;  %v3943_v25 = vmax.f32 %v9468_v16, %v9518_v21  ;;  %v9749_v44 = vpop.xlane.xlu0 %3928 }
 0x4bb   : > { %11632 = vst [vmem:[#allocation128_spill] sm:$0xff] %v9725_v36  ;;  %v9734_v24 = vpop.eup %6895  ;;  %v3343_v63 = vadd.f32 %v9718_v43, %v3335_v30  ;;  %6921 = vpow2.f32 %v9553_v22  ;;  %v3037_v34 = vmul.f32 %v11634_v56, %v3029_v39  ;;  %v3038_v20 = vmul.f32 %v11635_v35, %v3030_v37 }
 0x4bc   : > { %11633 = vst [vmem:[#allocation73_spill] sm:$0xff] %v9734_v24  ;;  %v9740_v62 = vpop.eup %6897  ;;  %v4060_v48 = vadd.f32 %v9734_v24, %v9725_v36  ;;  %6923 = vpow2.f32 %v9555_v1  ;;  %6453 = vmatprep.mubr.msk.bf16.mxu1 %vm1618_vm3, %v4179_v49  ;;  %v3954_v58 = vmax.f32 %v3946_v51, %v9501_v38  ;;  %v3592_v0 = vmax.f32 %v11637_v12, %v9548_v7  ;;  %v11641_v51 = vld [vmem:[#allocation98_spill] sm:$0xff] }
 0x4bd   : > { %11636 = vst [vmem:[#allocation39_spill] sm:$0xff] %v9740_v62  ;;  %v9751_v22 = vpop.eup %6899  ;;  %6925 = vrcp.f32 %v3343_v63  ;;  %v3045_v37 = vadd.f32 %v3037_v34, %v3021_v60  ;;  %v3046_v39 = vadd.f32 %v3038_v20, %v3022_v3  ;;  %v3945_v61 = vmax.f32 %v9565_v10, %v9615_v26  ;;  %v11642_v63 = vld [vmem:[#allocation118_spill] sm:$0xff]  ;;  %v11643_v3 = vld [vmem:[#allocation124_spill] sm:$0xff]  ;;  %v11644_v20 = vld [vmem:[#allocation63_spill] sm:$0xff] }
 0x4be   : > { %11638 = vst [vmem:[#allocation113_spill] sm:$0xff] %v9751_v22  ;;  %v9755_v30 = vpop.eup %6901  ;;  %v4068_v1 = vadd.f32 %v9751_v22, %v4060_v48  ;;  %6927 = vpow2.f32 %v9557_v2  ;;  %v3600_v49 = vsub.f32 %v11640_v40, %v3592_v0  ;;  %v3624_v12 = vsub.f32 %v11641_v51, %v3592_v0  ;;  %v9773_v51 = vpop.xlane.xlu1 %3937 }
 0x4bf   : > { %11639 = vst [vmem:[#allocation120_spill] sm:$0xff] %v9755_v30  ;;  %v9761_v24 = vpop.eup %6903  ;;  %6929 = vpow2.f32 %v9580_v28  ;;  %v3069_v60 = vadd.f32 %v11642_v63, %v3045_v37  ;;  %v3070_v34 = vadd.f32 %v11643_v3, %v3046_v39  ;;  %v3648_v36 = vsub.f32 %v11644_v20, %v3592_v0 }
 0x4c0   : > { %v9767_v62 = vpop.eup %6905  ;;  %v4076_v48 = vadd.f32 %v9755_v30, %v4068_v1  ;;  %6931 = vpow2.f32 %v9582_v11  ;;  %v3613_v2 = vmul.f32 1.442695, %v3600_v49  ;;  %v9771_v40 = vmul.f32 1.442695, %v3624_v12  ;;  %v9788_v12 = vpop.xlane.xlu0 %3934 }
 0x4c1   : > { %11645 = vst [vmem:[#allocation67_spill] sm:$0xff] %v9767_v62  ;;  %v9775_v22 = vpop.eup %6907  ;;  %v3695_v28 = vadd.f32 %v9767_v62, %v9761_v24  ;;  %6933 = vpow2.f32 %v9603_v57  ;;  %v4180_v37 = vpack.c.bf16 %v3070_v34, %v3069_v60  ;;  %v9780_v39 = vmul.f32 1.442695, %v3648_v36 }
 0x4c2   : > { %v9782_v63 = vpop.eup %6909  ;;  %6935 = vrcp.f32 %v4076_v48  ;;  %v3672_v11 = vsub.f32 %v9548_v7, %v3592_v0  ;;  %v3951_v1 = vmax.f32 %v3943_v25, %v9664_v5  ;;  %v3944_v49 = vmax.f32 %v9596_v13, %v9646_v54 }
 0x4c3   : > { %11646 = vst [vmem:[#allocation114_spill] sm:$0xff] %v9782_v63  ;;  %v9790_v3 = vpop.eup %6911  ;;  %v3703_v20 = vadd.f32 %v9782_v63, %v3695_v28  ;;  %6937 = vpow2.f32 %v9605_v15  ;;  %6454 = vmatmul.mubr.msk.bf16.vlgmr.msra.gmra.mxu1 %vm1618_vm3, %v4180_v37  ;;  %v3953_v57 = vmax.f32 %v3945_v61, %v9707_v19  ;;  %v9797_v36 = vmax.f32 %v3954_v58, %v9773_v51 }
 0x4c4   : > { %11647 = vst [vmem:[#allocation121_spill] sm:$0xff] %v9790_v3  ;;  %v9799_v7 = vpop.eup %6913  ;;  %6939 = vpow2.f32 %v9609_v23  ;;  %v3685_v25 = vmul.f32 1.442695, %v3672_v11  ;;  %v3952_v0 = vmax.f32 %v3944_v49, %v9692_v33  ;;  %v3959_v60 = vmax.f32 %v3951_v1, %v9749_v44 }
 0x4c5   : > { %11648 = vst [vmem:[#allocation96_spill] sm:$0xff] %v9799_v7  ;;  %v9804_v34 = vpop.eup %6915  ;;  %v3711_v15 = vadd.f32 %v9790_v3, %v3703_v20  ;;  %6941 = vpow2.f32 %v9611_v41  ;;  %v3961_v61 = vmax.f32 %v3953_v57, %v9788_v12  ;;  %v3970_v58 = vsub.f32 %v9405_v14, %v9797_v36 }
 0x4c6   : > { %11649 = vst [vmem:[#allocation66_spill] sm:$0xff] %v9804_v34  ;;  %v9811_v48 = vpop.eup %6917  ;;  %v4062_v23 = vadd.f32 %v9804_v34, %v9799_v7  ;;  %6943 = vpow2.f32 %v9613_v53  ;;  %v3967_v28 = vsub.f32 %v9468_v16, %v3959_v60  ;;  %v3991_v37 = vsub.f32 %v9518_v21, %v3959_v60 }
 0x4c7   : > { %v9818_v11 = vpop.eup %6919  ;;  %6945 = vrcp.f32 %v3711_v15  ;;  %v4015_v41 = vsub.f32 %v9664_v5, %v3959_v60  ;;  %v4039_v1 = vsub.f32 %v9749_v44, %v3959_v60  ;;  %v3960_v14 = vmax.f32 %v3952_v0, %v9732_v18 }
 0x4c8   : > { %11650 = vst [vmem:[#allocation44_spill] sm:$0xff] %v9818_v11  ;;  %v9823_v49 = vpop.eup %6921  ;;  %v4070_v20 = vadd.f32 %v9818_v11, %v4062_v23  ;;  %6947 = vpow2.f32 %v9634_v6  ;;  %v3979_v53 = vmul.f32 1.442695, %v3967_v28  ;;  %v4003_v57 = vmul.f32 1.442695, %v3991_v37 }
 0x4c9   : > { %11651 = vst [vmem:[#allocation119_spill] sm:$0xff] %v9823_v49  ;;  %v9827_v16 = vpop.eup %6923  ;;  %6949 = vpow2.f32 %v9636_v52  ;;  %v4027_v21 = vmul.f32 1.442695, %v4015_v41  ;;  %v4051_v15 = vmul.f32 1.442695, %v4039_v1  ;;  %v3968_v5 = vsub.f32 %v9596_v13, %v3960_v14 }
 0x4ca   : > { %11652 = vst [vmem:[#allocation102_spill] sm:$0xff] %v9827_v16  ;;  %v9831_v34 = vpop.eup %6925  ;;  %v4078_v44 = vadd.f32 %v9823_v49, %v4070_v20  ;;  %6951 = vpow2.f32 %v9643_v4  ;;  %v3992_v0 = vsub.f32 %v9646_v54, %v3960_v14  ;;  %v4016_v6 = vsub.f32 %v9692_v33, %v3960_v14 }
 0x4cb   : > { %v9837_v60 = vpop.eup %6927  ;;  %6953 = vpow2.f32 %v3613_v2  ;;  %v3981_v23 = vmul.f32 1.442695, %v3968_v5  ;;  %v4040_v52 = vsub.f32 %v9732_v18, %v3960_v14  ;;  %v3969_v28 = vsub.f32 %v9565_v10, %v3961_v61  ;;  %v9853_v10 = vpop.f32.mrf.mxu0 }
 0x4cc   : > { %11653 = vst [vmem:[#allocation43_spill] sm:$0xff] %v9837_v60  ;;  %v9841_v37 = vpop.eup %6929  ;;  %6955 = vrcp.f32 %v4078_v44  ;;  %v4059_v13 = vadd.f32 %v9837_v60, %v9827_v16  ;;  %v4005_v41 = vmul.f32 1.442695, %v3992_v0  ;;  %v4029_v4 = vmul.f32 1.442695, %v4016_v6  ;;  %v11704_v60 = vld [vmem:[#allocation85_spill] sm:$0xff] }
 0x4cd   : > { %11654 = vst [vmem:[#allocation90_spill] sm:$0xff] %v9841_v37  ;;  %v9845_v1 = vpop.eup %6931  ;;  %6957 = vpow2.f32 %v9771_v40  ;;  %v4053_v33 = vmul.f32 1.442695, %v4040_v52  ;;  %v9848_v54 = vmul.f32 1.442695, %v3969_v28  ;;  %v3993_v2 = vsub.f32 %v9615_v26, %v3961_v61  ;;  %v9884_v28 = vpop.f32.mrf.mxu0 }
 0x4ce   : > { %11655 = vst [vmem:[#allocation95_spill] sm:$0xff] %v9845_v1  ;;  %v9851_v18 = vpop.eup %6933  ;;  %v4067_v14 = vadd.f32 %v9841_v37, %v4059_v13  ;;  %6959 = vpow2.f32 %v9780_v39  ;;  %v4017_v20 = vsub.f32 %v9707_v19, %v3961_v61  ;;  %v4041_v5 = vsub.f32 %v9788_v12, %v3961_v61 }
 0x4cf   : > { %v9859_v44 = vpop.eup %6935  ;;  %6961 = vpow2.f32 %v3685_v25  ;;  %v9861_v40 = vmul.f32 1.442695, %v3993_v2  ;;  %v9863_v0 = vmul.f32 1.442695, %v3970_v58  ;;  %v3994_v26 = vsub.f32 %v9453_v50, %v9797_v36  ;;  %v9913_v11 = vpop.f32.mrf.mxu0 }
 0x4d0   : > { %11656 = vst [vmem:[#allocation98_spill] sm:$0xff] %v9859_v44  ;;  %v9867_v6 = vpop.eup %6937  ;;  %v4075_v52 = vadd.f32 %v9845_v1, %v4067_v14  ;;  %6963 = vpow2.f32 %v3979_v53  ;;  %v9870_v39 = vmul.f32 1.442695, %v4017_v20  ;;  %v9872_v19 = vmul.f32 1.442695, %v4041_v5  ;;  %v11705_v44 = vld [vmem:[#allocation75_spill] sm:$0xff] }
 0x4d1   : > { %v9874_v12 = vpop.eup %6939  ;;  %v3328_v25 = vadd.f32 %v9867_v6, %v9851_v18  ;;  %6965 = vpow2.f32 %v4003_v57  ;;  %v9878_v61 = vmul.f32 1.442695, %v3994_v26  ;;  %v4018_v50 = vsub.f32 %v9501_v38, %v9797_v36  ;;  %v11660_v26 = vld [vmem:[#allocation79_spill] sm:$0xff] }
 0x4d2   : > { %v9882_v58 = vpop.eup %6941  ;;  %6967 = vrcp.f32 %v4075_v52  ;;  %v4042_v53 = vsub.f32 %v9773_v51, %v9797_v36  ;;  %v2991_v13 = vmul.f32 %v9775_v22, %v9617_v59  ;;  %v2992_v2 = vmul.f32 %v9811_v48, %v9656_v47  ;;  %v11659_v36 = vld [vmem:[#allocation74_spill] sm:$0xff] }
 0x4d3   : > { %v9892_v57 = vpop.eup %6943  ;;  %v3336_v14 = vadd.f32 %v9874_v12, %v3328_v25  ;;  %6969 = vpow2.f32 %v4027_v21  ;;  %v9895_v38 = vmul.f32 1.442695, %v4018_v50  ;;  %v3007_v20 = vmul.f32 %v9775_v22, %v9630_v46  ;;  %v11662_v25 = vld [vmem:[#allocation97_spill] sm:$0xff] }
 0x4d4   : > { %11657 = vst [vmem:[#allocation118_spill] sm:$0xff] %v9892_v57  ;;  %v9899_v5 = vpop.eup %6945  ;;  %6971 = vpow2.f32 %v4051_v15  ;;  %v9901_v51 = vmul.f32 1.442695, %v4042_v53  ;;  %v2999_v59 = vmul.f32 %v2991_v13, %v11659_v36  ;;  %v3000_v52 = vmul.f32 %v2992_v2, %v11660_v26 }
 0x4d5   : > { %11658 = vst [vmem:[#allocation124_spill] sm:$0xff] %v9899_v5  ;;  %v9905_v47 = vpop.eup %6947  ;;  %v3344_v49 = vadd.f32 %v9882_v58, %v3336_v14  ;;  %6973 = vpow2.f32 %v3981_v23  ;;  %v3008_v21 = vmul.f32 %v9811_v48, %v9672_v45  ;;  %v3015_v50 = vmul.f32 %v3007_v20, %v11662_v25  ;;  %v11665_v45 = vld [vmem:[#allocation99_spill] sm:$0xff] }
 0x4d6   : > { %11661 = vst [vmem:[#allocation63_spill] sm:$0xff] %v9905_v47  ;;  %v9911_v46 = vpop.eup %6949  ;;  %v4061_v15 = vadd.f32 %v9905_v47, %v9892_v57  ;;  %6975 = vpow2.f32 %v4005_v41  ;;  %v3031_v53 = vmul.f32 %v9775_v22, %v9638_v29  ;;  %v3032_v13 = vmul.f32 %v9811_v48, %v9679_v31  ;;  %v11667_v41 = vld [vmem:[#allocation46_spill] sm:$0xff]  ;;  %v11668_v29 = vld [vmem:[#allocation107_spill] sm:$0xff] }
 0x4d7   : > { %11663 = vst [vmem:[#allocation74_spill] sm:$0xff] %v9911_v46  ;;  %v9921_v23 = vpop.eup %6951  ;;  %6977 = vrcp.f32 %v3344_v49  ;;  %v3016_v2 = vmul.f32 %v3008_v21, %v11665_v45  ;;  %v3023_v14 = vadd.f32 %v3015_v50, %v2999_v59  ;;  %v3055_v20 = vmul.f32 %v9775_v22, %v9648_v9  ;;  %v9938_v9 = vpop.f32.mrf.mxu0  ;;  %v11671_v50 = vld [vmem:[#allocation57_spill] sm:$0xff] }
 0x4d8   : > { %11664 = vst [vmem:[#allocation79_spill] sm:$0xff] %v9921_v23  ;;  %v9926_v7 = vpop.eup %6953  ;;  %v4069_v47 = vadd.f32 %v9911_v46, %v4061_v15  ;;  %6979 = vpow2.f32 %v4029_v4  ;;  %v3039_v57 = vmul.f32 %v3031_v53, %v11667_v41  ;;  %v3040_v30 = vmul.f32 %v3032_v13, %v11668_v29 }
 0x4d9   : > { %11666 = vst [vmem:[#allocation97_spill] sm:$0xff] %v9926_v7  ;;  %v9931_v1 = vpop.eup %6955  ;;  %6981 = vpow2.f32 %v4053_v33  ;;  %v3024_v31 = vadd.f32 %v3016_v2, %v3000_v52  ;;  %v3056_v49 = vmul.f32 %v9811_v48, %v9686_v32  ;;  %v3063_v59 = vmul.f32 %v3055_v20, %v9884_v28 }
 0x4da   : > { %11669 = vst [vmem:[#allocation99_spill] sm:$0xff] %v9931_v1  ;;  %v9936_v21 = vpop.eup %6957  ;;  %v4077_v22 = vadd.f32 %v9921_v23, %v4069_v47  ;;  %6983 = vpow2.f32 %v9848_v54  ;;  %v3047_v4 = vadd.f32 %v3039_v57, %v3023_v14  ;;  %v2993_v15 = vmul.f32 %v9540_v42, %v11671_v50  ;;  %v11674_v57 = vld [vmem:[#allocation72_spill] sm:$0xff]  ;;  %v11685_v23 = vld [vmem:[#allocation59_spill] sm:$0xff] }
 0x4db   : > { %11670 = vst [vmem:[#allocation46_spill] sm:$0xff] %v9936_v21  ;;  %v9944_v53 = vpop.eup %6959  ;;  %v3696_v33 = vadd.f32 %v9936_v21, %v9926_v7  ;;  %6985 = vpow2.f32 %v9861_v40  ;;  %v3048_v32 = vadd.f32 %v3040_v30, %v3024_v31  ;;  %v3064_v48 = vmul.f32 %v3056_v49, %v9938_v9  ;;  %v11676_v40 = vld [vmem:[#allocation87_spill] sm:$0xff]  ;;  %v11678_v49 = vld [vmem:[#allocation76_spill] sm:$0xff]  ;;  %v11735_v7 = vld [vmem:[#allocation106_spill] sm:$0xff] }
 0x4dc   : > { %11672 = vst [vmem:[#allocation107_spill] sm:$0xff] %v9944_v53  ;;  %v9950_v52 = vpop.eup %6961  ;;  %6987 = vrcp.f32 %v4077_v22  ;;  %v3071_v47 = vadd.f32 %v3063_v59, %v3047_v4  ;;  %v2994_v54 = vmul.f32 %v9584_v55, %v9413_v27  ;;  %v3001_v13 = vmul.f32 %v11674_v57, %v2993_v15  ;;  %v11679_v22 = vld [vmem:[#allocation58_spill] sm:$0xff]  ;;  %v11680_v4 = vld [vmem:[#allocation132_spill] sm:$0xff] }
 0x4dd   : > { %11673 = vst [vmem:[#allocation57_spill] sm:$0xff] %v9950_v52  ;;  %v9955_v2 = vpop.eup %6963  ;;  %v3704_v14 = vadd.f32 %v9944_v53, %v3696_v33  ;;  %6989 = vpow2.f32 %v9870_v39  ;;  %v3072_v20 = vadd.f32 %v3064_v48, %v3048_v32  ;;  %v3009_v30 = vmul.f32 %v9540_v42, %v11676_v40  ;;  %v11684_v40 = vld [vmem:[#allocation60_spill] sm:$0xff]  ;;  %v11714_v53 = vld [vmem:[#allocation54_spill] sm:$0xff] }
 0x4de   : > { %11675 = vst [vmem:[#allocation72_spill] sm:$0xff] %v9955_v2  ;;  %v9961_v31 = vpop.eup %6965  ;;  %6991 = vpow2.f32 %v9872_v19  ;;  %v3002_v59 = vmul.f32 %v11678_v49, %v2994_v54  ;;  %v3010_v27 = vmul.f32 %v9584_v55, %v11679_v22  ;;  %v3033_v50 = vmul.f32 %v9540_v42, %v11680_v4  ;;  %v11683_v19 = vld [vmem:[#allocation94_spill] sm:$0xff] }
 0x4df   : > { %11677 = vst [vmem:[#allocation87_spill] sm:$0xff] %v9961_v31  ;;  %v9969_v15 = vpop.eup %6967  ;;  %v3712_v39 = vadd.f32 %v9950_v52, %v3704_v14  ;;  %v4063_v33 = vadd.f32 %v9961_v31, %v9955_v2  ;;  %6993 = vpow2.f32 %v9863_v0  ;;  %v4181_v32 = vpack.c.bf16 %v3072_v20, %v3071_v47  ;;  %v11687_v0 = vld [vmem:[#allocation93_spill] sm:$0xff]  ;;  %v11688_v20 = vld [vmem:[#allocation42_spill] sm:$0xff]  ;;  %v11690_v2 = vld [vmem:[#allocation104_spill] sm:$0xff] }
 0x4e0   : > { %11681 = vst [vmem:[#allocation76_spill] sm:$0xff] %v9969_v15  ;;  %v9975_v48 = vpop.eup %6969  ;;  %6995 = vpow2.f32 %v9878_v61  ;;  %v3017_v54 = vmul.f32 %v11683_v19, %v3009_v30  ;;  %v3018_v22 = vmul.f32 %v11684_v40, %v3010_v27  ;;  %v3034_v4 = vmul.f32 %v9584_v55, %v11685_v23 }
 0x4e1   : > { %11682 = vst [vmem:[#allocation58_spill] sm:$0xff] %v9975_v48  ;;  %v9982_v46 = vpop.eup %6971  ;;  %6997 = vrcp.f32 %v3712_v39  ;;  %v4071_v14 = vadd.f32 %v9975_v48, %v4063_v33  ;;  %6457 = vmatprep.mubr.msk.bf16.mxu1 %vm1618_vm3, %v4181_v32  ;;  %v3041_v47 = vmul.f32 %v11687_v0, %v3033_v50  ;;  %v3057_v31 = vmul.f32 %v9540_v42, %v11688_v20  ;;  %v11692_v33 = vld [vmem:[#allocation61_spill] sm:$0xff] }
 0x4e2   : > { %11686 = vst [vmem:[#allocation132_spill] sm:$0xff] %v9982_v46  ;;  %v9989_v61 = vpop.eup %6973  ;;  %6999 = vpow2.f32 %v9895_v38  ;;  %v3025_v30 = vadd.f32 %v3017_v54, %v3001_v13  ;;  %v3026_v27 = vadd.f32 %v3018_v22, %v3002_v59  ;;  %v3042_v23 = vmul.f32 %v11690_v2, %v3034_v4  ;;  %v11693_v54 = vld [vmem:[#allocation40_spill] sm:$0xff]  ;;  %v11694_v22 = vld [vmem:[#allocation101_spill] sm:$0xff] }
 0x4e3   : > { %11689 = vst [vmem:[#allocation94_spill] sm:$0xff] %v9989_v61  ;;  %v9993_v1 = vpop.eup %6975  ;;  %v4079_v39 = vadd.f32 %v9982_v46, %v4071_v14  ;;  %7001 = vpow2.f32 %v9901_v51  ;;  %v3058_v50 = vmul.f32 %v9584_v55, %v11692_v33  ;;  %v3065_v32 = vmul.f32 %v9853_v10, %v3057_v31  ;;  %v11696_v14 = vld [vmem:[#allocation130_spill] sm:$0xff]  ;;  %v11697_v46 = vld [vmem:[#allocation89_spill] sm:$0xff]  ;;  %v11698_v33 = vld [vmem:[#allocation52_spill] sm:$0xff] }
 0x4e4   : > { %11691 = vst [vmem:[#allocation60_spill] sm:$0xff] %v9993_v1  ;;  %v10000_v42 = vpop.eup %6977  ;;  %v4064_v38 = vadd.f32 %v9993_v1, %v9989_v61  ;;  %v3049_v13 = vadd.f32 %v3041_v47, %v3025_v30  ;;  %v3050_v59 = vadd.f32 %v3042_v23, %v3026_v27  ;;  %v3355_v4 = vmul.f32 %v11694_v22, %v11693_v54  ;;  %v11700_v30 = vld [vmem:[#allocation65_spill] sm:$0xff]  ;;  %v11701_v23 = vld [vmem:[#allocation100_spill] sm:$0xff] }
 0x4e5   : > { %v10006_v20 = vpop.eup %6979  ;;  %7003 = vrcp.f32 %v4079_v39  ;;  %v3066_v51 = vmul.f32 %v9913_v11, %v3058_v50  ;;  %v3356_v55 = vmul.f32 %v11697_v46, %v11696_v14  ;;  %v3371_v31 = vmul.f32 %v11694_v22, %v11698_v33  ;;  %v11703_v50 = vld [vmem:[#allocation70_spill] sm:$0xff] }
 0x4e6   : > { %11695 = vst [vmem:[#allocation59_spill] sm:$0xff] %v10006_v20  ;;  %v10013_v48 = vpop.eup %6981  ;;  %v4072_v1 = vadd.f32 %v10006_v20, %v4064_v38  ;;  %v3073_v47 = vadd.f32 %v3065_v32, %v3049_v13  ;;  %v3363_v27 = vmul.f32 %v3355_v4, %v11700_v30  ;;  %v3372_v54 = vmul.f32 %v11697_v46, %v11701_v23  ;;  %v11707_v32 = vld [vmem:[#allocation91_spill] sm:$0xff] }
 0x4e7   : > { %11699 = vst [vmem:[#allocation93_spill] sm:$0xff] %v10013_v48  ;;  %v10019_v61 = vpop.eup %6983  ;;  %v3074_v39 = vadd.f32 %v3066_v51, %v3050_v59  ;;  %v3364_v37 = vmul.f32 %v3356_v55, %v11703_v50  ;;  %v3379_v14 = vmul.f32 %v3371_v31, %v11704_v60  ;;  %v3395_v33 = vmul.f32 %v11694_v22, %v11705_v44  ;;  %v11708_v4 = vld [vmem:[#allocation131_spill] sm:$0xff]  ;;  %v11711_v44 = vld [vmem:[#allocation36_spill] sm:$0xff] }
 0x4e8   : > { %11702 = vst [vmem:[#allocation42_spill] sm:$0xff] %v10019_v61  ;;  %v10025_v15 = vpop.eup %6985  ;;  %v4080_v38 = vadd.f32 %v10013_v48, %v4072_v1  ;;  %v3380_v13 = vmul.f32 %v3372_v54, %v11707_v32  ;;  %v3396_v20 = vmul.f32 %v11697_v46, %v11708_v4  ;;  %v11709_v23 = vld [vmem:[#allocation55_spill] sm:$0xff]  ;;  %v11713_v54 = vld [vmem:[#allocation45_spill] sm:$0xff]  ;;  %v3420_v4 = vmul.f32 %v11697_v46, %v11714_v53 }
 0x4e9   : > { %11706 = vst [vmem:[#allocation104_spill] sm:$0xff] %v10025_v15  ;;  %v3419_v16 = vmul.f32 %v11694_v22, %v11709_v23  ;;  %v10033_v59 = vpop.eup %6987  ;;  %v4065_v51 = vadd.f32 %v10025_v15, %v10019_v61  ;;  %v4182_v55 = vpack.c.bf16 %v3074_v39, %v3073_v47  ;;  %v3387_v31 = vadd.f32 %v3379_v14, %v3363_v27  ;;  %v11716_v47 = vld [vmem:[#allocation116_spill] sm:$0xff]  ;;  %v11717_v39 = vld [vmem:[#allocation37_spill] sm:$0xff]  ;;  %v11718_v14 = vld [vmem:[#allocation71_spill] sm:$0xff] }
 0x4ea   : > { %11710 = vst [vmem:[#allocation61_spill] sm:$0xff] %v10033_v59  ;;  %v3403_v52 = vmul.f32 %v3395_v33, %v11711_v44  ;;  %v10038_v3 = vpop.eup %6989  ;;  %7005 = vrcp.f32 %v4080_v38  ;;  %v3388_v1 = vadd.f32 %v3380_v13, %v3364_v37  ;;  %v3404_v48 = vmul.f32 %v3396_v20, %v11713_v54  ;;  %v11720_v38 = vld [vmem:[#allocation84_spill] sm:$0xff]  ;;  %v11722_v61 = vld [vmem:[#allocation127_spill] sm:$0xff] }
 0x4eb   : > { %11712 = vst [vmem:[#allocation40_spill] sm:$0xff] %v10038_v3  ;;  %v10043_v63 = vpop.eup %6991  ;;  %v4073_v22 = vadd.f32 %v10038_v3, %v4065_v51  ;;  %6458 = vmatmul.mubr.msk.bf16.gmra.mxu1 %vm1618_vm3, %v4182_v55  ;;  %v3427_v27 = vmul.f32 %v3419_v16, %v11716_v47  ;;  %v3357_v33 = vmul.f32 %v11718_v14, %v11717_v39  ;;  %v11721_v13 = vld [vmem:[#allocation48_spill] sm:$0xff]  ;;  %v11723_v53 = vld [vmem:[#allocation47_spill] sm:$0xff]  ;;  %v11726_v3 = vld [vmem:[#allocation49_spill] sm:$0xff] }
 0x4ec   : > { %11715 = vst [vmem:[#allocation101_spill] sm:$0xff] %v10043_v63  ;;  %v3411_v23 = vadd.f32 %v3403_v52, %v3387_v31  ;;  %v10050_v15 = vpop.eup %6993  ;;  %v3412_v37 = vadd.f32 %v3404_v48, %v3388_v1  ;;  %v3428_v20 = vmul.f32 %v3420_v4, %v11720_v38  ;;  %v3358_v46 = vmul.f32 %v11722_v61, %v11721_v13  ;;  %v11725_v16 = vld [vmem:[#allocation64_spill] sm:$0xff]  ;;  %v11728_v13 = vld [vmem:[#allocation82_spill] sm:$0xff] }
 0x4ed   : > { %11719 = vst [vmem:[#allocation130_spill] sm:$0xff] %v10050_v15  ;;  %v3373_v59 = vmul.f32 %v11718_v14, %v11723_v53  ;;  %v10057_v51 = vpop.eup %6995  ;;  %v4081_v52 = vadd.f32 %v10043_v63, %v4073_v22  ;;  %v3365_v31 = vmul.f32 %v11725_v16, %v3357_v33  ;;  %v3374_v39 = vmul.f32 %v11722_v61, %v11726_v3  ;;  %v11730_v22 = vld [vmem:[#allocation88_spill] sm:$0xff]  ;;  %v11732_v63 = vld [vmem:[#allocation105_spill] sm:$0xff] }
 0x4ee   : > { %11724 = vst [vmem:[#allocation89_spill] sm:$0xff] %v10057_v51  ;;  %v3435_v55 = vadd.f32 %v3427_v27, %v3411_v23  ;;  %v10063_v21 = vpop.eup %6997  ;;  %v4066_v48 = vadd.f32 %v10057_v51, %v10050_v15  ;;  %v3436_v1 = vadd.f32 %v3428_v20, %v3412_v37  ;;  %v3366_v4 = vmul.f32 %v11622_v17, %v3358_v46  ;;  %v11731_v27 = vld [vmem:[#allocation103_spill] sm:$0xff]  ;;  %v11734_v46 = vld [vmem:[#allocation38_spill] sm:$0xff] }
 0x4ef   : > { %11727 = vst [vmem:[#allocation52_spill] sm:$0xff] %v10063_v21  ;;  %v3381_v53 = vmul.f32 %v11728_v13, %v3373_v59  ;;  %v10069_v62 = vpop.eup %6999  ;;  %7007 = vrcp.f32 %v4081_v52  ;;  %v3382_v23 = vmul.f32 %v11730_v22, %v3374_v39  ;;  %v3397_v33 = vmul.f32 %v11718_v14, %v11731_v27 }
 0x4f0   : > { %11729 = vst [vmem:[#allocation65_spill] sm:$0xff] %v10069_v62  ;;  %v3398_v3 = vmul.f32 %v11722_v61, %v11732_v63  ;;  %v10076_v21 = vpop.eup %7001  ;;  %v4074_v51 = vadd.f32 %v10069_v62, %v4066_v48  ;;  %v4183_v37 = vpack.c.bf16 %v3436_v1, %v3435_v55  ;;  %v3421_v59 = vmul.f32 %v11718_v14, %v11734_v46  ;;  %v11736_v48 = vld [vmem:[#allocation111_spill] sm:$0xff] }
 0x4f1   : > { %11733 = vst [vmem:[#allocation100_spill] sm:$0xff] %v10076_v21  ;;  %v3389_v20 = vadd.f32 %v3381_v53, %v3365_v31  ;;  %v3390_v15 = vadd.f32 %v3382_v23, %v3366_v4  ;;  %v3405_v52 = vmul.f32 %v11634_v56, %v3397_v33  ;;  %v3422_v27 = vmul.f32 %v11722_v61, %v11735_v7  ;;  %v11737_v31 = vld [vmem:[#allocation122_spill] sm:$0xff]  ;;  %v11738_v23 = vld [vmem:[#allocation123_spill] sm:$0xff] }
 0x4f2   : > { %v3406_v39 = vmul.f32 %v11635_v35, %v3398_v3  ;;  %v10085_v5 = vpop.eup %7003  ;;  %v4082_v63 = vadd.f32 %v10076_v21, %v4074_v51  ;;  %6461 = vmatprep.mubr.msk.bf16.mxu1 %vm1618_vm3, %v4183_v37  ;;  %v3429_v55 = vmul.f32 %v11736_v48, %v3421_v59  ;;  %v3359_v1 = vmul.f32 %v9831_v34, %v11737_v31  ;;  %v11739_v3 = vld [vmem:[#allocation126_spill] sm:$0xff] }
 0x4f3   : > { %v3360_v14 = vmul.f32 %v10000_v42, %v9851_v18  ;;  %v3413_v4 = vadd.f32 %v3405_v52, %v3389_v20  ;;  %v3430_v33 = vmul.f32 %v11738_v23, %v3422_v27  ;;  %v3375_v7 = vmul.f32 %v9831_v34, %v11739_v3 }
 0x4f4   : > { %v3414_v53 = vadd.f32 %v3406_v39, %v3390_v15  ;;  %7009 = vrcp.f32 %v4082_v63  ;;  %v3367_v61 = vmul.f32 %v3359_v1, %v11659_v36  ;;  %v3376_v37 = vmul.f32 %v10000_v42, %v9867_v6  ;;  %v11740_v1 = vld [vmem:[#allocation133_spill] sm:$0xff] }
 0x4f5   : > { %v3368_v51 = vmul.f32 %v3360_v14, %v11660_v26  ;;  %v3437_v46 = vadd.f32 %v3429_v55, %v3413_v4  ;;  %v3383_v31 = vmul.f32 %v3375_v7, %v11662_v25  ;;  %v3399_v18 = vmul.f32 %v9831_v34, %v9715_v8  ;;  %v11741_v14 = vld [vmem:[#allocation53_spill] sm:$0xff]  ;;  %v11744_v7 = vld [vmem:[#allocation134_spill] sm:$0xff] }
 0x4f6   : > { %v3438_v59 = vadd.f32 %v3430_v33, %v3414_v53  ;;  %v3384_v15 = vmul.f32 %v3376_v37, %v11665_v45  ;;  %v3400_v20 = vmul.f32 %v10000_v42, %v9874_v12  ;;  %v3423_v52 = vmul.f32 %v9831_v34, %v9718_v43  ;;  %v11742_v34 = vld [vmem:[#allocation138_spill] sm:$0xff] }
 0x4f7   : > { %v3424_v39 = vmul.f32 %v10000_v42, %v9882_v58  ;;  %v10111_v27 = vpop.eup %7005  ;;  %v3391_v63 = vadd.f32 %v3383_v31, %v3367_v61  ;;  %v3407_v55 = vmul.f32 %v3399_v18, %v11667_v41  ;;  %v3361_v8 = vmul.f32 %v11741_v14, %v11740_v1  ;;  %v11743_v58 = vld [vmem:[#allocation125_spill] sm:$0xff] }
 0x4f8   : > { %v4184_v6 = vpack.c.bf16 %v3438_v59, %v3437_v46  ;;  %v3392_v4 = vadd.f32 %v3384_v15, %v3368_v51  ;;  %v3408_v53 = vmul.f32 %v3400_v20, %v11668_v29  ;;  %v3431_v12 = vmul.f32 %v3423_v52, %v9884_v28  ;;  %v11745_v46 = vld [vmem:[#allocation139_spill] sm:$0xff]  ;;  %v11746_v59 = vld [vmem:[#allocation136_spill] sm:$0xff]  ;;  %v11747_v18 = vld [vmem:[#allocation141_spill] sm:$0xff] }
 0x4f9   : > { %v3432_v33 = vmul.f32 %v3424_v39, %v9938_v9  ;;  %v3415_v43 = vadd.f32 %v3407_v55, %v3391_v63  ;;  %v3362_v42 = vmul.f32 %v11743_v58, %v11742_v34  ;;  %v3369_v3 = vmul.f32 %v11674_v57, %v3361_v8 }
 0x4fa   : > { %6462 = vmatmul.mubr.msk.bf16.gmra.mxu1 %vm1618_vm3, %v4184_v6  ;;  %v3377_v61 = vmul.f32 %v11741_v14, %v11744_v7  ;;  %v3416_v37 = vadd.f32 %v3408_v53, %v3392_v4  ;;  %v3378_v51 = vmul.f32 %v11743_v58, %v11745_v46  ;;  %v3401_v31 = vmul.f32 %v11741_v14, %v11746_v59  ;;  %v11748_v6 = vld [vmem:[#allocation137_spill] sm:$0xff]  ;;  %v11749_v7 = vld [vmem:[#allocation142_spill] sm:$0xff] }
 0x4fb   : > { %v3402_v15 = vmul.f32 %v11743_v58, %v11747_v18  ;;  %v3439_v20 = vadd.f32 %v3431_v12, %v3415_v43  ;;  %v3370_v52 = vmul.f32 %v11678_v49, %v3362_v42  ;;  %v3425_v63 = vmul.f32 %v11741_v14, %v11748_v6  ;;  %v11750_v42 = vld [vmem:[#allocation56_spill] sm:$0xff] }
 0x4fc   : > { %v3385_v39 = vmul.f32 %v11683_v19, %v3377_v61  ;;  %v10135_v55 = vpop.eup %7007  ;;  %v3440_v1 = vadd.f32 %v3432_v33, %v3416_v37  ;;  %v3386_v8 = vmul.f32 %v11684_v40, %v3378_v51  ;;  %v3409_v4 = vmul.f32 %v11687_v0, %v3401_v31  ;;  %v11751_v61 = vld [vmem:[#allocation135_spill] sm:$0xff]  ;;  %v11752_v18 = vld [vmem:[#allocation80_spill] sm:$0xff]  ;;  %v11754_v37 = vld [vmem:[#allocation77_spill] sm:$0xff] }
 0x4fd   : > { %v3410_v53 = vmul.f32 %v11690_v2, %v3402_v15  ;;  %v3426_v12 = vmul.f32 %v11743_v58, %v11749_v7  ;;  %v3433_v43 = vmul.f32 %v9853_v10, %v3425_v63  ;;  %v3723_v46 = vmul.f32 %v11751_v61, %v11750_v42  ;;  %v11753_v6 = vld [vmem:[#allocation140_spill] sm:$0xff] }
 0x4fe   : > { %v3393_v34 = vadd.f32 %v3385_v39, %v3369_v3  ;;  %v4185_v59 = vpack.c.bf16 %v3440_v1, %v3439_v20  ;;  %v3394_v14 = vadd.f32 %v3386_v8, %v3370_v52  ;;  %v3724_v33 = vmul.f32 %v11753_v6, %v11752_v18  ;;  %v11755_v39 = vld [vmem:[#allocation83_spill] sm:$0xff]  ;;  %v11756_v1 = vld [vmem:[#allocation78_spill] sm:$0xff] }
 0x4ff   : > { %v3739_v51 = vmul.f32 %v11751_v61, %v11754_v37  ;;  %v3434_v15 = vmul.f32 %v9913_v11, %v3426_v12  ;;  %v3731_v3 = vmul.f32 %v3723_v46, %v11700_v30  ;;  %v3740_v58 = vmul.f32 %v11753_v6, %v11755_v39  ;;  %v11757_v12 = vld [vmem:[#allocation86_spill] sm:$0xff]  ;;  %v11758_v46 = vld [vmem:[#allocation81_spill] sm:$0xff] }
 0x500   : > { %v3417_v31 = vadd.f32 %v3409_v4, %v3393_v34  ;;  %6465 = vmatprep.mubr.msk.bf16.mxu1 %vm1618_vm3, %v4185_v59  ;;  %v3418_v63 = vadd.f32 %v3410_v53, %v3394_v14  ;;  %v3732_v20 = vmul.f32 %v3724_v33, %v11703_v50  ;;  %v3763_v8 = vmul.f32 %v11751_v61, %v11756_v1  ;;  %v11759_v33 = vld [vmem:[#allocation41_spill] sm:$0xff] }
 0x501   : > { %v3747_v52 = vmul.f32 %v3739_v51, %v11704_v60  ;;  %v10158_v7 = vpop.eup %7009  ;;  %v3748_v34 = vmul.f32 %v3740_v58, %v11707_v32  ;;  %v3764_v42 = vmul.f32 %v11753_v6, %v11757_v12  ;;  %v3787_v18 = vmul.f32 %v11751_v61, %v11758_v46  ;;  %v11761_v58 = vld [vmem:[#allocation51_spill] sm:$0xff]  ;;  %v11762_v61 = vld [vmem:[#allocation112_spill] sm:$0xff]  ;;  %v11766_v46 = vld [vmem:[#allocation109_spill] sm:$0xff] }
 0x502   : > { %v3441_v4 = vadd.f32 %v3433_v43, %v3417_v31  ;;  %v3442_v59 = vadd.f32 %v3434_v15, %v3418_v63  ;;  %v3771_v14 = vmul.f32 %v3763_v8, %v11711_v44  ;;  %v3788_v37 = vmul.f32 %v11753_v6, %v11759_v33  ;;  %v11760_v31 = vld [vmem:[#allocation50_spill] sm:$0xff]  ;;  %v11763_v15 = vld [vmem:[#allocation129_spill] sm:$0xff]  ;;  %v11764_v8 = vld [vmem:[#allocation108_spill] sm:$0xff] }
 0x503   : > { %v3755_v53 = vadd.f32 %v3747_v52, %v3731_v3  ;;  %v3756_v51 = vadd.f32 %v3748_v34, %v3732_v20  ;;  %v3772_v39 = vmul.f32 %v3764_v42, %v11713_v54  ;;  %v3795_v43 = vmul.f32 %v3787_v18, %v11716_v47  ;;  %v11765_v20 = vld [vmem:[#allocation69_spill] sm:$0xff] }
 0x504   : > { %v3725_v1 = vmul.f32 %v11761_v58, %v11760_v31  ;;  %v4186_v21 = vpack.c.bf16 %v3442_v59, %v3441_v4  ;;  %v3796_v62 = vmul.f32 %v3788_v37, %v11720_v38  ;;  %v3726_v3 = vmul.f32 %v11763_v15, %v11762_v61  ;;  %v11767_v59 = vld [vmem:[#allocation115_spill] sm:$0xff] }
 0x505   : > { %v3779_v12 = vadd.f32 %v3771_v14, %v3755_v53  ;;  %v3780_v63 = vadd.f32 %v3772_v39, %v3756_v51  ;;  %v3741_v6 = vmul.f32 %v11761_v58, %v11764_v8  ;;  %v3742_v34 = vmul.f32 %v11763_v15, %v11765_v20  ;;  %v11768_v51 = vld [vmem:[#allocation110_spill] sm:$0xff]  ;;  %v11771_v20 = vld [vmem:[#allocation97_spill] sm:$0xff] }
 0x506   : > { %v3733_v52 = vmul.f32 %v11725_v16, %v3725_v1  ;;  %6466 = vmatmul.mubr.msk.bf16.gmra.mxu1 %vm1618_vm3, %v4186_v21  ;;  %v3734_v4 = vmul.f32 %v11622_v17, %v3726_v3  ;;  %v3765_v18 = vmul.f32 %v11761_v58, %v11766_v46  ;;  %v3766_v53 = vmul.f32 %v11763_v15, %v11767_v59 }
 0x507   : > { %v3803_v42 = vadd.f32 %v3795_v43, %v3779_v12  ;;  %v3804_v14 = vadd.f32 %v3796_v62, %v3780_v63  ;;  %v3749_v33 = vmul.f32 %v11728_v13, %v3741_v6  ;;  %v3750_v37 = vmul.f32 %v11730_v22, %v3742_v34  ;;  %v11769_v43 = vld [vmem:[#allocation117_spill] sm:$0xff]  ;;  %v11770_v12 = vld [vmem:[#allocation124_spill] sm:$0xff] }
 0x508   : > { %v3789_v39 = vmul.f32 %v11761_v58, %v11768_v51  ;;  %v3773_v31 = vmul.f32 %v11634_v56, %v3765_v18  ;;  %v3774_v21 = vmul.f32 %v11635_v35, %v3766_v53  ;;  %v3790_v1 = vmul.f32 %v11763_v15, %v11769_v43  ;;  %v11772_v34 = vld [vmem:[#allocation52_spill] sm:$0xff]  ;;  %v11773_v18 = vld [vmem:[#allocation67_spill] sm:$0xff] }
 0x509   : > { %v3727_v61 = vmul.f32 %v11770_v12, %v9761_v24  ;;  %v4187_v3 = vpack.c.bf16 %v3804_v14, %v3803_v42  ;;  %v3757_v8 = vadd.f32 %v3749_v33, %v3733_v52  ;;  %v3758_v62 = vadd.f32 %v3750_v37, %v3734_v4  ;;  %v11774_v24 = vld [vmem:[#allocation46_spill] sm:$0xff]  ;;  %v11776_v37 = vld [vmem:[#allocation107_spill] sm:$0xff] }
 0x50a   : > { %v3797_v63 = vmul.f32 %v11736_v48, %v3789_v39  ;;  %v3798_v6 = vmul.f32 %v11738_v23, %v3790_v1  ;;  %v3728_v58 = vmul.f32 %v11772_v34, %v11771_v20  ;;  %v3743_v59 = vmul.f32 %v11770_v12, %v11773_v18  ;;  %v11775_v42 = vld [vmem:[#allocation114_spill] sm:$0xff]  ;;  %v11777_v39 = vld [vmem:[#allocation121_spill] sm:$0xff] }
 0x50b   : > { %v3735_v46 = vmul.f32 %v3727_v61, %v11659_v36  ;;  %6469 = vmatprep.mubr.msk.bf16.mxu1 %vm1618_vm3, %v4187_v3  ;;  %v3781_v15 = vadd.f32 %v3773_v31, %v3757_v8  ;;  %v3782_v53 = vadd.f32 %v3774_v21, %v3758_v62  ;;  %v3744_v52 = vmul.f32 %v11772_v34, %v11774_v24  ;;  %v11778_v62 = vld [vmem:[#allocation57_spill] sm:$0xff]  ;;  %v11779_v24 = vld [vmem:[#allocation143_spill] sm:$0xff] }
 0x50c   : > { %v3767_v4 = vmul.f32 %v11770_v12, %v11775_v42  ;;  %v3736_v14 = vmul.f32 %v3728_v58, %v11660_v26  ;;  %v3751_v33 = vmul.f32 %v3743_v59, %v11662_v25  ;;  %v3768_v51 = vmul.f32 %v11772_v34, %v11776_v37  ;;  %v11780_v42 = vld [vmem:[#allocation68_spill] sm:$0xff] }
 0x50d   : > { %v3791_v43 = vmul.f32 %v11770_v12, %v11777_v39  ;;  %v3805_v1 = vadd.f32 %v3797_v63, %v3781_v15  ;;  %v3806_v61 = vadd.f32 %v3798_v6, %v3782_v53  ;;  %v3752_v31 = vmul.f32 %v3744_v52, %v11665_v45  ;;  %v11781_v12 = vld [vmem:[#allocation147_spill] sm:$0xff]  ;;  %v11783_v52 = vld [vmem:[#allocation144_spill] sm:$0xff]  ;;  %v11785_v39 = vld [vmem:[#allocation145_spill] sm:$0xff] }
 0x50e   : > { %v3775_v21 = vmul.f32 %v3767_v4, %v11667_v41  ;;  %v3759_v3 = vadd.f32 %v3751_v33, %v3735_v46  ;;  %v3776_v8 = vmul.f32 %v3768_v51, %v11668_v29  ;;  %v3792_v20 = vmul.f32 %v11772_v34, %v11778_v62  ;;  %v11782_v63 = vld [vmem:[#allocation39_spill] sm:$0xff]  ;;  %v11784_v4 = vld [vmem:[#allocation62_spill] sm:$0xff] }
 0x50f   : > { %v3799_v58 = vmul.f32 %v3791_v43, %v9884_v28  ;;  %v4188_v18 = vpack.c.bf16 %v3806_v61, %v3805_v1  ;;  %v3760_v59 = vadd.f32 %v3752_v31, %v3736_v14  ;;  %v3729_v37 = vmul.f32 %v11780_v42, %v11779_v24 }
 0x510   : > { %v3730_v6 = vmul.f32 %v11782_v63, %v11781_v12  ;;  %v3783_v15 = vadd.f32 %v3775_v21, %v3759_v3  ;;  %v3800_v53 = vmul.f32 %v3792_v20, %v9938_v9  ;;  %v3745_v46 = vmul.f32 %v11780_v42, %v11783_v52  ;;  %v11786_v21 = vld [vmem:[#allocation92_spill] sm:$0xff] }
 0x511   : > { %v3746_v33 = vmul.f32 %v11782_v63, %v11784_v4  ;;  %6470 = vmatmul.mubr.msk.bf16.gmra.mxu1 %vm1618_vm3, %v4188_v18  ;;  %v3784_v34 = vadd.f32 %v3776_v8, %v3760_v59  ;;  %v3737_v14 = vmul.f32 %v11674_v57, %v3729_v37  ;;  %v3769_v43 = vmul.f32 %v11780_v42, %v11785_v39  ;;  %v11787_v18 = vld [vmem:[#allocation146_spill] sm:$0xff]  ;;  %v11788_v59 = vld [vmem:[#allocation148_spill] sm:$0xff] }
 0x512   : > { %v3738_v51 = vmul.f32 %v11678_v49, %v3730_v6  ;;  %v3807_v1 = vadd.f32 %v3799_v58, %v3783_v15  ;;  %v3753_v61 = vmul.f32 %v11683_v19, %v3745_v46  ;;  %v3770_v3 = vmul.f32 %v11782_v63, %v11786_v21  ;;  %v11789_v6 = vld [vmem:[#allocation102_spill] sm:$0xff]  ;;  %v11790_v15 = vld [vmem:[#allocation76_spill] sm:$0xff] }
 0x513   : > { %v3754_v31 = vmul.f32 %v11684_v40, %v3746_v33  ;;  %v3808_v62 = vadd.f32 %v3800_v53, %v3784_v34  ;;  %v3777_v20 = vmul.f32 %v11687_v0, %v3769_v43  ;;  %v3793_v8 = vmul.f32 %v11780_v42, %v11787_v18  ;;  %v11791_v33 = vld [vmem:[#allocation128_spill] sm:$0xff]  ;;  %v11792_v34 = vld [vmem:[#allocation98_spill] sm:$0xff] }
 0x514   : > { %v3794_v24 = vmul.f32 %v11782_v63, %v11788_v59  ;;  %v3761_v37 = vadd.f32 %v3753_v61, %v3737_v14  ;;  %v3778_v58 = vmul.f32 %v11690_v2, %v3770_v3  ;;  %v4091_v52 = vmul.f32 %v11790_v15, %v11789_v6  ;;  %v11793_v63 = vld [vmem:[#allocation43_spill] sm:$0xff]  ;;  %v11794_v61 = vld [vmem:[#allocation73_spill] sm:$0xff] }
 0x515   : > { %v3762_v12 = vadd.f32 %v3754_v31, %v3738_v51  ;;  %v4189_v46 = vpack.c.bf16 %v3808_v62, %v3807_v1  ;;  %v3801_v4 = vmul.f32 %v9853_v10, %v3793_v8  ;;  %v4092_v39 = vmul.f32 %v11792_v34, %v11791_v33  ;;  %v11795_v31 = vld [vmem:[#allocation90_spill] sm:$0xff]  ;;  %v11796_v62 = vld [vmem:[#allocation113_spill] sm:$0xff]  ;;  %v11797_v59 = vld [vmem:[#allocation95_spill] sm:$0xff] }
 0x516   : > { %v3802_v53 = vmul.f32 %v9913_v11, %v3794_v24  ;;  %v3785_v43 = vadd.f32 %v3777_v20, %v3761_v37  ;;  %v4099_v21 = vmul.f32 %v4091_v52, %v11700_v30  ;;  %v4107_v14 = vmul.f32 %v11790_v15, %v11793_v63  ;;  %v11803_v63 = vld [vmem:[#allocation63_spill] sm:$0xff] }
 0x517   : > { %v3786_v42 = vadd.f32 %v3778_v58, %v3762_v12  ;;  %6473 = vmatprep.mubr.msk.bf16.mxu1 %vm1618_vm3, %v4189_v46  ;;  %v4100_v51 = vmul.f32 %v4092_v39, %v11703_v50  ;;  %v4108_v1 = vmul.f32 %v11792_v34, %v11794_v61  ;;  %v4131_v3 = vmul.f32 %v11790_v15, %v11795_v31  ;;  %v11798_v58 = vld [vmem:[#allocation120_spill] sm:$0xff] }
 0x518   : > { %v4132_v18 = vmul.f32 %v11792_v34, %v11796_v62  ;;  %v3809_v20 = vadd.f32 %v3801_v4, %v3785_v43  ;;  %v4115_v30 = vmul.f32 %v4107_v14, %v11704_v60  ;;  %v4155_v24 = vmul.f32 %v11790_v15, %v11797_v59  ;;  %v11799_v4 = vld [vmem:[#allocation118_spill] sm:$0xff]  ;;  %v11801_v15 = vld [vmem:[#allocation96_spill] sm:$0xff] }
 0x519   : > { %v3810_v8 = vadd.f32 %v3802_v53, %v3786_v42  ;;  %v4116_v37 = vmul.f32 %v4108_v1, %v11707_v32  ;;  %v4139_v50 = vmul.f32 %v4131_v3, %v11711_v44  ;;  %v4156_v6 = vmul.f32 %v11792_v34, %v11798_v58  ;;  %v11800_v53 = vld [vmem:[#allocation61_spill] sm:$0xff]  ;;  %v11802_v42 = vld [vmem:[#allocation99_spill] sm:$0xff]  ;;  %v11805_v14 = vld [vmem:[#allocation74_spill] sm:$0xff] }
 0x51a   : > { %v4140_v12 = vmul.f32 %v4132_v18, %v11713_v54  ;;  %v4123_v46 = vadd.f32 %v4115_v30, %v4099_v21  ;;  %v4163_v33 = vmul.f32 %v4155_v24, %v11716_v47  ;;  %v4093_v39 = vmul.f32 %v11800_v53, %v11799_v4  ;;  %v11804_v21 = vld [vmem:[#allocation66_spill] sm:$0xff]  ;;  %v11806_v31 = vld [vmem:[#allocation44_spill] sm:$0xff] }
 0x51b   : > { %v4190_v52 = vpack.c.bf16 %v3810_v8, %v3809_v20  ;;  %v4124_v60 = vadd.f32 %v4116_v37, %v4100_v51  ;;  %v4164_v43 = vmul.f32 %v4156_v6, %v11720_v38  ;;  %v4094_v32 = vmul.f32 %v11802_v42, %v11801_v15  ;;  %v11808_v37 = vld [vmem:[#allocation119_spill] sm:$0xff]  ;;  %v11810_v6 = vld [vmem:[#allocation94_spill] sm:$0xff] }
 0x51c   : > { %v4109_v44 = vmul.f32 %v11800_v53, %v11803_v63  ;;  %v4147_v54 = vadd.f32 %v4139_v50, %v4123_v46  ;;  %v4101_v34 = vmul.f32 %v11725_v16, %v4093_v39  ;;  %v4110_v47 = vmul.f32 %v11802_v42, %v11804_v21  ;;  %v11807_v16 = vld [vmem:[#allocation79_spill] sm:$0xff] }
 0x51d   : > { %6474 = vmatmul.mubr.msk.bf16.gmra.mxu1 %vm1618_vm3, %v4190_v52  ;;  %v4133_v61 = vmul.f32 %v11800_v53, %v11805_v14  ;;  %v4148_v51 = vadd.f32 %v4140_v12, %v4124_v60  ;;  %v4102_v38 = vmul.f32 %v11622_v17, %v4094_v32  ;;  %v4134_v3 = vmul.f32 %v11802_v42, %v11806_v31  ;;  %v11809_v12 = vld [vmem:[#allocation72_spill] sm:$0xff] }
 0x51e   : > { %v4117_v1 = vmul.f32 %v11728_v13, %v4109_v44  ;;  %v4171_v62 = vadd.f32 %v4163_v33, %v4147_v54  ;;  %v4118_v18 = vmul.f32 %v11730_v22, %v4110_v47  ;;  %v4157_v8 = vmul.f32 %v11800_v53, %v11807_v16  ;;  %v11811_v33 = vld [vmem:[#allocation87_spill] sm:$0xff]  ;;  %v11812_v60 = vld [vmem:[#allocation60_spill] sm:$0xff] }
 0x51f   : > { %v4141_v20 = vmul.f32 %v11634_v56, %v4133_v61  ;;  %v4172_v30 = vadd.f32 %v4164_v43, %v4148_v51  ;;  %v4142_v24 = vmul.f32 %v11635_v35, %v4134_v3  ;;  %v4158_v17 = vmul.f32 %v11802_v42, %v11808_v37  ;;  %v11813_v42 = vld [vmem:[#allocation58_spill] sm:$0xff] }
 0x520   : > { %v4125_v59 = vadd.f32 %v4117_v1, %v4101_v34  ;;  %v4126_v50 = vadd.f32 %v4118_v18, %v4102_v38  ;;  %v4165_v13 = vmul.f32 %v11736_v48, %v4157_v8  ;;  %v4095_v58 = vmul.f32 %v10085_v5, %v11809_v12  ;;  %v11816_v34 = vld [vmem:[#allocation93_spill] sm:$0xff]  ;;  %v11817_v61 = vld [vmem:[#allocation42_spill] sm:$0xff]  ;;  %v11819_v18 = vld [vmem:[#allocation104_spill] sm:$0xff] }
 0x521   : > { %v4096_v22 = vmul.f32 %v10111_v27, %v11810_v6  ;;  %v4191_v56 = vpack.c.bf16 %v4172_v30, %v4171_v62  ;;  %v4166_v46 = vmul.f32 %v11738_v23, %v4158_v17  ;;  %v4111_v4 = vmul.f32 %v10085_v5, %v11811_v33  ;;  %v11814_v23 = vld [vmem:[#allocation59_spill] sm:$0xff]  ;;  %v11818_v62 = vld [vmem:[#allocation130_spill] sm:$0xff]  ;;  %v11821_v8 = vld [vmem:[#allocation40_spill] sm:$0xff] }
 0x522   : > { %v4149_v52 = vadd.f32 %v4141_v20, %v4125_v59  ;;  %v4150_v35 = vadd.f32 %v4142_v24, %v4126_v50  ;;  %v4103_v53 = vmul.f32 %v4095_v58, %v11659_v36  ;;  %v4112_v48 = vmul.f32 %v10111_v27, %v11812_v60  ;;  %v11815_v36 = vld [vmem:[#allocation132_spill] sm:$0xff]  ;;  %v11820_v20 = vld [vmem:[#allocation89_spill] sm:$0xff] }
 0x523   : > { %v4104_v39 = vmul.f32 %v4096_v22, %v11660_v26  ;;  %6477 = vmatprep.mubr.msk.bf16.mxu1 %vm1618_vm3, %v4191_v56  ;;  %v4119_v15 = vmul.f32 %v4111_v4, %v11662_v25  ;;  %v4135_v32 = vmul.f32 %v10085_v5, %v11813_v42  ;;  %v4136_v63 = vmul.f32 %v10111_v27, %v11814_v23  ;;  %v11822_v30 = vld [vmem:[#allocation65_spill] sm:$0xff]  ;;  %v11824_v6 = vld [vmem:[#allocation100_spill] sm:$0xff]  ;;  %v11828_v42 = vld [vmem:[#allocation6_spill] sm:$0xff] }
 0x524   : > { %v4173_v43 = vadd.f32 %v4165_v13, %v4149_v52  ;;  %v4174_v44 = vadd.f32 %v4166_v46, %v4150_v35  ;;  %v4120_v54 = vmul.f32 %v4112_v48, %v11665_v45  ;;  %v4159_v26 = vmul.f32 %v10085_v5, %v11815_v36  ;;  %v11823_v50 = vld [vmem:[#allocation101_spill] sm:$0xff] }
 0x525   : > { %v4160_v21 = vmul.f32 %v10111_v27, %v11816_v34  ;;  %v4127_v47 = vadd.f32 %v4119_v15, %v4103_v53  ;;  %v4143_v14 = vmul.f32 %v4135_v32, %v11667_v41  ;;  %v4144_v25 = vmul.f32 %v4136_v63, %v11668_v29 }
 0x526   : > { %v4097_v51 = vmul.f32 %v10135_v55, %v11817_v61  ;;  %v4192_v38 = vpack.c.bf16 %v4174_v44, %v4173_v43  ;;  %v4128_v1 = vadd.f32 %v4120_v54, %v4104_v39  ;;  %v4167_v31 = vmul.f32 %v4159_v26, %v9884_v28  ;;  %v11829_v26 = vld [vmem:[#allocation8_spill] sm:$0xff] }
 0x527   : > { %v4168_v45 = vmul.f32 %v4160_v21, %v9938_v9  ;;  %v4151_v3 = vadd.f32 %v4143_v14, %v4127_v47  ;;  %v4098_v5 = vmul.f32 %v10158_v7, %v11818_v62  ;;  %v4113_v41 = vmul.f32 %v10135_v55, %v11819_v18  ;;  %v11830_v47 = vld [vmem:[#allocation9_spill] sm:$0xff]  ;;  %v11835_v18 = vld [vmem:[#allocation12_spill] sm:$0xff] }
 0x528   : > { %v4105_v27 = vmul.f32 %v11674_v57, %v4097_v51  ;;  %6478 = vmatmul.mubr.msk.bf16.gmra.mxu1 %vm1618_vm3, %v4192_v38  ;;  %v4152_v29 = vadd.f32 %v4144_v25, %v4128_v1  ;;  %v4114_v16 = vmul.f32 %v10158_v7, %v11820_v20  ;;  %v4137_v28 = vmul.f32 %v10135_v55, %v11821_v8  ;;  %v11831_v51 = vld [vmem:[#allocation10_spill] sm:$0xff]  ;;  %v11833_v1 = vld [vmem:[#allocation11_spill] sm:$0xff]  ;;  %v11836_v20 = vld [vmem:[#allocation13_spill] sm:$0xff] }
 0x529   : > { %v4138_v9 = vmul.f32 %v10158_v7, %v11822_v30  ;;  %v4106_v59 = vmul.f32 %v11678_v49, %v4098_v5  ;;  %v4121_v24 = vmul.f32 %v11683_v19, %v4113_v41  ;;  %v4175_v57 = vadd.f32 %v4167_v31, %v4151_v3  ;;  %v11837_v30 = vld [vmem:[#allocation14_spill] sm:$0xff] }
 0x52a   : > { %v4176_v37 = vadd.f32 %v4168_v45, %v4152_v29  ;;  %v4122_v17 = vmul.f32 %v11684_v40, %v4114_v16  ;;  %v4161_v13 = vmul.f32 %v10135_v55, %v11823_v50  ;;  %v4145_v58 = vmul.f32 %v11687_v0, %v4137_v28 }
 0x52b   : > { %v4129_v12 = vadd.f32 %v4121_v24, %v4105_v27  ;;  %v4162_v22 = vmul.f32 %v10158_v7, %v11824_v6  ;;  %v4146_v46 = vmul.f32 %v11690_v2, %v4138_v9  ;;  %v11825_v7 = vld [vmem:[#allocation5_spill] sm:$0xff]  ;;  %v11826_v2 = vld [vmem:[#allocation4_spill] sm:$0xff] }
 0x52c   : > { %v4193_v56 = vpack.c.bf16 %v4176_v37, %v4175_v57  ;;  %v4130_v52 = vadd.f32 %v4122_v17, %v4106_v59  ;;  %v4169_v33 = vmul.f32 %v9853_v10, %v4161_v13  ;;  %v11838_v59 = vld [vmem:[#allocation15_spill] sm:$0xff] }
 0x52d   : > { %v4153_v49 = vadd.f32 %v4145_v58, %v4129_v12  ;;  %v4170_v40 = vmul.f32 %v9913_v11, %v4162_v22  ;;  %v11827_v11 = vld [vmem:[#allocation7_spill] sm:$0xff]  ;;  %v11839_v12 = vld [vmem:[#allocation17_spill] sm:$0xff]  ;;  %v11841_v22 = vld [vmem:[#allocation16_spill] sm:$0xff] }
 0x52e   : > { %6481 = vmatprep.mubr.msk.bf16.mxu1 %vm1618_vm3, %v4193_v56  ;;  %v4154_v19 = vadd.f32 %v4146_v46, %v4130_v52 }
 0x52f   : > { %v4177_v4 = vadd.f32 %v4169_v33, %v4153_v49  ;;  %v11843_v49 = vld [vmem:[#allocation19_spill] sm:$0xff]  ;;  %v11845_v33 = vld [vmem:[#allocation18_spill] sm:$0xff] }
 0x530   : > { %v4178_v55 = vadd.f32 %v4170_v40, %v4154_v19 }
 0x532   : > { %v4194_v35 = vpack.c.bf16 %v4178_v55, %v4177_v4 }
 0x534   : > { %6482 = vmatmul.mubr.msk.bf16.gmra.mxu1 %vm1618_vm3, %v4194_v35 }
 0x583   : > { %v6455_v0 = vpop.f32.mrf.mxu1 }
 0x584   : > { %v10352_v48 = vadd.f32 %v6455_v0, %v11826_v2 }
 0x585   : > { %v4293_v53 = vpop.f32.mrf.mxu1 }
 0x586   : > { %v10349_v39 = vadd.f32 %v4293_v53, %v11825_v7  ;;  %v4460_v23 = vsel %vm1618_vm3, %v10352_v48, 0.0  ;;  %v11847_v7 = vld [vmem:[#allocation21_spill] sm:$0xff] }
 0x587   : > { %v6456_v60 = vpop.f32.mrf.mxu1 }
 0x588   : > { %v4454_v43 = vsel %vm1618_vm3, %v10349_v39, 0.0  ;;  %v10360_v32 = vadd.f32 %v6456_v60, %v11828_v42 }
 0x589   : > { %4455 = vadd.xlane.f32.xlu0 %v4454_v43  ;;  %v4296_v10 = vpop.f32.mrf.mxu1  ;;  %v11848_v43 = vld [vmem:[#allocation20_spill] sm:$0xff] }
 0x58a   : > { %v10357_v15 = vadd.f32 %v4296_v10, %v11827_v11  ;;  %v4463_v44 = vsel %vm1618_vm3, %v10360_v32, 0.0 }
 0x58c   : > { %v4457_v63 = vsel %vm1618_vm3, %v10357_v15, 0.0 }
 0x58d   : > { %4461 = vadd.xlane.f32.xlu0 %v4460_v23  ;;  %4458 = vadd.xlane.f32.xlu1 %v4457_v63  ;;  %v11849_v23 = vld [vmem:[#allocation23_spill] sm:$0xff] }
 0x591   : > { %4464 = vadd.xlane.f32.xlu1 %v4463_v44  ;;  %v11850_v44 = vld [vmem:[#allocation22_spill] sm:$0xff] }
 0x5ab   : > { %v6459_v54 = vpop.f32.mrf.mxu1 }
 0x5ac   : > { %v10372_v14 = vadd.f32 %v6459_v54, %v11830_v47 }
 0x5ad   : > { %v4309_v36 = vpop.f32.mrf.mxu1 }
 0x5ae   : > { %v10369_v34 = vadd.f32 %v4309_v36, %v11829_v26  ;;  %v4472_v45 = vsel %vm1618_vm3, %v10372_v14, 0.0 }
 0x5af   : > { %v6460_v21 = vpop.f32.mrf.mxu1 }
 0x5b0   : > { %v4466_v25 = vsel %vm1618_vm3, %v10369_v34, 0.0  ;;  %v10380_v31 = vadd.f32 %v6460_v21, %v11833_v1 }
 0x5b1   : > { %4467 = vadd.xlane.f32.xlu0 %v4466_v25  ;;  %v4312_v61 = vpop.f32.mrf.mxu1 }
 0x5b2   : > { %v10377_v38 = vadd.f32 %v4312_v61, %v11831_v51  ;;  %11834 = vst [vmem:[#allocation85_spill] sm:$0xff] %v10380_v31  ;;  %v4475_v62 = vsel %vm1618_vm3, %v10380_v31, 0.0  ;;  %v11851_v61 = vld [vmem:[#allocation25_spill] sm:$0xff] }
 0x5b4   : > { %11832 = vst [vmem:[#allocation70_spill] sm:$0xff] %v10377_v38  ;;  %v4469_v3 = vsel %vm1618_vm3, %v10377_v38, 0.0 }
 0x5b5   : > { %4473 = vadd.xlane.f32.xlu0 %v4472_v45  ;;  %4470 = vadd.xlane.f32.xlu1 %v4469_v3  ;;  %v11853_v45 = vld [vmem:[#allocation24_spill] sm:$0xff] }
 0x5b9   : > { %4476 = vadd.xlane.f32.xlu1 %v4475_v62 }
 0x5ba   : > { %v6463_v5 = vpop.f32.mrf.mxu1 }
 0x5bb   : > { %v10392_v16 = vadd.f32 %v6463_v5, %v11836_v20 }
 0x5bc   : > { %v4325_v27 = vpop.f32.mrf.mxu1 }
 0x5bd   : > { %v10389_v41 = vadd.f32 %v4325_v27, %v11835_v18  ;;  %v4484_v57 = vsel %vm1618_vm3, %v10392_v16, 0.0  ;;  %v11855_v27 = vld [vmem:[#allocation27_spill] sm:$0xff] }
 0x5be   : > { %v6464_v29 = vpop.f32.mrf.mxu1 }
 0x5bf   : > { %v4478_v8 = vsel %vm1618_vm3, %v10389_v41, 0.0  ;;  %v10400_v24 = vadd.f32 %v6464_v29, %v11838_v59  ;;  %v11857_v29 = vld [vmem:[#allocation26_spill] sm:$0xff] }
 0x5c0   : > { %4479 = vadd.xlane.f32.xlu0 %v4478_v8  ;;  %v4328_v28 = vpop.f32.mrf.mxu1 }
 0x5c1   : > { %v10397_v9 = vadd.f32 %v4328_v28, %v11837_v30  ;;  %v4487_v50 = vsel %vm1618_vm3, %v10400_v24, 0.0 }
 0x5c3   : > { %v4481_v37 = vsel %vm1618_vm3, %v10397_v9, 0.0 }
 0x5c4   : > { %4485 = vadd.xlane.f32.xlu0 %v4484_v57  ;;  %4482 = vadd.xlane.f32.xlu1 %v4481_v37  ;;  %v11859_v37 = vld [vmem:[#allocation29_spill] sm:$0xff] }
 0x5c6   : > { %v6467_v17 = vpop.f32.mrf.mxu1 }
 0x5c7   : > { %v10412_v56 = vadd.f32 %v6467_v17, %v11841_v22 }
 0x5c8   : > { %4488 = vadd.xlane.f32.xlu1 %v4487_v50  ;;  %v4341_v13 = vpop.f32.mrf.mxu1 }
 0x5c9   : > { %v10409_v58 = vadd.f32 %v4341_v13, %v11839_v12  ;;  %11842 = vst [vmem:[#allocation91_spill] sm:$0xff] %v10412_v56  ;;  %v4496_v4 = vsel %vm1618_vm3, %v10412_v56, 0.0  ;;  %v11860_v13 = vld [vmem:[#allocation28_spill] sm:$0xff] }
 0x5ca   : > { %v6468_v6 = vpop.f32.mrf.mxu1 }
 0x5cb   : > { %11840 = vst [vmem:[#allocation75_spill] sm:$0xff] %v10409_v58  ;;  %v4490_v52 = vsel %vm1618_vm3, %v10409_v58, 0.0  ;;  %v10420_v40 = vadd.f32 %v6468_v6, %v11845_v33 }
 0x5cc   : > { %4491 = vadd.xlane.f32.xlu0 %v4490_v52  ;;  %v4344_v46 = vpop.f32.mrf.mxu1  ;;  %v11861_v52 = vld [vmem:[#allocation31_spill] sm:$0xff] }
 0x5cd   : > { %v10417_v19 = vadd.f32 %v4344_v46, %v11843_v49  ;;  %11846 = vst [vmem:[#allocation55_spill] sm:$0xff] %v10420_v40  ;;  %v4499_v53 = vsel %vm1618_vm3, %v10420_v40, 0.0  ;;  %v11863_v49 = vld [vmem:[#allocation30_spill] sm:$0xff] }
 0x5cf   : > { %11844 = vst [vmem:[#allocation131_spill] sm:$0xff] %v10417_v19  ;;  %v4493_v55 = vsel %vm1618_vm3, %v10417_v19, 0.0 }
 0x5d0   : > { %4497 = vadd.xlane.f32.xlu0 %v4496_v4  ;;  %4494 = vadd.xlane.f32.xlu1 %v4493_v55 }
 0x5d1   : > { %v6471_v35 = vpop.f32.mrf.mxu1 }
 0x5d2   : > { %v10432_v10 = vadd.f32 %v6471_v35, %v11848_v43 }
 0x5d3   : > { %v4357_v0 = vpop.f32.mrf.mxu1 }
 0x5d4   : > { %v10429_v60 = vadd.f32 %v4357_v0, %v11847_v7  ;;  %4500 = vadd.xlane.f32.xlu1 %v4499_v53  ;;  %v4508_v36 = vsel %vm1618_vm3, %v10432_v10, 0.0  ;;  %v11865_v7 = vld [vmem:[#allocation33_spill] sm:$0xff] }
 0x5d5   : > { %v6472_v2 = vpop.f32.mrf.mxu1 }
 0x5d6   : > { %v4502_v11 = vsel %vm1618_vm3, %v10429_v60, 0.0  ;;  %v10440_v54 = vadd.f32 %v6472_v2, %v11850_v44 }
 0x5d7   : > { %4503 = vadd.xlane.f32.xlu0 %v4502_v11  ;;  %v4360_v42 = vpop.f32.mrf.mxu1  ;;  %v11867_v11 = vld [vmem:[#allocation32_spill] sm:$0xff] }
 0x5d8   : > { %v10437_v63 = vadd.f32 %v4360_v42, %v11849_v23  ;;  %v4511_v25 = vsel %vm1618_vm3, %v10440_v54, 0.0 }
 0x5da   : > { %v4505_v26 = vsel %vm1618_vm3, %v10437_v63, 0.0 }
 0x5db   : > { %4509 = vadd.xlane.f32.xlu0 %v4508_v36  ;;  %4506 = vadd.xlane.f32.xlu1 %v4505_v26  ;;  %v11869_v36 = vld [vmem:[#allocation35_spill] sm:$0xff] }
 0x5dd   : > { %v6475_v21 = vpop.f32.mrf.mxu1 }
 0x5de   : > { %v10452_v3 = vadd.f32 %v6475_v21, %v11853_v45  ;;  %v11871_v21 = vld [vmem:[#allocation34_spill] sm:$0xff] }
 0x5df   : > { %v4373_v47 = vpop.f32.mrf.mxu1  ;;  %4512 = vadd.xlane.f32.xlu1 %v4511_v25 }
 0x5e0   : > { %v10449_v51 = vadd.f32 %v4373_v47, %v11851_v61  ;;  %11854 = vst [vmem:[#allocation45_spill] sm:$0xff] %v10452_v3  ;;  %v4520_v8 = vsel %vm1618_vm3, %v10452_v3, 0.0 }
 0x5e1   : > { %v6476_v1 = vpop.f32.mrf.mxu1 }
 0x5e2   : > { %11852 = vst [vmem:[#allocation36_spill] sm:$0xff] %v10449_v51  ;;  %v4514_v62 = vsel %vm1618_vm3, %v10449_v51, 0.0  ;;  %v10460_v20 = vadd.f32 %v6476_v1, %v11857_v29 }
 0x5e3   : > { %4515 = vadd.xlane.f32.xlu0 %v4514_v62  ;;  %v4376_v5 = vpop.f32.mrf.mxu1 }
 0x5e4   : > { %v10457_v18 = vadd.f32 %v4376_v5, %v11855_v27  ;;  %11858 = vst [vmem:[#allocation116_spill] sm:$0xff] %v10460_v20  ;;  %v4523_v59 = vsel %vm1618_vm3, %v10460_v20, 0.0 }
 0x5e6   : > { %11856 = vst [vmem:[#allocation54_spill] sm:$0xff] %v10457_v18  ;;  %v4517_v28 = vsel %vm1618_vm3, %v10457_v18, 0.0 }
 0x5e7   : > { %4521 = vadd.xlane.f32.xlu0 %v4520_v8  ;;  %4518 = vadd.xlane.f32.xlu1 %v4517_v28 }
 0x5e8   : > { %v6479_v30 = vpop.f32.mrf.mxu1 }
 0x5e9   : > { %v10472_v12 = vadd.f32 %v6479_v30, %v11860_v13 }
 0x5ea   : > { %v4389_v57 = vpop.f32.mrf.mxu1 }
 0x5eb   : > { %4524 = vadd.xlane.f32.xlu1 %v4523_v59  ;;  %v10469_v17 = vadd.f32 %v4389_v57, %v11859_v37  ;;  %v4532_v4 = vsel %vm1618_vm3, %v10472_v12, 0.0 }
 0x5ec   : > { %v6480_v50 = vpop.f32.mrf.mxu1 }
 0x5ed   : > { %v4526_v6 = vsel %vm1618_vm3, %v10469_v17, 0.0  ;;  %v10480_v33 = vadd.f32 %v6480_v50, %v11863_v49 }
 0x5ee   : > { %4527 = vadd.xlane.f32.xlu0 %v4526_v6  ;;  %v4392_v22 = vpop.f32.mrf.mxu1 }
 0x5ef   : > { %v10477_v46 = vadd.f32 %v4392_v22, %v11861_v52  ;;  %11864 = vst [vmem:[#allocation71_spill] sm:$0xff] %v10480_v33  ;;  %v4535_v0 = vsel %vm1618_vm3, %v10480_v33, 0.0 }
 0x5f1   : > { %11862 = vst [vmem:[#allocation37_spill] sm:$0xff] %v10477_v46  ;;  %v4529_v55 = vsel %vm1618_vm3, %v10477_v46, 0.0 }
 0x5f2   : > { %4533 = vadd.xlane.f32.xlu0 %v4532_v4  ;;  %4530 = vadd.xlane.f32.xlu1 %v4529_v55 }
 0x5f4   : > { %v6483_v35 = vpop.f32.mrf.mxu1 }
 0x5f5   : > { %v10492_v42 = vadd.f32 %v6483_v35, %v11867_v11 }
 0x5f6   : > { %v4405_v53 = vpop.f32.mrf.mxu1  ;;  %4536 = vadd.xlane.f32.xlu1 %v4535_v0  ;;  %v6618_v0 = vld [vmem:[%s11060_s13 + $0x8] sm:$0xff]  }
 0x5f7   : > { %v10489_v2 = vadd.f32 %v4405_v53, %v11865_v7  ;;  %11868 = vst [vmem:[#allocation48_spill] sm:$0xff] %v10492_v42  ;;  %v4544_v25 = vsel %vm1618_vm3, %v10492_v42, 0.0  ;;  %6485 = vmatprep.subr.bf16.mxu0 %v6618_v0 }
 0x5f8   : > { %v6484_v43 = vpop.f32.mrf.mxu1  ;;  %6486 = vmatpush3.bf16.msra.mxu0 %v6618_v0 }
 0x5f9   : > { %11866 = vst [vmem:[#allocation84_spill] sm:$0xff] %v10489_v2  ;;  %v4538_v23 = vsel %vm1618_vm3, %v10489_v2, 0.0  ;;  %v10500_v47 = vadd.f32 %v6484_v43, %v11871_v21 }
 0x5fa   : > { %4539 = vadd.xlane.f32.xlu0 %v4538_v23  ;;  %v4408_v44 = vpop.f32.mrf.mxu1 }
 0x5fb   : > { %v10497_v26 = vadd.f32 %v4408_v44, %v11869_v36  ;;  %11872 = vst [vmem:[#allocation47_spill] sm:$0xff] %v10500_v47  ;;  %v4547_v1 = vsel %vm1618_vm3, %v10500_v47, 0.0 }
 0x5fd   : > { %11870 = vst [vmem:[#allocation127_spill] sm:$0xff] %v10497_v26  ;;  %v4541_v61 = vsel %vm1618_vm3, %v10497_v26, 0.0 }
 0x5fe   : > { %4545 = vadd.xlane.f32.xlu0 %v4544_v25  ;;  %4542 = vadd.xlane.f32.xlu1 %v4541_v61  ;;  %v6619_v25 = vld [vmem:[%s11060_s13] sm:$0xff]  }
 0x5ff   : > { %6487 = vmatprep.subr.bf16.mxu0 %v6619_v25 }
 0x600   : > { %6488 = vmatpush3.bf16.msra.mxu0 %v6619_v25 }
 0x602   : > { %4548 = vadd.xlane.f32.xlu1 %v4547_v1 }
 0x612   : > { %v4456_v45 = vpop.xlane.xlu0 %4455 }
 0x613   : > { %v4550_v62 = vmul.f32 0.03125, %v4456_v45 }
 0x615   : > { %v10509_v5 = vsub.f32 %v10349_v39, %v4550_v62 }
 0x616   : > { %v4459_v27 = vpop.xlane.xlu1 %4458  ;;  %v4462_v29 = vpop.xlane.xlu0 %4461 }
 0x617   : > { %v4551_v8 = vmul.f32 0.03125, %v4459_v27  ;;  %v4552_v28 = vmul.f32 0.03125, %v4462_v29  ;;  %v4614_v30 = vmul.f32 %v10509_v5, %v10509_v5 }
 0x619   : > { %v10514_v59 = vsub.f32 %v10357_v15, %v4551_v8  ;;  %v10517_v57 = vsub.f32 %v10352_v48, %v4552_v28  ;;  %v4646_v37 = vsel %vm1618_vm3, %v4614_v30, 0.0 }
 0x61a   : > { %v4465_v50 = vpop.xlane.xlu1 %4464  ;;  %4647 = vadd.xlane.f32.xlu0 %v4646_v37 }
 0x61b   : > { %v4553_v13 = vmul.f32 0.03125, %v4465_v50  ;;  %v4615_v6 = vmul.f32 %v10514_v59, %v10514_v59  ;;  %v4616_v22 = vmul.f32 %v10517_v57, %v10517_v57 }
 0x61d   : > { %v10525_v52 = vsub.f32 %v10360_v32, %v4553_v13  ;;  %v4649_v49 = vsel %vm1618_vm3, %v4615_v6, 0.0  ;;  %v4652_v4 = vsel %vm1618_vm3, %v4616_v22, 0.0 }
 0x61e   : > { %4650 = vadd.xlane.f32.xlu1 %v4649_v49  ;;  %4653 = vadd.xlane.f32.xlu0 %v4652_v4 }
 0x61f   : > { %v4617_v55 = vmul.f32 %v10525_v52, %v10525_v52 }
 0x621   : > { %v4655_v35 = vsel %vm1618_vm3, %v4617_v55, 0.0 }
 0x622   : > { %4656 = vadd.xlane.f32.xlu1 %v4655_v35 }
 0x63a   : > { %v4468_v53 = vpop.xlane.xlu0 %4467 }
 0x63b   : > { %v4554_v7 = vmul.f32 0.03125, %v4468_v53 }
 0x63d   : > { %v10536_v43 = vsub.f32 %v10369_v34, %v4554_v7 }
 0x63e   : > { %v4471_v11 = vpop.xlane.xlu1 %4470  ;;  %v4474_v23 = vpop.xlane.xlu0 %4473 }
 0x63f   : > { %v4555_v44 = vmul.f32 0.03125, %v4471_v11  ;;  %v4556_v36 = vmul.f32 0.03125, %v4474_v23  ;;  %v4618_v21 = vmul.f32 %v10536_v43, %v10536_v43 }
 0x641   : > { %v10544_v61 = vsub.f32 %v10377_v38, %v4555_v44  ;;  %v10547_v1 = vsub.f32 %v10372_v14, %v4556_v36  ;;  %v4658_v45 = vsel %vm1618_vm3, %v4618_v21, 0.0 }
 0x642   : > { %v4477_v62 = vpop.xlane.xlu1 %4476  ;;  %4659 = vadd.xlane.f32.xlu0 %v4658_v45 }
 0x643   : > { %v4557_v27 = vmul.f32 0.03125, %v4477_v62  ;;  %v4619_v29 = vmul.f32 %v10544_v61, %v10544_v61  ;;  %v4620_v8 = vmul.f32 %v10547_v1, %v10547_v1 }
 0x645   : > { %v10555_v28 = vsub.f32 %v10380_v31, %v4557_v27  ;;  %v4661_v30 = vsel %vm1618_vm3, %v4619_v29, 0.0  ;;  %v4664_v37 = vsel %vm1618_vm3, %v4620_v8, 0.0 }
 0x646   : > { %4662 = vadd.xlane.f32.xlu1 %v4661_v30  ;;  %4665 = vadd.xlane.f32.xlu0 %v4664_v37 }
 0x647   : > { %v4621_v50 = vmul.f32 %v10555_v28, %v10555_v28 }
 0x649   : > { %v4480_v13 = vpop.xlane.xlu0 %4479  ;;  %v4667_v22 = vsel %vm1618_vm3, %v4621_v50, 0.0 }
 0x64a   : > { %v4558_v6 = vmul.f32 0.03125, %v4480_v13  ;;  %4668 = vadd.xlane.f32.xlu1 %v4667_v22 }
 0x64c   : > { %v10563_v49 = vsub.f32 %v10389_v41, %v4558_v6 }
 0x64d   : > { %v4483_v4 = vpop.xlane.xlu1 %4482  ;;  %v4486_v55 = vpop.xlane.xlu0 %4485 }
 0x64e   : > { %v4559_v35 = vmul.f32 0.03125, %v4483_v4  ;;  %v4560_v0 = vmul.f32 0.03125, %v4486_v55  ;;  %v4622_v53 = vmul.f32 %v10563_v49, %v10563_v49 }
 0x650   : > { %v10568_v7 = vsub.f32 %v10397_v9, %v4559_v35  ;;  %v10571_v11 = vsub.f32 %v10392_v16, %v4560_v0  ;;  %v4670_v23 = vsel %vm1618_vm3, %v4622_v53, 0.0 }
 0x651   : > { %v4489_v44 = vpop.xlane.xlu1 %4488  ;;  %4671 = vadd.xlane.f32.xlu0 %v4670_v23 }
 0x652   : > { %v4561_v36 = vmul.f32 0.03125, %v4489_v44  ;;  %v4623_v21 = vmul.f32 %v10568_v7, %v10568_v7  ;;  %v4624_v25 = vmul.f32 %v10571_v11, %v10571_v11 }
 0x654   : > { %v10579_v45 = vsub.f32 %v10400_v24, %v4561_v36  ;;  %v4673_v62 = vsel %vm1618_vm3, %v4623_v21, 0.0  ;;  %v4676_v27 = vsel %vm1618_vm3, %v4624_v25, 0.0 }
 0x655   : > { %4674 = vadd.xlane.f32.xlu1 %v4673_v62  ;;  %4677 = vadd.xlane.f32.xlu0 %v4676_v27  ;;  %v4492_v29 = vpop.xlane.xlu0 %4491 }
 0x656   : > { %v4625_v8 = vmul.f32 %v10579_v45, %v10579_v45  ;;  %v4562_v30 = vmul.f32 0.03125, %v4492_v29 }
 0x658   : > { %v4679_v37 = vsel %vm1618_vm3, %v4625_v8, 0.0  ;;  %v10587_v50 = vsub.f32 %v10409_v58, %v4562_v30 }
 0x659   : > { %4680 = vadd.xlane.f32.xlu1 %v4679_v37  ;;  %v4495_v13 = vpop.xlane.xlu1 %4494  ;;  %v4498_v6 = vpop.xlane.xlu0 %4497 }
 0x65a   : > { %v4563_v22 = vmul.f32 0.03125, %v4495_v13  ;;  %v4564_v4 = vmul.f32 0.03125, %v4498_v6  ;;  %v4626_v55 = vmul.f32 %v10587_v50, %v10587_v50 }
 0x65c   : > { %v10592_v35 = vsub.f32 %v10417_v19, %v4563_v22  ;;  %v10595_v0 = vsub.f32 %v10412_v56, %v4564_v4  ;;  %v4682_v53 = vsel %vm1618_vm3, %v4626_v55, 0.0 }
 0x65d   : > { %v4501_v23 = vpop.xlane.xlu1 %4500  ;;  %4683 = vadd.xlane.f32.xlu0 %v4682_v53 }
 0x65e   : > { %v4565_v44 = vmul.f32 0.03125, %v4501_v23  ;;  %v4627_v36 = vmul.f32 %v10592_v35, %v10592_v35  ;;  %v4628_v21 = vmul.f32 %v10595_v0, %v10595_v0 }
 0x660   : > { %v10603_v25 = vsub.f32 %v10420_v40, %v4565_v44  ;;  %v4504_v62 = vpop.xlane.xlu0 %4503  ;;  %v4685_v27 = vsel %vm1618_vm3, %v4627_v36, 0.0  ;;  %v4688_v29 = vsel %vm1618_vm3, %v4628_v21, 0.0 }
 0x661   : > { %v4566_v8 = vmul.f32 0.03125, %v4504_v62  ;;  %4686 = vadd.xlane.f32.xlu1 %v4685_v27  ;;  %4689 = vadd.xlane.f32.xlu0 %v4688_v29 }
 0x662   : > { %v4629_v30 = vmul.f32 %v10603_v25, %v10603_v25 }
 0x663   : > { %v10610_v37 = vsub.f32 %v10429_v60, %v4566_v8 }
 0x664   : > { %v4507_v13 = vpop.xlane.xlu1 %4506  ;;  %v4510_v6 = vpop.xlane.xlu0 %4509  ;;  %v4691_v22 = vsel %vm1618_vm3, %v4629_v30, 0.0 }
 0x665   : > { %v4567_v4 = vmul.f32 0.03125, %v4507_v13  ;;  %v4568_v55 = vmul.f32 0.03125, %v4510_v6  ;;  %4692 = vadd.xlane.f32.xlu1 %v4691_v22  ;;  %v4630_v53 = vmul.f32 %v10610_v37, %v10610_v37 }
 0x667   : > { %v10616_v23 = vsub.f32 %v10437_v63, %v4567_v4  ;;  %v10619_v44 = vsub.f32 %v10432_v10, %v4568_v55  ;;  %v4694_v36 = vsel %vm1618_vm3, %v4630_v53, 0.0 }
 0x668   : > { %v4513_v21 = vpop.xlane.xlu1 %4512  ;;  %4695 = vadd.xlane.f32.xlu0 %v4694_v36 }
 0x669   : > { %v4569_v62 = vmul.f32 0.03125, %v4513_v21  ;;  %v4631_v27 = vmul.f32 %v10616_v23, %v10616_v23  ;;  %v4632_v29 = vmul.f32 %v10619_v44, %v10619_v44 }
 0x66b   : > { %v10627_v8 = vsub.f32 %v10440_v54, %v4569_v62  ;;  %v4697_v13 = vsel %vm1618_vm3, %v4631_v27, 0.0  ;;  %v4700_v6 = vsel %vm1618_vm3, %v4632_v29, 0.0 }
 0x66c   : > { %v4516_v30 = vpop.xlane.xlu0 %4515  ;;  %4698 = vadd.xlane.f32.xlu1 %v4697_v13  ;;  %4701 = vadd.xlane.f32.xlu0 %v4700_v6 }
 0x66d   : > { %v4570_v22 = vmul.f32 0.03125, %v4516_v30  ;;  %v4633_v4 = vmul.f32 %v10627_v8, %v10627_v8 }
 0x66f   : > { %v10634_v55 = vsub.f32 %v10449_v51, %v4570_v22  ;;  %v4703_v21 = vsel %vm1618_vm3, %v4633_v4, 0.0 }
 0x670   : > { %v4519_v53 = vpop.xlane.xlu1 %4518  ;;  %v4522_v36 = vpop.xlane.xlu0 %4521  ;;  %4704 = vadd.xlane.f32.xlu1 %v4703_v21 }
 0x671   : > { %v4571_v62 = vmul.f32 0.03125, %v4519_v53  ;;  %v4572_v38 = vmul.f32 0.03125, %v4522_v36  ;;  %v4634_v27 = vmul.f32 %v10634_v55, %v10634_v55 }
 0x673   : > { %v10640_v29 = vsub.f32 %v10457_v18, %v4571_v62  ;;  %v10643_v30 = vsub.f32 %v10452_v3, %v4572_v38  ;;  %v4706_v13 = vsel %vm1618_vm3, %v4634_v27, 0.0 }
 0x674   : > { %v4525_v6 = vpop.xlane.xlu1 %4524  ;;  %4707 = vadd.xlane.f32.xlu0 %v4706_v13 }
 0x675   : > { %v4573_v22 = vmul.f32 0.03125, %v4525_v6  ;;  %v4635_v4 = vmul.f32 %v10640_v29, %v10640_v29  ;;  %v4636_v53 = vmul.f32 %v10643_v30, %v10643_v30 }
 0x677   : > { %v10651_v36 = vsub.f32 %v10460_v20, %v4573_v22  ;;  %v4709_v21 = vsel %vm1618_vm3, %v4635_v4, 0.0  ;;  %v4712_v62 = vsel %vm1618_vm3, %v4636_v53, 0.0  ;;  %v4528_v38 = vpop.xlane.xlu0 %4527 }
 0x678   : > { %4710 = vadd.xlane.f32.xlu1 %v4709_v21  ;;  %4713 = vadd.xlane.f32.xlu0 %v4712_v62  ;;  %v4574_v27 = vmul.f32 0.03125, %v4528_v38 }
 0x679   : > { %v4637_v13 = vmul.f32 %v10651_v36, %v10651_v36 }
 0x67a   : > { %v10658_v6 = vsub.f32 %v10469_v17, %v4574_v27 }
 0x67b   : > { %v4715_v18 = vsel %vm1618_vm3, %v4637_v13, 0.0  ;;  %v4531_v19 = vpop.xlane.xlu1 %4530  ;;  %v4534_v51 = vpop.xlane.xlu0 %4533 }
 0x67c   : > { %4716 = vadd.xlane.f32.xlu1 %v4715_v18  ;;  %v4575_v22 = vmul.f32 0.03125, %v4531_v19  ;;  %v4576_v20 = vmul.f32 0.03125, %v4534_v51  ;;  %v4638_v4 = vmul.f32 %v10658_v6, %v10658_v6 }
 0x67e   : > { %v10664_v53 = vsub.f32 %v10477_v46, %v4575_v22  ;;  %v10667_v21 = vsub.f32 %v10472_v12, %v4576_v20  ;;  %v4718_v62 = vsel %vm1618_vm3, %v4638_v4, 0.0 }
 0x67f   : > { %v4537_v38 = vpop.xlane.xlu1 %4536  ;;  %4719 = vadd.xlane.f32.xlu0 %v4718_v62 }
 0x680   : > { %v4577_v27 = vmul.f32 0.03125, %v4537_v38  ;;  %v4639_v13 = vmul.f32 %v10664_v53, %v10664_v53  ;;  %v4640_v19 = vmul.f32 %v10667_v21, %v10667_v21 }
 0x682   : > { %v10675_v51 = vsub.f32 %v10480_v33, %v4577_v27  ;;  %v4721_v18 = vsel %vm1618_vm3, %v4639_v13, 0.0  ;;  %v4724_v22 = vsel %vm1618_vm3, %v4640_v19, 0.0 }
 0x683   : > { %v4540_v20 = vpop.xlane.xlu0 %4539  ;;  %4722 = vadd.xlane.f32.xlu1 %v4721_v18  ;;  %4725 = vadd.xlane.f32.xlu0 %v4724_v22 }
 0x684   : > { %v4578_v4 = vmul.f32 0.03125, %v4540_v20  ;;  %v4641_v62 = vmul.f32 %v10675_v51, %v10675_v51 }
 0x686   : > { %v10682_v38 = vsub.f32 %v10489_v2, %v4578_v4  ;;  %v4727_v40 = vsel %vm1618_vm3, %v4641_v62, 0.0 }
 0x687   : > { %v4543_v46 = vpop.xlane.xlu1 %4542  ;;  %v4546_v3 = vpop.xlane.xlu0 %4545  ;;  %4728 = vadd.xlane.f32.xlu1 %v4727_v40 }
 0x688   : > { %v4579_v27 = vmul.f32 0.03125, %v4543_v46  ;;  %v4580_v58 = vmul.f32 0.03125, %v4546_v3  ;;  %v4642_v13 = vmul.f32 %v10682_v38, %v10682_v38 }
 0x68a   : > { %v10688_v19 = vsub.f32 %v10497_v26, %v4579_v27  ;;  %v10691_v18 = vsub.f32 %v10492_v42, %v4580_v58  ;;  %v4730_v22 = vsel %vm1618_vm3, %v4642_v13, 0.0 }
 0x68b   : > { %v4549_v20 = vpop.xlane.xlu1 %4548  ;;  %4731 = vadd.xlane.f32.xlu0 %v4730_v22 }
 0x68c   : > { %v4581_v4 = vmul.f32 0.03125, %v4549_v20  ;;  %v4643_v62 = vmul.f32 %v10688_v19, %v10688_v19  ;;  %v4644_v40 = vmul.f32 %v10691_v18, %v10691_v18 }
 0x68e   : > { %v10699_v3 = vsub.f32 %v10500_v47, %v4581_v4  ;;  %v4733_v46 = vsel %vm1618_vm3, %v4643_v62, 0.0  ;;  %v4736_v27 = vsel %vm1618_vm3, %v4644_v40, 0.0 }
 0x68f   : > { %4734 = vadd.xlane.f32.xlu1 %v4733_v46  ;;  %4737 = vadd.xlane.f32.xlu0 %v4736_v27 }
 0x690   : > { %v4645_v58 = vmul.f32 %v10699_v3, %v10699_v3 }
 0x692   : > { %v4739_v13 = vsel %vm1618_vm3, %v4645_v58, 0.0 }
 0x693   : > { %4740 = vadd.xlane.f32.xlu1 %v4739_v13  ;;  %v10710_v13 = vld [vmem:[%s11058_s11] ss:$0 sm:$0xff] }
 0x6a3   : > { %v4648_v22 = vpop.xlane.xlu0 %4647 }
 0x6a4   : > { %v4742_v20 = vmul.f32 0.03125, %v4648_v22  ;;  %v10724_v22 = vld [vmem:[%s11059_s12] ss:$0 sm:$0xff] }
 0x6a6   : > { %v4774_v26 = vadd.f32 1e-05, %v4742_v20 }
 0x6a7   : > { %v4651_v2 = vpop.xlane.xlu1 %4650  ;;  %v4654_v42 = vpop.xlane.xlu0 %4653 }
 0x6a8   : > { %7011 = vrsqrt.f32 %v4774_v26  ;;  %v4743_v4 = vmul.f32 0.03125, %v4651_v2  ;;  %v4744_v47 = vmul.f32 0.03125, %v4654_v42  ;;  %v6620_v2 = vld [vmem:[%s11062_s15 + $0x18] sm:$0xff]  }
 0x6a9   : > { %6521 = vmatprep.subr.bf16.mxu1 %v6620_v2 }
 0x6aa   : > { %v4775_v33 = vadd.f32 1e-05, %v4743_v4  ;;  %v4776_v62 = vadd.f32 1e-05, %v4744_v47  ;;  %6522 = vmatpush3.bf16.msra.mxu1 %v6620_v2 }
 0x6ab   : > { %v4657_v56 = vpop.xlane.xlu1 %4656 }
 0x6ac   : > { %7013 = vrsqrt.f32 %v4775_v33  ;;  %v4745_v40 = vmul.f32 0.03125, %v4657_v56  ;;  %v6621_v33 = vld [vmem:[%s11062_s15 + $0x10] sm:$0xff]  }
 0x6ad   : > { %7015 = vrsqrt.f32 %v4776_v62  ;;  %6523 = vmatprep.subr.bf16.mxu1 %v6621_v33 }
 0x6ae   : > { %v4777_v46 = vadd.f32 1e-05, %v4745_v40  ;;  %6524 = vmatpush3.bf16.msra.mxu1 %v6621_v33 }
 0x6b0   : > { %7017 = vrsqrt.f32 %v4777_v46 }
 0x6b5   : > { %v7012_v27 = vpop.eup %7011 }
 0x6b6   : > { %v4838_v58 = vmul.f32 %v7012_v27, %v10509_v5 }
 0x6b8   : > { %v4876_v47 = vmul.f32 %v10710_v13, %v4838_v58 }
 0x6b9   : > { %v7014_v56 = vpop.eup %7013 }
 0x6ba   : > { %v7016_v42 = vpop.eup %7015  ;;  %v4839_v26 = vmul.f32 %v7014_v56, %v10514_v59  ;;  %v4914_v59 = vadd.f32 %v10724_v22, %v4876_v47 }
 0x6bb   : > { %v4840_v5 = vmul.f32 %v7016_v42, %v10517_v57 }
 0x6bc   : > { %v4877_v20 = vmul.f32 %v10710_v13, %v4839_v26 }
 0x6bd   : > { %v7018_v4 = vpop.eup %7017  ;;  %v4878_v62 = vmul.f32 %v10710_v13, %v4840_v5 }
 0x6be   : > { %v4841_v40 = vmul.f32 %v7018_v4, %v10525_v52  ;;  %v4915_v46 = vadd.f32 %v10724_v22, %v4877_v20 }
 0x6bf   : > { %v4916_v58 = vadd.f32 %v10724_v22, %v4878_v62 }
 0x6c0   : > { %v4879_v57 = vmul.f32 %v10710_v13, %v4841_v40  ;;  %v4946_v27 = vpack.c.bf16 %v4915_v46, %v4914_v59 }
 0x6c2   : > { %6489 = vmatprep.mubr.msk.bf16.mxu0 %vm1618_vm3, %v4946_v27  ;;  %v4917_v2 = vadd.f32 %v10724_v22, %v4879_v57 }
 0x6c4   : > { %v4947_v56 = vpack.c.bf16 %v4917_v2, %v4916_v58 }
 0x6c6   : > { %6490 = vmatmul.mubr.msk.bf16.vlgmr.msra.gmra.mxu0 %vm1618_vm3, %v4947_v56 }
 0x6cb   : > { %v4660_v42 = vpop.xlane.xlu0 %4659 }
 0x6cc   : > { %v4746_v26 = vmul.f32 0.03125, %v4660_v42 }
 0x6ce   : > { %v4778_v52 = vadd.f32 1e-05, %v4746_v26 }
 0x6cf   : > { %v4663_v5 = vpop.xlane.xlu1 %4662  ;;  %v4666_v47 = vpop.xlane.xlu0 %4665 }
 0x6d0   : > { %7019 = vrsqrt.f32 %v4778_v52  ;;  %v4747_v20 = vmul.f32 0.03125, %v4663_v5  ;;  %v4748_v33 = vmul.f32 0.03125, %v4666_v47 }
 0x6d2   : > { %v4779_v4 = vadd.f32 1e-05, %v4747_v20  ;;  %v4780_v40 = vadd.f32 1e-05, %v4748_v33 }
 0x6d3   : > { %v4669_v59 = vpop.xlane.xlu1 %4668 }
 0x6d4   : > { %7021 = vrsqrt.f32 %v4779_v4  ;;  %v4749_v46 = vmul.f32 0.03125, %v4669_v59 }
 0x6d5   : > { %7023 = vrsqrt.f32 %v4780_v40 }
 0x6d6   : > { %v4781_v62 = vadd.f32 1e-05, %v4749_v46 }
 0x6d8   : > { %7025 = vrsqrt.f32 %v4781_v62 }
 0x6da   : > { %v4672_v57 = vpop.xlane.xlu0 %4671 }
 0x6db   : > { %v4750_v27 = vmul.f32 0.03125, %v4672_v57 }
 0x6dd   : > { %v4782_v58 = vadd.f32 1e-05, %v4750_v27  ;;  %v7020_v2 = vpop.eup %7019 }
 0x6de   : > { %v4675_v56 = vpop.xlane.xlu1 %4674  ;;  %v4678_v42 = vpop.xlane.xlu0 %4677  ;;  %v4842_v52 = vmul.f32 %v7020_v2, %v10536_v43 }
 0x6df   : > { %7027 = vrsqrt.f32 %v4782_v58  ;;  %v4751_v26 = vmul.f32 0.03125, %v4675_v56  ;;  %v4752_v31 = vmul.f32 0.03125, %v4678_v42 }
 0x6e0   : > { %v4880_v4 = vmul.f32 %v10710_v13, %v4842_v52 }
 0x6e1   : > { %v4783_v5 = vadd.f32 1e-05, %v4751_v26  ;;  %v4784_v47 = vadd.f32 1e-05, %v4752_v31  ;;  %v7022_v20 = vpop.eup %7021 }
 0x6e2   : > { %v4681_v33 = vpop.xlane.xlu1 %4680  ;;  %v7024_v40 = vpop.eup %7023  ;;  %v4843_v46 = vmul.f32 %v7022_v20, %v10544_v61  ;;  %v4918_v43 = vadd.f32 %v10724_v22, %v4880_v4 }
 0x6e3   : > { %7029 = vrsqrt.f32 %v4783_v5  ;;  %v4753_v59 = vmul.f32 0.03125, %v4681_v33  ;;  %v4844_v62 = vmul.f32 %v7024_v40, %v10547_v1 }
 0x6e4   : > { %7031 = vrsqrt.f32 %v4784_v47  ;;  %v4881_v27 = vmul.f32 %v10710_v13, %v4843_v46 }
 0x6e5   : > { %v4785_v57 = vadd.f32 1e-05, %v4753_v59  ;;  %v7026_v58 = vpop.eup %7025  ;;  %v4882_v42 = vmul.f32 %v10710_v13, %v4844_v62 }
 0x6e6   : > { %v4684_v31 = vpop.xlane.xlu0 %4683  ;;  %v4919_v2 = vadd.f32 %v10724_v22, %v4881_v27  ;;  %v4845_v56 = vmul.f32 %v7026_v58, %v10555_v28 }
 0x6e7   : > { %7033 = vrsqrt.f32 %v4785_v57  ;;  %v4754_v26 = vmul.f32 0.03125, %v4684_v31  ;;  %v4920_v20 = vadd.f32 %v10724_v22, %v4882_v42 }
 0x6e8   : > { %v4948_v52 = vpack.c.bf16 %v4919_v2, %v4918_v43  ;;  %v4883_v61 = vmul.f32 %v10710_v13, %v4845_v56 }
 0x6e9   : > { %v4786_v5 = vadd.f32 1e-05, %v4754_v26 }
 0x6ea   : > { %v4687_v1 = vpop.xlane.xlu1 %4686  ;;  %v4690_v47 = vpop.xlane.xlu0 %4689  ;;  %6493 = vmatprep.mubr.msk.bf16.mxu0 %vm1618_vm3, %v4948_v52  ;;  %v4921_v33 = vadd.f32 %v10724_v22, %v4883_v61 }
 0x6eb   : > { %7035 = vrsqrt.f32 %v4786_v5  ;;  %v4755_v40 = vmul.f32 0.03125, %v4687_v1  ;;  %v4756_v59 = vmul.f32 0.03125, %v4690_v47 }
 0x6ec   : > { %v7028_v4 = vpop.eup %7027  ;;  %v4949_v28 = vpack.c.bf16 %v4921_v33, %v4920_v20 }
 0x6ed   : > { %v4846_v46 = vmul.f32 %v7028_v4, %v10563_v49  ;;  %v4787_v62 = vadd.f32 1e-05, %v4755_v40  ;;  %v4788_v57 = vadd.f32 1e-05, %v4756_v59 }
 0x6ee   : > { %v4693_v27 = vpop.xlane.xlu1 %4692  ;;  %6494 = vmatmul.mubr.msk.bf16.gmra.mxu0 %vm1618_vm3, %v4949_v28 }
 0x6ef   : > { %7037 = vrsqrt.f32 %v4787_v62  ;;  %v4757_v43 = vmul.f32 0.03125, %v4693_v27  ;;  %v4884_v56 = vmul.f32 %v10710_v13, %v4846_v46 }
 0x6f0   : > { %v7030_v58 = vpop.eup %7029  ;;  %7039 = vrsqrt.f32 %v4788_v57 }
 0x6f1   : > { %v7032_v31 = vpop.eup %7031  ;;  %v4847_v2 = vmul.f32 %v7030_v58, %v10568_v7  ;;  %v4789_v42 = vadd.f32 1e-05, %v4757_v43  ;;  %v4696_v26 = vpop.xlane.xlu0 %4695  ;;  %v4922_v47 = vadd.f32 %v10724_v22, %v4884_v56 }
 0x6f2   : > { %v4848_v52 = vmul.f32 %v7032_v31, %v10571_v11  ;;  %v4758_v61 = vmul.f32 0.03125, %v4696_v26 }
 0x6f3   : > { %v4885_v49 = vmul.f32 %v10710_v13, %v4847_v2  ;;  %7041 = vrsqrt.f32 %v4789_v42 }
 0x6f4   : > { %v7034_v5 = vpop.eup %7033  ;;  %v4790_v1 = vadd.f32 1e-05, %v4758_v61  ;;  %v4886_v40 = vmul.f32 %v10710_v13, %v4848_v52 }
 0x6f5   : > { %v4923_v20 = vadd.f32 %v10724_v22, %v4885_v49  ;;  %v4849_v33 = vmul.f32 %v7034_v5, %v10579_v45  ;;  %v4699_v4 = vpop.xlane.xlu1 %4698  ;;  %v4702_v7 = vpop.xlane.xlu0 %4701 }
 0x6f6   : > { %7043 = vrsqrt.f32 %v4790_v1  ;;  %v4759_v59 = vmul.f32 0.03125, %v4699_v4  ;;  %v4760_v28 = vmul.f32 0.03125, %v4702_v7  ;;  %v4924_v43 = vadd.f32 %v10724_v22, %v4886_v40 }
 0x6f7   : > { %v4950_v11 = vpack.c.bf16 %v4923_v20, %v4922_v47  ;;  %v4887_v46 = vmul.f32 %v10710_v13, %v4849_v33 }
 0x6f8   : > { %v7036_v62 = vpop.eup %7035  ;;  %v4791_v57 = vadd.f32 1e-05, %v4759_v59  ;;  %v4792_v27 = vadd.f32 1e-05, %v4760_v28 }
 0x6f9   : > { %6497 = vmatprep.mubr.msk.bf16.mxu0 %vm1618_vm3, %v4950_v11  ;;  %v4705_v58 = vpop.xlane.xlu1 %4704  ;;  %v4925_v45 = vadd.f32 %v10724_v22, %v4887_v46  ;;  %v4850_v31 = vmul.f32 %v7036_v62, %v10587_v50 }
 0x6fa   : > { %7045 = vrsqrt.f32 %v4791_v57  ;;  %v4761_v2 = vmul.f32 0.03125, %v4705_v58 }
 0x6fb   : > { %7047 = vrsqrt.f32 %v4792_v27  ;;  %v4951_v56 = vpack.c.bf16 %v4925_v45, %v4924_v43  ;;  %v4888_v61 = vmul.f32 %v10710_v13, %v4850_v31 }
 0x6fc   : > { %v7038_v42 = vpop.eup %7037  ;;  %v4793_v26 = vadd.f32 1e-05, %v4761_v2 }
 0x6fd   : > { %v4708_v52 = vpop.xlane.xlu0 %4707  ;;  %v7040_v49 = vpop.eup %7039  ;;  %6498 = vmatmul.mubr.msk.bf16.gmra.mxu0 %vm1618_vm3, %v4951_v56  ;;  %v4851_v1 = vmul.f32 %v7038_v42, %v10592_v35  ;;  %v4926_v40 = vadd.f32 %v10724_v22, %v4888_v61 }
 0x6fe   : > { %v4762_v5 = vmul.f32 0.03125, %v4708_v52  ;;  %7049 = vrsqrt.f32 %v4793_v26  ;;  %v4852_v47 = vmul.f32 %v7040_v49, %v10595_v0 }
 0x6ff   : > { %v4889_v50 = vmul.f32 %v10710_v13, %v4851_v1 }
 0x700   : > { %v4794_v20 = vadd.f32 1e-05, %v4762_v5  ;;  %v7042_v33 = vpop.eup %7041  ;;  %v4890_v35 = vmul.f32 %v10710_v13, %v4852_v47 }
 0x701   : > { %v4711_v4 = vpop.xlane.xlu1 %4710  ;;  %v4714_v7 = vpop.xlane.xlu0 %4713  ;;  %v4927_v11 = vadd.f32 %v10724_v22, %v4889_v50  ;;  %v4853_v46 = vmul.f32 %v7042_v33, %v10603_v25 }
 0x702   : > { %7051 = vrsqrt.f32 %v4794_v20  ;;  %v4763_v59 = vmul.f32 0.03125, %v4711_v4  ;;  %v4764_v28 = vmul.f32 0.03125, %v4714_v7  ;;  %v4928_v2 = vadd.f32 %v10724_v22, %v4890_v35 }
 0x703   : > { %v7044_v62 = vpop.eup %7043  ;;  %v4952_v27 = vpack.c.bf16 %v4927_v11, %v4926_v40  ;;  %v4891_v43 = vmul.f32 %v10710_v13, %v4853_v46 }
 0x704   : > { %v4795_v57 = vadd.f32 1e-05, %v4763_v59  ;;  %v4796_v0 = vadd.f32 1e-05, %v4764_v28  ;;  %v4854_v45 = vmul.f32 %v7044_v62, %v10610_v37 }
 0x705   : > { %v4717_v58 = vpop.xlane.xlu1 %4716  ;;  %6501 = vmatprep.mubr.msk.bf16.mxu0 %vm1618_vm3, %v4952_v27  ;;  %v4929_v25 = vadd.f32 %v10724_v22, %v4891_v43 }
 0x706   : > { %7053 = vrsqrt.f32 %v4795_v57  ;;  %v4765_v31 = vmul.f32 0.03125, %v4717_v58  ;;  %v4892_v5 = vmul.f32 %v10710_v13, %v4854_v45  ;;  %v6622_v45 = vld [vmem:[%s11062_s15 + $0x8] sm:$0xff]  }
 0x707   : > { %7055 = vrsqrt.f32 %v4796_v0  ;;  %v7046_v56 = vpop.eup %7045  ;;  %v4953_v61 = vpack.c.bf16 %v4929_v25, %v4928_v2  ;;  %6525 = vmatprep.subr.bf16.mxu1 %v6622_v45 }
 0x708   : > { %v4797_v42 = vadd.f32 1e-05, %v4765_v31  ;;  %v7048_v26 = vpop.eup %7047  ;;  %v4720_v52 = vpop.xlane.xlu0 %4719  ;;  %v4855_v49 = vmul.f32 %v7046_v56, %v10616_v23  ;;  %v4930_v40 = vadd.f32 %v10724_v22, %v4892_v5  ;;  %v6623_v31 = vld [vmem:[%s11062_s15] sm:$0xff]   ;;  %6526 = vmatpush3.bf16.msra.mxu1 %v6622_v45 }
 0x709   : > { %v4856_v37 = vmul.f32 %v7048_v26, %v10619_v44  ;;  %v4766_v1 = vmul.f32 0.03125, %v4720_v52  ;;  %6502 = vmatmul.mubr.msk.bf16.gmra.mxu0 %vm1618_vm3, %v4953_v61  ;;  %6527 = vmatprep.subr.bf16.mxu1 %v6623_v31 }
 0x70a   : > { %7057 = vrsqrt.f32 %v4797_v42  ;;  %v4893_v47 = vmul.f32 %v10710_v13, %v4855_v49 }
 0x70b   : > { %v7050_v20 = vpop.eup %7049  ;;  %v4798_v50 = vadd.f32 1e-05, %v4766_v1  ;;  %v4894_v59 = vmul.f32 %v10710_v13, %v4856_v37 }
 0x70c   : > { %v4857_v33 = vmul.f32 %v7050_v20, %v10627_v8  ;;  %v4723_v4 = vpop.xlane.xlu1 %4722  ;;  %v4726_v7 = vpop.xlane.xlu0 %4725  ;;  %v4931_v23 = vadd.f32 %v10724_v22, %v4893_v47  ;;  %6528 = vmatpush3.bf16.msra.mxu1 %v6623_v31 }
 0x70d   : > { %7059 = vrsqrt.f32 %v4798_v50  ;;  %v4767_v44 = vmul.f32 0.03125, %v4723_v4  ;;  %v4768_v28 = vmul.f32 0.03125, %v4726_v7  ;;  %v4932_v27 = vadd.f32 %v10724_v22, %v4894_v59 }
 0x70e   : > { %v4954_v46 = vpack.c.bf16 %v4931_v23, %v4930_v40  ;;  %v4895_v35 = vmul.f32 %v10710_v13, %v4857_v33 }
 0x70f   : > { %v7052_v11 = vpop.eup %7051  ;;  %v4799_v62 = vadd.f32 1e-05, %v4767_v44  ;;  %v4800_v57 = vadd.f32 1e-05, %v4768_v28 }
 0x710   : > { %v4858_v0 = vmul.f32 %v7052_v11, %v10634_v55  ;;  %v4729_v8 = vpop.xlane.xlu1 %4728  ;;  %6505 = vmatprep.mubr.msk.bf16.mxu0 %vm1618_vm3, %v4954_v46  ;;  %v4933_v58 = vadd.f32 %v10724_v22, %v4895_v35 }
 0x711   : > { %7061 = vrsqrt.f32 %v4799_v62  ;;  %v4769_v43 = vmul.f32 0.03125, %v4729_v8 }
 0x712   : > { %7063 = vrsqrt.f32 %v4800_v57  ;;  %v4955_v55 = vpack.c.bf16 %v4933_v58, %v4932_v27  ;;  %v4896_v26 = vmul.f32 %v10710_v13, %v4858_v0 }
 0x713   : > { %v7054_v2 = vpop.eup %7053  ;;  %v4801_v56 = vadd.f32 1e-05, %v4769_v43 }
 0x714   : > { %v7056_v25 = vpop.eup %7055  ;;  %v4859_v42 = vmul.f32 %v7054_v2, %v10640_v29  ;;  %v4732_v61 = vpop.xlane.xlu0 %4731  ;;  %6506 = vmatmul.mubr.msk.bf16.gmra.mxu0 %vm1618_vm3, %v4955_v55  ;;  %v4934_v29 = vadd.f32 %v10724_v22, %v4896_v26 }
 0x715   : > { %v4860_v52 = vmul.f32 %v7056_v25, %v10643_v30  ;;  %7065 = vrsqrt.f32 %v4801_v56  ;;  %v4770_v49 = vmul.f32 0.03125, %v4732_v61 }
 0x716   : > { %v4897_v5 = vmul.f32 %v10710_v13, %v4859_v42 }
 0x717   : > { %v7058_v37 = vpop.eup %7057  ;;  %v4802_v47 = vadd.f32 1e-05, %v4770_v49  ;;  %v4898_v30 = vmul.f32 %v10710_v13, %v4860_v52 }
 0x718   : > { %v4861_v1 = vmul.f32 %v7058_v37, %v10651_v36  ;;  %v4935_v20 = vadd.f32 %v10724_v22, %v4897_v5  ;;  %v4735_v50 = vpop.xlane.xlu1 %4734  ;;  %v4738_v33 = vpop.xlane.xlu0 %4737 }
 0x719   : > { %7067 = vrsqrt.f32 %v4802_v47  ;;  %v4771_v4 = vmul.f32 0.03125, %v4735_v50  ;;  %v4772_v7 = vmul.f32 0.03125, %v4738_v33  ;;  %v4936_v46 = vadd.f32 %v10724_v22, %v4898_v30 }
 0x71a   : > { %v4956_v40 = vpack.c.bf16 %v4935_v20, %v4934_v29  ;;  %v7060_v23 = vpop.eup %7059  ;;  %v4899_v59 = vmul.f32 %v10710_v13, %v4861_v1 }
 0x71b   : > { %v4803_v44 = vadd.f32 1e-05, %v4771_v4  ;;  %v4804_v28 = vadd.f32 1e-05, %v4772_v7  ;;  %v4862_v36 = vmul.f32 %v7060_v23, %v10658_v6 }
 0x71c   : > { %6509 = vmatprep.mubr.msk.bf16.mxu0 %vm1618_vm3, %v4956_v40  ;;  %v4741_v11 = vpop.xlane.xlu1 %4740  ;;  %v4937_v35 = vadd.f32 %v10724_v22, %v4899_v59  ;;  %v10843_v59 = vld [vmem:[%s11061_s14] ss:$0 sm:$0xff] }
 0x71d   : > { %7069 = vrsqrt.f32 %v4803_v44  ;;  %v4773_v62 = vmul.f32 0.03125, %v4741_v11  ;;  %v4900_v43 = vmul.f32 %v10710_v13, %v4862_v36 }
 0x71e   : > { %v7062_v57 = vpop.eup %7061  ;;  %7071 = vrsqrt.f32 %v4804_v28  ;;  %v4957_v0 = vpack.c.bf16 %v4937_v35, %v4936_v46 }
 0x71f   : > { %v7064_v8 = vpop.eup %7063  ;;  %v4805_v27 = vadd.f32 1e-05, %v4773_v62  ;;  %v4863_v58 = vmul.f32 %v7062_v57, %v10664_v53  ;;  %v4938_v55 = vadd.f32 %v10724_v22, %v4900_v43 }
 0x720   : > { %v4864_v45 = vmul.f32 %v7064_v8, %v10667_v21  ;;  %6510 = vmatmul.mubr.msk.bf16.gmra.mxu0 %vm1618_vm3, %v4957_v0 }
 0x721   : > { %7073 = vrsqrt.f32 %v4805_v27  ;;  %v4901_v6 = vmul.f32 %v10710_v13, %v4863_v58 }
 0x722   : > { %v7066_v31 = vpop.eup %7065  ;;  %v4902_v56 = vmul.f32 %v10710_v13, %v4864_v45 }
 0x723   : > { %v4865_v2 = vmul.f32 %v7066_v31, %v10675_v51  ;;  %v4939_v25 = vadd.f32 %v10724_v22, %v4901_v6 }
 0x724   : > { %v4940_v21 = vadd.f32 %v10724_v22, %v4902_v56 }
 0x725   : > { %v4958_v42 = vpack.c.bf16 %v4939_v25, %v4938_v55  ;;  %v4903_v53 = vmul.f32 %v10710_v13, %v4865_v2 }
 0x726   : > { %v7068_v26 = vpop.eup %7067 }
 0x727   : > { %6513 = vmatprep.mubr.msk.bf16.mxu0 %vm1618_vm3, %v4958_v42  ;;  %v4941_v52 = vadd.f32 %v10724_v22, %v4903_v53  ;;  %v4866_v61 = vmul.f32 %v7068_v26, %v10682_v38 }
 0x729   : > { %v4959_v49 = vpack.c.bf16 %v4941_v52, %v4940_v21  ;;  %v4904_v1 = vmul.f32 %v10710_v13, %v4866_v61 }
 0x72a   : > { %v7070_v51 = vpop.eup %7069 }
 0x72b   : > { %v7072_v5 = vpop.eup %7071  ;;  %6514 = vmatmul.mubr.msk.bf16.gmra.mxu0 %vm1618_vm3, %v4959_v49  ;;  %v4867_v37 = vmul.f32 %v7070_v51, %v10688_v19  ;;  %v4942_v33 = vadd.f32 %v10724_v22, %v4904_v1 }
 0x72c   : > { %v4868_v47 = vmul.f32 %v7072_v5, %v10691_v18 }
 0x72d   : > { %v4905_v29 = vmul.f32 %v10710_v13, %v4867_v37 }
 0x72e   : > { %v7074_v20 = vpop.eup %7073  ;;  %v4906_v30 = vmul.f32 %v10710_v13, %v4868_v47 }
 0x72f   : > { %v4869_v50 = vmul.f32 %v7074_v20, %v10699_v3  ;;  %v4943_v38 = vadd.f32 %v10724_v22, %v4905_v29 }
 0x730   : > { %v4944_v19 = vadd.f32 %v10724_v22, %v4906_v30 }
 0x731   : > { %v4960_v4 = vpack.c.bf16 %v4943_v38, %v4942_v33  ;;  %v4907_v7 = vmul.f32 %v10710_v13, %v4869_v50 }
 0x733   : > { %6517 = vmatprep.mubr.msk.bf16.mxu0 %vm1618_vm3, %v4960_v4  ;;  %v4945_v18 = vadd.f32 %v10724_v22, %v4907_v7 }
 0x735   : > { %v4961_v40 = vpack.c.bf16 %v4945_v18, %v4944_v19 }
 0x737   : > { %6518 = vmatmul.mubr.msk.bf16.gmra.mxu0 %vm1618_vm3, %v4961_v40 }
 0x786   : > { %v6491_v23 = vpop.f32.mrf.mxu0 }
 0x787   : > { %v5076_v36 = vadd.f32 %v6491_v23, %v10843_v59 }
 0x788   : > { %v5067_v3 = vpop.f32.mrf.mxu0 }
 0x789   : > { %v5068_v28 = vadd.f32 %v10843_v59, %v5067_v3  ;;  %v5196_v57 = vmax.f32 %v5076_v36, 0.0 }
 0x78a   : > { %v6492_v44 = vpop.f32.mrf.mxu0 }
 0x78b   : > { %v5079_v13 = vadd.f32 %v6492_v44, %v10843_v59  ;;  %v5194_v35 = vmax.f32 %v5068_v28, 0.0 }
 0x78c   : > { %v5070_v11 = vpop.f32.mrf.mxu0 }
 0x78d   : > { %v5071_v22 = vadd.f32 %v10843_v59, %v5070_v11  ;;  %v5197_v46 = vmax.f32 %v5079_v13, 0.0 }
 0x78f   : > { %v5195_v62 = vmax.f32 %v5071_v22, 0.0  ;;  %v5227_v8 = vpack.c.bf16 %v5197_v46, %v5196_v57 }
 0x791   : > { %v5226_v0 = vpack.c.bf16 %v5195_v62, %v5194_v35 }
 0x793   : > { %6529 = vmatprep.mubr.msk.bf16.mxu1 %vm5274_vm4, %v5226_v0 }
 0x794   : > { %6530 = vmatmul.mubr.msk.bf16.vlgmr.msra.gmra.mxu1 %vm5274_vm4, %v5227_v8 }
 0x7ae   : > { %v6495_v27 = vpop.f32.mrf.mxu0 }
 0x7af   : > { %v5092_v31 = vadd.f32 %v6495_v27, %v10843_v59 }
 0x7b0   : > { %v5083_v58 = vpop.f32.mrf.mxu0 }
 0x7b1   : > { %v5084_v45 = vadd.f32 %v10843_v59, %v5083_v58  ;;  %v5200_v53 = vmax.f32 %v5092_v31, 0.0 }
 0x7b2   : > { %v6496_v43 = vpop.f32.mrf.mxu0 }
 0x7b3   : > { %v5095_v6 = vadd.f32 %v6496_v43, %v10843_v59  ;;  %v5198_v56 = vmax.f32 %v5084_v45, 0.0 }
 0x7b4   : > { %v5086_v2 = vpop.f32.mrf.mxu0 }
 0x7b5   : > { %v5087_v55 = vadd.f32 %v10843_v59, %v5086_v2  ;;  %v5201_v25 = vmax.f32 %v5095_v6, 0.0  ;;  %v6624_v2 = vld [vmem:[%s11064_s17 + $0x8] sm:$0xff]  }
 0x7b6   : > { %6561 = vmatprep.subr.bf16.mxu0 %v6624_v2 }
 0x7b7   : > { %v5199_v42 = vmax.f32 %v5087_v55, 0.0  ;;  %v5229_v21 = vpack.c.bf16 %v5201_v25, %v5200_v53  ;;  %6562 = vmatpush3.bf16.msra.mxu0 %v6624_v2 }
 0x7b9   : > { %v5228_v26 = vpack.c.bf16 %v5199_v42, %v5198_v56 }
 0x7bb   : > { %6533 = vmatprep.mubr.msk.bf16.mxu1 %vm5274_vm4, %v5228_v26 }
 0x7bc   : > { %6534 = vmatmul.mubr.msk.bf16.gmra.mxu1 %vm5274_vm4, %v5229_v21 }
 0x7bd   : > { %v6499_v52 = vpop.f32.mrf.mxu0 }
 0x7be   : > { %v5108_v37 = vadd.f32 %v6499_v52, %v10843_v59 }
 0x7bf   : > { %v5099_v61 = vpop.f32.mrf.mxu0 }
 0x7c0   : > { %v5100_v51 = vadd.f32 %v10843_v59, %v5099_v61  ;;  %v5204_v33 = vmax.f32 %v5108_v37, 0.0 }
 0x7c1   : > { %v6500_v49 = vpop.f32.mrf.mxu0 }
 0x7c2   : > { %v5111_v5 = vadd.f32 %v6500_v49, %v10843_v59  ;;  %v5202_v20 = vmax.f32 %v5100_v51, 0.0 }
 0x7c3   : > { %v5102_v1 = vpop.f32.mrf.mxu0 }
 0x7c4   : > { %v5103_v47 = vadd.f32 %v10843_v59, %v5102_v1  ;;  %v5205_v29 = vmax.f32 %v5111_v5, 0.0 }
 0x7c6   : > { %v5203_v50 = vmax.f32 %v5103_v47, 0.0  ;;  %v5231_v30 = vpack.c.bf16 %v5205_v29, %v5204_v33 }
 0x7c8   : > { %v5230_v38 = vpack.c.bf16 %v5203_v50, %v5202_v20 }
 0x7c9   : > { %v6503_v4 = vpop.f32.mrf.mxu0 }
 0x7ca   : > { %6537 = vmatprep.mubr.msk.bf16.mxu1 %vm5274_vm4, %v5230_v38  ;;  %v5124_v23 = vadd.f32 %v6503_v4, %v10843_v59 }
 0x7cb   : > { %6538 = vmatmul.mubr.msk.bf16.gmra.mxu1 %vm5274_vm4, %v5231_v30  ;;  %v5115_v7 = vpop.f32.mrf.mxu0 }
 0x7cc   : > { %v5116_v18 = vadd.f32 %v10843_v59, %v5115_v7  ;;  %v5208_v11 = vmax.f32 %v5124_v23, 0.0 }
 0x7cd   : > { %v6504_v19 = vpop.f32.mrf.mxu0 }
 0x7ce   : > { %v5127_v40 = vadd.f32 %v6504_v19, %v10843_v59  ;;  %v5206_v13 = vmax.f32 %v5116_v18, 0.0 }
 0x7cf   : > { %v5118_v3 = vpop.f32.mrf.mxu0 }
 0x7d0   : > { %v5119_v44 = vadd.f32 %v10843_v59, %v5118_v3  ;;  %v5209_v28 = vmax.f32 %v5127_v40, 0.0 }
 0x7d2   : > { %v5207_v36 = vmax.f32 %v5119_v44, 0.0  ;;  %v5233_v35 = vpack.c.bf16 %v5209_v28, %v5208_v11 }
 0x7d4   : > { %v6507_v22 = vpop.f32.mrf.mxu0  ;;  %v5232_v46 = vpack.c.bf16 %v5207_v36, %v5206_v13 }
 0x7d5   : > { %v5140_v27 = vadd.f32 %v6507_v22, %v10843_v59 }
 0x7d6   : > { %v5131_v62 = vpop.f32.mrf.mxu0  ;;  %6541 = vmatprep.mubr.msk.bf16.mxu1 %vm5274_vm4, %v5232_v46 }
 0x7d7   : > { %6542 = vmatmul.mubr.msk.bf16.gmra.mxu1 %vm5274_vm4, %v5233_v35  ;;  %v5132_v0 = vadd.f32 %v10843_v59, %v5131_v62  ;;  %v5212_v55 = vmax.f32 %v5140_v27, 0.0 }
 0x7d8   : > { %v6508_v57 = vpop.f32.mrf.mxu0 }
 0x7d9   : > { %v5143_v8 = vadd.f32 %v6508_v57, %v10843_v59  ;;  %v5210_v6 = vmax.f32 %v5132_v0, 0.0 }
 0x7da   : > { %v5134_v58 = vpop.f32.mrf.mxu0 }
 0x7db   : > { %v5135_v43 = vadd.f32 %v10843_v59, %v5134_v58  ;;  %v5213_v45 = vmax.f32 %v5143_v8, 0.0 }
 0x7dd   : > { %v5211_v31 = vmax.f32 %v5135_v43, 0.0  ;;  %v5235_v56 = vpack.c.bf16 %v5213_v45, %v5212_v55 }
 0x7df   : > { %v5234_v25 = vpack.c.bf16 %v5211_v31, %v5210_v6  ;;  %v6625_v31 = vld [vmem:[%s11064_s17] sm:$0xff]  }
 0x7e0   : > { %v6511_v42 = vpop.f32.mrf.mxu0  ;;  %6563 = vmatprep.subr.bf16.mxu0 %v6625_v31 }
 0x7e1   : > { %6545 = vmatprep.mubr.msk.bf16.mxu1 %vm5274_vm4, %v5234_v25  ;;  %v5156_v61 = vadd.f32 %v6511_v42, %v10843_v59  ;;  %6564 = vmatpush3.bf16.msra.mxu0 %v6625_v31  ;;  %v11874_v31 = vld [vmem:[#allocation85_spill] sm:$0xff] }
 0x7e2   : > { %v5147_v53 = vpop.f32.mrf.mxu0  ;;  %6546 = vmatmul.mubr.msk.bf16.gmra.mxu1 %vm5274_vm4, %v5235_v56 }
 0x7e3   : > { %v5148_v21 = vadd.f32 %v10843_v59, %v5147_v53  ;;  %v5216_v47 = vmax.f32 %v5156_v61, 0.0 }
 0x7e4   : > { %v6512_v26 = vpop.f32.mrf.mxu0 }
 0x7e5   : > { %v5159_v52 = vadd.f32 %v6512_v26, %v10843_v59  ;;  %v5214_v37 = vmax.f32 %v5148_v21, 0.0 }
 0x7e6   : > { %v5150_v49 = vpop.f32.mrf.mxu0 }
 0x7e7   : > { %v5151_v51 = vadd.f32 %v10843_v59, %v5150_v49  ;;  %v5217_v5 = vmax.f32 %v5159_v52, 0.0 }
 0x7e9   : > { %v5215_v1 = vmax.f32 %v5151_v51, 0.0  ;;  %v5237_v50 = vpack.c.bf16 %v5217_v5, %v5216_v47 }
 0x7eb   : > { %v5236_v29 = vpack.c.bf16 %v5215_v1, %v5214_v37  ;;  %v6515_v20 = vpop.f32.mrf.mxu0 }
 0x7ec   : > { %v5172_v7 = vadd.f32 %v6515_v20, %v10843_v59 }
 0x7ed   : > { %v5163_v33 = vpop.f32.mrf.mxu0  ;;  %6549 = vmatprep.mubr.msk.bf16.mxu1 %vm5274_vm4, %v5236_v29 }
 0x7ee   : > { %6550 = vmatmul.mubr.msk.bf16.gmra.mxu1 %vm5274_vm4, %v5237_v50  ;;  %v5164_v30 = vadd.f32 %v10843_v59, %v5163_v33  ;;  %v5220_v44 = vmax.f32 %v5172_v7, 0.0 }
 0x7ef   : > { %v6516_v38 = vpop.f32.mrf.mxu0 }
 0x7f0   : > { %v5175_v4 = vadd.f32 %v6516_v38, %v10843_v59  ;;  %v5218_v23 = vmax.f32 %v5164_v30, 0.0 }
 0x7f1   : > { %v5166_v19 = vpop.f32.mrf.mxu0 }
 0x7f2   : > { %v5167_v18 = vadd.f32 %v10843_v59, %v5166_v19  ;;  %v5221_v40 = vmax.f32 %v5175_v4, 0.0 }
 0x7f4   : > { %v5219_v3 = vmax.f32 %v5167_v18, 0.0  ;;  %v5239_v13 = vpack.c.bf16 %v5221_v40, %v5220_v44 }
 0x7f6   : > { %v5238_v28 = vpack.c.bf16 %v5219_v3, %v5218_v23  ;;  %v10921_v23 = vld [vmem:[%s11063_s16] ss:$0 sm:$0xff] }
 0x7f7   : > { %v6519_v36 = vpop.f32.mrf.mxu0 }
 0x7f8   : > { %6553 = vmatprep.mubr.msk.bf16.mxu1 %vm5274_vm4, %v5238_v28  ;;  %v5188_v62 = vadd.f32 %v6519_v36, %v10843_v59 }
 0x7f9   : > { %v5179_v11 = vpop.f32.mrf.mxu0  ;;  %6554 = vmatmul.mubr.msk.bf16.gmra.mxu1 %vm5274_vm4, %v5239_v13 }
 0x7fa   : > { %v5180_v46 = vadd.f32 %v10843_v59, %v5179_v11  ;;  %v5224_v43 = vmax.f32 %v5188_v62, 0.0 }
 0x7fb   : > { %v6520_v22 = vpop.f32.mrf.mxu0 }
 0x7fc   : > { %v5191_v35 = vadd.f32 %v6520_v22, %v10843_v59  ;;  %v5222_v27 = vmax.f32 %v5180_v46, 0.0 }
 0x7fd   : > { %v5182_v57 = vpop.f32.mrf.mxu0 }
 0x7fe   : > { %v5183_v0 = vadd.f32 %v10843_v59, %v5182_v57  ;;  %v5225_v8 = vmax.f32 %v5191_v35, 0.0  ;;  %v6626_v59 = vld [vmem:[%s11066_s19] sm:$0xff]  }
 0x7ff   : > { %6573 = vmatprep.subr.bf16.mxu1 %v6626_v59 }
 0x800   : > { %v5223_v58 = vmax.f32 %v5183_v0, 0.0  ;;  %v5241_v6 = vpack.c.bf16 %v5225_v8, %v5224_v43  ;;  %6574 = vmatpush3.bf16.msra.mxu1 %v6626_v59 }
 0x802   : > { %v5240_v45 = vpack.c.bf16 %v5223_v58, %v5222_v27 }
 0x804   : > { %6557 = vmatprep.mubr.msk.bf16.mxu1 %vm5274_vm4, %v5240_v45 }
 0x805   : > { %6558 = vmatmul.mubr.msk.bf16.gmra.mxu1 %vm5274_vm4, %v5241_v6 }
 0x854   : > { %v6531_v2 = vpop.f32.mrf.mxu1 }
 0x855   : > { %v5486_v19 = vadd.f32 %v6531_v2, %v10352_v48 }
 0x856   : > { %v5357_v55 = vpop.f32.mrf.mxu1 }
 0x857   : > { %v5484_v3 = vadd.f32 %v5357_v55, %v10349_v39 }
 0x858   : > { %v6532_v25 = vpop.f32.mrf.mxu1 }
 0x859   : > { %v5487_v44 = vadd.f32 %v6532_v25, %v10360_v32  ;;  %v5525_v32 = vadd.f32 %v10921_v23, %v5486_v19 }
 0x85a   : > { %v5360_v56 = vpop.f32.mrf.mxu1 }
 0x85b   : > { %v5485_v48 = vadd.f32 %v5360_v56, %v10357_v15  ;;  %v5523_v15 = vadd.f32 %v10921_v23, %v5484_v3  ;;  %v5526_v46 = vadd.f32 %v10921_v23, %v5487_v44 }
 0x87c   : > { %v6535_v42 = vpop.f32.mrf.mxu1 }
 0x87d   : > { %v5490_v13 = vadd.f32 %v6535_v42, %v10372_v14 }
 0x87e   : > { %v5373_v53 = vpop.f32.mrf.mxu1 }
 0x87f   : > { %v5488_v36 = vadd.f32 %v5373_v53, %v10369_v34  ;;  %v5529_v57 = vadd.f32 %v10921_v23, %v5490_v13 }
 0x880   : > { %v6536_v26 = vpop.f32.mrf.mxu1 }
 0x881   : > { %v5527_v0 = vadd.f32 %v10921_v23, %v5488_v36  ;;  %v5491_v59 = vadd.f32 %v6536_v26, %v11874_v31 }
 0x882   : > { %v10902_v21 = vpop.f32.mrf.mxu1 }
 0x88b   : > { %v6539_v52 = vpop.f32.mrf.mxu1 }
 0x88c   : > { %v5494_v4 = vadd.f32 %v6539_v52, %v10392_v16 }
 0x88d   : > { %v5389_v61 = vpop.f32.mrf.mxu1 }
 0x88e   : > { %v5492_v18 = vadd.f32 %v5389_v61, %v10389_v41  ;;  %v5533_v41 = vadd.f32 %v10921_v23, %v5494_v4  ;;  %v11876_v61 = vld [vmem:[#allocation71_spill] sm:$0xff] }
 0x88f   : > { %v6540_v49 = vpop.f32.mrf.mxu1 }
 0x890   : > { %v5495_v16 = vadd.f32 %v6540_v49, %v10400_v24  ;;  %v5531_v24 = vadd.f32 %v10921_v23, %v5492_v18  ;;  %v11879_v18 = vld [vmem:[#allocation37_spill] sm:$0xff] }
 0x891   : > { %v5392_v51 = vpop.f32.mrf.mxu1 }
 0x892   : > { %v5493_v11 = vadd.f32 %v5392_v51, %v10397_v9  ;;  %v5524_v9 = vadd.f32 %v10921_v23, %v5485_v48  ;;  %v5555_v58 = vadd.f32 %v5531_v24, %v5523_v15 }
 0x894   : > { %v5532_v8 = vadd.f32 %v10921_v23, %v5493_v11 }
 0x896   : > { %v5556_v51 = vadd.f32 %v5532_v8, %v5524_v9 }
 0x897   : > { %v6543_v5 = vpop.f32.mrf.mxu1 }
 0x899   : > { %v5405_v37 = vpop.f32.mrf.mxu1 }
 0x89b   : > { %v10904_v1 = vpop.f32.mrf.mxu1 }
 0x89d   : > { %v10906_v47 = vpop.f32.mrf.mxu1 }
 0x8a2   : > { %v6547_v29 = vpop.f32.mrf.mxu1 }
 0x8a3   : > { %v5502_v40 = vadd.f32 %v6547_v29, %v10432_v10  ;;  %v11877_v29 = vld [vmem:[#allocation75_spill] sm:$0xff] }
 0x8a4   : > { %v5421_v20 = vpop.f32.mrf.mxu1 }
 0x8a5   : > { %v5500_v10 = vadd.f32 %v5421_v20, %v10429_v60  ;;  %v5541_v22 = vadd.f32 %v10921_v23, %v5502_v40  ;;  %v5534_v60 = vadd.f32 %v10921_v23, %v5495_v16  ;;  %v5496_v20 = vadd.f32 %v5405_v37, %v11877_v29  ;;  %v11880_v37 = vld [vmem:[#allocation55_spill] sm:$0xff]  ;;  %v11881_v16 = vld [vmem:[#allocation36_spill] sm:$0xff] }
 0x8a6   : > { %v6548_v50 = vpop.f32.mrf.mxu1  ;;  %v5499_v44 = vadd.f32 %v10904_v1, %v11880_v37 }
 0x8a7   : > { %v5503_v39 = vadd.f32 %v6548_v50, %v10440_v54  ;;  %v5557_v54 = vadd.f32 %v5533_v41, %v5525_v32  ;;  %v5539_v35 = vadd.f32 %v10921_v23, %v5500_v10  ;;  %v5558_v2 = vadd.f32 %v5534_v60, %v5526_v46  ;;  %v11878_v50 = vld [vmem:[#allocation45_spill] sm:$0xff] }
 0x8a8   : > { %v5424_v33 = vpop.f32.mrf.mxu1  ;;  %v5535_v11 = vadd.f32 %v10921_v23, %v5496_v20 }
 0x8a9   : > { %v5501_v14 = vadd.f32 %v5424_v33, %v10437_v63  ;;  %v5542_v63 = vadd.f32 %v10921_v23, %v5503_v39  ;;  %v5565_v43 = vadd.f32 %v5557_v54, %v5541_v22  ;;  %v5563_v42 = vadd.f32 %v5555_v58, %v5539_v35  ;;  %v11882_v39 = vld [vmem:[#allocation131_spill] sm:$0xff]  ;;  %v11883_v22 = vld [vmem:[#allocation116_spill] sm:$0xff] }
 0x8aa   : > { %v5497_v32 = vadd.f32 %v10906_v47, %v11882_v39  ;;  %v5538_v54 = vadd.f32 %v10921_v23, %v5499_v44  ;;  %v11885_v47 = vld [vmem:[#allocation54_spill] sm:$0xff]  ;;  %v6101_v39 = vld [vmem:[%s11065_s18] ss:$0 sm:$0xff] }
 0x8ab   : > { %v5540_v25 = vadd.f32 %v10921_v23, %v5501_v14  ;;  %v11884_v14 = vld [vmem:[#allocation70_spill] sm:$0xff] }
 0x8ae   : > { %v6551_v38 = vpop.f32.mrf.mxu1 }
 0x8af   : > { %v5506_v33 = vadd.f32 %v6551_v38, %v11878_v50  ;;  %v5564_v38 = vadd.f32 %v5556_v51, %v5540_v25 }
 0x8b0   : > { %v10908_v30 = vpop.f32.mrf.mxu1 }
 0x8b1   : > { %v5504_v48 = vadd.f32 %v10908_v30, %v11881_v16  ;;  %v5545_v24 = vadd.f32 %v10921_v23, %v5506_v33  ;;  %v5530_v30 = vadd.f32 %v10921_v23, %v5491_v59 }
 0x8b2   : > { %v10911_v7 = vpop.f32.mrf.mxu1 }
 0x8b3   : > { %v5507_v1 = vadd.f32 %v10911_v7, %v11883_v22  ;;  %v5543_v7 = vadd.f32 %v10921_v23, %v5504_v48  ;;  %v5562_v25 = vadd.f32 %v5538_v54, %v5530_v30 }
 0x8b4   : > { %v10926_v28 = vpop.f32.mrf.mxu1 }
 0x8b5   : > { %v5505_v35 = vadd.f32 %v10926_v28, %v11885_v47 }
 0x8b9   : > { %v6555_v34 = vpop.f32.mrf.mxu1 }
 0x8ba   : > { %v5510_v62 = vadd.f32 %v6555_v34, %v10472_v12  ;;  %v11875_v12 = vld [vmem:[#allocation91_spill] sm:$0xff]  ;;  %v5489_v34 = vadd.f32 %v10902_v21, %v11884_v14 }
 0x8bb   : > { %v5453_v27 = vpop.f32.mrf.mxu1  ;;  %v5498_v55 = vadd.f32 %v6543_v5, %v11875_v12 }
 0x8bc   : > { %v5549_v45 = vadd.f32 %v10921_v23, %v5510_v62  ;;  %v5508_v6 = vadd.f32 %v5453_v27, %v10469_v17  ;;  %v5566_v17 = vadd.f32 %v5558_v2, %v5542_v63  ;;  %v11886_v27 = vld [vmem:[#allocation48_spill] sm:$0xff] }
 0x8bd   : > { %v6556_v56 = vpop.f32.mrf.mxu1  ;;  %v5537_v3 = vadd.f32 %v10921_v23, %v5498_v55  ;;  %v11887_v2 = vld [vmem:[#allocation84_spill] sm:$0xff]  ;;  %v5528_v55 = vadd.f32 %v10921_v23, %v5489_v34 }
 0x8be   : > { %v5573_v53 = vadd.f32 %v5565_v43, %v5549_v45  ;;  %v5547_v52 = vadd.f32 %v10921_v23, %v5508_v6  ;;  %v5511_v49 = vadd.f32 %v6556_v56, %v11876_v61  ;;  %v5559_v43 = vadd.f32 %v5535_v11, %v5527_v0 }
 0x8bf   : > { %v5456_v26 = vpop.f32.mrf.mxu1  ;;  %v5561_v9 = vadd.f32 %v5537_v3, %v5529_v57  ;;  %v5536_v45 = vadd.f32 %v10921_v23, %v5497_v32  ;;  %v5546_v57 = vadd.f32 %v10921_v23, %v5507_v1  ;;  %v5544_v56 = vadd.f32 %v10921_v23, %v5505_v35 }
 0x8c0   : > { %v5581_v5 = vmul.f32 0.25, %v5573_v53  ;;  %v5571_v4 = vadd.f32 %v5563_v42, %v5547_v52  ;;  %v5550_v19 = vadd.f32 %v10921_v23, %v5511_v49  ;;  %v5509_v40 = vadd.f32 %v5456_v26, %v11879_v18  ;;  %v11888_v49 = vld [vmem:[#allocation47_spill] sm:$0xff] }
 0x8c1   : > { %v5569_v21 = vadd.f32 %v5561_v9, %v5545_v24  ;;  %v5567_v53 = vadd.f32 %v5559_v43, %v5543_v7  ;;  %v5560_v29 = vadd.f32 %v5536_v45, %v5528_v55  ;;  %v5570_v20 = vadd.f32 %v5562_v25, %v5546_v57 }
 0x8c2   : > { %v5589_v41 = vsel %vm1618_vm3, %v5581_v5, 0.0  ;;  %v5579_v10 = vmul.f32 0.25, %v5571_v4  ;;  %v5574_v13 = vadd.f32 %v5566_v17, %v5550_v19  ;;  %v5548_v36 = vadd.f32 %v10921_v23, %v5509_v40 }
 0x8c3   : > { %5597 = vst [vmem:[%s10967_s3 + $0x10] sm:$0xff] %v5589_v41  ;;  %v5568_v19 = vadd.f32 %v5560_v29, %v5544_v56 }
 0x8c4   : > { %v5587_v15 = vsel %vm1618_vm3, %v5579_v10, 0.0  ;;  %v5582_v46 = vmul.f32 0.25, %v5574_v13  ;;  %v5572_v60 = vadd.f32 %v5564_v38, %v5548_v36 }
 0x8c5   : > { %5595 = vst [vmem:[%s10967_s3] sm:$0xff] %v5587_v15  ;;  %v6559_v62 = vpop.f32.mrf.mxu1 }
 0x8c6   : > { %v5590_v8 = vsel %vm1618_vm3, %v5582_v46, 0.0  ;;  %v5580_v63 = vmul.f32 0.25, %v5572_v60  ;;  %v5514_v58 = vadd.f32 %v6559_v62, %v11886_v27  ;;  %v5604_v0 = vpack.c.bf16 %v5582_v46, %v5581_v5  ;;  %v11889_v5 = vld [vmem:[#allocation127_spill] sm:$0xff] }
 0x8c7   : > { %5598 = vst [vmem:[%s10967_s3 + $0x18] sm:$0xff] %v5590_v8  ;;  %v5469_v6 = vpop.f32.mrf.mxu1 }
 0x8c8   : > { %v5588_v28 = vsel %vm1618_vm3, %v5580_v63, 0.0  ;;  %v5603_v31 = vpack.c.bf16 %v5580_v63, %v5579_v10  ;;  %v5553_v59 = vadd.f32 %v10921_v23, %v5514_v58  ;;  %v5512_v12 = vadd.f32 %v5469_v6, %v11887_v2 }
 0x8c9   : > { %5596 = vst [vmem:[%s10967_s3 + $0x8] sm:$0xff] %v5588_v28  ;;  %v6560_v42 = vpop.f32.mrf.mxu1 }
 0x8ca   : > { %v5577_v52 = vadd.f32 %v5569_v21, %v5553_v59  ;;  %v5551_v61 = vadd.f32 %v10921_v23, %v5512_v12  ;;  %v5515_v51 = vadd.f32 %v6560_v42, %v11888_v49  ;;  %6565 = vmatprep.mubr.msk.bf16.mxu0 %vm1618_vm3, %v5603_v31  ;;  %v6108_v31 = vld [vmem:[%s11067_s20] ss:$0 sm:$0xff] }
 0x8cb   : > { %v5472_v17 = vpop.f32.mrf.mxu1  ;;  %6566 = vmatmul.mubr.msk.bf16.vlgmr.msra.gmra.mxu0 %vm1618_vm3, %v5604_v0 }
 0x8cc   : > { %v5585_v50 = vmul.f32 0.25, %v5577_v52  ;;  %v5575_v33 = vadd.f32 %v5567_v53, %v5551_v61  ;;  %v5554_v26 = vadd.f32 %v10921_v23, %v5515_v51  ;;  %v5513_v4 = vadd.f32 %v5472_v17, %v11889_v5 }
 0x8ce   : > { %v5593_v18 = vsel %vm1618_vm3, %v5585_v50, 0.0  ;;  %v5583_v40 = vmul.f32 0.25, %v5575_v33  ;;  %v5578_v3 = vadd.f32 %v5570_v20, %v5554_v26  ;;  %v5552_v37 = vadd.f32 %v10921_v23, %v5513_v4 }
 0x8cf   : > { %5601 = vst [vmem:[%s10967_s3 + $0x30] sm:$0xff] %v5593_v18 }
 0x8d0   : > { %v5591_v44 = vsel %vm1618_vm3, %v5583_v40, 0.0  ;;  %v5586_v38 = vmul.f32 0.25, %v5578_v3  ;;  %v5576_v16 = vadd.f32 %v5568_v19, %v5552_v37 }
 0x8d1   : > { %5599 = vst [vmem:[%s10967_s3 + $0x20] sm:$0xff] %v5591_v44 }
 0x8d2   : > { %v5594_v48 = vsel %vm1618_vm3, %v5586_v38, 0.0  ;;  %v5584_v41 = vmul.f32 0.25, %v5576_v16  ;;  %v5606_v36 = vpack.c.bf16 %v5586_v38, %v5585_v50 }
 0x8d3   : > { %5602 = vst [vmem:[%s10967_s3 + $0x38] sm:$0xff] %v5594_v48 }
 0x8d4   : > { %v5592_v10 = vsel %vm1618_vm3, %v5584_v41, 0.0  ;;  %v5605_v13 = vpack.c.bf16 %v5584_v41, %v5583_v40 }
 0x8d5   : > { %5600 = vst [vmem:[%s10967_s3 + $0x28] sm:$0xff] %v5592_v10 }
 0x8d6   : > { %6569 = vmatprep.mubr.msk.bf16.mxu0 %vm1618_vm3, %v5605_v13 }
 0x8d7   : > { %6570 = vmatmul.mubr.msk.bf16.gmra.mxu0 %vm1618_vm3, %v5606_v36 }
 0x98b   : > { %v6567_v23 = vpop.f32.mrf.mxu0 }
 0x98c   : > { %v5685_v1 = vadd.f32 %v6567_v23, %v6101_v39 }
 0x98d   : > { %v5676_v11 = vpop.f32.mrf.mxu0 }
 0x98e   : > { %v5677_v24 = vadd.f32 %v6101_v39, %v5676_v11  ;;  %v5709_v34 = vmax.f32 %v5685_v1, 0.0 }
 0x98f   : > { %v6568_v32 = vpop.f32.mrf.mxu0 }
 0x990   : > { %v5688_v22 = vadd.f32 %v6568_v32, %v6101_v39  ;;  %v5707_v60 = vmax.f32 %v5677_v24, 0.0 }
 0x991   : > { %v5679_v30 = vpop.f32.mrf.mxu0 }
 0x992   : > { %v5680_v15 = vadd.f32 %v6101_v39, %v5679_v30  ;;  %v5710_v46 = vmax.f32 %v5688_v22, 0.0 }
 0x994   : > { %v5708_v14 = vmax.f32 %v5680_v15, 0.0  ;;  %v5716_v54 = vpack.c.bf16 %v5710_v46, %v5709_v34 }
 0x996   : > { %v5715_v9 = vpack.c.bf16 %v5708_v14, %v5707_v60 }
 0x997   : > { %v6571_v47 = vpop.f32.mrf.mxu0 }
 0x998   : > { %6575 = vmatprep.mubr.msk.bf16.mxu1 %vm1367_vm2, %v5715_v9  ;;  %v5701_v63 = vadd.f32 %v6571_v47, %v6101_v39 }
 0x999   : > { %v5692_v35 = vpop.f32.mrf.mxu0  ;;  %6576 = vmatmul.mubr.msk.bf16.vlgmr.msra.gmra.mxu1 %vm1367_vm2, %v5716_v54 }
 0x99a   : > { %v5693_v7 = vadd.f32 %v6101_v39, %v5692_v35  ;;  %v5713_v57 = vmax.f32 %v5701_v63, 0.0 }
 0x99b   : > { %v6572_v62 = vpop.f32.mrf.mxu0 }
 0x99c   : > { %v5704_v8 = vadd.f32 %v6572_v62, %v6101_v39  ;;  %v5711_v45 = vmax.f32 %v5693_v7, 0.0 }
 0x99d   : > { %v5695_v27 = vpop.f32.mrf.mxu0 }
 0x99e   : > { %v5696_v58 = vadd.f32 %v6101_v39, %v5695_v27  ;;  %v5714_v43 = vmax.f32 %v5704_v8, 0.0 }
 0x9a0   : > { %v5712_v21 = vmax.f32 %v5696_v58, 0.0  ;;  %v5718_v28 = vpack.c.bf16 %v5714_v43, %v5713_v57 }
 0x9a2   : > { %v5717_v6 = vpack.c.bf16 %v5712_v21, %v5711_v45 }
 0x9a4   : > { %6579 = vmatprep.mubr.msk.bf16.mxu1 %vm1367_vm2, %v5717_v6 }
 0x9a5   : > { %6580 = vmatmul.mubr.msk.bf16.gmra.mxu1 %vm1367_vm2, %v5718_v28 }
 0xa59   : > { %v6577_v59 = vpop.f32.mrf.mxu1 }
 0xa5a   : > { %v5789_v2 = vadd.f32 %v6577_v59, %v6108_v31 }
 0xa5b   : > { %v5780_v12 = vpop.f32.mrf.mxu1 }
 0xa5c   : > { %5813 = vst [vmem:[%s1039_s2 + $0x10] sm:$0xff] %v5789_v2  ;;  %v5781_v55 = vadd.f32 %v6108_v31, %v5780_v12 }
 0xa5d   : > { %v6578_v25 = vpop.f32.mrf.mxu1 }
 0xa5e   : > { %5811 = vst [vmem:[%s1039_s2] sm:$0xff] %v5781_v55  ;;  %v5792_v56 = vadd.f32 %v6578_v25, %v6108_v31 }
 0xa5f   : > { %v5783_v0 = vpop.f32.mrf.mxu1 }
 0xa60   : > { %5814 = vst [vmem:[%s1039_s2 + $0x18] sm:$0xff] %v5792_v56  ;;  %v5784_v42 = vadd.f32 %v6108_v31, %v5783_v0 }
 0xa62   : > { %5812 = vst [vmem:[%s1039_s2 + $0x8] sm:$0xff] %v5784_v42 }
 0xa65   : > { %v6581_v53 = vpop.f32.mrf.mxu1 }
 0xa66   : > { %v5805_v52 = vadd.f32 %v6581_v53, %v6108_v31 }
 0xa67   : > { %v5796_v61 = vpop.f32.mrf.mxu1 }
 0xa68   : > { %5817 = vst [vmem:[%s1039_s2 + $0x30] sm:$0xff] %v5805_v52  ;;  %v5797_v49 = vadd.f32 %v6108_v31, %v5796_v61 }
 0xa69   : > { %v6582_v51 = vpop.f32.mrf.mxu1 }
 0xa6a   : > { %5815 = vst [vmem:[%s1039_s2 + $0x20] sm:$0xff] %v5797_v49  ;;  %v5808_v29 = vadd.f32 %v6582_v51, %v6108_v31 }
 0xa6b   : > { %v5799_v20 = vpop.f32.mrf.mxu1 }
 0xa6c   : > { %5818 = vst [vmem:[%s1039_s2 + $0x38] sm:$0xff] %v5808_v29  ;;  %v5800_v17 = vadd.f32 %v6108_v31, %v5799_v20 }
 0xa6e   : > { %5816 = vst [vmem:[%s1039_s2 + $0x28] sm:$0xff] %v5800_v17 }
 0xa6f PF: > { %p30_p9 = scmp.ge.s32.totalorder %s7231_s4, 4   ;;  %s11890_s3 = smov %s7093_s28 }
 0xa70   : > { %s11891_s28 = smov %s7240_s1  ;;  %s11892_s29 = smov %s7231_s4 }
 0xa71   :  { %32 = sbr.rel (!%p30_p9) target bundleno = 10 (0xa), region = 235 }

</bundles_post_ra>
